<compile_context>
chip_gen: v7x
topology: tpu7x:2x2x1
jax: 0.10.0
libtpu: 0.0.40
codegen_flags: <defaults>
</compile_context>

<pallas_src>
import jax
import jax.numpy as jnp
from jax import lax
from jax.experimental import pallas as pl
from jax.experimental.pallas import tpu as pltpu

VOCAB = 5
EMB = 256
HID = 25
NUM_LAYERS = 2

H = HID          # real hidden width per direction
HP = 64          # lane-padded hidden width per direction
GW = 2 * HP      # both directions, padded (128 lanes = 1 vreg)
PW = 3 * GW      # packed gate width: 3 gates x 2 dirs (384)


def _gate_cols(g, d):
    """Column range of (gate g, direction d) inside the packed 384-lane layout."""
    s = g * GW + d * HP
    return s, s + H


# ----------------------------- fused Pallas kernel --------------------------

def fused_gru_head_kernel(ids_ref, e0f_ref, e0b_ref, gxb0_ref, bhhn0_ref, whh0_ref,
                          wx1a_ref, wx1b_ref, gxb1_ref, bhhn1_ref, whh1_ref,
                          w1p_ref, c1_ref, w2p_ref, c2_ref, w3t_ref, b3_ref,
                          out_ref):
    f32 = jnp.float32
    bf16 = jnp.bfloat16
    B = out_ref.shape[0]
    TB = ids_ref.shape[0]
    T = TB // B

    def bdot(a, w):  # bf16 MXU matmul, f32 accumulation
        return jnp.dot(a.astype(bf16), w, preferred_element_type=f32)

    # ---------- batched, h-independent work (off the serial path) ----------
    iota = lax.broadcasted_iota(jnp.int32, (TB, VOCAB), 1)
    ohf = (ids_ref[:, 0:1] == iota).astype(bf16)      # token at time t
    ohb = (ids_ref[:, 1:2] == iota).astype(bf16)      # token at time T-1-t
    # embedding + W_ih + b_ih (+ b_hh[r,z]) are folded into per-token tables.
    gx0 = bdot(ohf, e0f_ref[...]) + bdot(ohb, e0b_ref[...]) + gxb0_ref[...]

    whh0 = whh0_ref[...]
    whh1 = whh1_ref[...]
    bhhn0 = jnp.broadcast_to(bhhn0_ref[...], (B, GW))  # hoisted broadcasts
    bhhn1 = jnp.broadcast_to(bhhn1_ref[...], (B, GW))

    def gru_step(gx, gh, bhn, h):
        # PyTorch gate order [r, z, n]; each gate block is 128 lanes = 1 vreg.
        r = jax.nn.sigmoid(gx[:, 0:GW] + gh[:, 0:GW])
        z = jax.nn.sigmoid(gx[:, GW:2 * GW] + gh[:, GW:2 * GW])
        n = jnp.tanh(gx[:, 2 * GW:3 * GW] + r * (gh[:, 2 * GW:3 * GW] + bhn))
        return (1.0 - z) * n + z * h

    # ---------- layer 0: serial path = h @ W_hh + gate math ----------
    h = jnp.zeros((B, GW), f32)
    hs0 = []
    for t in range(T):
        gh = bdot(h, whh0)
        h = gru_step(gx0[t * B:(t + 1) * B], gh, bhhn0, h)
        hs0.append(h)   # lanes [0,64)=fwd out @ time t, [64,128)=bwd out @ time T-1-t

    # ---------- layer-1 input projection, batched over all T steps ----------
    # TODO(synk): nn.GRU inter-layer dropout(0.2) is train-only; eval identity here.
    h0cat = jnp.concatenate(hs0, axis=0)          # (T*B, 128), step order
    h0rev = jnp.concatenate(hs0[::-1], axis=0)    # (T*B, 128), reversed steps
    gx1 = bdot(h0cat, wx1a_ref[...]) + bdot(h0rev, wx1b_ref[...]) + gxb1_ref[...]

    # ---------- layer 1 recurrence ----------
    h = jnp.zeros((B, GW), f32)
    hs1 = []
    for t in range(T):
        gh = bdot(h, whh1)
        h = gru_step(gx1[t * B:(t + 1) * B], gh, bhhn1, h)
        hs1.append(h)

    # ---------- head: single lane-dense slab, one K=(T+2)*128 matmul --------
    # slab blocks: [hs1[0..T-1], hs0[T-1] (= hn layer0 f|b), hs1[T-1] (= hn layer1 f|b)]
    xh = jnp.concatenate(hs1 + [hs0[T - 1], hs1[T - 1]], axis=1)   # (B, (T+2)*128)
    y1 = jnp.maximum(bdot(xh, w1p_ref[...]) + c1_ref[...], 0.0)    # Lin+BN+ReLU
    y2 = jnp.maximum(bdot(y1, w2p_ref[...]) + c2_ref[...], 0.0)    # Lin+BN+ReLU
    out_ref[...] = jnp.dot(y2, w3t_ref[...],
                           preferred_element_type=f32) + b3_ref[...]   # Lin -> (B,2)


# ----------------------------- wrapper ---------------------------------------

def forward(packed, x_ids):
    B, T = x_ids.shape
    ids = x_ids.astype(jnp.int32)
    ids_f = jnp.transpose(ids, (1, 0)).reshape(T * B, 1)            # token @ time t
    ids_b = jnp.transpose(ids[:, ::-1], (1, 0)).reshape(T * B, 1)   # token @ time T-1-t
    ids2 = jnp.concatenate([ids_f, ids_b], axis=1)                  # (T*B, 2)

    args = (ids2,
            packed['e0f'], packed['e0b'], packed['gxb0'], packed['bhhn0'],
            packed['whh0'],
            packed['wx1a'], packed['wx1b'], packed['gxb1'], packed['bhhn1'],
            packed['whh1'],
            packed['w1p'], packed['c1'], packed['w2p'], packed['c2'],
            packed['w3t'], packed['b3'])

    # Single program: all weights (~1.8 MiB bf16) live in VMEM for the whole
    # forward pass; no grid needed at B=8 (add a batch grid only for large B).
    out = pl.pallas_call(
        fused_gru_head_kernel,
        out_shape=jax.ShapeDtypeStruct((B, 2), jnp.float32),
        in_specs=[pl.BlockSpec(memory_space=pltpu.MemorySpace.VMEM)] * len(args),
        out_specs=pl.BlockSpec(memory_space=pltpu.MemorySpace.VMEM),
    )(*args)
    return out, 1


# ----------------------------- one-time weight packing -----------------------

def pack_params(raw, max_len):
    """Pre-transpose / pre-pack all weights into the 64-lane-half layout."""
    T = max_len
    f32, bf16 = jnp.float32, jnp.bfloat16
    pk = {}

    emb = raw['embedding']                                  # (VOCAB, EMB)

    # layer 0: fold embedding + input projection + b_ih into per-token tables
    for d, sfx in enumerate(('f', 'b')):
        w_ih = raw['gru_l0']['w_ih_' + sfx]                 # (3H, EMB)
        b_ih = raw['gru_l0']['b_ih_' + sfx]                 # (3H,)
        proj = emb @ w_ih.T + b_ih                          # (VOCAB, 3H)
        tab = jnp.zeros((VOCAB, PW), f32)
        for g in range(3):
            c0, c1 = _gate_cols(g, d)
            tab = tab.at[:, c0:c1].set(proj[:, g * H:(g + 1) * H])
        pk['e0' + sfx] = tab.astype(bf16)

    # recurrent weights; split b_hh into (r,z)-part (foldable into gx) and n-part
    gxb = {}
    bhhn = {}
    for layer in range(NUM_LAYERS):
        whh = jnp.zeros((GW, PW), f32)
        b_rz = jnp.zeros((1, PW), f32)
        b_n = jnp.zeros((1, GW), f32)
        for d, sfx in enumerate(('f', 'b')):
            wt = raw[f'gru_l{layer}']['w_hh_' + sfx].T      # (H, 3H)
            bh = raw[f'gru_l{layer}']['b_hh_' + sfx]
            for g in range(3):
                c0, c1 = _gate_cols(g, d)
                whh = whh.at[d * HP:d * HP + H, c0:c1].set(wt[:, g * H:(g + 1) * H])
                if g < 2:
                    b_rz = b_rz.at[0, c0:c1].set(bh[g * H:(g + 1) * H])
            b_n = b_n.at[0, d * HP:d * HP + H].set(bh[2 * H:3 * H])
        pk[f'whh{layer}'] = whh.astype(bf16)
        gxb[layer] = b_rz
        bhhn[layer] = b_n
    pk['bhhn0'] = bhhn[0]
    pk['bhhn1'] = bhhn[1]

    # layer-1 input projection packed so that, at combined step t,
    #   gx1[t] = hs0[t] @ WA + hs0[T-1-t] @ WB  (+ biases)
    # WA rows [0:64]  = fwd cell's weights for the f0-half of its input
    # WA rows [64:128]= bwd cell's weights for the b0-half
    # WB rows [0:64]  = bwd cell's weights for the f0-half
    # WB rows [64:128]= fwd cell's weights for the b0-half
    wa = jnp.zeros((GW, PW), f32)
    wb = jnp.zeros((GW, PW), f32)
    bx1 = jnp.zeros((1, PW), f32)
    for d, sfx in enumerate(('f', 'b')):
        wt = raw['gru_l1']['w_ih_' + sfx].T                 # (2H, 3H)
        bi = raw['gru_l1']['b_ih_' + sfx]
        for g in range(3):
            c0, c1 = _gate_cols(g, d)
            bx1 = bx1.at[0, c0:c1].set(bi[g * H:(g + 1) * H])
            blk_f = wt[0:H, g * H:(g + 1) * H]              # consumes f0-half
            blk_b = wt[H:2 * H, g * H:(g + 1) * H]          # consumes b0-half
            if d == 0:                                      # forward cell
                wa = wa.at[0:H, c0:c1].set(blk_f)
                wb = wb.at[HP:HP + H, c0:c1].set(blk_b)
            else:                                           # backward cell
                wb = wb.at[0:H, c0:c1].set(blk_f)
                wa = wa.at[HP:HP + H, c0:c1].set(blk_b)
    pk['wx1a'] = wa.astype(bf16)
    pk['wx1b'] = wb.astype(bf16)
    pk['gxb0'] = gxb[0]                 # layer-0 b_ih lives in the tables
    pk['gxb1'] = gxb[1] + bx1

    # head: fold eval-mode BatchNorm into the adjacent Linear.
    # W1 rows re-packed to match the kernel's slab  [hs1[0..T-1], hs0[T-1], hs1[T-1]]
    bp = raw['block']
    w1ts = bp['w1'].T * bp['bn1_scale'][None, :]            # (H*(2T+4), 1024)
    n1 = w1ts.shape[1]
    w1p = jnp.zeros(((T + 2) * GW, n1), f32)
    for t in range(T):
        # block t consumes hs1[t] = [f1 @ time t | b1 @ time T-1-t]
        w1p = w1p.at[t * GW:t * GW + H, :].set(w1ts[(2 * t) * H:(2 * t + 1) * H, :])
        cb = 2 * (T - 1 - t) + 1
        w1p = w1p.at[t * GW + HP:t * GW + HP + H, :].set(w1ts[cb * H:(cb + 1) * H, :])
    # block T consumes hs0[T-1] = [f0_final | b0_final]  (hn layer 0)
    w1p = w1p.at[T * GW:T * GW + H, :].set(w1ts[(2 * T) * H:(2 * T + 1) * H, :])
    w1p = w1p.at[T * GW + HP:T * GW + HP + H, :].set(w1ts[(2 * T + 1) * H:(2 * T + 2) * H, :])
    # block T+1 consumes hs1[T-1] = [f1_final | b1_final]  (hn layer 1)
    w1p = w1p.at[(T + 1) * GW:(T + 1) * GW + H, :].set(w1ts[(2 * T + 2) * H:(2 * T + 3) * H, :])
    w1p = w1p.at[(T + 1) * GW + HP:(T + 1) * GW + HP + H, :].set(w1ts[(2 * T + 3) * H:(2 * T + 4) * H, :])
    pk['w1p'] = w1p.astype(bf16)
    pk['c1'] = (bp['b1'] * bp['bn1_scale'] + bp['bn1_shift']).reshape(1, -1)
    pk['w2p'] = (bp['w2'].T * bp['bn2_scale'][None, :]).astype(bf16)
    pk['c2'] = (bp['b2'] * bp['bn2_scale'] + bp['bn2_shift']).reshape(1, -1)
    pk['w3t'] = bp['w3'].T                                   # (256, 2) f32, one-off
    pk['b3'] = bp['b3'].reshape(1, -1)
    return pk


# ----------------------------- raw (PyTorch-layout) params -------------------

def init_params(key, max_len):
    keys = iter(jax.random.split(key, 64))

    def nxt():
        return next(keys)

    def uni(shape, k):
        return jax.random.uniform(nxt(), shape, jnp.float32, -k, k)

    params = {}
    emb = jax.random.normal(nxt(), (VOCAB, EMB), jnp.float32)
    emb = emb.at[0].set(0.0)                                 # padding_idx=0
    params['embedding'] = emb

    k_gru = 1.0 / (HID ** 0.5)
    for layer in range(NUM_LAYERS):
        in_f = EMB if layer == 0 else 2 * HID
        params[f'gru_l{layer}'] = {
            'w_ih_f': uni((3 * HID, in_f), k_gru), 'w_hh_f': uni((3 * HID, HID), k_gru),
            'b_ih_f': uni((3 * HID,), k_gru),      'b_hh_f': uni((3 * HID,), k_gru),
            'w_ih_b': uni((3 * HID, in_f), k_gru), 'w_hh_b': uni((3 * HID, HID), k_gru),
            'b_ih_b': uni((3 * HID,), k_gru),      'b_hh_b': uni((3 * HID,), k_gru),
        }

    eps = 1e-5

    def bn(n):
        gamma = 1.0 + 0.1 * jax.random.normal(nxt(), (n,), jnp.float32)
        beta = 0.1 * jax.random.normal(nxt(), (n,), jnp.float32)
        rm = 0.1 * jax.random.normal(nxt(), (n,), jnp.float32)
        rv = jnp.abs(jax.random.normal(nxt(), (n,), jnp.float32)) + 0.5
        scale = gamma / jnp.sqrt(rv + eps)
        shift = beta - rm * scale
        return scale, shift

    d_in = HID * (2 * max_len + 4)
    bn1_scale, bn1_shift = bn(1024)
    bn2_scale, bn2_shift = bn(256)
    params['block'] = {
        'w1': uni((1024, d_in), d_in ** -0.5), 'b1': uni((1024,), d_in ** -0.5),
        'bn1_scale': bn1_scale, 'bn1_shift': bn1_shift,
        'w2': uni((256, 1024), 1024 ** -0.5), 'b2': uni((256,), 1024 ** -0.5),
        'bn2_scale': bn2_scale, 'bn2_shift': bn2_shift,
        'w3': uni((2, 256), 256 ** -0.5), 'b3': uni((2,), 256 ** -0.5),
    }
    return params


if __name__ == "__main__":
    MAX_LEN = 8
    BATCH = 8
    key = jax.random.PRNGKey(0)
    kp, kx = jax.random.split(key)
    raw_params = init_params(kp, MAX_LEN)
    packed = pack_params(raw_params, MAX_LEN)          # one-time repacking
    x_ids = jax.random.randint(kx, (BATCH, MAX_LEN), 0, VOCAB, dtype=jnp.int32)

    fwd = jax.jit(forward)
    out, flag = fwd(packed, x_ids)
    jax.block_until_ready(out)
    assert out.shape == (BATCH, 2)
    print("KERNEL_OK")
</pallas_src>

<mosaic_0001>
module attributes {stable_mosaic.version = 11 : i64} {
  func.func @fused_gru_head_kernel(%arg0: memref<64x2xi32, #tpu.memory_space<vmem>>, %arg1: memref<5x384xbf16, #tpu.memory_space<vmem>>, %arg2: memref<5x384xbf16, #tpu.memory_space<vmem>>, %arg3: memref<1x384xf32, #tpu.memory_space<vmem>>, %arg4: memref<1x128xf32, #tpu.memory_space<vmem>>, %arg5: memref<128x384xbf16, #tpu.memory_space<vmem>>, %arg6: memref<128x384xbf16, #tpu.memory_space<vmem>>, %arg7: memref<128x384xbf16, #tpu.memory_space<vmem>>, %arg8: memref<1x384xf32, #tpu.memory_space<vmem>>, %arg9: memref<1x128xf32, #tpu.memory_space<vmem>>, %arg10: memref<128x384xbf16, #tpu.memory_space<vmem>>, %arg11: memref<1280x1024xbf16, #tpu.memory_space<vmem>>, %arg12: memref<1x1024xf32, #tpu.memory_space<vmem>>, %arg13: memref<1024x256xbf16, #tpu.memory_space<vmem>>, %arg14: memref<1x256xf32, #tpu.memory_space<vmem>>, %arg15: memref<256x2xf32, #tpu.memory_space<vmem>>, %arg16: memref<1x2xf32, #tpu.memory_space<vmem>>, %arg17: memref<8x2xf32, #tpu.memory_space<vmem>>) attributes {dimension_semantics = [], scalar_prefetch = 0 : i64, scratch_operands = 0 : i64, tpu.core_type = #tpu.core_type<tc>} {
    %0 = tpu.iota {dimensions = array<i32: 1>} : vector<64x5xi32>
    %c0 = arith.constant 0 : index
    %c0_0 = arith.constant 0 : index
    %1 = vector.load %arg0[%c0, %c0_0] : memref<64x2xi32, #tpu.memory_space<vmem>>, vector<64x1xi32>
    %2 = vector.broadcast %1 : vector<64x1xi32> to vector<64x5xi32>
    %3 = arith.cmpi eq, %2, %0 : vector<64x5xi32>
    %4 = arith.extui %3 : vector<64x5xi1> to vector<64x5xi32>
    %5 = arith.sitofp %4 : vector<64x5xi32> to vector<64x5xf32>
    %6 = arith.truncf %5 : vector<64x5xf32> to vector<64x5xbf16>
    %c0_1 = arith.constant 0 : index
    %c1 = arith.constant 1 : index
    %7 = vector.load %arg0[%c0_1, %c1] : memref<64x2xi32, #tpu.memory_space<vmem>>, vector<64x1xi32>
    %8 = vector.broadcast %7 : vector<64x1xi32> to vector<64x5xi32>
    %9 = arith.cmpi eq, %8, %0 : vector<64x5xi32>
    %10 = arith.extui %9 : vector<64x5xi1> to vector<64x5xi32>
    %11 = arith.sitofp %10 : vector<64x5xi32> to vector<64x5xf32>
    %12 = arith.truncf %11 : vector<64x5xf32> to vector<64x5xbf16>
    %c0_2 = arith.constant 0 : index
    %c0_3 = arith.constant 0 : index
    %13 = vector.load %arg1[%c0_2, %c0_3] : memref<5x384xbf16, #tpu.memory_space<vmem>>, vector<5x384xbf16>
    %cst = arith.constant dense<0.000000e+00> : vector<64x384xf32>
    %14 = tpu.matmul %6, %13, %cst {dimension_numbers = #tpu.dot_dimension_numbers<[1], [0], [0], [1], [0, 0, 1, 1], [], []>} : vector<64x5xbf16>, vector<5x384xbf16>, vector<64x384xf32> -> vector<64x384xf32>
    %c0_4 = arith.constant 0 : index
    %c0_5 = arith.constant 0 : index
    %15 = vector.load %arg2[%c0_4, %c0_5] : memref<5x384xbf16, #tpu.memory_space<vmem>>, vector<5x384xbf16>
    %cst_6 = arith.constant dense<0.000000e+00> : vector<64x384xf32>
    %16 = tpu.matmul %12, %15, %cst_6 {dimension_numbers = #tpu.dot_dimension_numbers<[1], [0], [0], [1], [0, 0, 1, 1], [], []>} : vector<64x5xbf16>, vector<5x384xbf16>, vector<64x384xf32> -> vector<64x384xf32>
    %17 = arith.addf %14, %16 : vector<64x384xf32>
    %c0_7 = arith.constant 0 : index
    %c0_8 = arith.constant 0 : index
    %18 = vector.load %arg3[%c0_7, %c0_8] : memref<1x384xf32, #tpu.memory_space<vmem>>, vector<1x384xf32>
    %19 = vector.broadcast %18 : vector<1x384xf32> to vector<64x384xf32>
    %20 = arith.addf %17, %19 : vector<64x384xf32>
    %c0_9 = arith.constant 0 : index
    %c0_10 = arith.constant 0 : index
    %21 = vector.load %arg5[%c0_9, %c0_10] : memref<128x384xbf16, #tpu.memory_space<vmem>>, vector<128x384xbf16>
    %c0_11 = arith.constant 0 : index
    %c0_12 = arith.constant 0 : index
    %22 = vector.load %arg10[%c0_11, %c0_12] : memref<128x384xbf16, #tpu.memory_space<vmem>>, vector<128x384xbf16>
    %c0_13 = arith.constant 0 : index
    %c0_14 = arith.constant 0 : index
    %23 = vector.load %arg4[%c0_13, %c0_14] : memref<1x128xf32, #tpu.memory_space<vmem>>, vector<1x128xf32>
    %24 = vector.shape_cast %23 : vector<1x128xf32> to vector<1x128xf32>
    %25 = vector.broadcast %24 : vector<1x128xf32> to vector<8x128xf32>
    %c0_15 = arith.constant 0 : index
    %c0_16 = arith.constant 0 : index
    %26 = vector.load %arg9[%c0_15, %c0_16] : memref<1x128xf32, #tpu.memory_space<vmem>>, vector<1x128xf32>
    %27 = vector.shape_cast %26 : vector<1x128xf32> to vector<1x128xf32>
    %28 = vector.broadcast %27 : vector<1x128xf32> to vector<8x128xf32>
    %cst_17 = arith.constant 0.000000e+00 : f32
    %29 = vector.broadcast %cst_17 : f32 to vector<8x128xf32>
    %30 = arith.truncf %29 : vector<8x128xf32> to vector<8x128xbf16>
    %cst_18 = arith.constant dense<0.000000e+00> : vector<8x384xf32>
    %31 = tpu.matmul %30, %21, %cst_18 {dimension_numbers = #tpu.dot_dimension_numbers<[1], [0], [0], [1], [0, 0, 1, 1], [], []>} : vector<8x128xbf16>, vector<128x384xbf16>, vector<8x384xf32> -> vector<8x384xf32>
    %32 = vector.extract_strided_slice %20 {offsets = [0, 0], sizes = [8, 384], strides = [1, 1]} : vector<64x384xf32> to vector<8x384xf32>
    %33 = vector.extract_strided_slice %32 {offsets = [0, 0], sizes = [8, 128], strides = [1, 1]} : vector<8x384xf32> to vector<8x128xf32>
    %34 = vector.extract_strided_slice %31 {offsets = [0, 0], sizes = [8, 128], strides = [1, 1]} : vector<8x384xf32> to vector<8x128xf32>
    %35 = arith.addf %33, %34 : vector<8x128xf32>
    %36 = arith.negf %35 : vector<8x128xf32>
    %37 = math.exp %36 : vector<8x128xf32>
    %cst_19 = arith.constant 1.000000e+00 : f32
    %38 = vector.broadcast %cst_19 : f32 to vector<8x128xf32>
    %39 = arith.addf %38, %37 : vector<8x128xf32>
    %40 = arith.divf %38, %39 : vector<8x128xf32>
    %41 = vector.extract_strided_slice %32 {offsets = [0, 128], sizes = [8, 128], strides = [1, 1]} : vector<8x384xf32> to vector<8x128xf32>
    %42 = vector.extract_strided_slice %31 {offsets = [0, 128], sizes = [8, 128], strides = [1, 1]} : vector<8x384xf32> to vector<8x128xf32>
    %43 = arith.addf %41, %42 : vector<8x128xf32>
    %44 = arith.negf %43 : vector<8x128xf32>
    %45 = math.exp %44 : vector<8x128xf32>
    %cst_20 = arith.constant 1.000000e+00 : f32
    %46 = vector.broadcast %cst_20 : f32 to vector<8x128xf32>
    %47 = arith.addf %46, %45 : vector<8x128xf32>
    %48 = arith.divf %46, %47 : vector<8x128xf32>
    %49 = vector.extract_strided_slice %32 {offsets = [0, 256], sizes = [8, 128], strides = [1, 1]} : vector<8x384xf32> to vector<8x128xf32>
    %50 = vector.extract_strided_slice %31 {offsets = [0, 256], sizes = [8, 128], strides = [1, 1]} : vector<8x384xf32> to vector<8x128xf32>
    %51 = arith.addf %50, %25 : vector<8x128xf32>
    %52 = arith.mulf %40, %51 : vector<8x128xf32>
    %53 = arith.addf %49, %52 : vector<8x128xf32>
    %54 = math.tanh %53 : vector<8x128xf32>
    %cst_21 = arith.constant 1.000000e+00 : f32
    %55 = vector.broadcast %cst_21 : f32 to vector<8x128xf32>
    %56 = arith.subf %55, %48 : vector<8x128xf32>
    %57 = arith.mulf %56, %54 : vector<8x128xf32>
    %58 = arith.mulf %48, %29 : vector<8x128xf32>
    %59 = arith.addf %57, %58 : vector<8x128xf32>
    %60 = arith.truncf %59 : vector<8x128xf32> to vector<8x128xbf16>
    %cst_22 = arith.constant dense<0.000000e+00> : vector<8x384xf32>
    %61 = tpu.matmul %60, %21, %cst_22 {dimension_numbers = #tpu.dot_dimension_numbers<[1], [0], [0], [1], [0, 0, 1, 1], [], []>} : vector<8x128xbf16>, vector<128x384xbf16>, vector<8x384xf32> -> vector<8x384xf32>
    %62 = vector.extract_strided_slice %20 {offsets = [8, 0], sizes = [8, 384], strides = [1, 1]} : vector<64x384xf32> to vector<8x384xf32>
    %63 = vector.extract_strided_slice %62 {offsets = [0, 0], sizes = [8, 128], strides = [1, 1]} : vector<8x384xf32> to vector<8x128xf32>
    %64 = vector.extract_strided_slice %61 {offsets = [0, 0], sizes = [8, 128], strides = [1, 1]} : vector<8x384xf32> to vector<8x128xf32>
    %65 = arith.addf %63, %64 : vector<8x128xf32>
    %66 = arith.negf %65 : vector<8x128xf32>
    %67 = math.exp %66 : vector<8x128xf32>
    %cst_23 = arith.constant 1.000000e+00 : f32
    %68 = vector.broadcast %cst_23 : f32 to vector<8x128xf32>
    %69 = arith.addf %68, %67 : vector<8x128xf32>
    %70 = arith.divf %68, %69 : vector<8x128xf32>
    %71 = vector.extract_strided_slice %62 {offsets = [0, 128], sizes = [8, 128], strides = [1, 1]} : vector<8x384xf32> to vector<8x128xf32>
    %72 = vector.extract_strided_slice %61 {offsets = [0, 128], sizes = [8, 128], strides = [1, 1]} : vector<8x384xf32> to vector<8x128xf32>
    %73 = arith.addf %71, %72 : vector<8x128xf32>
    %74 = arith.negf %73 : vector<8x128xf32>
    %75 = math.exp %74 : vector<8x128xf32>
    %cst_24 = arith.constant 1.000000e+00 : f32
    %76 = vector.broadcast %cst_24 : f32 to vector<8x128xf32>
    %77 = arith.addf %76, %75 : vector<8x128xf32>
    %78 = arith.divf %76, %77 : vector<8x128xf32>
    %79 = vector.extract_strided_slice %62 {offsets = [0, 256], sizes = [8, 128], strides = [1, 1]} : vector<8x384xf32> to vector<8x128xf32>
    %80 = vector.extract_strided_slice %61 {offsets = [0, 256], sizes = [8, 128], strides = [1, 1]} : vector<8x384xf32> to vector<8x128xf32>
    %81 = arith.addf %80, %25 : vector<8x128xf32>
    %82 = arith.mulf %70, %81 : vector<8x128xf32>
    %83 = arith.addf %79, %82 : vector<8x128xf32>
    %84 = math.tanh %83 : vector<8x128xf32>
    %cst_25 = arith.constant 1.000000e+00 : f32
    %85 = vector.broadcast %cst_25 : f32 to vector<8x128xf32>
    %86 = arith.subf %85, %78 : vector<8x128xf32>
    %87 = arith.mulf %86, %84 : vector<8x128xf32>
    %88 = arith.mulf %78, %59 : vector<8x128xf32>
    %89 = arith.addf %87, %88 : vector<8x128xf32>
    %90 = arith.truncf %89 : vector<8x128xf32> to vector<8x128xbf16>
    %cst_26 = arith.constant dense<0.000000e+00> : vector<8x384xf32>
    %91 = tpu.matmul %90, %21, %cst_26 {dimension_numbers = #tpu.dot_dimension_numbers<[1], [0], [0], [1], [0, 0, 1, 1], [], []>} : vector<8x128xbf16>, vector<128x384xbf16>, vector<8x384xf32> -> vector<8x384xf32>
    %92 = vector.extract_strided_slice %20 {offsets = [16, 0], sizes = [8, 384], strides = [1, 1]} : vector<64x384xf32> to vector<8x384xf32>
    %93 = vector.extract_strided_slice %92 {offsets = [0, 0], sizes = [8, 128], strides = [1, 1]} : vector<8x384xf32> to vector<8x128xf32>
    %94 = vector.extract_strided_slice %91 {offsets = [0, 0], sizes = [8, 128], strides = [1, 1]} : vector<8x384xf32> to vector<8x128xf32>
    %95 = arith.addf %93, %94 : vector<8x128xf32>
    %96 = arith.negf %95 : vector<8x128xf32>
    %97 = math.exp %96 : vector<8x128xf32>
    %cst_27 = arith.constant 1.000000e+00 : f32
    %98 = vector.broadcast %cst_27 : f32 to vector<8x128xf32>
    %99 = arith.addf %98, %97 : vector<8x128xf32>
    %100 = arith.divf %98, %99 : vector<8x128xf32>
    %101 = vector.extract_strided_slice %92 {offsets = [0, 128], sizes = [8, 128], strides = [1, 1]} : vector<8x384xf32> to vector<8x128xf32>
    %102 = vector.extract_strided_slice %91 {offsets = [0, 128], sizes = [8, 128], strides = [1, 1]} : vector<8x384xf32> to vector<8x128xf32>
    %103 = arith.addf %101, %102 : vector<8x128xf32>
    %104 = arith.negf %103 : vector<8x128xf32>
    %105 = math.exp %104 : vector<8x128xf32>
    %cst_28 = arith.constant 1.000000e+00 : f32
    %106 = vector.broadcast %cst_28 : f32 to vector<8x128xf32>
    %107 = arith.addf %106, %105 : vector<8x128xf32>
    %108 = arith.divf %106, %107 : vector<8x128xf32>
    %109 = vector.extract_strided_slice %92 {offsets = [0, 256], sizes = [8, 128], strides = [1, 1]} : vector<8x384xf32> to vector<8x128xf32>
    %110 = vector.extract_strided_slice %91 {offsets = [0, 256], sizes = [8, 128], strides = [1, 1]} : vector<8x384xf32> to vector<8x128xf32>
    %111 = arith.addf %110, %25 : vector<8x128xf32>
    %112 = arith.mulf %100, %111 : vector<8x128xf32>
    %113 = arith.addf %109, %112 : vector<8x128xf32>
    %114 = math.tanh %113 : vector<8x128xf32>
    %cst_29 = arith.constant 1.000000e+00 : f32
    %115 = vector.broadcast %cst_29 : f32 to vector<8x128xf32>
    %116 = arith.subf %115, %108 : vector<8x128xf32>
    %117 = arith.mulf %116, %114 : vector<8x128xf32>
    %118 = arith.mulf %108, %89 : vector<8x128xf32>
    %119 = arith.addf %117, %118 : vector<8x128xf32>
    %120 = arith.truncf %119 : vector<8x128xf32> to vector<8x128xbf16>
    %cst_30 = arith.constant dense<0.000000e+00> : vector<8x384xf32>
    %121 = tpu.matmul %120, %21, %cst_30 {dimension_numbers = #tpu.dot_dimension_numbers<[1], [0], [0], [1], [0, 0, 1, 1], [], []>} : vector<8x128xbf16>, vector<128x384xbf16>, vector<8x384xf32> -> vector<8x384xf32>
    %122 = vector.extract_strided_slice %20 {offsets = [24, 0], sizes = [8, 384], strides = [1, 1]} : vector<64x384xf32> to vector<8x384xf32>
    %123 = vector.extract_strided_slice %122 {offsets = [0, 0], sizes = [8, 128], strides = [1, 1]} : vector<8x384xf32> to vector<8x128xf32>
    %124 = vector.extract_strided_slice %121 {offsets = [0, 0], sizes = [8, 128], strides = [1, 1]} : vector<8x384xf32> to vector<8x128xf32>
    %125 = arith.addf %123, %124 : vector<8x128xf32>
    %126 = arith.negf %125 : vector<8x128xf32>
    %127 = math.exp %126 : vector<8x128xf32>
    %cst_31 = arith.constant 1.000000e+00 : f32
    %128 = vector.broadcast %cst_31 : f32 to vector<8x128xf32>
    %129 = arith.addf %128, %127 : vector<8x128xf32>
    %130 = arith.divf %128, %129 : vector<8x128xf32>
    %131 = vector.extract_strided_slice %122 {offsets = [0, 128], sizes = [8, 128], strides = [1, 1]} : vector<8x384xf32> to vector<8x128xf32>
    %132 = vector.extract_strided_slice %121 {offsets = [0, 128], sizes = [8, 128], strides = [1, 1]} : vector<8x384xf32> to vector<8x128xf32>
    %133 = arith.addf %131, %132 : vector<8x128xf32>
    %134 = arith.negf %133 : vector<8x128xf32>
    %135 = math.exp %134 : vector<8x128xf32>
    %cst_32 = arith.constant 1.000000e+00 : f32
    %136 = vector.broadcast %cst_32 : f32 to vector<8x128xf32>
    %137 = arith.addf %136, %135 : vector<8x128xf32>
    %138 = arith.divf %136, %137 : vector<8x128xf32>
    %139 = vector.extract_strided_slice %122 {offsets = [0, 256], sizes = [8, 128], strides = [1, 1]} : vector<8x384xf32> to vector<8x128xf32>
    %140 = vector.extract_strided_slice %121 {offsets = [0, 256], sizes = [8, 128], strides = [1, 1]} : vector<8x384xf32> to vector<8x128xf32>
    %141 = arith.addf %140, %25 : vector<8x128xf32>
    %142 = arith.mulf %130, %141 : vector<8x128xf32>
    %143 = arith.addf %139, %142 : vector<8x128xf32>
    %144 = math.tanh %143 : vector<8x128xf32>
    %cst_33 = arith.constant 1.000000e+00 : f32
    %145 = vector.broadcast %cst_33 : f32 to vector<8x128xf32>
    %146 = arith.subf %145, %138 : vector<8x128xf32>
    %147 = arith.mulf %146, %144 : vector<8x128xf32>
    %148 = arith.mulf %138, %119 : vector<8x128xf32>
    %149 = arith.addf %147, %148 : vector<8x128xf32>
    %150 = arith.truncf %149 : vector<8x128xf32> to vector<8x128xbf16>
    %cst_34 = arith.constant dense<0.000000e+00> : vector<8x384xf32>
    %151 = tpu.matmul %150, %21, %cst_34 {dimension_numbers = #tpu.dot_dimension_numbers<[1], [0], [0], [1], [0, 0, 1, 1], [], []>} : vector<8x128xbf16>, vector<128x384xbf16>, vector<8x384xf32> -> vector<8x384xf32>
    %152 = vector.extract_strided_slice %20 {offsets = [32, 0], sizes = [8, 384], strides = [1, 1]} : vector<64x384xf32> to vector<8x384xf32>
    %153 = vector.extract_strided_slice %152 {offsets = [0, 0], sizes = [8, 128], strides = [1, 1]} : vector<8x384xf32> to vector<8x128xf32>
    %154 = vector.extract_strided_slice %151 {offsets = [0, 0], sizes = [8, 128], strides = [1, 1]} : vector<8x384xf32> to vector<8x128xf32>
    %155 = arith.addf %153, %154 : vector<8x128xf32>
    %156 = arith.negf %155 : vector<8x128xf32>
    %157 = math.exp %156 : vector<8x128xf32>
    %cst_35 = arith.constant 1.000000e+00 : f32
    %158 = vector.broadcast %cst_35 : f32 to vector<8x128xf32>
    %159 = arith.addf %158, %157 : vector<8x128xf32>
    %160 = arith.divf %158, %159 : vector<8x128xf32>
    %161 = vector.extract_strided_slice %152 {offsets = [0, 128], sizes = [8, 128], strides = [1, 1]} : vector<8x384xf32> to vector<8x128xf32>
    %162 = vector.extract_strided_slice %151 {offsets = [0, 128], sizes = [8, 128], strides = [1, 1]} : vector<8x384xf32> to vector<8x128xf32>
    %163 = arith.addf %161, %162 : vector<8x128xf32>
    %164 = arith.negf %163 : vector<8x128xf32>
    %165 = math.exp %164 : vector<8x128xf32>
    %cst_36 = arith.constant 1.000000e+00 : f32
    %166 = vector.broadcast %cst_36 : f32 to vector<8x128xf32>
    %167 = arith.addf %166, %165 : vector<8x128xf32>
    %168 = arith.divf %166, %167 : vector<8x128xf32>
    %169 = vector.extract_strided_slice %152 {offsets = [0, 256], sizes = [8, 128], strides = [1, 1]} : vector<8x384xf32> to vector<8x128xf32>
    %170 = vector.extract_strided_slice %151 {offsets = [0, 256], sizes = [8, 128], strides = [1, 1]} : vector<8x384xf32> to vector<8x128xf32>
    %171 = arith.addf %170, %25 : vector<8x128xf32>
    %172 = arith.mulf %160, %171 : vector<8x128xf32>
    %173 = arith.addf %169, %172 : vector<8x128xf32>
    %174 = math.tanh %173 : vector<8x128xf32>
    %cst_37 = arith.constant 1.000000e+00 : f32
    %175 = vector.broadcast %cst_37 : f32 to vector<8x128xf32>
    %176 = arith.subf %175, %168 : vector<8x128xf32>
    %177 = arith.mulf %176, %174 : vector<8x128xf32>
    %178 = arith.mulf %168, %149 : vector<8x128xf32>
    %179 = arith.addf %177, %178 : vector<8x128xf32>
    %180 = arith.truncf %179 : vector<8x128xf32> to vector<8x128xbf16>
    %cst_38 = arith.constant dense<0.000000e+00> : vector<8x384xf32>
    %181 = tpu.matmul %180, %21, %cst_38 {dimension_numbers = #tpu.dot_dimension_numbers<[1], [0], [0], [1], [0, 0, 1, 1], [], []>} : vector<8x128xbf16>, vector<128x384xbf16>, vector<8x384xf32> -> vector<8x384xf32>
    %182 = vector.extract_strided_slice %20 {offsets = [40, 0], sizes = [8, 384], strides = [1, 1]} : vector<64x384xf32> to vector<8x384xf32>
    %183 = vector.extract_strided_slice %182 {offsets = [0, 0], sizes = [8, 128], strides = [1, 1]} : vector<8x384xf32> to vector<8x128xf32>
    %184 = vector.extract_strided_slice %181 {offsets = [0, 0], sizes = [8, 128], strides = [1, 1]} : vector<8x384xf32> to vector<8x128xf32>
    %185 = arith.addf %183, %184 : vector<8x128xf32>
    %186 = arith.negf %185 : vector<8x128xf32>
    %187 = math.exp %186 : vector<8x128xf32>
    %cst_39 = arith.constant 1.000000e+00 : f32
    %188 = vector.broadcast %cst_39 : f32 to vector<8x128xf32>
    %189 = arith.addf %188, %187 : vector<8x128xf32>
    %190 = arith.divf %188, %189 : vector<8x128xf32>
    %191 = vector.extract_strided_slice %182 {offsets = [0, 128], sizes = [8, 128], strides = [1, 1]} : vector<8x384xf32> to vector<8x128xf32>
    %192 = vector.extract_strided_slice %181 {offsets = [0, 128], sizes = [8, 128], strides = [1, 1]} : vector<8x384xf32> to vector<8x128xf32>
    %193 = arith.addf %191, %192 : vector<8x128xf32>
    %194 = arith.negf %193 : vector<8x128xf32>
    %195 = math.exp %194 : vector<8x128xf32>
    %cst_40 = arith.constant 1.000000e+00 : f32
    %196 = vector.broadcast %cst_40 : f32 to vector<8x128xf32>
    %197 = arith.addf %196, %195 : vector<8x128xf32>
    %198 = arith.divf %196, %197 : vector<8x128xf32>
    %199 = vector.extract_strided_slice %182 {offsets = [0, 256], sizes = [8, 128], strides = [1, 1]} : vector<8x384xf32> to vector<8x128xf32>
    %200 = vector.extract_strided_slice %181 {offsets = [0, 256], sizes = [8, 128], strides = [1, 1]} : vector<8x384xf32> to vector<8x128xf32>
    %201 = arith.addf %200, %25 : vector<8x128xf32>
    %202 = arith.mulf %190, %201 : vector<8x128xf32>
    %203 = arith.addf %199, %202 : vector<8x128xf32>
    %204 = math.tanh %203 : vector<8x128xf32>
    %cst_41 = arith.constant 1.000000e+00 : f32
    %205 = vector.broadcast %cst_41 : f32 to vector<8x128xf32>
    %206 = arith.subf %205, %198 : vector<8x128xf32>
    %207 = arith.mulf %206, %204 : vector<8x128xf32>
    %208 = arith.mulf %198, %179 : vector<8x128xf32>
    %209 = arith.addf %207, %208 : vector<8x128xf32>
    %210 = arith.truncf %209 : vector<8x128xf32> to vector<8x128xbf16>
    %cst_42 = arith.constant dense<0.000000e+00> : vector<8x384xf32>
    %211 = tpu.matmul %210, %21, %cst_42 {dimension_numbers = #tpu.dot_dimension_numbers<[1], [0], [0], [1], [0, 0, 1, 1], [], []>} : vector<8x128xbf16>, vector<128x384xbf16>, vector<8x384xf32> -> vector<8x384xf32>
    %212 = vector.extract_strided_slice %20 {offsets = [48, 0], sizes = [8, 384], strides = [1, 1]} : vector<64x384xf32> to vector<8x384xf32>
    %213 = vector.extract_strided_slice %212 {offsets = [0, 0], sizes = [8, 128], strides = [1, 1]} : vector<8x384xf32> to vector<8x128xf32>
    %214 = vector.extract_strided_slice %211 {offsets = [0, 0], sizes = [8, 128], strides = [1, 1]} : vector<8x384xf32> to vector<8x128xf32>
    %215 = arith.addf %213, %214 : vector<8x128xf32>
    %216 = arith.negf %215 : vector<8x128xf32>
    %217 = math.exp %216 : vector<8x128xf32>
    %cst_43 = arith.constant 1.000000e+00 : f32
    %218 = vector.broadcast %cst_43 : f32 to vector<8x128xf32>
    %219 = arith.addf %218, %217 : vector<8x128xf32>
    %220 = arith.divf %218, %219 : vector<8x128xf32>
    %221 = vector.extract_strided_slice %212 {offsets = [0, 128], sizes = [8, 128], strides = [1, 1]} : vector<8x384xf32> to vector<8x128xf32>
    %222 = vector.extract_strided_slice %211 {offsets = [0, 128], sizes = [8, 128], strides = [1, 1]} : vector<8x384xf32> to vector<8x128xf32>
    %223 = arith.addf %221, %222 : vector<8x128xf32>
    %224 = arith.negf %223 : vector<8x128xf32>
    %225 = math.exp %224 : vector<8x128xf32>
    %cst_44 = arith.constant 1.000000e+00 : f32
    %226 = vector.broadcast %cst_44 : f32 to vector<8x128xf32>
    %227 = arith.addf %226, %225 : vector<8x128xf32>
    %228 = arith.divf %226, %227 : vector<8x128xf32>
    %229 = vector.extract_strided_slice %212 {offsets = [0, 256], sizes = [8, 128], strides = [1, 1]} : vector<8x384xf32> to vector<8x128xf32>
    %230 = vector.extract_strided_slice %211 {offsets = [0, 256], sizes = [8, 128], strides = [1, 1]} : vector<8x384xf32> to vector<8x128xf32>
    %231 = arith.addf %230, %25 : vector<8x128xf32>
    %232 = arith.mulf %220, %231 : vector<8x128xf32>
    %233 = arith.addf %229, %232 : vector<8x128xf32>
    %234 = math.tanh %233 : vector<8x128xf32>
    %cst_45 = arith.constant 1.000000e+00 : f32
    %235 = vector.broadcast %cst_45 : f32 to vector<8x128xf32>
    %236 = arith.subf %235, %228 : vector<8x128xf32>
    %237 = arith.mulf %236, %234 : vector<8x128xf32>
    %238 = arith.mulf %228, %209 : vector<8x128xf32>
    %239 = arith.addf %237, %238 : vector<8x128xf32>
    %240 = arith.truncf %239 : vector<8x128xf32> to vector<8x128xbf16>
    %cst_46 = arith.constant dense<0.000000e+00> : vector<8x384xf32>
    %241 = tpu.matmul %240, %21, %cst_46 {dimension_numbers = #tpu.dot_dimension_numbers<[1], [0], [0], [1], [0, 0, 1, 1], [], []>} : vector<8x128xbf16>, vector<128x384xbf16>, vector<8x384xf32> -> vector<8x384xf32>
    %242 = vector.extract_strided_slice %20 {offsets = [56, 0], sizes = [8, 384], strides = [1, 1]} : vector<64x384xf32> to vector<8x384xf32>
    %243 = vector.extract_strided_slice %242 {offsets = [0, 0], sizes = [8, 128], strides = [1, 1]} : vector<8x384xf32> to vector<8x128xf32>
    %244 = vector.extract_strided_slice %241 {offsets = [0, 0], sizes = [8, 128], strides = [1, 1]} : vector<8x384xf32> to vector<8x128xf32>
    %245 = arith.addf %243, %244 : vector<8x128xf32>
    %246 = arith.negf %245 : vector<8x128xf32>
    %247 = math.exp %246 : vector<8x128xf32>
    %cst_47 = arith.constant 1.000000e+00 : f32
    %248 = vector.broadcast %cst_47 : f32 to vector<8x128xf32>
    %249 = arith.addf %248, %247 : vector<8x128xf32>
    %250 = arith.divf %248, %249 : vector<8x128xf32>
    %251 = vector.extract_strided_slice %242 {offsets = [0, 128], sizes = [8, 128], strides = [1, 1]} : vector<8x384xf32> to vector<8x128xf32>
    %252 = vector.extract_strided_slice %241 {offsets = [0, 128], sizes = [8, 128], strides = [1, 1]} : vector<8x384xf32> to vector<8x128xf32>
    %253 = arith.addf %251, %252 : vector<8x128xf32>
    %254 = arith.negf %253 : vector<8x128xf32>
    %255 = math.exp %254 : vector<8x128xf32>
    %cst_48 = arith.constant 1.000000e+00 : f32
    %256 = vector.broadcast %cst_48 : f32 to vector<8x128xf32>
    %257 = arith.addf %256, %255 : vector<8x128xf32>
    %258 = arith.divf %256, %257 : vector<8x128xf32>
    %259 = vector.extract_strided_slice %242 {offsets = [0, 256], sizes = [8, 128], strides = [1, 1]} : vector<8x384xf32> to vector<8x128xf32>
    %260 = vector.extract_strided_slice %241 {offsets = [0, 256], sizes = [8, 128], strides = [1, 1]} : vector<8x384xf32> to vector<8x128xf32>
    %261 = arith.addf %260, %25 : vector<8x128xf32>
    %262 = arith.mulf %250, %261 : vector<8x128xf32>
    %263 = arith.addf %259, %262 : vector<8x128xf32>
    %264 = math.tanh %263 : vector<8x128xf32>
    %cst_49 = arith.constant 1.000000e+00 : f32
    %265 = vector.broadcast %cst_49 : f32 to vector<8x128xf32>
    %266 = arith.subf %265, %258 : vector<8x128xf32>
    %267 = arith.mulf %266, %264 : vector<8x128xf32>
    %268 = arith.mulf %258, %239 : vector<8x128xf32>
    %269 = arith.addf %267, %268 : vector<8x128xf32>
    %270 = tpu.concatenate %59, %89, %119, %149, %179, %209, %239, %269 in 0 : vector<8x128xf32>, vector<8x128xf32>, vector<8x128xf32>, vector<8x128xf32>, vector<8x128xf32>, vector<8x128xf32>, vector<8x128xf32>, vector<8x128xf32> -> vector<64x128xf32>
    %271 = tpu.concatenate %269, %239, %209, %179, %149, %119, %89, %59 in 0 : vector<8x128xf32>, vector<8x128xf32>, vector<8x128xf32>, vector<8x128xf32>, vector<8x128xf32>, vector<8x128xf32>, vector<8x128xf32>, vector<8x128xf32> -> vector<64x128xf32>
    %c0_50 = arith.constant 0 : index
    %c0_51 = arith.constant 0 : index
    %272 = vector.load %arg6[%c0_50, %c0_51] : memref<128x384xbf16, #tpu.memory_space<vmem>>, vector<128x384xbf16>
    %273 = arith.truncf %270 : vector<64x128xf32> to vector<64x128xbf16>
    %cst_52 = arith.constant dense<0.000000e+00> : vector<64x384xf32>
    %274 = tpu.matmul %273, %272, %cst_52 {dimension_numbers = #tpu.dot_dimension_numbers<[1], [0], [0], [1], [0, 0, 1, 1], [], []>} : vector<64x128xbf16>, vector<128x384xbf16>, vector<64x384xf32> -> vector<64x384xf32>
    %c0_53 = arith.constant 0 : index
    %c0_54 = arith.constant 0 : index
    %275 = vector.load %arg7[%c0_53, %c0_54] : memref<128x384xbf16, #tpu.memory_space<vmem>>, vector<128x384xbf16>
    %276 = arith.truncf %271 : vector<64x128xf32> to vector<64x128xbf16>
    %cst_55 = arith.constant dense<0.000000e+00> : vector<64x384xf32>
    %277 = tpu.matmul %276, %275, %cst_55 {dimension_numbers = #tpu.dot_dimension_numbers<[1], [0], [0], [1], [0, 0, 1, 1], [], []>} : vector<64x128xbf16>, vector<128x384xbf16>, vector<64x384xf32> -> vector<64x384xf32>
    %278 = arith.addf %274, %277 : vector<64x384xf32>
    %c0_56 = arith.constant 0 : index
    %c0_57 = arith.constant 0 : index
    %279 = vector.load %arg8[%c0_56, %c0_57] : memref<1x384xf32, #tpu.memory_space<vmem>>, vector<1x384xf32>
    %280 = vector.broadcast %279 : vector<1x384xf32> to vector<64x384xf32>
    %281 = arith.addf %278, %280 : vector<64x384xf32>
    %cst_58 = arith.constant 0.000000e+00 : f32
    %282 = vector.broadcast %cst_58 : f32 to vector<8x128xf32>
    %283 = arith.truncf %282 : vector<8x128xf32> to vector<8x128xbf16>
    %cst_59 = arith.constant dense<0.000000e+00> : vector<8x384xf32>
    %284 = tpu.matmul %283, %22, %cst_59 {dimension_numbers = #tpu.dot_dimension_numbers<[1], [0], [0], [1], [0, 0, 1, 1], [], []>} : vector<8x128xbf16>, vector<128x384xbf16>, vector<8x384xf32> -> vector<8x384xf32>
    %285 = vector.extract_strided_slice %281 {offsets = [0, 0], sizes = [8, 384], strides = [1, 1]} : vector<64x384xf32> to vector<8x384xf32>
    %286 = vector.extract_strided_slice %285 {offsets = [0, 0], sizes = [8, 128], strides = [1, 1]} : vector<8x384xf32> to vector<8x128xf32>
    %287 = vector.extract_strided_slice %284 {offsets = [0, 0], sizes = [8, 128], strides = [1, 1]} : vector<8x384xf32> to vector<8x128xf32>
    %288 = arith.addf %286, %287 : vector<8x128xf32>
    %289 = arith.negf %288 : vector<8x128xf32>
    %290 = math.exp %289 : vector<8x128xf32>
    %cst_60 = arith.constant 1.000000e+00 : f32
    %291 = vector.broadcast %cst_60 : f32 to vector<8x128xf32>
    %292 = arith.addf %291, %290 : vector<8x128xf32>
    %293 = arith.divf %291, %292 : vector<8x128xf32>
    %294 = vector.extract_strided_slice %285 {offsets = [0, 128], sizes = [8, 128], strides = [1, 1]} : vector<8x384xf32> to vector<8x128xf32>
    %295 = vector.extract_strided_slice %284 {offsets = [0, 128], sizes = [8, 128], strides = [1, 1]} : vector<8x384xf32> to vector<8x128xf32>
    %296 = arith.addf %294, %295 : vector<8x128xf32>
    %297 = arith.negf %296 : vector<8x128xf32>
    %298 = math.exp %297 : vector<8x128xf32>
    %cst_61 = arith.constant 1.000000e+00 : f32
    %299 = vector.broadcast %cst_61 : f32 to vector<8x128xf32>
    %300 = arith.addf %299, %298 : vector<8x128xf32>
    %301 = arith.divf %299, %300 : vector<8x128xf32>
    %302 = vector.extract_strided_slice %285 {offsets = [0, 256], sizes = [8, 128], strides = [1, 1]} : vector<8x384xf32> to vector<8x128xf32>
    %303 = vector.extract_strided_slice %284 {offsets = [0, 256], sizes = [8, 128], strides = [1, 1]} : vector<8x384xf32> to vector<8x128xf32>
    %304 = arith.addf %303, %28 : vector<8x128xf32>
    %305 = arith.mulf %293, %304 : vector<8x128xf32>
    %306 = arith.addf %302, %305 : vector<8x128xf32>
    %307 = math.tanh %306 : vector<8x128xf32>
    %cst_62 = arith.constant 1.000000e+00 : f32
    %308 = vector.broadcast %cst_62 : f32 to vector<8x128xf32>
    %309 = arith.subf %308, %301 : vector<8x128xf32>
    %310 = arith.mulf %309, %307 : vector<8x128xf32>
    %311 = arith.mulf %301, %282 : vector<8x128xf32>
    %312 = arith.addf %310, %311 : vector<8x128xf32>
    %313 = arith.truncf %312 : vector<8x128xf32> to vector<8x128xbf16>
    %cst_63 = arith.constant dense<0.000000e+00> : vector<8x384xf32>
    %314 = tpu.matmul %313, %22, %cst_63 {dimension_numbers = #tpu.dot_dimension_numbers<[1], [0], [0], [1], [0, 0, 1, 1], [], []>} : vector<8x128xbf16>, vector<128x384xbf16>, vector<8x384xf32> -> vector<8x384xf32>
    %315 = vector.extract_strided_slice %281 {offsets = [8, 0], sizes = [8, 384], strides = [1, 1]} : vector<64x384xf32> to vector<8x384xf32>
    %316 = vector.extract_strided_slice %315 {offsets = [0, 0], sizes = [8, 128], strides = [1, 1]} : vector<8x384xf32> to vector<8x128xf32>
    %317 = vector.extract_strided_slice %314 {offsets = [0, 0], sizes = [8, 128], strides = [1, 1]} : vector<8x384xf32> to vector<8x128xf32>
    %318 = arith.addf %316, %317 : vector<8x128xf32>
    %319 = arith.negf %318 : vector<8x128xf32>
    %320 = math.exp %319 : vector<8x128xf32>
    %cst_64 = arith.constant 1.000000e+00 : f32
    %321 = vector.broadcast %cst_64 : f32 to vector<8x128xf32>
    %322 = arith.addf %321, %320 : vector<8x128xf32>
    %323 = arith.divf %321, %322 : vector<8x128xf32>
    %324 = vector.extract_strided_slice %315 {offsets = [0, 128], sizes = [8, 128], strides = [1, 1]} : vector<8x384xf32> to vector<8x128xf32>
    %325 = vector.extract_strided_slice %314 {offsets = [0, 128], sizes = [8, 128], strides = [1, 1]} : vector<8x384xf32> to vector<8x128xf32>
    %326 = arith.addf %324, %325 : vector<8x128xf32>
    %327 = arith.negf %326 : vector<8x128xf32>
    %328 = math.exp %327 : vector<8x128xf32>
    %cst_65 = arith.constant 1.000000e+00 : f32
    %329 = vector.broadcast %cst_65 : f32 to vector<8x128xf32>
    %330 = arith.addf %329, %328 : vector<8x128xf32>
    %331 = arith.divf %329, %330 : vector<8x128xf32>
    %332 = vector.extract_strided_slice %315 {offsets = [0, 256], sizes = [8, 128], strides = [1, 1]} : vector<8x384xf32> to vector<8x128xf32>
    %333 = vector.extract_strided_slice %314 {offsets = [0, 256], sizes = [8, 128], strides = [1, 1]} : vector<8x384xf32> to vector<8x128xf32>
    %334 = arith.addf %333, %28 : vector<8x128xf32>
    %335 = arith.mulf %323, %334 : vector<8x128xf32>
    %336 = arith.addf %332, %335 : vector<8x128xf32>
    %337 = math.tanh %336 : vector<8x128xf32>
    %cst_66 = arith.constant 1.000000e+00 : f32
    %338 = vector.broadcast %cst_66 : f32 to vector<8x128xf32>
    %339 = arith.subf %338, %331 : vector<8x128xf32>
    %340 = arith.mulf %339, %337 : vector<8x128xf32>
    %341 = arith.mulf %331, %312 : vector<8x128xf32>
    %342 = arith.addf %340, %341 : vector<8x128xf32>
    %343 = arith.truncf %342 : vector<8x128xf32> to vector<8x128xbf16>
    %cst_67 = arith.constant dense<0.000000e+00> : vector<8x384xf32>
    %344 = tpu.matmul %343, %22, %cst_67 {dimension_numbers = #tpu.dot_dimension_numbers<[1], [0], [0], [1], [0, 0, 1, 1], [], []>} : vector<8x128xbf16>, vector<128x384xbf16>, vector<8x384xf32> -> vector<8x384xf32>
    %345 = vector.extract_strided_slice %281 {offsets = [16, 0], sizes = [8, 384], strides = [1, 1]} : vector<64x384xf32> to vector<8x384xf32>
    %346 = vector.extract_strided_slice %345 {offsets = [0, 0], sizes = [8, 128], strides = [1, 1]} : vector<8x384xf32> to vector<8x128xf32>
    %347 = vector.extract_strided_slice %344 {offsets = [0, 0], sizes = [8, 128], strides = [1, 1]} : vector<8x384xf32> to vector<8x128xf32>
    %348 = arith.addf %346, %347 : vector<8x128xf32>
    %349 = arith.negf %348 : vector<8x128xf32>
    %350 = math.exp %349 : vector<8x128xf32>
    %cst_68 = arith.constant 1.000000e+00 : f32
    %351 = vector.broadcast %cst_68 : f32 to vector<8x128xf32>
    %352 = arith.addf %351, %350 : vector<8x128xf32>
    %353 = arith.divf %351, %352 : vector<8x128xf32>
    %354 = vector.extract_strided_slice %345 {offsets = [0, 128], sizes = [8, 128], strides = [1, 1]} : vector<8x384xf32> to vector<8x128xf32>
    %355 = vector.extract_strided_slice %344 {offsets = [0, 128], sizes = [8, 128], strides = [1, 1]} : vector<8x384xf32> to vector<8x128xf32>
    %356 = arith.addf %354, %355 : vector<8x128xf32>
    %357 = arith.negf %356 : vector<8x128xf32>
    %358 = math.exp %357 : vector<8x128xf32>
    %cst_69 = arith.constant 1.000000e+00 : f32
    %359 = vector.broadcast %cst_69 : f32 to vector<8x128xf32>
    %360 = arith.addf %359, %358 : vector<8x128xf32>
    %361 = arith.divf %359, %360 : vector<8x128xf32>
    %362 = vector.extract_strided_slice %345 {offsets = [0, 256], sizes = [8, 128], strides = [1, 1]} : vector<8x384xf32> to vector<8x128xf32>
    %363 = vector.extract_strided_slice %344 {offsets = [0, 256], sizes = [8, 128], strides = [1, 1]} : vector<8x384xf32> to vector<8x128xf32>
    %364 = arith.addf %363, %28 : vector<8x128xf32>
    %365 = arith.mulf %353, %364 : vector<8x128xf32>
    %366 = arith.addf %362, %365 : vector<8x128xf32>
    %367 = math.tanh %366 : vector<8x128xf32>
    %cst_70 = arith.constant 1.000000e+00 : f32
    %368 = vector.broadcast %cst_70 : f32 to vector<8x128xf32>
    %369 = arith.subf %368, %361 : vector<8x128xf32>
    %370 = arith.mulf %369, %367 : vector<8x128xf32>
    %371 = arith.mulf %361, %342 : vector<8x128xf32>
    %372 = arith.addf %370, %371 : vector<8x128xf32>
    %373 = arith.truncf %372 : vector<8x128xf32> to vector<8x128xbf16>
    %cst_71 = arith.constant dense<0.000000e+00> : vector<8x384xf32>
    %374 = tpu.matmul %373, %22, %cst_71 {dimension_numbers = #tpu.dot_dimension_numbers<[1], [0], [0], [1], [0, 0, 1, 1], [], []>} : vector<8x128xbf16>, vector<128x384xbf16>, vector<8x384xf32> -> vector<8x384xf32>
    %375 = vector.extract_strided_slice %281 {offsets = [24, 0], sizes = [8, 384], strides = [1, 1]} : vector<64x384xf32> to vector<8x384xf32>
    %376 = vector.extract_strided_slice %375 {offsets = [0, 0], sizes = [8, 128], strides = [1, 1]} : vector<8x384xf32> to vector<8x128xf32>
    %377 = vector.extract_strided_slice %374 {offsets = [0, 0], sizes = [8, 128], strides = [1, 1]} : vector<8x384xf32> to vector<8x128xf32>
    %378 = arith.addf %376, %377 : vector<8x128xf32>
    %379 = arith.negf %378 : vector<8x128xf32>
    %380 = math.exp %379 : vector<8x128xf32>
    %cst_72 = arith.constant 1.000000e+00 : f32
    %381 = vector.broadcast %cst_72 : f32 to vector<8x128xf32>
    %382 = arith.addf %381, %380 : vector<8x128xf32>
    %383 = arith.divf %381, %382 : vector<8x128xf32>
    %384 = vector.extract_strided_slice %375 {offsets = [0, 128], sizes = [8, 128], strides = [1, 1]} : vector<8x384xf32> to vector<8x128xf32>
    %385 = vector.extract_strided_slice %374 {offsets = [0, 128], sizes = [8, 128], strides = [1, 1]} : vector<8x384xf32> to vector<8x128xf32>
    %386 = arith.addf %384, %385 : vector<8x128xf32>
    %387 = arith.negf %386 : vector<8x128xf32>
    %388 = math.exp %387 : vector<8x128xf32>
    %cst_73 = arith.constant 1.000000e+00 : f32
    %389 = vector.broadcast %cst_73 : f32 to vector<8x128xf32>
    %390 = arith.addf %389, %388 : vector<8x128xf32>
    %391 = arith.divf %389, %390 : vector<8x128xf32>
    %392 = vector.extract_strided_slice %375 {offsets = [0, 256], sizes = [8, 128], strides = [1, 1]} : vector<8x384xf32> to vector<8x128xf32>
    %393 = vector.extract_strided_slice %374 {offsets = [0, 256], sizes = [8, 128], strides = [1, 1]} : vector<8x384xf32> to vector<8x128xf32>
    %394 = arith.addf %393, %28 : vector<8x128xf32>
    %395 = arith.mulf %383, %394 : vector<8x128xf32>
    %396 = arith.addf %392, %395 : vector<8x128xf32>
    %397 = math.tanh %396 : vector<8x128xf32>
    %cst_74 = arith.constant 1.000000e+00 : f32
    %398 = vector.broadcast %cst_74 : f32 to vector<8x128xf32>
    %399 = arith.subf %398, %391 : vector<8x128xf32>
    %400 = arith.mulf %399, %397 : vector<8x128xf32>
    %401 = arith.mulf %391, %372 : vector<8x128xf32>
    %402 = arith.addf %400, %401 : vector<8x128xf32>
    %403 = arith.truncf %402 : vector<8x128xf32> to vector<8x128xbf16>
    %cst_75 = arith.constant dense<0.000000e+00> : vector<8x384xf32>
    %404 = tpu.matmul %403, %22, %cst_75 {dimension_numbers = #tpu.dot_dimension_numbers<[1], [0], [0], [1], [0, 0, 1, 1], [], []>} : vector<8x128xbf16>, vector<128x384xbf16>, vector<8x384xf32> -> vector<8x384xf32>
    %405 = vector.extract_strided_slice %281 {offsets = [32, 0], sizes = [8, 384], strides = [1, 1]} : vector<64x384xf32> to vector<8x384xf32>
    %406 = vector.extract_strided_slice %405 {offsets = [0, 0], sizes = [8, 128], strides = [1, 1]} : vector<8x384xf32> to vector<8x128xf32>
    %407 = vector.extract_strided_slice %404 {offsets = [0, 0], sizes = [8, 128], strides = [1, 1]} : vector<8x384xf32> to vector<8x128xf32>
    %408 = arith.addf %406, %407 : vector<8x128xf32>
    %409 = arith.negf %408 : vector<8x128xf32>
    %410 = math.exp %409 : vector<8x128xf32>
    %cst_76 = arith.constant 1.000000e+00 : f32
    %411 = vector.broadcast %cst_76 : f32 to vector<8x128xf32>
    %412 = arith.addf %411, %410 : vector<8x128xf32>
    %413 = arith.divf %411, %412 : vector<8x128xf32>
    %414 = vector.extract_strided_slice %405 {offsets = [0, 128], sizes = [8, 128], strides = [1, 1]} : vector<8x384xf32> to vector<8x128xf32>
    %415 = vector.extract_strided_slice %404 {offsets = [0, 128], sizes = [8, 128], strides = [1, 1]} : vector<8x384xf32> to vector<8x128xf32>
    %416 = arith.addf %414, %415 : vector<8x128xf32>
    %417 = arith.negf %416 : vector<8x128xf32>
    %418 = math.exp %417 : vector<8x128xf32>
    %cst_77 = arith.constant 1.000000e+00 : f32
    %419 = vector.broadcast %cst_77 : f32 to vector<8x128xf32>
    %420 = arith.addf %419, %418 : vector<8x128xf32>
    %421 = arith.divf %419, %420 : vector<8x128xf32>
    %422 = vector.extract_strided_slice %405 {offsets = [0, 256], sizes = [8, 128], strides = [1, 1]} : vector<8x384xf32> to vector<8x128xf32>
    %423 = vector.extract_strided_slice %404 {offsets = [0, 256], sizes = [8, 128], strides = [1, 1]} : vector<8x384xf32> to vector<8x128xf32>
    %424 = arith.addf %423, %28 : vector<8x128xf32>
    %425 = arith.mulf %413, %424 : vector<8x128xf32>
    %426 = arith.addf %422, %425 : vector<8x128xf32>
    %427 = math.tanh %426 : vector<8x128xf32>
    %cst_78 = arith.constant 1.000000e+00 : f32
    %428 = vector.broadcast %cst_78 : f32 to vector<8x128xf32>
    %429 = arith.subf %428, %421 : vector<8x128xf32>
    %430 = arith.mulf %429, %427 : vector<8x128xf32>
    %431 = arith.mulf %421, %402 : vector<8x128xf32>
    %432 = arith.addf %430, %431 : vector<8x128xf32>
    %433 = arith.truncf %432 : vector<8x128xf32> to vector<8x128xbf16>
    %cst_79 = arith.constant dense<0.000000e+00> : vector<8x384xf32>
    %434 = tpu.matmul %433, %22, %cst_79 {dimension_numbers = #tpu.dot_dimension_numbers<[1], [0], [0], [1], [0, 0, 1, 1], [], []>} : vector<8x128xbf16>, vector<128x384xbf16>, vector<8x384xf32> -> vector<8x384xf32>
    %435 = vector.extract_strided_slice %281 {offsets = [40, 0], sizes = [8, 384], strides = [1, 1]} : vector<64x384xf32> to vector<8x384xf32>
    %436 = vector.extract_strided_slice %435 {offsets = [0, 0], sizes = [8, 128], strides = [1, 1]} : vector<8x384xf32> to vector<8x128xf32>
    %437 = vector.extract_strided_slice %434 {offsets = [0, 0], sizes = [8, 128], strides = [1, 1]} : vector<8x384xf32> to vector<8x128xf32>
    %438 = arith.addf %436, %437 : vector<8x128xf32>
    %439 = arith.negf %438 : vector<8x128xf32>
    %440 = math.exp %439 : vector<8x128xf32>
    %cst_80 = arith.constant 1.000000e+00 : f32
    %441 = vector.broadcast %cst_80 : f32 to vector<8x128xf32>
    %442 = arith.addf %441, %440 : vector<8x128xf32>
    %443 = arith.divf %441, %442 : vector<8x128xf32>
    %444 = vector.extract_strided_slice %435 {offsets = [0, 128], sizes = [8, 128], strides = [1, 1]} : vector<8x384xf32> to vector<8x128xf32>
    %445 = vector.extract_strided_slice %434 {offsets = [0, 128], sizes = [8, 128], strides = [1, 1]} : vector<8x384xf32> to vector<8x128xf32>
    %446 = arith.addf %444, %445 : vector<8x128xf32>
    %447 = arith.negf %446 : vector<8x128xf32>
    %448 = math.exp %447 : vector<8x128xf32>
    %cst_81 = arith.constant 1.000000e+00 : f32
    %449 = vector.broadcast %cst_81 : f32 to vector<8x128xf32>
    %450 = arith.addf %449, %448 : vector<8x128xf32>
    %451 = arith.divf %449, %450 : vector<8x128xf32>
    %452 = vector.extract_strided_slice %435 {offsets = [0, 256], sizes = [8, 128], strides = [1, 1]} : vector<8x384xf32> to vector<8x128xf32>
    %453 = vector.extract_strided_slice %434 {offsets = [0, 256], sizes = [8, 128], strides = [1, 1]} : vector<8x384xf32> to vector<8x128xf32>
    %454 = arith.addf %453, %28 : vector<8x128xf32>
    %455 = arith.mulf %443, %454 : vector<8x128xf32>
    %456 = arith.addf %452, %455 : vector<8x128xf32>
    %457 = math.tanh %456 : vector<8x128xf32>
    %cst_82 = arith.constant 1.000000e+00 : f32
    %458 = vector.broadcast %cst_82 : f32 to vector<8x128xf32>
    %459 = arith.subf %458, %451 : vector<8x128xf32>
    %460 = arith.mulf %459, %457 : vector<8x128xf32>
    %461 = arith.mulf %451, %432 : vector<8x128xf32>
    %462 = arith.addf %460, %461 : vector<8x128xf32>
    %463 = arith.truncf %462 : vector<8x128xf32> to vector<8x128xbf16>
    %cst_83 = arith.constant dense<0.000000e+00> : vector<8x384xf32>
    %464 = tpu.matmul %463, %22, %cst_83 {dimension_numbers = #tpu.dot_dimension_numbers<[1], [0], [0], [1], [0, 0, 1, 1], [], []>} : vector<8x128xbf16>, vector<128x384xbf16>, vector<8x384xf32> -> vector<8x384xf32>
    %465 = vector.extract_strided_slice %281 {offsets = [48, 0], sizes = [8, 384], strides = [1, 1]} : vector<64x384xf32> to vector<8x384xf32>
    %466 = vector.extract_strided_slice %465 {offsets = [0, 0], sizes = [8, 128], strides = [1, 1]} : vector<8x384xf32> to vector<8x128xf32>
    %467 = vector.extract_strided_slice %464 {offsets = [0, 0], sizes = [8, 128], strides = [1, 1]} : vector<8x384xf32> to vector<8x128xf32>
    %468 = arith.addf %466, %467 : vector<8x128xf32>
    %469 = arith.negf %468 : vector<8x128xf32>
    %470 = math.exp %469 : vector<8x128xf32>
    %cst_84 = arith.constant 1.000000e+00 : f32
    %471 = vector.broadcast %cst_84 : f32 to vector<8x128xf32>
    %472 = arith.addf %471, %470 : vector<8x128xf32>
    %473 = arith.divf %471, %472 : vector<8x128xf32>
    %474 = vector.extract_strided_slice %465 {offsets = [0, 128], sizes = [8, 128], strides = [1, 1]} : vector<8x384xf32> to vector<8x128xf32>
    %475 = vector.extract_strided_slice %464 {offsets = [0, 128], sizes = [8, 128], strides = [1, 1]} : vector<8x384xf32> to vector<8x128xf32>
    %476 = arith.addf %474, %475 : vector<8x128xf32>
    %477 = arith.negf %476 : vector<8x128xf32>
    %478 = math.exp %477 : vector<8x128xf32>
    %cst_85 = arith.constant 1.000000e+00 : f32
    %479 = vector.broadcast %cst_85 : f32 to vector<8x128xf32>
    %480 = arith.addf %479, %478 : vector<8x128xf32>
    %481 = arith.divf %479, %480 : vector<8x128xf32>
    %482 = vector.extract_strided_slice %465 {offsets = [0, 256], sizes = [8, 128], strides = [1, 1]} : vector<8x384xf32> to vector<8x128xf32>
    %483 = vector.extract_strided_slice %464 {offsets = [0, 256], sizes = [8, 128], strides = [1, 1]} : vector<8x384xf32> to vector<8x128xf32>
    %484 = arith.addf %483, %28 : vector<8x128xf32>
    %485 = arith.mulf %473, %484 : vector<8x128xf32>
    %486 = arith.addf %482, %485 : vector<8x128xf32>
    %487 = math.tanh %486 : vector<8x128xf32>
    %cst_86 = arith.constant 1.000000e+00 : f32
    %488 = vector.broadcast %cst_86 : f32 to vector<8x128xf32>
    %489 = arith.subf %488, %481 : vector<8x128xf32>
    %490 = arith.mulf %489, %487 : vector<8x128xf32>
    %491 = arith.mulf %481, %462 : vector<8x128xf32>
    %492 = arith.addf %490, %491 : vector<8x128xf32>
    %493 = arith.truncf %492 : vector<8x128xf32> to vector<8x128xbf16>
    %cst_87 = arith.constant dense<0.000000e+00> : vector<8x384xf32>
    %494 = tpu.matmul %493, %22, %cst_87 {dimension_numbers = #tpu.dot_dimension_numbers<[1], [0], [0], [1], [0, 0, 1, 1], [], []>} : vector<8x128xbf16>, vector<128x384xbf16>, vector<8x384xf32> -> vector<8x384xf32>
    %495 = vector.extract_strided_slice %281 {offsets = [56, 0], sizes = [8, 384], strides = [1, 1]} : vector<64x384xf32> to vector<8x384xf32>
    %496 = vector.extract_strided_slice %495 {offsets = [0, 0], sizes = [8, 128], strides = [1, 1]} : vector<8x384xf32> to vector<8x128xf32>
    %497 = vector.extract_strided_slice %494 {offsets = [0, 0], sizes = [8, 128], strides = [1, 1]} : vector<8x384xf32> to vector<8x128xf32>
    %498 = arith.addf %496, %497 : vector<8x128xf32>
    %499 = arith.negf %498 : vector<8x128xf32>
    %500 = math.exp %499 : vector<8x128xf32>
    %cst_88 = arith.constant 1.000000e+00 : f32
    %501 = vector.broadcast %cst_88 : f32 to vector<8x128xf32>
    %502 = arith.addf %501, %500 : vector<8x128xf32>
    %503 = arith.divf %501, %502 : vector<8x128xf32>
    %504 = vector.extract_strided_slice %495 {offsets = [0, 128], sizes = [8, 128], strides = [1, 1]} : vector<8x384xf32> to vector<8x128xf32>
    %505 = vector.extract_strided_slice %494 {offsets = [0, 128], sizes = [8, 128], strides = [1, 1]} : vector<8x384xf32> to vector<8x128xf32>
    %506 = arith.addf %504, %505 : vector<8x128xf32>
    %507 = arith.negf %506 : vector<8x128xf32>
    %508 = math.exp %507 : vector<8x128xf32>
    %cst_89 = arith.constant 1.000000e+00 : f32
    %509 = vector.broadcast %cst_89 : f32 to vector<8x128xf32>
    %510 = arith.addf %509, %508 : vector<8x128xf32>
    %511 = arith.divf %509, %510 : vector<8x128xf32>
    %512 = vector.extract_strided_slice %495 {offsets = [0, 256], sizes = [8, 128], strides = [1, 1]} : vector<8x384xf32> to vector<8x128xf32>
    %513 = vector.extract_strided_slice %494 {offsets = [0, 256], sizes = [8, 128], strides = [1, 1]} : vector<8x384xf32> to vector<8x128xf32>
    %514 = arith.addf %513, %28 : vector<8x128xf32>
    %515 = arith.mulf %503, %514 : vector<8x128xf32>
    %516 = arith.addf %512, %515 : vector<8x128xf32>
    %517 = math.tanh %516 : vector<8x128xf32>
    %cst_90 = arith.constant 1.000000e+00 : f32
    %518 = vector.broadcast %cst_90 : f32 to vector<8x128xf32>
    %519 = arith.subf %518, %511 : vector<8x128xf32>
    %520 = arith.mulf %519, %517 : vector<8x128xf32>
    %521 = arith.mulf %511, %492 : vector<8x128xf32>
    %522 = arith.addf %520, %521 : vector<8x128xf32>
    %523 = tpu.concatenate %312, %342, %372, %402, %432, %462, %492, %522, %269, %522 in 1 : vector<8x128xf32>, vector<8x128xf32>, vector<8x128xf32>, vector<8x128xf32>, vector<8x128xf32>, vector<8x128xf32>, vector<8x128xf32>, vector<8x128xf32>, vector<8x128xf32>, vector<8x128xf32> -> vector<8x1280xf32>
    %c0_91 = arith.constant 0 : index
    %c0_92 = arith.constant 0 : index
    %524 = vector.load %arg11[%c0_91, %c0_92] : memref<1280x1024xbf16, #tpu.memory_space<vmem>>, vector<1280x1024xbf16>
    %525 = arith.truncf %523 : vector<8x1280xf32> to vector<8x1280xbf16>
    %cst_93 = arith.constant dense<0.000000e+00> : vector<8x1024xf32>
    %526 = tpu.matmul %525, %524, %cst_93 {dimension_numbers = #tpu.dot_dimension_numbers<[1], [0], [0], [1], [0, 0, 1, 1], [], []>} : vector<8x1280xbf16>, vector<1280x1024xbf16>, vector<8x1024xf32> -> vector<8x1024xf32>
    %c0_94 = arith.constant 0 : index
    %c0_95 = arith.constant 0 : index
    %527 = vector.load %arg12[%c0_94, %c0_95] : memref<1x1024xf32, #tpu.memory_space<vmem>>, vector<1x1024xf32>
    %528 = vector.broadcast %527 : vector<1x1024xf32> to vector<8x1024xf32>
    %529 = arith.addf %526, %528 : vector<8x1024xf32>
    %cst_96 = arith.constant 0.000000e+00 : f32
    %530 = vector.broadcast %cst_96 : f32 to vector<8x1024xf32>
    %531 = arith.maximumf %529, %530 : vector<8x1024xf32>
    %c0_97 = arith.constant 0 : index
    %c0_98 = arith.constant 0 : index
    %532 = vector.load %arg13[%c0_97, %c0_98] : memref<1024x256xbf16, #tpu.memory_space<vmem>>, vector<1024x256xbf16>
    %533 = arith.truncf %531 : vector<8x1024xf32> to vector<8x1024xbf16>
    %cst_99 = arith.constant dense<0.000000e+00> : vector<8x256xf32>
    %534 = tpu.matmul %533, %532, %cst_99 {dimension_numbers = #tpu.dot_dimension_numbers<[1], [0], [0], [1], [0, 0, 1, 1], [], []>} : vector<8x1024xbf16>, vector<1024x256xbf16>, vector<8x256xf32> -> vector<8x256xf32>
    %c0_100 = arith.constant 0 : index
    %c0_101 = arith.constant 0 : index
    %535 = vector.load %arg14[%c0_100, %c0_101] : memref<1x256xf32, #tpu.memory_space<vmem>>, vector<1x256xf32>
    %536 = vector.broadcast %535 : vector<1x256xf32> to vector<8x256xf32>
    %537 = arith.addf %534, %536 : vector<8x256xf32>
    %cst_102 = arith.constant 0.000000e+00 : f32
    %538 = vector.broadcast %cst_102 : f32 to vector<8x256xf32>
    %539 = arith.maximumf %537, %538 : vector<8x256xf32>
    %c0_103 = arith.constant 0 : index
    %c0_104 = arith.constant 0 : index
    %540 = vector.load %arg15[%c0_103, %c0_104] : memref<256x2xf32, #tpu.memory_space<vmem>>, vector<256x2xf32>
    %cst_105 = arith.constant dense<0.000000e+00> : vector<8x2xf32>
    %541 = tpu.matmul %539, %540, %cst_105 {dimension_numbers = #tpu.dot_dimension_numbers<[1], [0], [0], [1], [0, 0, 1, 1], [], []>} : vector<8x256xf32>, vector<256x2xf32>, vector<8x2xf32> -> vector<8x2xf32>
    %c0_106 = arith.constant 0 : index
    %c0_107 = arith.constant 0 : index
    %542 = vector.load %arg16[%c0_106, %c0_107] : memref<1x2xf32, #tpu.memory_space<vmem>>, vector<1x2xf32>
    %543 = vector.broadcast %542 : vector<1x2xf32> to vector<8x2xf32>
    %544 = arith.addf %541, %543 : vector<8x2xf32>
    %c0_108 = arith.constant 0 : index
    %c0_109 = arith.constant 0 : index
    %545 = vector.load %arg17[%c0_108, %c0_109] : memref<8x2xf32, #tpu.memory_space<vmem>>, vector<8x2xf32>
    tpu.vector_store %arg17[%c0_108, %c0_109], %544 {strides = array<i32>} : memref<8x2xf32, #tpu.memory_space<vmem>>, vector<8x2xf32>,
    return
  }
}

</mosaic_0001>

<bundles_post_ra>
// kernel: forward.1
= control target key start
LH: loop header
LB: loop body
LE: loop exit
PB: predicated region body
PF: predicated region fallthrough
CT: control target
= control target key end

     0   :  { %s13342_s0 = inlined_call_operand.vmem [shape: s32[64,2], index: 0, kind: input, shape index: {}]   ;;  %s13343_s1 = inlined_call_operand.hbm [shape: bf16[5,384], index: 1, kind: input, shape index: {}]   ;;  %s13344_s2 = inlined_call_operand.hbm [shape: bf16[5,384], index: 2, kind: input, shape index: {}]   ;;  %s13345_s3 = inlined_call_operand.hbm [shape: f32[1,384], index: 3, kind: input, shape index: {}]   ;;  %s13346_s4 = inlined_call_operand.hbm [shape: f32[1,128], index: 4, kind: input, shape index: {}]   ;;  %s13347_s5 = inlined_call_operand.hbm [shape: bf16[128,384], index: 5, kind: input, shape index: {}]   ;;  %s13348_s6 = inlined_call_operand.hbm [shape: bf16[128,384], index: 6, kind: input, shape index: {}]   ;;  %s13349_s7 = inlined_call_operand.hbm [shape: bf16[128,384], index: 7, kind: input, shape index: {}]   ;;  %s13350_s8 = inlined_call_operand.hbm [shape: f32[1,384], index: 8, kind: input, shape index: {}]   ;;  %s13351_s9 = inlined_call_operand.hbm [shape: f32[1,128], index: 9, kind: input, shape index: {}]   ;;  %s13352_s10 = inlined_call_operand.hbm [shape: bf16[128,384], index: 10, kind: input, shape index: {}]   ;;  %s13353_s11 = inlined_call_operand.hbm [shape: bf16[1280,1024], index: 11, kind: input, shape index: {}]   ;;  %s13354_s12 = inlined_call_operand.hbm [shape: f32[1,1024], index: 12, kind: input, shape index: {}]   ;;  %s13355_s13 = inlined_call_operand.hbm [shape: bf16[1024,256], index: 13, kind: input, shape index: {}]   ;;  %s13356_s14 = inlined_call_operand.hbm [shape: f32[1,256], index: 14, kind: input, shape index: {}]   ;;  %s13357_s15 = inlined_call_operand.vmem [shape: f32[256,2], index: 15, kind: input, shape index: {}]   ;;  %s13358_s16 = inlined_call_operand.hbm [shape: f32[1,2], index: 16, kind: input, shape index: {}]   ;;  %s13359_s17 = inlined_call_operand.vmem [shape: f32[8,2], index: 17, kind: output, shape index: {}]  }
   0x1   :  { %13375 = sst [smem:[#allocation44_spill]] %s13342_s0 }
   0x2   :  { %13376 = sst [smem:[#allocation45_spill]] %s13343_s1 }
   0x3   :  { %22 = vsyncpa [#allocation3], 0 }
   0x4   :  { %23 = vsyncpa [#allocation5], 0 }
   0x5   :  { %24 = vsyncpa [#allocation8], 0 }
   0x6   :  { %25 = vsyncpa [#allocation11], 0 }
   0x7   :  { %26 = vsyncpa [#allocation14], 0 }
   0x8   :  { %27 = vsyncpa [#allocation17], 0 }
   0x9   :  { %28 = vsyncpa [#allocation20], 0 }
   0xa   :  { %29 = vsyncpa [#allocation23], 0  ;;  %s11770_s24 = smov [#allocation4]   ;;  %s11771_s26 = smov [#allocation7]  }
   0xb   :  { %s48_s25 = sshll.u32 %s11770_s24, 4  ;;  %s68_s27 = sshll.u32 %s11771_s26, 4  ;;  %s49_s25 = int_to_ptr.vmem [resolvable:$true] %s48_s25  ;;  %s69_s27 = int_to_ptr.vmem [resolvable:$true] %s68_s27 }
   0xc   :  { %s11424_s0 = scalar_lea.hbm %s13344_s2, 192 }
   0xd   :  { %p11425_p0 = scmp.ne.s32.totalorder %s13344_s2, %s11424_s0  ;;  %p11428_p1 = scmp.lt.u32.totalorder %s11424_s0, %s13344_s2 }
   0xf   :  { %p11430_p2 = pnand %p11428_p1, %p11425_p0 }
  0x11   :  { %11433 = shalt.err (!%p11430_p2)
}
  0x12   :  { %s11434_s20 = scalar_lea.vmem %s49_s25, 192  ;;  %p11439_p4 = scmp.lt.s32.totalorder %s49_s25, %s49_s25 }
  0x13   :  { %p11435_p3 = scmp.ne.s32.totalorder %s49_s25, %s11434_s20  ;;  %p11440_p5 = scmp.lt.s32.totalorder %s11434_s20, %s11434_s20 }
  0x15   :  { %p11441_p6 = por %p11440_p5, %p11439_p4 }
  0x17   :  { %p11442_p7 = pnand %p11441_p6, %p11435_p3 }
  0x19   :  { %11445 = shalt.err (!%p11442_p7)
}
  0x1a   :  { %51 = dma.hbm_to_vmem [thread:$0]  %s13344_s2, 192, %s49_s25, [#allocation5]  }
  0x1b   :  { %s11446_s26 = scalar_lea.hbm %s13346_s4, 16 }
  0x1c   :  { %p11447_p8 = scmp.ne.s32.totalorder %s13346_s4, %s11446_s26  ;;  %p11450_p9 = scmp.lt.u32.totalorder %s11446_s26, %s13346_s4 }
  0x1e   :  { %p11452_p10 = pnand %p11450_p9, %p11447_p8 }
  0x20   :  { %11455 = shalt.err (!%p11452_p10)
}
  0x21   :  { %s11456_s18 = scalar_lea.vmem %s69_s27, 16  ;;  %s11460_s19 = scalar_lea.vmem %s69_s27, 32 }
  0x22   :  { %p11457_p11 = scmp.ne.s32.totalorder %s69_s27, %s11456_s18  ;;  %p11461_p12 = scmp.lt.s32.totalorder %s69_s27, %s69_s27 }
  0x23   :  { %p11462_p13 = scmp.lt.s32.totalorder %s11460_s19, %s11456_s18 }
  0x25   :  { %p11463_p0 = por %p11462_p13, %p11461_p12 }
  0x27   :  { %p11464_p1 = pnand %p11463_p0, %p11457_p11 }
  0x29   :  { %11467 = shalt.err (!%p11464_p1)
}
  0x2a   :  { %71 = dma.hbm_to_vmem [thread:$0]  %s13346_s4, 16, %s69_s27, [#allocation8]  }
  0x2b   :  { %s11772_s1 = smov [#allocation10]   ;;  %s11773_s21 = smov [#allocation13]  }
  0x2c   :  { %s89_s20 = sshll.u32 %s11772_s1, 4  ;;  %s114_s22 = sshll.u32 %s11773_s21, 4  ;;  %s90_s20 = int_to_ptr.vmem [resolvable:$true] %s89_s20  ;;  %s11910_s22 = int_to_ptr.vmem [resolvable:$true] %s114_s22 }
  0x2d   :  { %s11468_s26 = scalar_lea.hbm %s13348_s6, 3072 }
  0x2e   :  { %p11469_p2 = scmp.ne.s32.totalorder %s13348_s6, %s11468_s26  ;;  %p11472_p3 = scmp.lt.u32.totalorder %s11468_s26, %s13348_s6 }
  0x30   :  { %p11474_p4 = pnand %p11472_p3, %p11469_p2 }
  0x32   :  { %11477 = shalt.err (!%p11474_p4)
}
  0x33   :  { %s11478_s4 = scalar_lea.vmem %s90_s20, 3072  ;;  %p11483_p6 = scmp.lt.s32.totalorder %s90_s20, %s90_s20 }
  0x34   :  { %p11479_p5 = scmp.ne.s32.totalorder %s90_s20, %s11478_s4  ;;  %p11484_p7 = scmp.lt.s32.totalorder %s11478_s4, %s11478_s4 }
  0x36   :  { %p11485_p8 = por %p11484_p7, %p11483_p6 }
  0x38   :  { %p11486_p9 = pnand %p11485_p8, %p11479_p5 }
  0x3a   :  { %11489 = shalt.err (!%p11486_p9)
}
  0x3b   :  { %s11774_s27 = smov 192   ;;  %s11775_s18 = smov 12  }
  0x3c   :  { %95 = dma.hbm_to_vmem [thread:$0]  %s13348_s6, 3072, %s90_s20, [#allocation11], %s11774_s27, %s11774_s27, %s11775_s18  }
  0x3d   :  { %s11490_s21 = scalar_lea.hbm %s13350_s8, 48 }
  0x3e   :  { %p11491_p10 = scmp.ne.s32.totalorder %s13350_s8, %s11490_s21  ;;  %p11494_p11 = scmp.lt.u32.totalorder %s11490_s21, %s13350_s8 }
  0x40   :  { %p11496_p12 = pnand %p11494_p11, %p11491_p10 }
  0x42   :  { %11499 = shalt.err (!%p11496_p12)
}
  0x43   :  { %s11500_s29 = scalar_lea.vmem %s11910_s22, 48  ;;  %s11504_s6 = scalar_lea.vmem %s11910_s22, 64 }
  0x44   :  { %p11501_p13 = scmp.ne.s32.totalorder %s11910_s22, %s11500_s29  ;;  %p11505_p0 = scmp.lt.s32.totalorder %s11910_s22, %s11910_s22 }
  0x45   :  { %p11506_p1 = scmp.lt.s32.totalorder %s11504_s6, %s11500_s29 }
  0x47   :  { %p11507_p2 = por %p11506_p1, %p11505_p0 }
  0x49   :  { %p11508_p3 = pnand %p11507_p2, %p11501_p13 }
  0x4b   :  { %11511 = shalt.err (!%p11508_p3)
}
  0x4c   :  { %117 = dma.hbm_to_vmem [thread:$0]  %s13350_s8, 48, %s11910_s22, [#allocation14]  }
  0x4d   :  { %s11776_s30 = smov [#allocation16]   ;;  %s11777_s19 = smov [#allocation19]  }
  0x4e   :  { %s133_s4 = sshll.u32 %s11776_s30, 4  ;;  %s158_s2 = sshll.u32 %s11777_s19, 4  ;;  %s134_s4 = int_to_ptr.vmem [resolvable:$true] %s133_s4  ;;  %s159_s2 = int_to_ptr.vmem [resolvable:$true] %s158_s2 }
  0x4f   :  { %s11512_s21 = scalar_lea.hbm %s13352_s10, 3072 }
  0x50   :  { %p11513_p4 = scmp.ne.s32.totalorder %s13352_s10, %s11512_s21  ;;  %p11516_p5 = scmp.lt.u32.totalorder %s11512_s21, %s13352_s10 }
  0x52   :  { %p11518_p6 = pnand %p11516_p5, %p11513_p4 }
  0x54   :  { %11521 = shalt.err (!%p11518_p6)
}
  0x55   :  { %s11522_s8 = scalar_lea.vmem %s134_s4, 3072  ;;  %p11527_p8 = scmp.lt.s32.totalorder %s134_s4, %s134_s4 }
  0x56   :  { %p11523_p7 = scmp.ne.s32.totalorder %s134_s4, %s11522_s8  ;;  %p11528_p9 = scmp.lt.s32.totalorder %s11522_s8, %s11522_s8 }
  0x58   :  { %p11529_p10 = por %p11528_p9, %p11527_p8 }
  0x5a   :  { %p11530_p11 = pnand %p11529_p10, %p11523_p7 }
  0x5c   :  { %11533 = shalt.err (!%p11530_p11)
}
  0x5d   :  { %139 = dma.hbm_to_vmem [thread:$0]  %s13352_s10, 3072, %s134_s4, [#allocation17], %s11774_s27, %s11774_s27, %s11775_s18  }
  0x5e   :  { %s11534_s0 = scalar_lea.hbm %s13354_s12, 128 }
  0x5f   :  { %p11535_p12 = scmp.ne.s32.totalorder %s13354_s12, %s11534_s0  ;;  %p11538_p13 = scmp.lt.u32.totalorder %s11534_s0, %s13354_s12 }
  0x61   :  { %p11540_p0 = pnand %p11538_p13, %p11535_p12 }
  0x63   :  { %11543 = shalt.err (!%p11540_p0)
}
  0x64   :  { %s11544_s21 = scalar_lea.vmem %s159_s2, 128  ;;  %p11549_p2 = scmp.lt.s32.totalorder %s159_s2, %s159_s2 }
  0x65   :  { %p11545_p1 = scmp.ne.s32.totalorder %s159_s2, %s11544_s21  ;;  %p11550_p3 = scmp.lt.s32.totalorder %s11544_s21, %s11544_s21 }
  0x67   :  { %p11551_p4 = por %p11550_p3, %p11549_p2 }
  0x69   :  { %p11552_p5 = pnand %p11551_p4, %p11545_p1 }
  0x6b   :  { %11555 = shalt.err (!%p11552_p5)
}
  0x6c   :  { %161 = dma.hbm_to_vmem [thread:$0]  %s13354_s12, 128, %s159_s2, [#allocation20]  }
  0x6d   :  { %s11778_s23 = smov [#allocation22]   ;;  %s11779_s26 = smov [#allocation2]  }
  0x6e   :  { %s180_s24 = sshll.u32 %s11778_s23, 4  ;;  %s38_s28 = sshll.u32 %s11779_s26, 4  ;;  %s181_s24 = int_to_ptr.vmem [resolvable:$true] %s180_s24  ;;  %s39_s28 = int_to_ptr.vmem [resolvable:$true] %s38_s28 }
  0x6f   :  { %s11556_s29 = scalar_lea.hbm %s13356_s14, 32 }
  0x70   :  { %p11557_p6 = scmp.ne.s32.totalorder %s13356_s14, %s11556_s29  ;;  %p11560_p7 = scmp.lt.u32.totalorder %s11556_s29, %s13356_s14 }
  0x72   :  { %p11562_p8 = pnand %p11560_p7, %p11557_p6 }
  0x74   :  { %11565 = shalt.err (!%p11562_p8)
}
  0x75   :  { %s11566_s12 = scalar_lea.vmem %s181_s24, 32  ;;  %p11571_p10 = scmp.lt.s32.totalorder %s181_s24, %s181_s24 }
  0x76   :  { %p11567_p9 = scmp.ne.s32.totalorder %s181_s24, %s11566_s12  ;;  %p11572_p11 = scmp.lt.s32.totalorder %s11566_s12, %s11566_s12 }
  0x78   :  { %p11573_p12 = por %p11572_p11, %p11571_p10 }
  0x7a   :  { %p11574_p13 = pnand %p11573_p12, %p11567_p9 }
  0x7c   :  { %11577 = shalt.err (!%p11574_p13)
}
  0x7d   :  { %183 = dma.hbm_to_vmem [thread:$0]  %s13356_s14, 32, %s181_s24, [#allocation23]  }
  0x7e   :  { %s13377_s21 = sld [smem:[#allocation45_spill]] }
  0x84   :  { %s11578_s10 = scalar_lea.hbm %s13377_s21, 192 }
  0x85   :  { %p11579_p0 = scmp.ne.s32.totalorder %s13377_s21, %s11578_s10  ;;  %p11582_p1 = scmp.lt.u32.totalorder %s11578_s10, %s13377_s21 }
  0x87   :  { %p11584_p2 = pnand %p11582_p1, %p11579_p0 }
  0x89   :  { %11587 = shalt.err (!%p11584_p2)
}
  0x8a   :  { %s11588_s22 = scalar_lea.vmem %s39_s28, 192  ;;  %p11593_p4 = scmp.lt.s32.totalorder %s39_s28, %s39_s28 }
  0x8b   :  { %p11589_p3 = scmp.ne.s32.totalorder %s39_s28, %s11588_s22  ;;  %p11594_p5 = scmp.lt.s32.totalorder %s11588_s22, %s11588_s22 }
  0x8d   :  { %p11595_p6 = por %p11594_p5, %p11593_p4 }
  0x8f   :  { %p11596_p7 = pnand %p11595_p6, %p11589_p3 }
  0x91   :  { %11599 = shalt.err (!%p11596_p7)
}
  0x92   :  { %41 = dma.hbm_to_vmem [thread:$0]  %s13377_s21, 192, %s39_s28, [#allocation3]  }
  0x93   :  { %s11780_s29 = smov [#allocation6]   ;;  %s11781_s20 = smov [#allocation9]  }
  0x94   :  { %s58_s6 = sshll.u32 %s11780_s29, 4  ;;  %s77_s0 = sshll.u32 %s11781_s20, 4  ;;  %s59_s6 = int_to_ptr.vmem [resolvable:$true] %s58_s6  ;;  %s11996_s0 = int_to_ptr.vmem [resolvable:$true] %s77_s0 }
  0x95   :  { %s11600_s2 = scalar_lea.hbm %s13345_s3, 48 }
  0x96   :  { %p11601_p8 = scmp.ne.s32.totalorder %s13345_s3, %s11600_s2  ;;  %p11604_p9 = scmp.lt.u32.totalorder %s11600_s2, %s13345_s3 }
  0x98   :  { %p11606_p10 = pnand %p11604_p9, %p11601_p8 }
  0x9a   :  { %11609 = shalt.err (!%p11606_p10)
}
  0x9b   :  { %s11610_s28 = scalar_lea.vmem %s59_s6, 48  ;;  %s11614_s21 = scalar_lea.vmem %s59_s6, 64 }
  0x9c   :  { %p11611_p11 = scmp.ne.s32.totalorder %s59_s6, %s11610_s28  ;;  %p11615_p12 = scmp.lt.s32.totalorder %s59_s6, %s59_s6 }
  0x9d   :  { %p11616_p13 = scmp.lt.s32.totalorder %s11614_s21, %s11610_s28 }
  0x9f   :  { %p11617_p0 = por %p11616_p13, %p11615_p12 }
  0xa1   :  { %p11618_p1 = pnand %p11617_p0, %p11611_p11 }
  0xa3   :  { %11621 = shalt.err (!%p11618_p1)
}
  0xa4   :  { %61 = dma.hbm_to_vmem [thread:$0]  %s13345_s3, 48, %s59_s6, [#allocation5]  }
  0xa5   :  { %s11622_s22 = scalar_lea.hbm %s13347_s5, 3072 }
  0xa6   :  { %p11623_p2 = scmp.ne.s32.totalorder %s13347_s5, %s11622_s22  ;;  %p11626_p3 = scmp.lt.u32.totalorder %s11622_s22, %s13347_s5 }
  0xa8   :  { %p11628_p4 = pnand %p11626_p3, %p11623_p2 }
  0xaa   :  { %11631 = shalt.err (!%p11628_p4)
}
  0xab   :  { %s11632_s30 = scalar_lea.vmem %s11996_s0, 3072  ;;  %p11637_p6 = scmp.lt.s32.totalorder %s11996_s0, %s11996_s0 }
  0xac   :  { %p11633_p5 = scmp.ne.s32.totalorder %s11996_s0, %s11632_s30  ;;  %p11638_p7 = scmp.lt.s32.totalorder %s11632_s30, %s11632_s30 }
  0xae   :  { %p11639_p8 = por %p11638_p7, %p11637_p6 }
  0xb0   :  { %p11640_p9 = pnand %p11639_p8, %p11633_p5 }
  0xb2   :  { %11643 = shalt.err (!%p11640_p9)
}
  0xb3   :  { %83 = dma.hbm_to_vmem [thread:$0]  %s13347_s5, 3072, %s11996_s0, [#allocation8], %s11774_s27, %s11774_s27, %s11775_s18  }
  0xb4   :  { %s11782_s12 = smov [#allocation12]   ;;  %s11783_s19 = smov [#allocation15]  }
  0xb5   :  { %s101_s2 = sshll.u32 %s11782_s12, 4  ;;  %s124_s25 = sshll.u32 %s11783_s19, 4  ;;  %s102_s2 = int_to_ptr.vmem [resolvable:$true] %s101_s2  ;;  %s125_s25 = int_to_ptr.vmem [resolvable:$true] %s124_s25 }
  0xb6   :  { %s11644_s28 = scalar_lea.hbm %s13349_s7, 3072 }
  0xb7   :  { %p11645_p10 = scmp.ne.s32.totalorder %s13349_s7, %s11644_s28  ;;  %p11648_p11 = scmp.lt.u32.totalorder %s11644_s28, %s13349_s7 }
  0xb9   :  { %p11650_p12 = pnand %p11648_p11, %p11645_p10 }
  0xbb   :  { %11653 = shalt.err (!%p11650_p12)
}
  0xbc   :  { %s11654_s5 = scalar_lea.vmem %s102_s2, 3072  ;;  %p11659_p0 = scmp.lt.s32.totalorder %s102_s2, %s102_s2 }
  0xbd   :  { %p11655_p13 = scmp.ne.s32.totalorder %s102_s2, %s11654_s5  ;;  %p11660_p1 = scmp.lt.s32.totalorder %s11654_s5, %s11654_s5 }
  0xbf   :  { %p11661_p2 = por %p11660_p1, %p11659_p0 }
  0xc1   :  { %p11662_p3 = pnand %p11661_p2, %p11655_p13 }
  0xc3   :  { %11665 = shalt.err (!%p11662_p3)
}
  0xc4   :  { %107 = dma.hbm_to_vmem [thread:$0]  %s13349_s7, 3072, %s102_s2, [#allocation11], %s11774_s27, %s11774_s27, %s11775_s18  }
  0xc5   :  { %s11666_s24 = scalar_lea.hbm %s13351_s9, 16 }
  0xc6   :  { %p11667_p4 = scmp.ne.s32.totalorder %s13351_s9, %s11666_s24  ;;  %p11670_p5 = scmp.lt.u32.totalorder %s11666_s24, %s13351_s9 }
  0xc8   :  { %p11672_p6 = pnand %p11670_p5, %p11667_p4 }
  0xca   :  { %11675 = shalt.err (!%p11672_p6)
}
  0xcb   :  { %s11676_s6 = scalar_lea.vmem %s125_s25, 16  ;;  %s11680_s12 = scalar_lea.vmem %s125_s25, 32 }
  0xcc   :  { %p11677_p7 = scmp.ne.s32.totalorder %s125_s25, %s11676_s6  ;;  %p11681_p8 = scmp.lt.s32.totalorder %s125_s25, %s125_s25 }
  0xcd   :  { %p11682_p9 = scmp.lt.s32.totalorder %s11680_s12, %s11676_s6 }
  0xcf   :  { %p11683_p10 = por %p11682_p9, %p11681_p8 }
  0xd1   :  { %p11684_p11 = pnand %p11683_p10, %p11677_p7 }
  0xd3   :  { %11687 = shalt.err (!%p11684_p11)
}
  0xd4   :  { %127 = dma.hbm_to_vmem [thread:$0]  %s13351_s9, 16, %s125_s25, [#allocation14]  }
  0xd5   :  { %s11784_s18 = smov [#allocation18]   ;;  %s11688_s10 = scalar_lea.hbm %s13353_s11, 81920 }
  0xd6   :  { %s145_s2 = sshll.u32 %s11784_s18, 4  ;;  %p11689_p12 = scmp.ne.s32.totalorder %s13353_s11, %s11688_s10  ;;  %s146_s2 = int_to_ptr.vmem [resolvable:$true] %s145_s2 }
  0xd7   :  { %p11692_p13 = scmp.lt.u32.totalorder %s11688_s10, %s13353_s11 }
  0xd9   :  { %p11694_p0 = pnand %p11692_p13, %p11689_p12 }
  0xdb   :  { %11697 = shalt.err (!%p11694_p0)
}
  0xdc   :  { %s11698_s26 = scalar_lea.vmem %s146_s2, 81920  ;;  %p11703_p2 = scmp.lt.s32.totalorder %s146_s2, %s146_s2 }
  0xdd   :  { %p11699_p1 = scmp.ne.s32.totalorder %s146_s2, %s11698_s26  ;;  %p11704_p3 = scmp.lt.s32.totalorder %s11698_s26, %s11698_s26 }
  0xdf   :  { %p11705_p4 = por %p11704_p3, %p11703_p2 }
  0xe1   :  { %p11706_p5 = pnand %p11705_p4, %p11699_p1 }
  0xe3   :  { %11709 = shalt.err (!%p11706_p5)
}
  0xe4   :  { %s11785_s9 = smov 512   ;;  %s11786_s25 = smov 32  }
  0xe5   :  { %151 = dma.hbm_to_vmem [thread:$0]  %s13353_s11, 81920, %s146_s2, [#allocation17], %s11785_s9, %s11785_s9, %s11786_s25  }
  0xe6   :  { %s11787_s8 = smov [#allocation21]   ;;  %s11710_s29 = scalar_lea.hbm %s13355_s13, 16384 }
  0xe7   :  { %s167_s22 = sshll.u32 %s11787_s8, 4  ;;  %p11711_p6 = scmp.ne.s32.totalorder %s13355_s13, %s11710_s29  ;;  %s168_s22 = int_to_ptr.vmem [resolvable:$true] %s167_s22 }
  0xe8   :  { %p11714_p7 = scmp.lt.u32.totalorder %s11710_s29, %s13355_s13 }
  0xea   :  { %p11716_p8 = pnand %p11714_p7, %p11711_p6 }
  0xec   :  { %11719 = shalt.err (!%p11716_p8)
}
  0xed   :  { %s11720_s12 = scalar_lea.vmem %s168_s22, 16384  ;;  %p11725_p10 = scmp.lt.s32.totalorder %s168_s22, %s168_s22 }
  0xee   :  { %p11721_p9 = scmp.ne.s32.totalorder %s168_s22, %s11720_s12  ;;  %p11726_p11 = scmp.lt.s32.totalorder %s11720_s12, %s11720_s12 }
  0xf0   :  { %p11727_p12 = por %p11726_p11, %p11725_p10 }
  0xf2   :  { %p11728_p13 = pnand %p11727_p12, %p11721_p9 }
  0xf4   :  { %11731 = shalt.err (!%p11728_p13)
}
  0xf5   :  { %s11788_s11 = smov 128   ;;  %s11789_s7 = smov 8  }
  0xf6   :  { %173 = dma.hbm_to_vmem [thread:$0]  %s13355_s13, 16384, %s168_s22, [#allocation20], %s11788_s11, %s11788_s11, %s11789_s7  }
  0xf7   :  { %s11790_s2 = smov [#allocation24]   ;;  %s11732_s28 = scalar_lea.hbm %s13358_s16, 16 }
  0xf8   :  { %s192_s19 = sshll.u32 %s11790_s2, 4  ;;  %p11733_p0 = scmp.ne.s32.totalorder %s13358_s16, %s11732_s28  ;;  %s193_s19 = int_to_ptr.vmem [resolvable:$true] %s192_s19 }
  0xf9   :  { %p11736_p1 = scmp.lt.u32.totalorder %s11732_s28, %s13358_s16 }
  0xfb   :  { %p11738_p2 = pnand %p11736_p1, %p11733_p0 }
  0xfd   :  { %11741 = shalt.err (!%p11738_p2)
}
  0xfe   :  { %s11742_s9 = scalar_lea.vmem %s193_s19, 16  ;;  %s11746_s13 = scalar_lea.vmem %s193_s19, 32 }
  0xff   :  { %p11743_p3 = scmp.ne.s32.totalorder %s193_s19, %s11742_s9  ;;  %p11747_p4 = scmp.lt.s32.totalorder %s193_s19, %s193_s19 }
 0x100   :  { %p11748_p5 = scmp.lt.s32.totalorder %s11746_s13, %s11742_s9 }
 0x102   :  { %p11749_p6 = por %p11748_p5, %p11747_p4 }
 0x104   :  { %p11750_p7 = pnand %p11749_p6, %p11743_p3 }
 0x106   :  { %11753 = shalt.err (!%p11750_p7)
}
 0x107   :  { %195 = dma.hbm_to_vmem [thread:$0]  %s13358_s16, 16, %s193_s19, [#allocation23]  }
 0x108   :  { %11754 = dma.done.wait [#allocation3], 192  }
 0x109   :  { %11755 = vsyncadd [#allocation3], 4294967104 }
 0x10a   :  { %11756 = dma.done.wait [#allocation5], 240  }
 0x10b   :  { %11757 = vsyncadd [#allocation5], 4294967056 }
 0x10c   :  { %11758 = dma.done.wait [#allocation8], 3088  }
 0x10d   :  { %11759 = vsyncadd [#allocation8], 4294964208 }
 0x10e   :  { %11760 = dma.done.wait [#allocation11], 6144  }
 0x10f   :  { %11761 = vsyncadd [#allocation11], 4294961152 }
 0x110   :  { %11762 = dma.done.wait [#allocation14], 64  }
 0x111   :  { %11763 = vsyncadd [#allocation14], 4294967232 }
 0x112   :  { %11764 = dma.done.wait [#allocation17], 84992  }
 0x113   :  { %11765 = vsyncadd [#allocation17], 4294882304 }
 0x114   :  { %11766 = dma.done.wait [#allocation20], 16512  }
 0x115   :  { %11767 = vsyncadd [#allocation20], 4294950784 }
 0x116   :  { %11768 = dma.done.wait [#allocation23], 48  }
 0x117   :  { %11769 = vsyncadd [#allocation23], 4294967248  ;;  %v11791_v0 = vmov 1   ;;  %v13362_v1 = vmov 0   ;;  %s13378_s8 = sld [smem:[#allocation44_spill]]  ;;  %vm381_vm0 = vcmask 1041408   ;;  %v242_v22 = vlaneseq }
 0x118   :  { %10901 = vset.pattern.permute.xlu1 %v11791_v0  ;;  %10900 = vset.pattern.permute.xlu0 %v11791_v0  ;;  %vm382_vm1 = vcmask 1042432   ;;  %v11793_v4 = vmov 65535   ;;  %v358_v8 = vld [vmem:[#allocation4] sm:$0x77]  ;;  %v12129_v26 = vld [vmem:[#allocation2] sm:$0x77] }
 0x119   :  { %426 = vmatprep.mubr.bf16.mxu0 %v13362_v1  ;;  %v383_v5 = vsel %vm381_vm0, 4294967295, %v11793_v4  ;;  %v9187_v10 = vcombine.high %v358_v8, %v358_v8  ;;  %v9186_v11 = vcombine.low %v358_v8, %v358_v8  ;;  %v10907_v16 = vld [vmem:[#allocation4 + $0x8] ss:$0 sps:$4 sm:$0x77]   ;;  %v12127_v23 = vand.u32 127, %v242_v22 }
 0x11a   :  { %v12106_v9 = vsel %vm382_vm1, %v383_v5, 0  ;;  %v10908_v20 = vld [vmem:[#allocation2 + $0x8] ss:$0 sps:$4 sm:$0x77]   ;;  %v9198_v27 = vcombine.high %v12129_v26, %v12129_v26  ;;  %v13364_v30 = vmov 0.0   ;;  %vm368_vm4 = vcmask 39936  }
 0x11b   :  { %v389_v14 = vand.u32 %v9187_v10, %v12106_v9  ;;  %v386_v15 = vand.u32 %v9186_v11, %v12106_v9  ;;  %v392_v19 = vand.u32 %v10907_v16, %v12106_v9  ;;  %v559_v21 = vand.u32 %v10908_v20, %v12106_v9  ;;  %v12161_v50 = vld [vmem:[#allocation9 + $0x4] ss:$12 sps:$4 sm:$0xff]   ;;  %v12177_v61 = vld [vmem:[#allocation9] ss:$12 sps:$4 sm:$0xff]   ;;  %v12184_v62 = vld [vmem:[#allocation9 + $0x1c] ss:$12 sps:$4 sm:$0xff]  }
 0x11c   :  { %v556_v34 = vand.u32 %v9198_v27, %v12106_v9  ;;  %v12190_v5 = vld [vmem:[#allocation9 + $0x18] ss:$12 sps:$4 sm:$0xff]   ;;  %v12202_v11 = vld [vmem:[#allocation9 + $0x30] ss:$12 sps:$4 sm:$0xff]  }
 0x11d   :  { %v246_v2 = vld [vmem:[%s13378_s8 + $0x10] sm:$0xff]  ;;  %v244_v3 = vld [vmem:[%s13378_s8] sm:$0xff]  ;;  %v247_v6 = vld [vmem:[%s13378_s8 + $0x18] sm:$0xff]  ;;  %394 = vmatprep.subr.bf16.mxu0 %v389_v14  ;;  %10740 = vmatprep.subr.bf16.mxu1 %v392_v19 }
 0x11e   :  { %311 = vperm.xlu1 %10901, %v246_v2   ;;  %305 = vperm.xlu0 %10900, %v244_v3   ;;  %v245_v7 = vld [vmem:[%s13378_s8 + $0x8] sm:$0xff]  ;;  %v248_v13 = vld [vmem:[%s13378_s8 + $0x20] sm:$0xff]  ;;  %v251_v17 = vld [vmem:[%s13378_s8 + $0x38] sm:$0xff] }
 0x11f   :  { %v249_v12 = vld [vmem:[%s13378_s8 + $0x28] sm:$0xff]  ;;  %v250_v18 = vld [vmem:[%s13378_s8 + $0x30] sm:$0xff]  ;;  %395 = vmatpush1.bf16.msra.mxu0 %v386_v15  ;;  %10741 = vmatpush3.bf16.msra.mxu1 %v392_v19 }
 0x120   :  { %10320 = vmatprep.subr.bf16.mxu0 %v392_v19  ;;  %10330 = vmatprep.subr.bf16.mxu1 %v559_v21  ;;  %v12214_v14 = vld [vmem:[#allocation9 + $0x48] ss:$12 sps:$4 sm:$0xff]   ;;  %v12217_v16 = vld [vmem:[#allocation9 + $0x64] ss:$12 sps:$4 sm:$0xff]  }
 0x121   :  { %v12238_v20 = vld [vmem:[#allocation9 + $0x90] ss:$12 sps:$4 sm:$0xff]  }
 0x122   :  { %314 = vperm.xlu1 %10901, %v247_v6   ;;  %308 = vperm.xlu0 %10900, %v245_v7   ;;  %v12286_v27 = vld [vmem:[#allocation9 + $0x50] ss:$12 sps:$4 sm:$0xff]  }
 0x126   :  { %320 = vperm.xlu1 %10901, %v249_v12   ;;  %317 = vperm.xlu0 %10900, %v248_v13  }
 0x12a   :  { %326 = vperm.xlu1 %10901, %v251_v17   ;;  %323 = vperm.xlu0 %10900, %v250_v18  }
 0x12e   :  { %10903 = vset.pattern.permute.xlu1 %v13362_v1  ;;  %10902 = vset.pattern.permute.xlu0 %v13362_v1 }
 0x12f   :  { %256 = vperm.xlu1 %10903, %v245_v7   ;;  %253 = vperm.xlu0 %10902, %v244_v3  }
 0x133   :  { %259 = vperm.xlu1 %10903, %v246_v2   ;;  %262 = vperm.xlu0 %10902, %v247_v6   ;;  %v12195_v6 = vld [vmem:[#allocation9 + $0x34] ss:$12 sps:$4 sm:$0xff]  }
 0x137   :  { %265 = vperm.xlu1 %10903, %v248_v13   ;;  %268 = vperm.xlu0 %10902, %v249_v12   ;;  %v9197_v12 = vcombine.low %v12129_v26, %v12129_v26  ;;  %v12209_v13 = vld [vmem:[#allocation9 + $0x4c] ss:$12 sps:$4 sm:$0xff]  }
 0x138   :  { %v12282_v26 = vld [vmem:[#allocation9 + $0x38] ss:$12 sps:$4 sm:$0xff]  }
 0x139   :  { %v553_v15 = vand.u32 %v9197_v12, %v12106_v9  ;;  %v12231_v9 = vld [vmem:[#allocation9 + $0x78] ss:$12 sps:$4 sm:$0xff]  }
 0x13b   :  { %271 = vperm.xlu1 %10903, %v250_v18   ;;  %274 = vperm.xlu0 %10902, %v251_v17   ;;  %v12223_v17 = vld [vmem:[#allocation9 + $0x60] ss:$12 sps:$4 sm:$0xff]   ;;  %v12226_v18 = vld [vmem:[#allocation9 + $0x7c] ss:$12 sps:$4 sm:$0xff]  }
 0x13f   :  { %10904 = vset.pattern.permute.xlu0 %v11791_v0 }
 0x19d   :  { %v312_v24 = vpop.permute.xlu1 %311  ;;  %v306_v25 = vpop.permute.xlu0 %305 }
 0x19e   :  { %vm328_vm2 = vcmp.eq.s32.totalorder %v306_v25, %v12127_v23  ;;  %vm330_vm5 = vcmp.eq.s32.totalorder %v312_v24, %v12127_v23  ;;  %v12271_v24 = vld [vmem:[#allocation9 + $0x8] ss:$12 sps:$4 sm:$0xff]   ;;  %v12276_v25 = vld [vmem:[#allocation9 + $0x20] ss:$12 sps:$4 sm:$0xff]  }
 0x19f   :  { %v9178_v31 = vsel %vm328_vm2, 1.0, %v13364_v30  ;;  %v9180_v40 = vsel %vm330_vm5, 1.0, %v13364_v30 }
 0x1a1   :  { %v315_v28 = vpop.permute.xlu1 %314  ;;  %v309_v29 = vpop.permute.xlu0 %308 }
 0x1a2   :  { %vm329_vm3 = vcmp.eq.s32.totalorder %v309_v29, %v12127_v23  ;;  %vm331_vm6 = vcmp.eq.s32.totalorder %v315_v28, %v12127_v23  ;;  %v12290_v28 = vld [vmem:[#allocation9 + $0x68] ss:$12 sps:$4 sm:$0xff]   ;;  %v12294_v29 = vld [vmem:[#allocation9 + $0x80] ss:$12 sps:$4 sm:$0xff]  }
 0x1a3   :  { %v9179_v32 = vsel %vm329_vm3, 1.0, %v13364_v30  ;;  %v9181_v41 = vsel %vm331_vm6, 1.0, %v13364_v30  ;;  %vm11795_vm3 = vmmov 0  }
 0x1a4   :  { %v12137_v33 = vpack.c.bf16 %v9179_v32, %v9178_v31  ;;  %v12156_v46 = vpack.c.bf16 %v9181_v41, %v9180_v40  ;;  %v12298_v31 = vld [vmem:[#allocation9 + $0x98] ss:$12 sps:$4 sm:$0xff]   ;;  %v12302_v32 = vld [vmem:[#allocation9 + $0xb0] ss:$12 sps:$4 sm:$0xff]  }
 0x1a5   :  { %v321_v35 = vpop.permute.xlu1 %320  ;;  %v318_v36 = vpop.permute.xlu0 %317 }
 0x1a6   :  { %vm333_vm7 = vcmp.eq.s32.totalorder %v321_v35, %v12127_v23  ;;  %vm332_vm8 = vcmp.eq.s32.totalorder %v318_v36, %v12127_v23  ;;  %9189 = vmatmul.mubr.msk.bf16.vlgmr.msra.gmra.mrb[0].mxu0 %vm368_vm4, %v12137_v33 }
 0x1a7   :  { %v9183_v37 = vsel %vm333_vm7, 1.0, %v13364_v30  ;;  %v9182_v38 = vsel %vm332_vm8, 1.0, %v13364_v30  ;;  %10321 = vmatpush3.bf16.msra.mxu0 %v392_v19  ;;  %436 = vmatprep.mubr.bf16.mxu0 %v13362_v1  ;;  %v12233_v19 = vld [vmem:[#allocation9 + $0x94] ss:$12 sps:$4 sm:$0xff]  }
 0x1a8   :  { %v354_v39 = vpack.c.bf16 %v9183_v37, %v9182_v38  ;;  %561 = vmatprep.subr.bf16.mxu0 %v556_v34  ;;  %v699_v38 = vld [vmem:[#allocation6] sm:$0x7] }
 0x1a9   :  { %v327_v42 = vpop.permute.xlu1 %326  ;;  %v324_v43 = vpop.permute.xlu0 %323 }
 0x1aa   :  { %vm335_vm9 = vcmp.eq.s32.totalorder %v327_v42, %v12127_v23  ;;  %vm334_vm10 = vcmp.eq.s32.totalorder %v324_v43, %v12127_v23  ;;  %10326 = vmatprep.mubr.msk.bf16.mxu1 %vm368_vm4, %v354_v39 }
 0x1ab   :  { %v9185_v44 = vsel %vm335_vm9, 1.0, %v13364_v30  ;;  %v9184_v45 = vsel %vm334_vm10, 1.0, %v13364_v30 }
 0x1ac   :  { %v355_v47 = vpack.c.bf16 %v9185_v44, %v9184_v45 }
 0x1ae   :  { %v257_v48 = vpop.permute.xlu1 %256  ;;  %9190 = vmatmul.mubr.msk.bf16.gmra.mrb[4].mxu0 %vm368_vm4, %v12156_v46  ;;  %10327 = vmatmul.mubr.msk.bf16.vlgmr.msra.gmra.mrb[0].mxu1 %vm368_vm4, %v355_v47  ;;  %v254_v49 = vpop.permute.xlu0 %253 }
 0x1af   :  { %vm277_vm11 = vcmp.eq.s32.totalorder %v257_v48, %v12127_v23  ;;  %vm276_vm12 = vcmp.eq.s32.totalorder %v254_v49, %v12127_v23  ;;  %10331 = vmatpush3.bf16.msra.mxu1 %v559_v21  ;;  %446 = vmatprep.mubr.bf16.mxu0 %v13362_v1  ;;  %v12242_v21 = vld [vmem:[#allocation9 + $0xac] ss:$12 sps:$4 sm:$0xff]  }
 0x1b0   :  { %v9171_v51 = vsel %vm277_vm11, 1.0, %v13364_v30  ;;  %v9170_v52 = vsel %vm276_vm12, 1.0, %v13364_v30  ;;  %1050 = vmatprep.subr.bf16.mxu1 %v12161_v50 }
 0x1b1   :  { %v300_v53 = vpack.c.bf16 %v9171_v51, %v9170_v52 }
 0x1b2   :  { %v260_v54 = vpop.permute.xlu1 %259  ;;  %v263_v55 = vpop.permute.xlu0 %262 }
 0x1b3   :  { %vm278_vm13 = vcmp.eq.s32.totalorder %v260_v54, %v12127_v23  ;;  %vm279_vm14 = vcmp.eq.s32.totalorder %v263_v55, %v12127_v23  ;;  %10332 = vmatprep.mubr.msk.bf16.mxu1 %vm368_vm4, %v300_v53 }
 0x1b4   :  { %v9172_v56 = vsel %vm278_vm13, 1.0, %v13364_v30  ;;  %v9173_v57 = vsel %vm279_vm14, 1.0, %v13364_v30 }
 0x1b5   :  { %v12174_v58 = vpack.c.bf16 %v9173_v57, %v9172_v56 }
 0x1b6   :  { %v266_v59 = vpop.permute.xlu1 %265  ;;  %9191 = vmatmul.mubr.msk.bf16.gmra.mrb[8].mxu0 %vm368_vm4, %v354_v39  ;;  %v269_v60 = vpop.permute.xlu0 %268 }
 0x1b7   :  { %vm280_vm15 = vcmp.eq.s32.totalorder %v266_v59, %v12127_v23  ;;  %vm281_vm0 = vcmp.eq.s32.totalorder %v269_v60, %v12127_v23  ;;  %10333 = vmatmul.mubr.msk.bf16.vlgmr.msra.gmra.mrb[4].mxu1 %vm368_vm4, %v12174_v58  ;;  %456 = vmatprep.mubr.bf16.mxu0 %v13362_v1 }
 0x1b8   :  { %v9174_v63 = vsel %vm280_vm15, 1.0, %v13364_v30  ;;  %v9175_v0 = vsel %vm281_vm0, 1.0, %v13364_v30  ;;  %1051 = vmatpush1.bf16.msra.mxu1 %v12177_v61 }
 0x1b9   :  { %v302_v2 = vpack.c.bf16 %v9175_v0, %v9174_v63  ;;  %1052 = vmatprep.subr.bf16.mxu1 %v12184_v62 }
 0x1ba   :  { %v272_v3 = vpop.permute.xlu1 %271  ;;  %v275_v4 = vpop.permute.xlu0 %274 }
 0x1bb   :  { %vm282_vm1 = vcmp.eq.s32.totalorder %v272_v3, %v12127_v23  ;;  %vm283_vm2 = vcmp.eq.s32.totalorder %v275_v4, %v12127_v23  ;;  %10336 = vmatprep.mubr.msk.bf16.mxu1 %vm368_vm4, %v302_v2  ;;  %v12247_v23 = vld [vmem:[#allocation9 + $0xa8] ss:$12 sps:$4 sm:$0xff]  }
 0x1bc   :  { %v9176_v7 = vsel %vm282_vm1, 1.0, %v13364_v30  ;;  %v9177_v8 = vsel %vm283_vm2, 1.0, %v13364_v30  ;;  %1053 = vmatpush1.bf16.msra.mxu1 %v12190_v5 }
 0x1bd   :  { %v303_v10 = vpack.c.bf16 %v9177_v8, %v9176_v7  ;;  %1054 = vmatprep.subr.bf16.mxu1 %v12195_v6 }
 0x1be   :  { %9192 = vmatmul.mubr.msk.bf16.gmra.mrb[12].mxu0 %vm368_vm4, %v355_v47 }
 0x1bf   :  { %10322 = vmatprep.mubr.msk.bf16.mxu0 %vm368_vm4, %v12137_v33  ;;  %10337 = vmatmul.mubr.msk.bf16.gmra.mrb[0].mxu1 %vm368_vm4, %v303_v10  ;;  %v12327_v33 = vshrl.u32 %v242_v22, 7 }
 0x1c0   :  { %1055 = vmatpush1.bf16.msra.mxu1 %v12202_v11  ;;  %1082 = vmatprep.mubr.bf16.mxu1 %v13362_v1 }
 0x1c1   :  { %1056 = vmatprep.subr.bf16.mxu1 %v12209_v13  ;;  %13379 = vst [vmem:[#allocation33_spill] sm:$0xff] %v12327_v33  ;;  %v12330_v36 = vsub.s32 2, %v12327_v33  ;;  %v12356_v59 = vsub.s32 0, %v12327_v33  ;;  %v12362_v63 = vsub.s32 1, %v12327_v33 }
 0x1c3   :  { %13380 = vst [vmem:[#allocation34_spill] sm:$0xff] %v12330_v36  ;;  %v12333_v40 = vrot.slane %v699_v38, %v12330_v36  ;;  %13382 = vst [vmem:[#allocation36_spill] sm:$0xff] %v12356_v59  ;;  %v708_v4 = vrot.slane %v699_v38, %v12362_v63 }
 0x1c4   :  { %1057 = vmatpush1.bf16.msra.mxu1 %v12214_v14  ;;  %13383 = vst [vmem:[#allocation37_spill] sm:$0xff] %v12362_v63 }
 0x1c5   :  { %1058 = vmatprep.subr.bf16.mxu1 %v12217_v16 }
 0x1c6   :  { %10323 = vmatmul.mubr.msk.bf16.vlgmr.msra.gmra.mrb[16].mxu0 %vm368_vm4, %v12156_v46 }
 0x1c7   :  { %562 = vmatpush1.bf16.msra.mxu0 %v553_v15  ;;  %593 = vmatprep.mubr.bf16.mxu0 %v13362_v1 }
 0x1c8   :  { %946 = vmatprep.subr.bf16.mxu0 %v12161_v50  ;;  %1059 = vmatpush1.bf16.msra.mxu1 %v12223_v17 }
 0x1c9   :  { %1060 = vmatprep.subr.bf16.mxu1 %v12226_v18 }
 0x1cc   :  { %1061 = vmatpush1.bf16.msra.mxu1 %v12231_v9 }
 0x1cd   :  { %1062 = vmatprep.subr.bf16.mxu1 %v12233_v19 }
 0x1ce   :  { %9200 = vmatmul.mubr.msk.bf16.vlgmr.msra.gmra.mrb[0].mxu0 %vm368_vm4, %v300_v53 }
 0x1cf   :  { %947 = vmatpush1.bf16.msra.mxu0 %v12177_v61  ;;  %603 = vmatprep.mubr.bf16.mxu0 %v13362_v1 }
 0x1d0   :  { %948 = vmatprep.subr.bf16.mxu0 %v12184_v62  ;;  %1063 = vmatpush1.bf16.msra.mxu1 %v12238_v20 }
 0x1d1   :  { %1064 = vmatprep.subr.bf16.mxu1 %v12242_v21 }
 0x1d3   :  { %949 = vmatpush1.bf16.msra.mxu0 %v12190_v5 }
 0x1d4   :  { %950 = vmatprep.subr.bf16.mxu0 %v12195_v6  ;;  %1065 = vmatpush1.bf16.msra.mxu1 %v12247_v23 }
 0x1d5   :  { %1154 = vmatprep.subr.bf16.mxu1 %v12161_v50 }
 0x1d6   :  { %9201 = vmatmul.mubr.msk.bf16.gmra.mrb[4].mxu0 %vm368_vm4, %v12174_v58 }
 0x1d7   :  { %951 = vmatpush1.bf16.msra.mxu0 %v12202_v11  ;;  %613 = vmatprep.mubr.bf16.mxu0 %v13362_v1 }
 0x1d8   :  { %952 = vmatprep.subr.bf16.mxu0 %v12209_v13 }
 0x1db   :  { %953 = vmatpush1.bf16.msra.mxu0 %v12214_v14 }
 0x1dc   :  { %954 = vmatprep.subr.bf16.mxu0 %v12217_v16 }
 0x1de   :  { %9202 = vmatmul.mubr.msk.bf16.gmra.mrb[8].mxu0 %vm368_vm4, %v302_v2  ;;  %v704_v2 = vrot.slane %v699_v38, %v12356_v59 }
 0x1df   :  { %955 = vmatpush1.bf16.msra.mxu0 %v12223_v17  ;;  %623 = vmatprep.mubr.bf16.mxu0 %v13362_v1 }
 0x1e0   :  { %956 = vmatprep.subr.bf16.mxu0 %v12226_v18 }
 0x1e3   :  { %957 = vmatpush1.bf16.msra.mxu0 %v12231_v9 }
 0x1e4   :  { %958 = vmatprep.subr.bf16.mxu0 %v12233_v19 }
 0x1e6   :  { %9203 = vmatmul.mubr.msk.bf16.gmra.mrb[12].mxu0 %vm368_vm4, %v303_v10  ;;  %vm9156_vm4 = vcmask 15360  }
 0x1e7   :  { %959 = vmatpush1.bf16.msra.mxu0 %v12238_v20  ;;  %978 = vmatprep.mubr.bf16.mxu0 %v13362_v1 }
 0x1e8   :  { %960 = vmatprep.subr.bf16.mxu0 %v12242_v21 }
 0x1eb   :  { %961 = vmatpush1.bf16.msra.mxu0 %v12247_v23 }
 0x1ec   :  { %10340 = vmatprep.subr.bf16.mxu0 %v13364_v30 }
 0x1ee   :  { %979 = vmatmul.mubr.bf16.vlgmr.msra.gmra.mrb[20].mxu0 %v13362_v1 }
 0x1ef   :  { %10341 = vmatpush3.bf16.msra.mxu0 %v12271_v24  ;;  %10356 = vmatprep.mubr.msk.bf16.mxu0 %vm11795_vm3, %v13364_v30 }
 0x1f0   :  { %10342 = vmatprep.subr.bf16.mxu0 %v13364_v30 }
 0x1f3   :  { %10343 = vmatpush3.bf16.msra.mxu0 %v12276_v25 }
 0x1f4   :  { %10344 = vmatprep.subr.bf16.mxu0 %v13364_v30 }
 0x1f7   :  { %10345 = vmatpush3.bf16.msra.mxu0 %v12282_v26 }
 0x1f8   :  { %10346 = vmatprep.subr.bf16.mxu0 %v13364_v30 }
 0x1fb   :  { %10347 = vmatpush3.bf16.msra.mxu0 %v12286_v27 }
 0x1fc   :  { %10348 = vmatprep.subr.bf16.mxu0 %v13364_v30 }
 0x1ff   :  { %10349 = vmatpush3.bf16.msra.mxu0 %v12290_v28 }
 0x200   :  { %10350 = vmatprep.subr.bf16.mxu0 %v13364_v30 }
 0x203   :  { %10351 = vmatpush3.bf16.msra.mxu0 %v12294_v29 }
 0x204   :  { %10352 = vmatprep.subr.bf16.mxu0 %v13364_v30 }
 0x207   :  { %10353 = vmatpush3.bf16.msra.mxu0 %v12298_v31 }
 0x208   :  { %10354 = vmatprep.subr.bf16.mxu0 %v13364_v30 }
 0x20b   :  { %10355 = vmatpush3.bf16.msra.mxu0 %v12302_v32 }
 0x20c   :  { %10360 = vmatprep.subr.bf16.mxu0 %v13364_v30 }
 0x20e   :  { %10357 = vmatmul.mubr.bf16.vlgmr.msra.gmra.mrb[24].mxu0 %v13362_v1 }
 0x20f   :  { %10361 = vmatpush3.bf16.msra.mxu0 %v12271_v24  ;;  %10376 = vmatprep.mubr.msk.bf16.mxu0 %vm11795_vm3, %v13364_v30 }
 0x210   :  { %10362 = vmatprep.subr.bf16.mxu0 %v13364_v30 }
 0x213   :  { %10363 = vmatpush3.bf16.msra.mxu0 %v12276_v25 }
 0x214   :  { %10364 = vmatprep.subr.bf16.mxu0 %v13364_v30 }
 0x217   :  { %10365 = vmatpush3.bf16.msra.mxu0 %v12282_v26 }
 0x218   :  { %10366 = vmatprep.subr.bf16.mxu0 %v13364_v30 }
 0x21b   :  { %10367 = vmatpush3.bf16.msra.mxu0 %v12286_v27 }
 0x21c   :  { %10368 = vmatprep.subr.bf16.mxu0 %v13364_v30 }
 0x21f   :  { %10369 = vmatpush3.bf16.msra.mxu0 %v12290_v28 }
 0x220   :  { %10370 = vmatprep.subr.bf16.mxu0 %v13364_v30 }
 0x223   :  { %10371 = vmatpush3.bf16.msra.mxu0 %v12294_v29 }
 0x224   :  { %10372 = vmatprep.subr.bf16.mxu0 %v13364_v30 }
 0x227   :  { %10373 = vmatpush3.bf16.msra.mxu0 %v12298_v31 }
 0x228   :  { %10374 = vmatprep.subr.bf16.mxu0 %v13364_v30 }
 0x22b   :  { %10375 = vmatpush3.bf16.msra.mxu0 %v12302_v32 }
 0x22c   :  { %10380 = vmatprep.subr.bf16.mxu0 %v13364_v30 }
 0x28a   :  { %v10334_v34 = vpop.f32.mrb[4].mxu1 }
 0x28b   :  { %v668_v35 = vpop.f32.mrb[5].mxu1 }
 0x28c   :  { %v10335_v37 = vpop.f32.mrb[6].mxu1 }
 0x28d   :  { %v671_v39 = vpop.f32.mrb[7].mxu1 }
 0x292   :  { %v10338_v41 = vpop.f32.mrb[0].mxu1 }
 0x293   :  { %v12336_v42 = vadd.f32 %v10338_v41, %v12333_v40  ;;  %v684_v43 = vpop.f32.mrb[1].mxu1 }
 0x294   :  { %v12339_v44 = vadd.f32 %v12333_v40, %v684_v43  ;;  %v10339_v22 = vpop.f32.mrb[2].mxu1 }
 0x295   :  { %v12342_v45 = vadd.f32 %v10339_v22, %v12333_v40  ;;  %v687_v46 = vpop.f32.mrb[3].mxu1 }
 0x296   :  { %v12345_v47 = vadd.f32 %v12333_v40, %v687_v46 }
 0x297   :  { %13381 = vst [vmem:[#allocation35_spill] sm:$0xff] %v12342_v45 }
 0x299   :  { %v10324_v48 = vpop.f32.mrb[16].mxu0 }
 0x29a   :  { %v677_v49 = vadd.f32 %v10334_v34, %v10324_v48  ;;  %v501_v51 = vpop.f32.mrb[17].mxu0 }
 0x29b   :  { %v12347_v52 = vadd.f32 %v668_v35, %v501_v51  ;;  %v10325_v53 = vpop.f32.mrb[18].mxu0 }
 0x29c   :  { %v12350_v54 = vadd.f32 %v12333_v40, %v677_v49  ;;  %v680_v55 = vadd.f32 %v10335_v37, %v10325_v53  ;;  %v504_v56 = vpop.f32.mrb[19].mxu0 }
 0x29d   :  { %v672_v57 = vadd.f32 %v671_v39, %v504_v56 }
 0x29e   :  { %v12353_v58 = vadd.f32 %v12333_v40, %v680_v55 }
 0x29f   :  { %v12359_v60 = vadd.f32 %v12333_v40, %v672_v57 }
 0x2a1   :  { %v595_v0 = vpop.f32.mrb[0].mxu0 }
 0x2a2   :  { %v597_v3 = vpop.f32.mrb[1].mxu0 }
 0x2a3   :  { %v599_v7 = vpop.f32.mrb[2].mxu0  ;;  %v717_v1 = vadd.f32 %v708_v4, %v597_v3 }
 0x2a4   :  { %v12366_v8 = vadd.f32 %v704_v2, %v599_v7  ;;  %v601_v10 = vpop.f32.mrb[3].mxu0 }
 0x2a5   :  { %v12368_v12 = vadd.f32 %v708_v4, %v601_v10 }
 0x2a9   :  { %v605_v15 = vpop.f32.mrb[4].mxu0 }
 0x2aa   :  { %v12370_v34 = vadd.f32 %v704_v2, %v605_v15  ;;  %v607_v35 = vpop.f32.mrb[5].mxu0 }
 0x2ab   :  { %v12372_v37 = vadd.f32 %v708_v4, %v607_v35  ;;  %v609_v39 = vpop.f32.mrb[6].mxu0 }
 0x2ac   :  { %v12374_v41 = vadd.f32 %v704_v2, %v609_v39  ;;  %v611_v43 = vpop.f32.mrb[7].mxu0 }
 0x2ad   :  { %v12376_v22 = vadd.f32 %v708_v4, %v611_v43 }
 0x2b1   :  { %v615_v46 = vpop.f32.mrb[8].mxu0 }
 0x2b2   :  { %v12378_v38 = vadd.f32 %v704_v2, %v615_v46  ;;  %v617_v48 = vpop.f32.mrb[9].mxu0 }
 0x2b3   :  { %v12380_v49 = vadd.f32 %v708_v4, %v617_v48  ;;  %v619_v51 = vpop.f32.mrb[10].mxu0  ;;  %v716_v48 = vadd.f32 %v704_v2, %v595_v0 }
 0x2b4   :  { %v12382_v53 = vadd.f32 %v704_v2, %v619_v51  ;;  %v621_v55 = vpop.f32.mrb[11].mxu0 }
 0x2b5   :  { %v12384_v56 = vadd.f32 %v708_v4, %v621_v55 }
 0x2b9   :  { %v625_v57 = vpop.f32.mrb[12].mxu0 }
 0x2ba   :  { %v12386_v7 = vadd.f32 %v704_v2, %v625_v57  ;;  %v627_v10 = vpop.f32.mrb[13].mxu0 }
 0x2bb   :  { %v12388_v15 = vadd.f32 %v708_v4, %v627_v10  ;;  %v629_v35 = vpop.f32.mrb[14].mxu0 }
 0x2bc   :  { %v12390_v39 = vadd.f32 %v704_v2, %v629_v35  ;;  %v631_v43 = vpop.f32.mrb[15].mxu0 }
 0x2bd   :  { %v12392_v46 = vadd.f32 %v708_v4, %v631_v43 }
 0x2be   :  { %13384 = vst [vmem:[#allocation38_spill] sm:$0xff] %v12390_v39  ;;  %v12394_v39 = vld [vmem:[#allocation7] ss:$0 sm:$0xff] }
 0x2bf   :  { %13385 = vst [vmem:[#allocation39_spill] sm:$0xff] %v12392_v46 }
 0x2c1   :  { %v980_v30 = vpop.f32.mrb[20].mxu0 }
 0x2c2   :  { %v1027_v51 = vadd.f32 %v980_v30, %v716_v48  ;;  %v982_v33 = vpop.f32.mrb[21].mxu0 }
 0x2c3   :  { %v1034_v63 = vadd.f32 %v982_v33, %v717_v1  ;;  %v984_v55 = vpop.f32.mrb[22].mxu0  ;;  %v718_v1 = vadd.f32 %v12333_v40, %v12347_v52  ;;  %v13386_v40 = vmov 0.0   ;;  %v13387_v52 = vmov 0  }
 0x2c4   :  { %v9234_v59 = vmul.f32 -1.442695, %v1027_v51  ;;  %v985_v36 = vpop.f32.mrb[23].mxu0 }
 0x2c5   :  { %v9235_v57 = vmul.f32 -1.442695, %v1034_v63 }
 0x2c6   :  { %11231 = vpow2.f32 %v9234_v59 }
 0x2c7   :  { %11233 = vpow2.f32 %v9235_v57 }
 0x2d0   :  { %v11232_v45 = vpop.eup %11231 }
 0x2d1   :  { %v1031_v10 = vadd.f32 1.0, %v11232_v45  ;;  %v11234_v35 = vpop.eup %11233 }
 0x2d2   :  { %v1038_v43 = vadd.f32 1.0, %v11234_v35 }
 0x2d3   :  { %11235 = vrcp.f32 %v1031_v10 }
 0x2d4   :  { %11237 = vrcp.f32 %v1038_v43 }
 0x2dd   :  { %v11236_v30 = vpop.eup %11235 }
 0x2de   :  { %v11238_v45 = vpop.eup %11237 }
 0x2df   :  { %v1045_v63 = vsub.f32 1.0, %v11238_v45  ;;  %v1047_v48 = vmul.f32 0.0, %v11238_v45 }
 0x2e1   :  { %v1021_v46 = vpop.f32.mrb[24].mxu0 }
 0x2e2   :  { %v1041_v0 = vadd.f32 %v12394_v39, %v1021_v46  ;;  %v10358_v2 = vpop.f32.mrb[25].mxu0 }
 0x2e3   :  { %v1024_v3 = vpop.f32.mrb[26].mxu0 }
 0x2e4   :  { %v1042_v33 = vmul.f32 %v11236_v30, %v1041_v0  ;;  %v10359_v36 = vpop.f32.mrb[27].mxu0 }
 0x2e6   :  { %v1043_v59 = vadd.f32 %v1042_v33, %v718_v1 }
 0x2e8   :  { %11239 = vtanh.f32 %v1043_v59 }
 0x2f2   :  { %v11240_v4 = vpop.eup %11239 }
 0x2f3   :  { %v1046_v51 = vmul.f32 %v11240_v4, %v1045_v63 }
 0x2f5   :  { %v12399_v55 = vadd.f32 %v1047_v48, %v1046_v51 }
 0x2f7   :  { %v1049_v46 = vpack.c.bf16 %v12399_v55, %v12399_v55 }
 0x2f9   :  { %1083 = vmatmul.mubr.bf16.vlgmr.msra.gmra.mrb[8].mxu1 %v1049_v46  ;;  %10377 = vmatmul.mubr.bf16.vlgmr.msra.gmra.mrb[28].mxu0 %v1049_v46 }
 0x2fa   :  { %1155 = vmatpush1.bf16.msra.mxu1 %v12177_v61  ;;  %10381 = vmatpush3.bf16.msra.mxu0 %v12271_v24 }
 0x2fb   :  { %1156 = vmatprep.subr.bf16.mxu1 %v12184_v62  ;;  %10382 = vmatprep.subr.bf16.mxu0 %v13386_v40 }
 0x2fc   :  { %1186 = vmatprep.mubr.bf16.mxu1 %v13387_v52  ;;  %10396 = vmatprep.mubr.msk.bf16.mxu0 %vm11795_vm3, %v13386_v40 }
 0x2fe   :  { %1157 = vmatpush1.bf16.msra.mxu1 %v12190_v5  ;;  %10383 = vmatpush3.bf16.msra.mxu0 %v12276_v25 }
 0x2ff   :  { %1158 = vmatprep.subr.bf16.mxu1 %v12195_v6  ;;  %10384 = vmatprep.subr.bf16.mxu0 %v13386_v40 }
 0x302   :  { %1159 = vmatpush1.bf16.msra.mxu1 %v12202_v11  ;;  %10385 = vmatpush3.bf16.msra.mxu0 %v12282_v26 }
 0x303   :  { %1160 = vmatprep.subr.bf16.mxu1 %v12209_v13  ;;  %10386 = vmatprep.subr.bf16.mxu0 %v13386_v40 }
 0x306   :  { %1161 = vmatpush1.bf16.msra.mxu1 %v12214_v14  ;;  %10387 = vmatpush3.bf16.msra.mxu0 %v12286_v27 }
 0x307   :  { %1162 = vmatprep.subr.bf16.mxu1 %v12217_v16  ;;  %10388 = vmatprep.subr.bf16.mxu0 %v13386_v40 }
 0x30a   :  { %1163 = vmatpush1.bf16.msra.mxu1 %v12223_v17  ;;  %10389 = vmatpush3.bf16.msra.mxu0 %v12290_v28 }
 0x30b   :  { %1164 = vmatprep.subr.bf16.mxu1 %v12226_v18  ;;  %10390 = vmatprep.subr.bf16.mxu0 %v13386_v40 }
 0x30e   :  { %1165 = vmatpush1.bf16.msra.mxu1 %v12231_v9  ;;  %10391 = vmatpush3.bf16.msra.mxu0 %v12294_v29 }
 0x30f   :  { %1166 = vmatprep.subr.bf16.mxu1 %v12233_v19  ;;  %10392 = vmatprep.subr.bf16.mxu0 %v13386_v40 }
 0x312   :  { %1167 = vmatpush1.bf16.msra.mxu1 %v12238_v20  ;;  %10393 = vmatpush3.bf16.msra.mxu0 %v12298_v31 }
 0x313   :  { %1168 = vmatprep.subr.bf16.mxu1 %v12242_v21  ;;  %10394 = vmatprep.subr.bf16.mxu0 %v13386_v40 }
 0x316   :  { %1169 = vmatpush1.bf16.msra.mxu1 %v12247_v23  ;;  %10395 = vmatpush3.bf16.msra.mxu0 %v12302_v32 }
 0x317   :  { %1258 = vmatprep.subr.bf16.mxu1 %v12161_v50  ;;  %10400 = vmatprep.subr.bf16.mxu0 %v13386_v40 }
 0x3cc   :  { %v1084_v57 = vpop.f32.mrb[8].mxu1  ;;  %v1125_v10 = vpop.f32.mrb[28].mxu0 }
 0x3cd   :  { %v1131_v35 = vadd.f32 %v1084_v57, %v12366_v8  ;;  %v1086_v43 = vpop.f32.mrb[9].mxu1  ;;  %v10378_v0 = vpop.f32.mrb[29].mxu0  ;;  %v1145_v51 = vadd.f32 %v12394_v39, %v1125_v10 }
 0x3ce   :  { %v1138_v2 = vadd.f32 %v1086_v43, %v12368_v12  ;;  %v1088_v30 = vpop.f32.mrb[10].mxu1  ;;  %v1128_v3 = vpop.f32.mrb[30].mxu0 }
 0x3cf   :  { %v9236_v1 = vmul.f32 -1.442695, %v1131_v35  ;;  %v1089_v33 = vpop.f32.mrb[11].mxu1  ;;  %v10379_v36 = vpop.f32.mrb[31].mxu0 }
 0x3d0   :  { %v9237_v59 = vmul.f32 -1.442695, %v1138_v2 }
 0x3d1   :  { %11241 = vpow2.f32 %v9236_v1 }
 0x3d2   :  { %11243 = vpow2.f32 %v9237_v59 }
 0x3db   :  { %v11242_v45 = vpop.eup %11241 }
 0x3dc   :  { %v1135_v63 = vadd.f32 1.0, %v11242_v45  ;;  %v11244_v4 = vpop.eup %11243 }
 0x3dd   :  { %v1142_v48 = vadd.f32 1.0, %v11244_v4 }
 0x3de   :  { %11245 = vrcp.f32 %v1135_v63 }
 0x3df   :  { %11247 = vrcp.f32 %v1142_v48 }
 0x3e8   :  { %v11246_v8 = vpop.eup %11245 }
 0x3e9   :  { %v1146_v46 = vmul.f32 %v11246_v8, %v1145_v51  ;;  %v11248_v57 = vpop.eup %11247 }
 0x3ea   :  { %v1149_v35 = vsub.f32 1.0, %v11248_v57  ;;  %v1151_v0 = vmul.f32 %v11248_v57, %v12399_v55 }
 0x3eb   :  { %v1147_v12 = vadd.f32 %v1146_v46, %v12359_v60 }
 0x3ed   :  { %11249 = vtanh.f32 %v1147_v12 }
 0x3f7   :  { %v11250_v43 = vpop.eup %11249 }
 0x3f8   :  { %v1150_v2 = vmul.f32 %v11250_v43, %v1149_v35 }
 0x3fa   :  { %v12443_v30 = vadd.f32 %v1151_v0, %v1150_v2 }
 0x3fc   :  { %v1153_v3 = vpack.c.bf16 %v12443_v30, %v12443_v30 }
 0x3fe   :  { %1187 = vmatmul.mubr.bf16.vlgmr.msra.gmra.mrb[12].mxu1 %v1153_v3  ;;  %10397 = vmatmul.mubr.bf16.vlgmr.msra.gmra.mrb[32].mxu0 %v1153_v3 }
 0x3ff   :  { %1259 = vmatpush1.bf16.msra.mxu1 %v12177_v61  ;;  %10401 = vmatpush3.bf16.msra.mxu0 %v12271_v24 }
 0x400   :  { %1260 = vmatprep.subr.bf16.mxu1 %v12184_v62  ;;  %10402 = vmatprep.subr.bf16.mxu0 %v13386_v40 }
 0x401   :  { %1290 = vmatprep.mubr.bf16.mxu1 %v13387_v52  ;;  %10416 = vmatprep.mubr.msk.bf16.mxu0 %vm11795_vm3, %v13386_v40 }
 0x403   :  { %1261 = vmatpush1.bf16.msra.mxu1 %v12190_v5  ;;  %10403 = vmatpush3.bf16.msra.mxu0 %v12276_v25 }
 0x404   :  { %1262 = vmatprep.subr.bf16.mxu1 %v12195_v6  ;;  %10404 = vmatprep.subr.bf16.mxu0 %v13386_v40 }
 0x407   :  { %1263 = vmatpush1.bf16.msra.mxu1 %v12202_v11  ;;  %10405 = vmatpush3.bf16.msra.mxu0 %v12282_v26 }
 0x408   :  { %1264 = vmatprep.subr.bf16.mxu1 %v12209_v13  ;;  %10406 = vmatprep.subr.bf16.mxu0 %v13386_v40 }
 0x40b   :  { %1265 = vmatpush1.bf16.msra.mxu1 %v12214_v14  ;;  %10407 = vmatpush3.bf16.msra.mxu0 %v12286_v27 }
 0x40c   :  { %1266 = vmatprep.subr.bf16.mxu1 %v12217_v16  ;;  %10408 = vmatprep.subr.bf16.mxu0 %v13386_v40 }
 0x40f   :  { %1267 = vmatpush1.bf16.msra.mxu1 %v12223_v17  ;;  %10409 = vmatpush3.bf16.msra.mxu0 %v12290_v28 }
 0x410   :  { %1268 = vmatprep.subr.bf16.mxu1 %v12226_v18  ;;  %10410 = vmatprep.subr.bf16.mxu0 %v13386_v40 }
 0x413   :  { %1269 = vmatpush1.bf16.msra.mxu1 %v12231_v9  ;;  %10411 = vmatpush3.bf16.msra.mxu0 %v12294_v29 }
 0x414   :  { %1270 = vmatprep.subr.bf16.mxu1 %v12233_v19  ;;  %10412 = vmatprep.subr.bf16.mxu0 %v13386_v40 }
 0x417   :  { %1271 = vmatpush1.bf16.msra.mxu1 %v12238_v20  ;;  %10413 = vmatpush3.bf16.msra.mxu0 %v12298_v31 }
 0x418   :  { %1272 = vmatprep.subr.bf16.mxu1 %v12242_v21  ;;  %10414 = vmatprep.subr.bf16.mxu0 %v13386_v40 }
 0x41b   :  { %1273 = vmatpush1.bf16.msra.mxu1 %v12247_v23  ;;  %10415 = vmatpush3.bf16.msra.mxu0 %v12302_v32 }
 0x41c   :  { %1362 = vmatprep.subr.bf16.mxu1 %v12161_v50  ;;  %10420 = vmatprep.subr.bf16.mxu0 %v13386_v40 }
 0x4d1   :  { %v1188_v60 = vpop.f32.mrb[12].mxu1  ;;  %v1229_v10 = vpop.f32.mrb[32].mxu0 }
 0x4d2   :  { %v1235_v1 = vadd.f32 %v1188_v60, %v12370_v34  ;;  %v1190_v33 = vpop.f32.mrb[13].mxu1  ;;  %v10398_v36 = vpop.f32.mrb[33].mxu0  ;;  %v1249_v43 = vadd.f32 %v12394_v39, %v1229_v10 }
 0x4d3   :  { %v1242_v59 = vadd.f32 %v1190_v33, %v12372_v37  ;;  %v1192_v45 = vpop.f32.mrb[14].mxu1  ;;  %v1232_v63 = vpop.f32.mrb[34].mxu0 }
 0x4d4   :  { %v9238_v4 = vmul.f32 -1.442695, %v1235_v1  ;;  %v1193_v48 = vpop.f32.mrb[15].mxu1  ;;  %v10399_v51 = vpop.f32.mrb[35].mxu0 }
 0x4d5   :  { %v9239_v8 = vmul.f32 -1.442695, %v1242_v59 }
 0x4d6   :  { %11251 = vpow2.f32 %v9238_v4 }
 0x4d7   :  { %11253 = vpow2.f32 %v9239_v8 }
 0x4e0   :  { %v11252_v46 = vpop.eup %11251 }
 0x4e1   :  { %v1239_v12 = vadd.f32 1.0, %v11252_v46  ;;  %v11254_v57 = vpop.eup %11253 }
 0x4e2   :  { %v1246_v35 = vadd.f32 1.0, %v11254_v57 }
 0x4e3   :  { %11255 = vrcp.f32 %v1239_v12 }
 0x4e4   :  { %11257 = vrcp.f32 %v1246_v35 }
 0x4ed   :  { %v11256_v34 = vpop.eup %11255 }
 0x4ee   :  { %v1250_v0 = vmul.f32 %v11256_v34, %v1249_v43  ;;  %v11258_v2 = vpop.eup %11257 }
 0x4ef   :  { %v1253_v3 = vsub.f32 1.0, %v11258_v2  ;;  %v1255_v1 = vmul.f32 %v11258_v2, %v12443_v30 }
 0x4f0   :  { %v1251_v37 = vadd.f32 %v1250_v0, %v12350_v54 }
 0x4f2   :  { %11259 = vtanh.f32 %v1251_v37 }
 0x4fc   :  { %v11260_v60 = vpop.eup %11259 }
 0x4fd   :  { %v1254_v33 = vmul.f32 %v11260_v60, %v1253_v3 }
 0x4ff   :  { %v12487_v36 = vadd.f32 %v1255_v1, %v1254_v33 }
 0x501   :  { %v1257_v59 = vpack.c.bf16 %v12487_v36, %v12487_v36 }
 0x503   :  { %1291 = vmatmul.mubr.bf16.vlgmr.msra.gmra.mrb[16].mxu1 %v1257_v59  ;;  %10417 = vmatmul.mubr.bf16.vlgmr.msra.gmra.mrb[36].mxu0 %v1257_v59 }
 0x504   :  { %1363 = vmatpush1.bf16.msra.mxu1 %v12177_v61  ;;  %10421 = vmatpush3.bf16.msra.mxu0 %v12271_v24 }
 0x505   :  { %1364 = vmatprep.subr.bf16.mxu1 %v12184_v62  ;;  %10422 = vmatprep.subr.bf16.mxu0 %v13386_v40 }
 0x506   :  { %1394 = vmatprep.mubr.bf16.mxu1 %v13387_v52  ;;  %10436 = vmatprep.mubr.msk.bf16.mxu0 %vm11795_vm3, %v13386_v40 }
 0x508   :  { %1365 = vmatpush1.bf16.msra.mxu1 %v12190_v5  ;;  %10423 = vmatpush3.bf16.msra.mxu0 %v12276_v25 }
 0x509   :  { %1366 = vmatprep.subr.bf16.mxu1 %v12195_v6  ;;  %10424 = vmatprep.subr.bf16.mxu0 %v13386_v40 }
 0x50c   :  { %1367 = vmatpush1.bf16.msra.mxu1 %v12202_v11  ;;  %10425 = vmatpush3.bf16.msra.mxu0 %v12282_v26 }
 0x50d   :  { %1368 = vmatprep.subr.bf16.mxu1 %v12209_v13  ;;  %10426 = vmatprep.subr.bf16.mxu0 %v13386_v40 }
 0x510   :  { %1369 = vmatpush1.bf16.msra.mxu1 %v12214_v14  ;;  %10427 = vmatpush3.bf16.msra.mxu0 %v12286_v27 }
 0x511   :  { %1370 = vmatprep.subr.bf16.mxu1 %v12217_v16  ;;  %10428 = vmatprep.subr.bf16.mxu0 %v13386_v40 }
 0x514   :  { %1371 = vmatpush1.bf16.msra.mxu1 %v12223_v17  ;;  %10429 = vmatpush3.bf16.msra.mxu0 %v12290_v28 }
 0x515   :  { %1372 = vmatprep.subr.bf16.mxu1 %v12226_v18  ;;  %10430 = vmatprep.subr.bf16.mxu0 %v13386_v40 }
 0x518   :  { %1373 = vmatpush1.bf16.msra.mxu1 %v12231_v9  ;;  %10431 = vmatpush3.bf16.msra.mxu0 %v12294_v29 }
 0x519   :  { %1374 = vmatprep.subr.bf16.mxu1 %v12233_v19  ;;  %10432 = vmatprep.subr.bf16.mxu0 %v13386_v40 }
 0x51c   :  { %1375 = vmatpush1.bf16.msra.mxu1 %v12238_v20  ;;  %10433 = vmatpush3.bf16.msra.mxu0 %v12298_v31 }
 0x51d   :  { %1376 = vmatprep.subr.bf16.mxu1 %v12242_v21  ;;  %10434 = vmatprep.subr.bf16.mxu0 %v13386_v40 }
 0x520   :  { %1377 = vmatpush1.bf16.msra.mxu1 %v12247_v23  ;;  %10435 = vmatpush3.bf16.msra.mxu0 %v12302_v32 }
 0x521   :  { %1466 = vmatprep.subr.bf16.mxu1 %v12161_v50  ;;  %10440 = vmatprep.subr.bf16.mxu0 %v13386_v40 }
 0x5d6   :  { %v1292_v54 = vpop.f32.mrb[16].mxu1  ;;  %v1333_v10 = vpop.f32.mrb[36].mxu0 }
 0x5d7   :  { %v1339_v45 = vadd.f32 %v1292_v54, %v12374_v41  ;;  %v1294_v63 = vpop.f32.mrb[17].mxu1  ;;  %v10418_v4 = vpop.f32.mrb[37].mxu0  ;;  %v1353_v2 = vadd.f32 %v12394_v39, %v1333_v10 }
 0x5d8   :  { %v1346_v48 = vadd.f32 %v1294_v63, %v12376_v22  ;;  %v1296_v51 = vpop.f32.mrb[18].mxu1  ;;  %v1336_v8 = vpop.f32.mrb[38].mxu0 }
 0x5d9   :  { %v9240_v46 = vmul.f32 -1.442695, %v1339_v45  ;;  %v1297_v12 = vpop.f32.mrb[19].mxu1  ;;  %v10419_v57 = vpop.f32.mrb[39].mxu0 }
 0x5da   :  { %v9241_v35 = vmul.f32 -1.442695, %v1346_v48 }
 0x5db   :  { %11261 = vpow2.f32 %v9240_v46 }
 0x5dc   :  { %11263 = vpow2.f32 %v9241_v35 }
 0x5e5   :  { %v11262_v43 = vpop.eup %11261 }
 0x5e6   :  { %v1343_v34 = vadd.f32 1.0, %v11262_v43  ;;  %v11264_v0 = vpop.eup %11263 }
 0x5e7   :  { %v1350_v37 = vadd.f32 1.0, %v11264_v0 }
 0x5e8   :  { %11265 = vrcp.f32 %v1343_v34 }
 0x5e9   :  { %11267 = vrcp.f32 %v1350_v37 }
 0x5f2   :  { %v11266_v41 = vpop.eup %11265 }
 0x5f3   :  { %v1354_v3 = vmul.f32 %v11266_v41, %v1353_v2  ;;  %v11268_v60 = vpop.eup %11267 }
 0x5f4   :  { %v1357_v1 = vsub.f32 1.0, %v11268_v60  ;;  %v1359_v59 = vmul.f32 %v11268_v60, %v12487_v36 }
 0x5f5   :  { %v1355_v22 = vadd.f32 %v1354_v3, %v12353_v58 }
 0x5f7   :  { %11269 = vtanh.f32 %v1355_v22 }
 0x601   :  { %v11270_v33 = vpop.eup %11269 }
 0x602   :  { %v1358_v54 = vmul.f32 %v11270_v33, %v1357_v1 }
 0x604   :  { %v12531_v45 = vadd.f32 %v1359_v59, %v1358_v54 }
 0x606   :  { %v1361_v63 = vpack.c.bf16 %v12531_v45, %v12531_v45 }
 0x608   :  { %1395 = vmatmul.mubr.bf16.vlgmr.msra.gmra.mrb[20].mxu1 %v1361_v63  ;;  %10437 = vmatmul.mubr.bf16.vlgmr.msra.gmra.mrb[40].mxu0 %v1361_v63 }
 0x609   :  { %1467 = vmatpush1.bf16.msra.mxu1 %v12177_v61  ;;  %10441 = vmatpush3.bf16.msra.mxu0 %v12271_v24 }
 0x60a   :  { %1468 = vmatprep.subr.bf16.mxu1 %v12184_v62  ;;  %10442 = vmatprep.subr.bf16.mxu0 %v13386_v40 }
 0x60b   :  { %1498 = vmatprep.mubr.bf16.mxu1 %v13387_v52  ;;  %10456 = vmatprep.mubr.msk.bf16.mxu0 %vm11795_vm3, %v13386_v40 }
 0x60d   :  { %1469 = vmatpush1.bf16.msra.mxu1 %v12190_v5  ;;  %10443 = vmatpush3.bf16.msra.mxu0 %v12276_v25 }
 0x60e   :  { %1470 = vmatprep.subr.bf16.mxu1 %v12195_v6  ;;  %10444 = vmatprep.subr.bf16.mxu0 %v13386_v40 }
 0x611   :  { %1471 = vmatpush1.bf16.msra.mxu1 %v12202_v11  ;;  %10445 = vmatpush3.bf16.msra.mxu0 %v12282_v26 }
 0x612   :  { %1472 = vmatprep.subr.bf16.mxu1 %v12209_v13  ;;  %10446 = vmatprep.subr.bf16.mxu0 %v13386_v40 }
 0x615   :  { %1473 = vmatpush1.bf16.msra.mxu1 %v12214_v14  ;;  %10447 = vmatpush3.bf16.msra.mxu0 %v12286_v27 }
 0x616   :  { %1474 = vmatprep.subr.bf16.mxu1 %v12217_v16  ;;  %10448 = vmatprep.subr.bf16.mxu0 %v13386_v40 }
 0x619   :  { %1475 = vmatpush1.bf16.msra.mxu1 %v12223_v17  ;;  %10449 = vmatpush3.bf16.msra.mxu0 %v12290_v28 }
 0x61a   :  { %1476 = vmatprep.subr.bf16.mxu1 %v12226_v18  ;;  %10450 = vmatprep.subr.bf16.mxu0 %v13386_v40 }
 0x61d   :  { %1477 = vmatpush1.bf16.msra.mxu1 %v12231_v9  ;;  %10451 = vmatpush3.bf16.msra.mxu0 %v12294_v29 }
 0x61e   :  { %1478 = vmatprep.subr.bf16.mxu1 %v12233_v19  ;;  %10452 = vmatprep.subr.bf16.mxu0 %v13386_v40 }
 0x621   :  { %1479 = vmatpush1.bf16.msra.mxu1 %v12238_v20  ;;  %10453 = vmatpush3.bf16.msra.mxu0 %v12298_v31 }
 0x622   :  { %1480 = vmatprep.subr.bf16.mxu1 %v12242_v21  ;;  %10454 = vmatprep.subr.bf16.mxu0 %v13386_v40 }
 0x625   :  { %1481 = vmatpush1.bf16.msra.mxu1 %v12247_v23  ;;  %10455 = vmatpush3.bf16.msra.mxu0 %v12302_v32 }
 0x626   :  { %1570 = vmatprep.subr.bf16.mxu1 %v12161_v50  ;;  %10460 = vmatprep.subr.bf16.mxu0 %v13386_v40 }
 0x6db   :  { %v1396_v58 = vpop.f32.mrb[20].mxu1  ;;  %v1437_v10 = vpop.f32.mrb[40].mxu0 }
 0x6dc   :  { %v1443_v4 = vadd.f32 %v1396_v58, %v12378_v38  ;;  %v1398_v48 = vpop.f32.mrb[21].mxu1  ;;  %v10438_v51 = vpop.f32.mrb[41].mxu0  ;;  %v1457_v41 = vadd.f32 %v12394_v39, %v1437_v10 }
 0x6dd   :  { %v1450_v8 = vadd.f32 %v1398_v48, %v12380_v49  ;;  %v1400_v46 = vpop.f32.mrb[22].mxu1  ;;  %v1440_v12 = vpop.f32.mrb[42].mxu0 }
 0x6de   :  { %v9242_v57 = vmul.f32 -1.442695, %v1443_v4  ;;  %v1401_v35 = vpop.f32.mrb[23].mxu1  ;;  %v10439_v43 = vpop.f32.mrb[43].mxu0 }
 0x6df   :  { %v9243_v34 = vmul.f32 -1.442695, %v1450_v8  ;;  %v11392_v43 = vld [vmem:[#allocation9] ss:$12 sps:$4 sm:$0xff]  }
 0x6e0   :  { %11271 = vpow2.f32 %v9242_v57 }
 0x6e1   :  { %11273 = vpow2.f32 %v9243_v34  ;;  %v11393_v34 = vld [vmem:[#allocation9 + $0x1c] ss:$12 sps:$4 sm:$0xff]  }
 0x6ea   :  { %v11272_v0 = vpop.eup %11271 }
 0x6eb   :  { %v1447_v50 = vadd.f32 1.0, %v11272_v0  ;;  %v11274_v37 = vpop.eup %11273  ;;  %v11395_v0 = vld [vmem:[#allocation9 + $0x34] ss:$12 sps:$4 sm:$0xff]  }
 0x6ec   :  { %v1454_v2 = vadd.f32 1.0, %v11274_v37  ;;  %v11398_v37 = vld [vmem:[#allocation9 + $0x48] ss:$12 sps:$4 sm:$0xff]  }
 0x6ed   :  { %11275 = vrcp.f32 %v1447_v50  ;;  %v11396_v50 = vld [vmem:[#allocation9 + $0x30] ss:$12 sps:$4 sm:$0xff]  }
 0x6ee   :  { %11277 = vrcp.f32 %v1454_v2  ;;  %v11399_v2 = vld [vmem:[#allocation9 + $0x64] ss:$12 sps:$4 sm:$0xff]  }
 0x6f7   :  { %v11276_v38 = vpop.eup %11275 }
 0x6f8   :  { %v1458_v3 = vmul.f32 %v11276_v38, %v1457_v41  ;;  %v11278_v22 = vpop.eup %11277  ;;  %v11401_v41 = vld [vmem:[#allocation9 + $0x7c] ss:$12 sps:$4 sm:$0xff]   ;;  %v11403_v38 = vld [vmem:[#allocation9 + $0x94] ss:$12 sps:$4 sm:$0xff]  }
 0x6f9   :  { %v1461_v60 = vsub.f32 1.0, %v11278_v22  ;;  %v1463_v33 = vmul.f32 %v11278_v22, %v12531_v45 }
 0x6fa   :  { %v1459_v49 = vadd.f32 %v1458_v3, %v12339_v44  ;;  %v11405_v3 = vld [vmem:[#allocation9 + $0xac] ss:$12 sps:$4 sm:$0xff]  }
 0x6fc   :  { %11279 = vtanh.f32 %v1459_v49 }
 0x706   :  { %v11280_v1 = vpop.eup %11279 }
 0x707   :  { %v1462_v59 = vmul.f32 %v11280_v1, %v1461_v60 }
 0x709   :  { %v12575_v54 = vadd.f32 %v1463_v33, %v1462_v59 }
 0x70b   :  { %v1465_v63 = vpack.c.bf16 %v12575_v54, %v12575_v54 }
 0x70d   :  { %1499 = vmatmul.mubr.bf16.vlgmr.msra.gmra.mrb[24].mxu1 %v1465_v63  ;;  %10457 = vmatmul.mubr.bf16.vlgmr.msra.gmra.mrb[44].mxu0 %v1465_v63 }
 0x70e   :  { %1571 = vmatpush1.bf16.msra.mxu1 %v12177_v61  ;;  %10461 = vmatpush3.bf16.msra.mxu0 %v12271_v24  ;;  %v11391_v61 = vld [vmem:[#allocation9 + $0x4] ss:$12 sps:$4 sm:$0xff]  }
 0x70f   :  { %1572 = vmatprep.subr.bf16.mxu1 %v12184_v62  ;;  %10462 = vmatprep.subr.bf16.mxu0 %v13386_v40 }
 0x710   :  { %1602 = vmatprep.mubr.bf16.mxu1 %v13387_v52  ;;  %10476 = vmatprep.mubr.msk.bf16.mxu0 %vm11795_vm3, %v13386_v40 }
 0x712   :  { %1573 = vmatpush1.bf16.msra.mxu1 %v12190_v5  ;;  %10463 = vmatpush3.bf16.msra.mxu0 %v12276_v25 }
 0x713   :  { %1574 = vmatprep.subr.bf16.mxu1 %v12195_v6  ;;  %10464 = vmatprep.subr.bf16.mxu0 %v13386_v40 }
 0x716   :  { %1575 = vmatpush1.bf16.msra.mxu1 %v12202_v11  ;;  %10465 = vmatpush3.bf16.msra.mxu0 %v12282_v26 }
 0x717   :  { %1576 = vmatprep.subr.bf16.mxu1 %v12209_v13  ;;  %10466 = vmatprep.subr.bf16.mxu0 %v13386_v40 }
 0x71a   :  { %1577 = vmatpush1.bf16.msra.mxu1 %v12214_v14  ;;  %10467 = vmatpush3.bf16.msra.mxu0 %v12286_v27 }
 0x71b   :  { %1578 = vmatprep.subr.bf16.mxu1 %v12217_v16  ;;  %10468 = vmatprep.subr.bf16.mxu0 %v13386_v40 }
 0x71e   :  { %1579 = vmatpush1.bf16.msra.mxu1 %v12223_v17  ;;  %10469 = vmatpush3.bf16.msra.mxu0 %v12290_v28 }
 0x71f   :  { %1580 = vmatprep.subr.bf16.mxu1 %v12226_v18  ;;  %10470 = vmatprep.subr.bf16.mxu0 %v13386_v40 }
 0x722   :  { %1581 = vmatpush1.bf16.msra.mxu1 %v12231_v9  ;;  %10471 = vmatpush3.bf16.msra.mxu0 %v12294_v29 }
 0x723   :  { %1582 = vmatprep.subr.bf16.mxu1 %v12233_v19  ;;  %10472 = vmatprep.subr.bf16.mxu0 %v13386_v40 }
 0x726   :  { %1583 = vmatpush1.bf16.msra.mxu1 %v12238_v20  ;;  %10473 = vmatpush3.bf16.msra.mxu0 %v12298_v31 }
 0x727   :  { %1584 = vmatprep.subr.bf16.mxu1 %v12242_v21  ;;  %10474 = vmatprep.subr.bf16.mxu0 %v13386_v40 }
 0x72a   :  { %1585 = vmatpush1.bf16.msra.mxu1 %v12247_v23  ;;  %10475 = vmatpush3.bf16.msra.mxu0 %v12302_v32 }
 0x72b   :  { %1674 = vmatprep.subr.bf16.mxu1 %v11391_v61  ;;  %10480 = vmatprep.subr.bf16.mxu0 %v13386_v40 }
 0x7e0   :  { %v1500_v62 = vpop.f32.mrb[24].mxu1  ;;  %v1541_v5 = vpop.f32.mrb[44].mxu0 }
 0x7e1   :  { %v1547_v6 = vadd.f32 %v1500_v62, %v12382_v53  ;;  %v1502_v11 = vpop.f32.mrb[25].mxu1  ;;  %v10458_v13 = vpop.f32.mrb[45].mxu0  ;;  %v1561_v10 = vadd.f32 %v12394_v39, %v1541_v5 }
 0x7e2   :  { %v1554_v14 = vadd.f32 %v1502_v11, %v12384_v56  ;;  %v1504_v16 = vpop.f32.mrb[26].mxu1  ;;  %v1544_v17 = vpop.f32.mrb[46].mxu0 }
 0x7e3   :  { %v9244_v18 = vmul.f32 -1.442695, %v1547_v6  ;;  %v1505_v9 = vpop.f32.mrb[27].mxu1  ;;  %v10459_v19 = vpop.f32.mrb[47].mxu0 }
 0x7e4   :  { %v9245_v20 = vmul.f32 -1.442695, %v1554_v14 }
 0x7e5   :  { %11281 = vpow2.f32 %v9244_v18 }
 0x7e6   :  { %11283 = vpow2.f32 %v9245_v20 }
 0x7ef   :  { %v11282_v21 = vpop.eup %11281 }
 0x7f0   :  { %v1551_v23 = vadd.f32 1.0, %v11282_v21  ;;  %v11284_v44 = vpop.eup %11283 }
 0x7f1   :  { %v1558_v58 = vadd.f32 1.0, %v11284_v44  ;;  %v10945_v44 = vld [vmem:[#allocation12 + $0x4] ss:$12 sps:$4 sm:$0xff]  }
 0x7f2   :  { %11285 = vrcp.f32 %v1551_v23 }
 0x7f3   :  { %11287 = vrcp.f32 %v1558_v58  ;;  %v10946_v58 = vld [vmem:[#allocation12 + $0x8] ss:$12 sps:$4 sm:$0xff]  }
 0x7fc   :  { %v11286_v53 = vpop.eup %11285 }
 0x7fd   :  { %v1562_v4 = vmul.f32 %v11286_v53, %v1561_v10  ;;  %v11288_v48 = vpop.eup %11287  ;;  %v10943_v10 = vld [vmem:[#allocation12] ss:$12 sps:$4 sm:$0xff]  }
 0x7fe   :  { %v1565_v51 = vsub.f32 1.0, %v11288_v48  ;;  %v1567_v46 = vmul.f32 %v11288_v48, %v12575_v54  ;;  %v10950_v53 = vld [vmem:[#allocation12 + $0x20] ss:$12 sps:$4 sm:$0xff]   ;;  %v10954_v48 = vld [vmem:[#allocation12 + $0x38] ss:$12 sps:$4 sm:$0xff]  }
 0x7ff   :  { %v1563_v56 = vadd.f32 %v1562_v4, %v12345_v47  ;;  %v11394_v47 = vld [vmem:[#allocation9 + $0x18] ss:$12 sps:$4 sm:$0xff]  }
 0x800   :  { %v10947_v4 = vld [vmem:[#allocation12 + $0x18] ss:$12 sps:$4 sm:$0xff]  }
 0x801   :  { %11289 = vtanh.f32 %v1563_v56  ;;  %v10953_v56 = vld [vmem:[#allocation12 + $0x34] ss:$12 sps:$4 sm:$0xff]  }
 0x80b   :  { %v11290_v8 = vpop.eup %11289 }
 0x80c   :  { %v1566_v12 = vmul.f32 %v11290_v8, %v1565_v51  ;;  %v10951_v51 = vld [vmem:[#allocation12 + $0x30] ss:$12 sps:$4 sm:$0xff]   ;;  %v10957_v8 = vld [vmem:[#allocation12 + $0x4c] ss:$12 sps:$4 sm:$0xff]  }
 0x80e   :  { %v12618_v57 = vadd.f32 %v1567_v46, %v1566_v12  ;;  %v10958_v46 = vld [vmem:[#allocation12 + $0x50] ss:$12 sps:$4 sm:$0xff]   ;;  %v10955_v12 = vld [vmem:[#allocation12 + $0x48] ss:$12 sps:$4 sm:$0xff]  }
 0x810   :  { %v1569_v35 = vpack.c.bf16 %v12618_v57, %v12618_v57 }
 0x812   :  { %1603 = vmatmul.mubr.bf16.vlgmr.msra.gmra.mrb[28].mxu1 %v1569_v35  ;;  %10477 = vmatmul.mubr.bf16.vlgmr.msra.gmra.mrb[48].mxu0 %v1569_v35  ;;  %v10961_v35 = vld [vmem:[#allocation12 + $0x64] ss:$12 sps:$4 sm:$0xff]  }
 0x813   :  { %1675 = vmatpush1.bf16.msra.mxu1 %v11392_v43  ;;  %10481 = vmatpush3.bf16.msra.mxu0 %v12271_v24  ;;  %v11397_v24 = vld [vmem:[#allocation9 + $0x4c] ss:$12 sps:$4 sm:$0xff]   ;;  %v10962_v43 = vld [vmem:[#allocation12 + $0x68] ss:$12 sps:$4 sm:$0xff]  }
 0x814   :  { %1676 = vmatprep.subr.bf16.mxu1 %v11393_v34  ;;  %10482 = vmatprep.subr.bf16.mxu0 %v13386_v40  ;;  %v10959_v34 = vld [vmem:[#allocation12 + $0x60] ss:$12 sps:$4 sm:$0xff]  }
 0x815   :  { %1706 = vmatprep.mubr.bf16.mxu1 %v13387_v52  ;;  %10496 = vmatprep.mubr.msk.bf16.mxu0 %vm11795_vm3, %v13386_v40 }
 0x817   :  { %1677 = vmatpush1.bf16.msra.mxu1 %v11394_v47  ;;  %10483 = vmatpush3.bf16.msra.mxu0 %v12276_v25  ;;  %v11400_v25 = vld [vmem:[#allocation9 + $0x60] ss:$12 sps:$4 sm:$0xff]   ;;  %v10965_v47 = vld [vmem:[#allocation12 + $0x7c] ss:$12 sps:$4 sm:$0xff]  }
 0x818   :  { %1678 = vmatprep.subr.bf16.mxu1 %v11395_v0  ;;  %10484 = vmatprep.subr.bf16.mxu0 %v13386_v40  ;;  %v10966_v0 = vld [vmem:[#allocation12 + $0x80] ss:$12 sps:$4 sm:$0xff]  }
 0x81b   :  { %1679 = vmatpush1.bf16.msra.mxu1 %v11396_v50  ;;  %10485 = vmatpush3.bf16.msra.mxu0 %v12282_v26  ;;  %v11402_v26 = vld [vmem:[#allocation9 + $0x78] ss:$12 sps:$4 sm:$0xff]  }
 0x81c   :  { %1680 = vmatprep.subr.bf16.mxu1 %v11397_v24  ;;  %10486 = vmatprep.subr.bf16.mxu0 %v13386_v40  ;;  %v10963_v50 = vld [vmem:[#allocation12 + $0x78] ss:$12 sps:$4 sm:$0xff]   ;;  %v10969_v24 = vld [vmem:[#allocation12 + $0x94] ss:$12 sps:$4 sm:$0xff]  }
 0x81f   :  { %1681 = vmatpush1.bf16.msra.mxu1 %v11398_v37  ;;  %10487 = vmatpush3.bf16.msra.mxu0 %v12286_v27  ;;  %v11404_v27 = vld [vmem:[#allocation9 + $0x90] ss:$12 sps:$4 sm:$0xff]   ;;  %v10970_v37 = vld [vmem:[#allocation12 + $0x98] ss:$12 sps:$4 sm:$0xff]  }
 0x820   :  { %1682 = vmatprep.subr.bf16.mxu1 %v11399_v2  ;;  %10488 = vmatprep.subr.bf16.mxu0 %v13386_v40  ;;  %v10967_v2 = vld [vmem:[#allocation12 + $0x90] ss:$12 sps:$4 sm:$0xff]  }
 0x823   :  { %1683 = vmatpush1.bf16.msra.mxu1 %v11400_v25  ;;  %10489 = vmatpush3.bf16.msra.mxu0 %v12290_v28  ;;  %v11406_v28 = vld [vmem:[#allocation9 + $0xa8] ss:$12 sps:$4 sm:$0xff]   ;;  %v10973_v25 = vld [vmem:[#allocation12 + $0xac] ss:$12 sps:$4 sm:$0xff]  }
 0x824   :  { %1684 = vmatprep.subr.bf16.mxu1 %v11401_v41  ;;  %10490 = vmatprep.subr.bf16.mxu0 %v13386_v40  ;;  %v10974_v41 = vld [vmem:[#allocation12 + $0xb0] ss:$12 sps:$4 sm:$0xff]  }
 0x827   :  { %1685 = vmatpush1.bf16.msra.mxu1 %v11402_v26  ;;  %10491 = vmatpush3.bf16.msra.mxu0 %v12294_v29  ;;  %v10971_v26 = vld [vmem:[#allocation12 + $0xa8] ss:$12 sps:$4 sm:$0xff]  }
 0x828   :  { %1686 = vmatprep.subr.bf16.mxu1 %v11403_v38  ;;  %10492 = vmatprep.subr.bf16.mxu0 %v13386_v40  ;;  %v10977_v38 = vld [vmem:[#allocation10 + $0x4] ss:$12 sps:$4 sm:$0xff]  }
 0x82b   :  { %1687 = vmatpush1.bf16.msra.mxu1 %v11404_v27  ;;  %10493 = vmatpush3.bf16.msra.mxu0 %v12298_v31  ;;  %v10978_v27 = vld [vmem:[#allocation10 + $0x8] ss:$12 sps:$4 sm:$0xff]  }
 0x82c   :  { %1688 = vmatprep.subr.bf16.mxu1 %v11405_v3  ;;  %10494 = vmatprep.subr.bf16.mxu0 %v13386_v40 }
 0x82f   :  { %1689 = vmatpush1.bf16.msra.mxu1 %v11406_v28  ;;  %10495 = vmatpush3.bf16.msra.mxu0 %v12302_v32 }
 0x830   :  { %1977 = vmatprep.subr.bf16.mxu1 %v10945_v44  ;;  %10500 = vmatprep.subr.bf16.mxu0 %v10946_v58 }
 0x8e5   :  { %v1604_v49 = vpop.f32.mrb[28].mxu1  ;;  %v1645_v22 = vpop.f32.mrb[48].mxu0 }
 0x8e6   :  { %v1651_v29 = vadd.f32 %v1604_v49, %v12386_v7  ;;  %v1606_v60 = vpop.f32.mrb[29].mxu1  ;;  %v10478_v1 = vpop.f32.mrb[49].mxu0  ;;  %v1665_v14 = vadd.f32 %v12394_v39, %v1645_v22  ;;  %v13388_v49 = vld [vmem:[#allocation38_spill] sm:$0xff] }
 0x8e7   :  { %v1658_v33 = vadd.f32 %v1606_v60, %v12388_v15  ;;  %v1608_v59 = vpop.f32.mrb[30].mxu1  ;;  %v1648_v63 = vpop.f32.mrb[50].mxu0  ;;  %v13389_v1 = vld [vmem:[#allocation39_spill] sm:$0xff] }
 0x8e8   :  { %v9246_v61 = vmul.f32 -1.442695, %v1651_v29  ;;  %v1609_v31 = vpop.f32.mrb[31].mxu1  ;;  %v10479_v62 = vpop.f32.mrb[51].mxu0 }
 0x8e9   :  { %v9247_v5 = vmul.f32 -1.442695, %v1658_v33 }
 0x8ea   :  { %11291 = vpow2.f32 %v9246_v61 }
 0x8eb   :  { %11293 = vpow2.f32 %v9247_v5 }
 0x8f4   :  { %v11292_v6 = vpop.eup %11291 }
 0x8f5   :  { %v1655_v11 = vadd.f32 1.0, %v11292_v6  ;;  %v11294_v32 = vpop.eup %11293 }
 0x8f6   :  { %v1662_v13 = vadd.f32 1.0, %v11294_v32 }
 0x8f7   :  { %11295 = vrcp.f32 %v1655_v11 }
 0x8f8   :  { %11297 = vrcp.f32 %v1662_v13 }
 0x901   :  { %v11296_v7 = vpop.eup %11295 }
 0x902   :  { %v1666_v16 = vmul.f32 %v11296_v7, %v1665_v14  ;;  %v11298_v17 = vpop.eup %11297 }
 0x903   :  { %v1669_v18 = vsub.f32 1.0, %v11298_v17  ;;  %v1671_v19 = vmul.f32 %v11298_v17, %v12618_v57 }
 0x904   :  { %v1667_v15 = vadd.f32 %v1666_v16, %v12336_v42  ;;  %v10949_v42 = vld [vmem:[#allocation12 + $0x1c] ss:$12 sps:$4 sm:$0xff]  }
 0x906   :  { %11299 = vtanh.f32 %v1667_v15  ;;  %v13390_v15 = vld [vmem:[#allocation35_spill] sm:$0xff] }
 0x910   :  { %v11300_v9 = vpop.eup %11299 }
 0x911   :  { %v1670_v20 = vmul.f32 %v11300_v9, %v1669_v18 }
 0x913   :  { %v12645_v21 = vadd.f32 %v1671_v19, %v1670_v20 }
 0x915   :  { %v1673_v23 = vpack.c.bf16 %v12645_v21, %v12645_v21 }
 0x917   :  { %1707 = vmatmul.mubr.bf16.vlgmr.msra.gmra.mrb[32].mxu1 %v1673_v23  ;;  %10497 = vmatmul.mubr.bf16.vlgmr.msra.gmra.mrb[52].mxu0 %v1673_v23 }
 0x918   :  { %2009 = vmatprep.mubr.bf16.mxu1 %v13387_v52  ;;  %1978 = vmatpush1.bf16.msra.mxu1 %v10943_v10 }
 0x919   :  { %10501 = vmatpush3.bf16.msra.mxu0 %v10946_v58  ;;  %1979 = vmatprep.subr.bf16.mxu1 %v10949_v42  ;;  %v10975_v58 = vld [vmem:[#allocation10] ss:$12 sps:$4 sm:$0xff]   ;;  %v10981_v42 = vld [vmem:[#allocation10 + $0x1c] ss:$12 sps:$4 sm:$0xff]  }
 0x91a   :  { %10502 = vmatprep.subr.bf16.mxu0 %v10950_v53 }
 0x91c   :  { %1980 = vmatpush1.bf16.msra.mxu1 %v10947_v4  ;;  %v1847_v4 = vpack.c.bf16 %v12487_v36, %v12531_v45 }
 0x91d   :  { %10503 = vmatpush3.bf16.msra.mxu0 %v10950_v53  ;;  %1981 = vmatprep.subr.bf16.mxu1 %v10953_v56  ;;  %v10982_v53 = vld [vmem:[#allocation10 + $0x20] ss:$12 sps:$4 sm:$0xff]   ;;  %v10979_v56 = vld [vmem:[#allocation10 + $0x18] ss:$12 sps:$4 sm:$0xff]  }
 0x91e   :  { %10504 = vmatprep.subr.bf16.mxu0 %v10954_v48 }
 0x920   :  { %1982 = vmatpush1.bf16.msra.mxu1 %v10951_v51  ;;  %v10986_v51 = vld [vmem:[#allocation10 + $0x38] ss:$12 sps:$4 sm:$0xff]  }
 0x921   :  { %10505 = vmatpush3.bf16.msra.mxu0 %v10954_v48  ;;  %1983 = vmatprep.subr.bf16.mxu1 %v10957_v8  ;;  %v10985_v48 = vld [vmem:[#allocation10 + $0x34] ss:$12 sps:$4 sm:$0xff]   ;;  %v10983_v8 = vld [vmem:[#allocation10 + $0x30] ss:$12 sps:$4 sm:$0xff]  }
 0x922   :  { %10506 = vmatprep.subr.bf16.mxu0 %v10958_v46 }
 0x924   :  { %1984 = vmatpush1.bf16.msra.mxu1 %v10955_v12  ;;  %v10989_v12 = vld [vmem:[#allocation10 + $0x4c] ss:$12 sps:$4 sm:$0xff]  }
 0x925   :  { %10507 = vmatpush3.bf16.msra.mxu0 %v10958_v46  ;;  %1985 = vmatprep.subr.bf16.mxu1 %v10961_v35  ;;  %v1848_v46 = vpack.c.bf16 %v12399_v55, %v12443_v30  ;;  %v10990_v35 = vld [vmem:[#allocation10 + $0x50] ss:$12 sps:$4 sm:$0xff]  }
 0x926   :  { %10508 = vmatprep.subr.bf16.mxu0 %v10962_v43 }
 0x928   :  { %1986 = vmatpush1.bf16.msra.mxu1 %v10959_v34  ;;  %v10987_v34 = vld [vmem:[#allocation10 + $0x48] ss:$12 sps:$4 sm:$0xff]  }
 0x929   :  { %10509 = vmatpush3.bf16.msra.mxu0 %v10962_v43  ;;  %1987 = vmatprep.subr.bf16.mxu1 %v10965_v47  ;;  %v1809_v43 = vpack.c.bf16 %v12443_v30, %v12399_v55  ;;  %v10993_v47 = vld [vmem:[#allocation10 + $0x64] ss:$12 sps:$4 sm:$0xff]   ;;  %v11001_v30 = vld [vmem:[#allocation10 + $0x94] ss:$12 sps:$4 sm:$0xff]  }
 0x92a   :  { %10510 = vmatprep.subr.bf16.mxu0 %v10966_v0  ;;  %v10995_v55 = vld [vmem:[#allocation10 + $0x78] ss:$12 sps:$4 sm:$0xff]  }
 0x92c   :  { %1988 = vmatpush1.bf16.msra.mxu1 %v10963_v50  ;;  %v10991_v50 = vld [vmem:[#allocation10 + $0x60] ss:$12 sps:$4 sm:$0xff]  }
 0x92d   :  { %10511 = vmatpush3.bf16.msra.mxu0 %v10966_v0  ;;  %1989 = vmatprep.subr.bf16.mxu1 %v10969_v24  ;;  %v10994_v0 = vld [vmem:[#allocation10 + $0x68] ss:$12 sps:$4 sm:$0xff]  }
 0x92e   :  { %10512 = vmatprep.subr.bf16.mxu0 %v10970_v37  ;;  %v10997_v24 = vld [vmem:[#allocation10 + $0x7c] ss:$12 sps:$4 sm:$0xff]  }
 0x930   :  { %1990 = vmatpush1.bf16.msra.mxu1 %v10967_v2  ;;  %v11002_v2 = vld [vmem:[#allocation10 + $0x98] ss:$12 sps:$4 sm:$0xff]  }
 0x931   :  { %10513 = vmatpush3.bf16.msra.mxu0 %v10970_v37  ;;  %1991 = vmatprep.subr.bf16.mxu1 %v10973_v25  ;;  %v10998_v37 = vld [vmem:[#allocation10 + $0x80] ss:$12 sps:$4 sm:$0xff]   ;;  %v10999_v25 = vld [vmem:[#allocation10 + $0x90] ss:$12 sps:$4 sm:$0xff]  }
 0x932   :  { %10514 = vmatprep.subr.bf16.mxu0 %v10974_v41 }
 0x934   :  { %1992 = vmatpush1.bf16.msra.mxu1 %v10971_v26  ;;  %v11006_v26 = vld [vmem:[#allocation10 + $0xb0] ss:$12 sps:$4 sm:$0xff]  }
 0x935   :  { %10515 = vmatpush3.bf16.msra.mxu0 %v10974_v41  ;;  %2243 = vmatprep.subr.bf16.mxu1 %v10977_v38  ;;  %v11005_v41 = vld [vmem:[#allocation10 + $0xac] ss:$12 sps:$4 sm:$0xff]   ;;  %v11003_v38 = vld [vmem:[#allocation10 + $0xa8] ss:$12 sps:$4 sm:$0xff]  }
 0x936   :  { %10524 = vmatprep.subr.bf16.mxu0 %v10978_v27 }
 0x9ea   :  { %v1708_v3 = vpop.f32.mrb[32].mxu1  ;;  %v1749_v28 = vpop.f32.mrb[52].mxu0 }
 0x9eb   :  { %v1755_v22 = vadd.f32 %v1708_v3, %v13388_v49  ;;  %v1710_v29 = vpop.f32.mrb[33].mxu1  ;;  %v10498_v60 = vpop.f32.mrb[53].mxu0  ;;  %v1769_v14 = vadd.f32 %v12394_v39, %v1749_v28  ;;  %v1846_v39 = vpack.c.bf16 %v12575_v54, %v12618_v57  ;;  %v12673_v3 = vld [vmem:[#allocation16] ss:$12 sps:$4 sm:$0xff]   ;;  %v12676_v28 = vld [vmem:[#allocation16 + $0x1c] ss:$12 sps:$4 sm:$0xff]   ;;  %v1810_v49 = vpack.c.bf16 %v12531_v45, %v12487_v36 }
 0x9ec   :  { %v1762_v33 = vadd.f32 %v1710_v29, %v13389_v1  ;;  %v1712_v59 = vpop.f32.mrb[34].mxu1  ;;  %v1752_v63 = vpop.f32.mrb[54].mxu0  ;;  %v1811_v29 = vpack.c.bf16 %v12618_v57, %v12575_v54  ;;  %v12686_v60 = vld [vmem:[#allocation16 + $0x18] ss:$12 sps:$4 sm:$0xff]   ;;  %v12689_v1 = vld [vmem:[#allocation16 + $0x34] ss:$12 sps:$4 sm:$0xff]  }
 0x9ed   :  { %v9248_v61 = vmul.f32 -1.442695, %v1755_v22  ;;  %v1713_v31 = vpop.f32.mrb[35].mxu1  ;;  %v10499_v62 = vpop.f32.mrb[55].mxu0  ;;  %v12681_v22 = vld [vmem:[#allocation16 + $0x8] ss:$12 sps:$4 sm:$0xff]  }
 0x9ee   :  { %v9249_v5 = vmul.f32 -1.442695, %v1762_v33  ;;  %v12693_v36 = vld [vmem:[#allocation16 + $0x20] ss:$12 sps:$4 sm:$0xff]   ;;  %v12697_v45 = vld [vmem:[#allocation16 + $0x30] ss:$12 sps:$4 sm:$0xff]  }
 0x9ef   :  { %11301 = vpow2.f32 %v9248_v61  ;;  %v12700_v54 = vld [vmem:[#allocation16 + $0x4c] ss:$12 sps:$4 sm:$0xff]   ;;  %v12709_v59 = vld [vmem:[#allocation16 + $0x48] ss:$12 sps:$4 sm:$0xff]   ;;  %v12713_v63 = vld [vmem:[#allocation16 + $0x64] ss:$12 sps:$4 sm:$0xff]  }
 0x9f0   :  { %11303 = vpow2.f32 %v9249_v5  ;;  %v12705_v33 = vld [vmem:[#allocation16 + $0x38] ss:$12 sps:$4 sm:$0xff]   ;;  %v12722_v61 = vld [vmem:[#allocation16 + $0x60] ss:$12 sps:$4 sm:$0xff]   ;;  %v12725_v31 = vld [vmem:[#allocation16 + $0x7c] ss:$12 sps:$4 sm:$0xff]  }
 0x9f1   :  { %v12728_v62 = vld [vmem:[#allocation16 + $0x68] ss:$12 sps:$4 sm:$0xff]   ;;  %v12732_v5 = vld [vmem:[#allocation16 + $0x78] ss:$12 sps:$4 sm:$0xff]  }
 0x9f9   :  { %v11302_v6 = vpop.eup %11301 }
 0x9fa   :  { %v1759_v11 = vadd.f32 1.0, %v11302_v6  ;;  %v11304_v32 = vpop.eup %11303  ;;  %v12736_v6 = vld [vmem:[#allocation16 + $0x94] ss:$12 sps:$4 sm:$0xff]  }
 0x9fb   :  { %v1766_v13 = vadd.f32 1.0, %v11304_v32  ;;  %v12743_v32 = vld [vmem:[#allocation16 + $0x90] ss:$12 sps:$4 sm:$0xff]  }
 0x9fc   :  { %11305 = vrcp.f32 %v1759_v11  ;;  %v12739_v11 = vld [vmem:[#allocation16 + $0x80] ss:$12 sps:$4 sm:$0xff]  }
 0x9fd   :  { %11307 = vrcp.f32 %v1766_v13  ;;  %v12746_v13 = vld [vmem:[#allocation16 + $0xac] ss:$12 sps:$4 sm:$0xff]  }
 0xa06   :  { %v11306_v7 = vpop.eup %11305 }
 0xa07   :  { %v1770_v16 = vmul.f32 %v11306_v7, %v1769_v14  ;;  %v11308_v18 = vpop.eup %11307  ;;  %v12749_v14 = vld [vmem:[#allocation16 + $0x98] ss:$12 sps:$4 sm:$0xff]   ;;  %v12753_v7 = vld [vmem:[#allocation16 + $0xa8] ss:$12 sps:$4 sm:$0xff]  }
 0xa08   :  { %v1773_v9 = vsub.f32 1.0, %v11308_v18  ;;  %v1775_v23 = vmul.f32 %v11308_v18, %v12645_v21 }
 0xa09   :  { %v1771_v17 = vadd.f32 %v1770_v16, %v13390_v15  ;;  %v12758_v16 = vld [vmem:[#allocation16 + $0xb0] ss:$12 sps:$4 sm:$0xff]  }
 0xa0a   :  { %v2381_v15 = vld [vmem:[#allocation13] sm:$0x7] }
 0xa0b   :  { %11309 = vtanh.f32 %v1771_v17  ;;  %v13392_v17 = vld [vmem:[#allocation34_spill] sm:$0xff] }
 0xa0c   :  { %v12803_v18 = vrot.slane %v2381_v15, %v13392_v17 }
 0xa15   :  { %v11310_v19 = vpop.eup %11309 }
 0xa16   :  { %v1774_v20 = vmul.f32 %v11310_v19, %v1773_v9  ;;  %v13393_v19 = vld [vmem:[#allocation36_spill] sm:$0xff] }
 0xa18   :  { %v12655_v44 = vadd.f32 %v1775_v23, %v1774_v20  ;;  %v2386_v20 = vrot.slane %v2381_v15, %v13393_v19 }
 0xa1a   :  { %13391 = vst [vmem:[#allocation38_spill] sm:$0xff] %v12655_v44  ;;  %v1845_v10 = vpack.c.bf16 %v12645_v21, %v12655_v44  ;;  %v1812_v57 = vpack.c.bf16 %v12655_v44, %v12645_v21  ;;  %v12716_v21 = vld [vmem:[#allocation16 + $0x50] ss:$12 sps:$4 sm:$0xff]  }
 0xa1c   :  { %2010 = vmatmul.mubr.bf16.vlgmr.msra.gmra.mrb[36].mxu1 %v1845_v10  ;;  %10516 = vmatprep.mubr.bf16.mxu0 %v1845_v10 }
 0xa1d   :  { %2244 = vmatpush1.bf16.msra.mxu1 %v10975_v58  ;;  %10517 = vmatmul.mubr.bf16.vlgmr.msra.gmra.mrb[56].mxu0 %v1846_v39 }
 0xa1e   :  { %10525 = vmatpush3.bf16.msra.mxu0 %v10978_v27  ;;  %10520 = vmatprep.mubr.bf16.mxu0 %v1847_v4  ;;  %v12671_v27 = vld [vmem:[#allocation16 + $0x4] ss:$12 sps:$4 sm:$0xff]  }
 0xa1f   :  { %2245 = vmatprep.subr.bf16.mxu1 %v10981_v42  ;;  %10526 = vmatprep.subr.bf16.mxu0 %v10982_v53 }
 0xa20   :  { %2019 = vmatprep.mubr.bf16.mxu1 %v13387_v52 }
 0xa21   :  { %2246 = vmatpush1.bf16.msra.mxu1 %v10979_v56 }
 0xa22   :  { %10527 = vmatpush3.bf16.msra.mxu0 %v10982_v53  ;;  %2247 = vmatprep.subr.bf16.mxu1 %v10985_v48 }
 0xa23   :  { %10528 = vmatprep.subr.bf16.mxu0 %v10986_v51 }
 0xa24   :  { %2020 = vmatmul.mubr.bf16.gmra.mrb[40].mxu1 %v1846_v39  ;;  %v13394_v39 = vld [vmem:[#allocation37_spill] sm:$0xff] }
 0xa25   :  { %2248 = vmatpush1.bf16.msra.mxu1 %v10983_v8  ;;  %10521 = vmatmul.mubr.bf16.gmra.mrb[60].mxu0 %v1848_v46  ;;  %v2390_v42 = vrot.slane %v2381_v15, %v13394_v39 }
 0xa26   :  { %10529 = vmatpush3.bf16.msra.mxu0 %v10986_v51  ;;  %10540 = vmatprep.mubr.bf16.mxu0 %v1809_v43 }
 0xa27   :  { %2249 = vmatprep.subr.bf16.mxu1 %v10989_v12  ;;  %10530 = vmatprep.subr.bf16.mxu0 %v10990_v35 }
 0xa28   :  { %2029 = vmatprep.mubr.bf16.mxu1 %v13387_v52 }
 0xa29   :  { %2250 = vmatpush1.bf16.msra.mxu1 %v10987_v34 }
 0xa2a   :  { %10531 = vmatpush3.bf16.msra.mxu0 %v10990_v35  ;;  %2251 = vmatprep.subr.bf16.mxu1 %v10993_v47 }
 0xa2b   :  { %10532 = vmatprep.subr.bf16.mxu0 %v10994_v0 }
 0xa2c   :  { %2030 = vmatmul.mubr.bf16.gmra.mrb[44].mxu1 %v1847_v4 }
 0xa2d   :  { %2252 = vmatpush1.bf16.msra.mxu1 %v10991_v50  ;;  %2039 = vmatprep.mubr.bf16.mxu1 %v13387_v52 }
 0xa2e   :  { %10533 = vmatpush3.bf16.msra.mxu0 %v10994_v0  ;;  %2253 = vmatprep.subr.bf16.mxu1 %v10997_v24 }
 0xa2f   :  { %10534 = vmatprep.subr.bf16.mxu0 %v10998_v37 }
 0xa31   :  { %2254 = vmatpush1.bf16.msra.mxu1 %v10995_v55 }
 0xa32   :  { %10535 = vmatpush3.bf16.msra.mxu0 %v10998_v37  ;;  %2255 = vmatprep.subr.bf16.mxu1 %v11001_v30 }
 0xa33   :  { %10536 = vmatprep.subr.bf16.mxu0 %v11002_v2 }
 0xa34   :  { %2040 = vmatmul.mubr.bf16.gmra.mrb[48].mxu1 %v1848_v46 }
 0xa35   :  { %2256 = vmatpush1.bf16.msra.mxu1 %v10999_v25  ;;  %2275 = vmatprep.mubr.bf16.mxu1 %v13387_v52 }
 0xa36   :  { %10537 = vmatpush3.bf16.msra.mxu0 %v11002_v2  ;;  %2257 = vmatprep.subr.bf16.mxu1 %v11005_v41 }
 0xa37   :  { %10538 = vmatprep.subr.bf16.mxu0 %v11006_v26 }
 0xa39   :  { %2258 = vmatpush1.bf16.msra.mxu1 %v11003_v38 }
 0xa3a   :  { %10539 = vmatpush3.bf16.msra.mxu0 %v11006_v26  ;;  %2550 = vmatprep.subr.bf16.mxu1 %v12671_v27 }
 0xa3b   :  { %10548 = vmatprep.subr.bf16.mxu0 %v13386_v40 }
 0xa3c   :  { %2276 = vmatmul.mubr.bf16.vlgmr.msra.gmra.mrb[36].mxu1 %v1809_v43 }
 0xa3d   :  { %10541 = vmatmul.mubr.bf16.vlgmr.msra.gmra.mrb[56].mxu0 %v1810_v49  ;;  %2551 = vmatpush1.bf16.msra.mxu1 %v12673_v3 }
 0xa3e   :  { %10544 = vmatprep.mubr.bf16.mxu0 %v1811_v29  ;;  %2552 = vmatprep.subr.bf16.mxu1 %v12676_v28 }
 0xa3f   :  { %2285 = vmatprep.mubr.bf16.mxu1 %v13387_v52  ;;  %10549 = vmatpush3.bf16.msra.mxu0 %v12681_v22 }
 0xa40   :  { %10550 = vmatprep.subr.bf16.mxu0 %v13386_v40 }
 0xa41   :  { %2553 = vmatpush1.bf16.msra.mxu1 %v12686_v60 }
 0xa42   :  { %2554 = vmatprep.subr.bf16.mxu1 %v12689_v1 }
 0xa43   :  { %10551 = vmatpush3.bf16.msra.mxu0 %v12693_v36 }
 0xa44   :  { %2286 = vmatmul.mubr.bf16.gmra.mrb[40].mxu1 %v1810_v49  ;;  %10552 = vmatprep.subr.bf16.mxu0 %v13386_v40 }
 0xa45   :  { %10545 = vmatmul.mubr.bf16.gmra.mrb[60].mxu0 %v1812_v57  ;;  %2555 = vmatpush1.bf16.msra.mxu1 %v12697_v45 }
 0xa46   :  { %2556 = vmatprep.subr.bf16.mxu1 %v12700_v54  ;;  %2295 = vmatprep.mubr.bf16.mxu1 %v13387_v52 }
 0xa47   :  { %10553 = vmatpush3.bf16.msra.mxu0 %v12705_v33  ;;  %10564 = vmatprep.mubr.msk.bf16.mxu0 %vm11795_vm3, %v13386_v40 }
 0xa48   :  { %10554 = vmatprep.subr.bf16.mxu0 %v13386_v40 }
 0xa49   :  { %2557 = vmatpush1.bf16.msra.mxu1 %v12709_v59 }
 0xa4a   :  { %2558 = vmatprep.subr.bf16.mxu1 %v12713_v63 }
 0xa4b   :  { %10555 = vmatpush3.bf16.msra.mxu0 %v12716_v21 }
 0xa4c   :  { %2296 = vmatmul.mubr.bf16.gmra.mrb[44].mxu1 %v1811_v29  ;;  %10556 = vmatprep.subr.bf16.mxu0 %v13386_v40 }
 0xa4d   :  { %2559 = vmatpush1.bf16.msra.mxu1 %v12722_v61  ;;  %2305 = vmatprep.mubr.bf16.mxu1 %v13387_v52 }
 0xa4e   :  { %2560 = vmatprep.subr.bf16.mxu1 %v12725_v31 }
 0xa4f   :  { %10557 = vmatpush3.bf16.msra.mxu0 %v12728_v62 }
 0xa50   :  { %10558 = vmatprep.subr.bf16.mxu0 %v13386_v40 }
 0xa51   :  { %2561 = vmatpush1.bf16.msra.mxu1 %v12732_v5 }
 0xa52   :  { %2562 = vmatprep.subr.bf16.mxu1 %v12736_v6 }
 0xa53   :  { %10559 = vmatpush3.bf16.msra.mxu0 %v12739_v11 }
 0xa54   :  { %2306 = vmatmul.mubr.bf16.gmra.mrb[48].mxu1 %v1812_v57  ;;  %10560 = vmatprep.subr.bf16.mxu0 %v13386_v40 }
 0xa55   :  { %2563 = vmatpush1.bf16.msra.mxu1 %v12743_v32  ;;  %2582 = vmatprep.mubr.bf16.mxu1 %v13387_v52 }
 0xa56   :  { %2564 = vmatprep.subr.bf16.mxu1 %v12746_v13 }
 0xa57   :  { %10561 = vmatpush3.bf16.msra.mxu0 %v12749_v14 }
 0xa58   :  { %10562 = vmatprep.subr.bf16.mxu0 %v13386_v40 }
 0xa59   :  { %2565 = vmatpush1.bf16.msra.mxu1 %v12753_v7 }
 0xa5a   :  { %2654 = vmatprep.subr.bf16.mxu1 %v12671_v27 }
 0xa5b   :  { %10563 = vmatpush3.bf16.msra.mxu0 %v12758_v16 }
 0xa5c   :  { %2583 = vmatmul.mubr.bf16.vlgmr.msra.gmra.mrb[52].mxu1 %v13387_v52  ;;  %10568 = vmatprep.subr.bf16.mxu0 %v13386_v40 }
 0xa5d   :  { %2655 = vmatpush1.bf16.msra.mxu1 %v12673_v3  ;;  %2686 = vmatprep.mubr.bf16.mxu1 %v13387_v52 }
 0xa5e   :  { %10565 = vmatmul.mubr.bf16.vlgmr.msra.gmra.mrb[64].mxu0 %v13387_v52  ;;  %2656 = vmatprep.subr.bf16.mxu1 %v12676_v28 }
 0xa5f   :  { %10569 = vmatpush3.bf16.msra.mxu0 %v12681_v22  ;;  %10584 = vmatprep.mubr.msk.bf16.mxu0 %vm11795_vm3, %v13386_v40 }
 0xa60   :  { %10570 = vmatprep.subr.bf16.mxu0 %v13386_v40 }
 0xa61   :  { %2657 = vmatpush1.bf16.msra.mxu1 %v12686_v60 }
 0xa62   :  { %2658 = vmatprep.subr.bf16.mxu1 %v12689_v1 }
 0xa63   :  { %10571 = vmatpush3.bf16.msra.mxu0 %v12693_v36 }
 0xa64   :  { %10572 = vmatprep.subr.bf16.mxu0 %v13386_v40 }
 0xa65   :  { %2659 = vmatpush1.bf16.msra.mxu1 %v12697_v45 }
 0xa66   :  { %2660 = vmatprep.subr.bf16.mxu1 %v12700_v54 }
 0xa67   :  { %10573 = vmatpush3.bf16.msra.mxu0 %v12705_v33 }
 0xa68   :  { %10574 = vmatprep.subr.bf16.mxu0 %v13386_v40 }
 0xa69   :  { %2661 = vmatpush1.bf16.msra.mxu1 %v12709_v59 }
 0xa6a   :  { %2662 = vmatprep.subr.bf16.mxu1 %v12713_v63 }
 0xa6b   :  { %10575 = vmatpush3.bf16.msra.mxu0 %v12716_v21 }
 0xa6c   :  { %10576 = vmatprep.subr.bf16.mxu0 %v13386_v40 }
 0xa6d   :  { %2663 = vmatpush1.bf16.msra.mxu1 %v12722_v61 }
 0xa6e   :  { %2664 = vmatprep.subr.bf16.mxu1 %v12725_v31 }
 0xa6f   :  { %10577 = vmatpush3.bf16.msra.mxu0 %v12728_v62 }
 0xa70   :  { %10578 = vmatprep.subr.bf16.mxu0 %v13386_v40 }
 0xa71   :  { %2665 = vmatpush1.bf16.msra.mxu1 %v12732_v5 }
 0xa72   :  { %2666 = vmatprep.subr.bf16.mxu1 %v12736_v6 }
 0xa73   :  { %10579 = vmatpush3.bf16.msra.mxu0 %v12739_v11 }
 0xa74   :  { %10580 = vmatprep.subr.bf16.mxu0 %v13386_v40 }
 0xa75   :  { %2667 = vmatpush1.bf16.msra.mxu1 %v12743_v32 }
 0xa76   :  { %2668 = vmatprep.subr.bf16.mxu1 %v12746_v13 }
 0xa77   :  { %10581 = vmatpush3.bf16.msra.mxu0 %v12749_v14 }
 0xa78   :  { %10582 = vmatprep.subr.bf16.mxu0 %v13386_v40 }
 0xa79   :  { %2669 = vmatpush1.bf16.msra.mxu1 %v12753_v7 }
 0xa7a   :  { %2758 = vmatprep.subr.bf16.mxu1 %v12671_v27 }
 0xa7b   :  { %10583 = vmatpush3.bf16.msra.mxu0 %v12758_v16 }
 0xa7c   :  { %10588 = vmatprep.subr.bf16.mxu0 %v13386_v40 }
 0xb0f   :  { %v2277_v9 = vpop.f32.mrb[36].mxu1 }
 0xb10   :  { %v10542_v23 = vpop.f32.mrb[56].mxu0  ;;  %v2279_v58 = vpop.f32.mrb[37].mxu1 }
 0xb11   :  { %v12807_v10 = vadd.f32 %v10542_v23, %v12803_v18  ;;  %v12810_v53 = vpop.f32.mrb[57].mxu0  ;;  %v2281_v4 = vpop.f32.mrb[38].mxu1  ;;  %v2399_v17 = vadd.f32 %v2390_v42, %v2279_v58 }
 0xb12   :  { %v12812_v56 = vadd.f32 %v2386_v20, %v2281_v4  ;;  %v10543_v48 = vpop.f32.mrb[58].mxu0  ;;  %v2283_v51 = vpop.f32.mrb[39].mxu1 }
 0xb13   :  { %v12815_v8 = vadd.f32 %v10543_v48, %v12803_v18  ;;  %v12817_v46 = vadd.f32 %v2390_v42, %v2283_v51  ;;  %v2353_v12 = vpop.f32.mrb[59].mxu0 }
 0xb14   :  { %v12820_v35 = vadd.f32 %v12803_v18, %v2353_v12 }
 0xb17   :  { %v2287_v43 = vpop.f32.mrb[40].mxu1 }
 0xb18   :  { %v12822_v34 = vadd.f32 %v2386_v20, %v2287_v43  ;;  %v10546_v47 = vpop.f32.mrb[60].mxu0  ;;  %v2289_v0 = vpop.f32.mrb[41].mxu1 }
 0xb19   :  { %v12825_v50 = vadd.f32 %v10546_v47, %v12803_v18  ;;  %v12827_v24 = vadd.f32 %v2390_v42, %v2289_v0  ;;  %v2366_v37 = vpop.f32.mrb[61].mxu0  ;;  %v2291_v55 = vpop.f32.mrb[42].mxu1 }
 0xb1a   :  { %v12830_v30 = vadd.f32 %v12803_v18, %v2366_v37  ;;  %v12832_v2 = vadd.f32 %v2386_v20, %v2291_v55  ;;  %v10547_v25 = vpop.f32.mrb[62].mxu0  ;;  %v2293_v41 = vpop.f32.mrb[43].mxu1 }
 0xb1b   :  { %13395 = vst [vmem:[#allocation39_spill] sm:$0xff] %v12825_v50  ;;  %v12835_v26 = vadd.f32 %v10547_v25, %v12803_v18  ;;  %v12837_v38 = vadd.f32 %v2390_v42, %v2293_v41  ;;  %v2369_v49 = vpop.f32.mrb[63].mxu0 }
 0xb1c   :  { %v12840_v29 = vadd.f32 %v12803_v18, %v2369_v49 }
 0xb1d   :  { %13396 = vst [vmem:[#allocation35_spill] sm:$0xff] %v12835_v26 }
 0xb1e   :  { %13397 = vst [vmem:[#allocation40_spill] sm:$0xff] %v12840_v29 }
 0xb1f   :  { %v2297_v57 = vpop.f32.mrb[44].mxu1 }
 0xb20   :  { %v12842_v15 = vadd.f32 %v2386_v20, %v2297_v57  ;;  %v2299_v23 = vpop.f32.mrb[45].mxu1 }
 0xb21   :  { %v12844_v4 = vadd.f32 %v2390_v42, %v2299_v23  ;;  %v2301_v48 = vpop.f32.mrb[46].mxu1  ;;  %v2398_v23 = vadd.f32 %v2386_v20, %v2277_v9  ;;  %v12858_v9 = vld [vmem:[#allocation15] ss:$0 sm:$0xff] }
 0xb22   :  { %v12846_v51 = vadd.f32 %v2386_v20, %v2301_v48  ;;  %v2303_v12 = vpop.f32.mrb[47].mxu1 }
 0xb23   :  { %v12848_v43 = vadd.f32 %v2390_v42, %v2303_v12 }
 0xb27   :  { %v2307_v47 = vpop.f32.mrb[48].mxu1 }
 0xb28   :  { %v12850_v0 = vadd.f32 %v2386_v20, %v2307_v47  ;;  %v2309_v37 = vpop.f32.mrb[49].mxu1 }
 0xb29   :  { %v12852_v55 = vadd.f32 %v2390_v42, %v2309_v37  ;;  %v2311_v25 = vpop.f32.mrb[50].mxu1 }
 0xb2a   :  { %13398 = vst [vmem:[#allocation41_spill] sm:$0xff] %v12850_v0  ;;  %v12854_v41 = vadd.f32 %v2386_v20, %v2311_v25  ;;  %v2313_v49 = vpop.f32.mrb[51].mxu1 }
 0xb2b   :  { %13399 = vst [vmem:[#allocation42_spill] sm:$0xff] %v12852_v55  ;;  %v12856_v57 = vadd.f32 %v2390_v42, %v2313_v49 }
 0xb2c   :  { %13400 = vst [vmem:[#allocation43_spill] sm:$0xff] %v12854_v41 }
 0xb2f   :  { %v2584_v39 = vpop.f32.mrb[52].mxu1 }
 0xb30   :  { %v2631_v48 = vadd.f32 %v2584_v39, %v2398_v23  ;;  %v2586_v19 = vpop.f32.mrb[53].mxu1 }
 0xb31   :  { %v2638_v44 = vadd.f32 %v2586_v19, %v2399_v17  ;;  %v2588_v12 = vpop.f32.mrb[54].mxu1  ;;  %v2625_v26 = vpop.f32.mrb[64].mxu0  ;;  %v2400_v19 = vadd.f32 %v12803_v18, %v12810_v53 }
 0xb32   :  { %v9322_v50 = vmul.f32 -1.442695, %v2631_v48  ;;  %v2589_v47 = vpop.f32.mrb[55].mxu1  ;;  %v10566_v0 = vpop.f32.mrb[65].mxu0  ;;  %v2645_v58 = vadd.f32 %v12858_v9, %v2625_v26 }
 0xb33   :  { %v2628_v29 = vpop.f32.mrb[66].mxu0  ;;  %v9323_v55 = vmul.f32 -1.442695, %v2638_v44 }
 0xb34   :  { %11311 = vpow2.f32 %v9322_v50  ;;  %v10567_v37 = vpop.f32.mrb[67].mxu0 }
 0xb35   :  { %11313 = vpow2.f32 %v9323_v55 }
 0xb3e   :  { %v11312_v25 = vpop.eup %11311 }
 0xb3f   :  { %v2635_v41 = vadd.f32 1.0, %v11312_v25  ;;  %v11314_v49 = vpop.eup %11313 }
 0xb40   :  { %v2642_v20 = vadd.f32 1.0, %v11314_v49 }
 0xb41   :  { %11315 = vrcp.f32 %v2635_v41 }
 0xb42   :  { %11317 = vrcp.f32 %v2642_v20 }
 0xb4b   :  { %v11316_v17 = vpop.eup %11315 }
 0xb4c   :  { %v2646_v39 = vmul.f32 %v11316_v17, %v2645_v58  ;;  %v11318_v50 = vpop.eup %11317 }
 0xb4d   :  { %v2649_v44 = vsub.f32 1.0, %v11318_v50  ;;  %v2651_v0 = vmul.f32 0.0, %v11318_v50 }
 0xb4e   :  { %v2647_v42 = vadd.f32 %v2646_v39, %v2400_v19 }
 0xb50   :  { %11319 = vtanh.f32 %v2647_v42 }
 0xb5a   :  { %v11320_v29 = vpop.eup %11319 }
 0xb5b   :  { %v2650_v55 = vmul.f32 %v11320_v29, %v2649_v44 }
 0xb5d   :  { %v12863_v41 = vadd.f32 %v2651_v0, %v2650_v55 }
 0xb5f   :  { %v12867_v23 = vpack.c.bf16 %v12863_v41, %v12863_v41 }
 0xb61   :  { %2687 = vmatmul.mubr.bf16.vlgmr.msra.gmra.mrb[56].mxu1 %v12867_v23  ;;  %10585 = vmatmul.mubr.bf16.vlgmr.msra.gmra.mrb[68].mxu0 %v12867_v23 }
 0xb62   :  { %2759 = vmatpush1.bf16.msra.mxu1 %v12673_v3  ;;  %10589 = vmatpush3.bf16.msra.mxu0 %v12681_v22 }
 0xb63   :  { %2760 = vmatprep.subr.bf16.mxu1 %v12676_v28  ;;  %10590 = vmatprep.subr.bf16.mxu0 %v13386_v40 }
 0xb64   :  { %2790 = vmatprep.mubr.bf16.mxu1 %v13387_v52  ;;  %10604 = vmatprep.mubr.msk.bf16.mxu0 %vm11795_vm3, %v13386_v40 }
 0xb66   :  { %2761 = vmatpush1.bf16.msra.mxu1 %v12686_v60  ;;  %10591 = vmatpush3.bf16.msra.mxu0 %v12693_v36 }
 0xb67   :  { %2762 = vmatprep.subr.bf16.mxu1 %v12689_v1  ;;  %10592 = vmatprep.subr.bf16.mxu0 %v13386_v40 }
 0xb6a   :  { %2763 = vmatpush1.bf16.msra.mxu1 %v12697_v45  ;;  %10593 = vmatpush3.bf16.msra.mxu0 %v12705_v33 }
 0xb6b   :  { %2764 = vmatprep.subr.bf16.mxu1 %v12700_v54  ;;  %10594 = vmatprep.subr.bf16.mxu0 %v13386_v40 }
 0xb6e   :  { %2765 = vmatpush1.bf16.msra.mxu1 %v12709_v59  ;;  %10595 = vmatpush3.bf16.msra.mxu0 %v12716_v21 }
 0xb6f   :  { %2766 = vmatprep.subr.bf16.mxu1 %v12713_v63  ;;  %10596 = vmatprep.subr.bf16.mxu0 %v13386_v40 }
 0xb72   :  { %2767 = vmatpush1.bf16.msra.mxu1 %v12722_v61  ;;  %10597 = vmatpush3.bf16.msra.mxu0 %v12728_v62 }
 0xb73   :  { %2768 = vmatprep.subr.bf16.mxu1 %v12725_v31  ;;  %10598 = vmatprep.subr.bf16.mxu0 %v13386_v40 }
 0xb76   :  { %2769 = vmatpush1.bf16.msra.mxu1 %v12732_v5  ;;  %10599 = vmatpush3.bf16.msra.mxu0 %v12739_v11 }
 0xb77   :  { %2770 = vmatprep.subr.bf16.mxu1 %v12736_v6  ;;  %10600 = vmatprep.subr.bf16.mxu0 %v13386_v40 }
 0xb7a   :  { %2771 = vmatpush1.bf16.msra.mxu1 %v12743_v32  ;;  %10601 = vmatpush3.bf16.msra.mxu0 %v12749_v14 }
 0xb7b   :  { %2772 = vmatprep.subr.bf16.mxu1 %v12746_v13  ;;  %10602 = vmatprep.subr.bf16.mxu0 %v13386_v40 }
 0xb7e   :  { %2773 = vmatpush1.bf16.msra.mxu1 %v12753_v7  ;;  %10603 = vmatpush3.bf16.msra.mxu0 %v12758_v16 }
 0xb7f   :  { %2862 = vmatprep.subr.bf16.mxu1 %v12671_v27  ;;  %10608 = vmatprep.subr.bf16.mxu0 %v13386_v40 }
 0xc34   :  { %v2688_v18 = vpop.f32.mrb[56].mxu1  ;;  %v2729_v53 = vpop.f32.mrb[68].mxu0 }
 0xc35   :  { %v2735_v26 = vadd.f32 %v2688_v18, %v12812_v56  ;;  %v2690_v48 = vpop.f32.mrb[57].mxu1  ;;  %v10586_v12 = vpop.f32.mrb[69].mxu0  ;;  %v2749_v44 = vadd.f32 %v12858_v9, %v2729_v53 }
 0xc36   :  { %v2742_v47 = vadd.f32 %v2690_v48, %v12817_v46  ;;  %v2692_v37 = vpop.f32.mrb[58].mxu1  ;;  %v2732_v25 = vpop.f32.mrb[70].mxu0 }
 0xc37   :  { %v9324_v49 = vmul.f32 -1.442695, %v2735_v26  ;;  %v2693_v20 = vpop.f32.mrb[59].mxu1  ;;  %v10587_v58 = vpop.f32.mrb[71].mxu0 }
 0xc38   :  { %v9325_v17 = vmul.f32 -1.442695, %v2742_v47 }
 0xc39   :  { %11321 = vpow2.f32 %v9324_v49 }
 0xc3a   :  { %11323 = vpow2.f32 %v9325_v17 }
 0xc43   :  { %v11322_v19 = vpop.eup %11321 }
 0xc44   :  { %v2739_v39 = vadd.f32 1.0, %v11322_v19  ;;  %v11324_v42 = vpop.eup %11323 }
 0xc45   :  { %v2746_v50 = vadd.f32 1.0, %v11324_v42 }
 0xc46   :  { %11325 = vrcp.f32 %v2739_v39 }
 0xc47   :  { %11327 = vrcp.f32 %v2746_v50 }
 0xc50   :  { %v11326_v56 = vpop.eup %11325 }
 0xc51   :  { %v2750_v29 = vmul.f32 %v11326_v56, %v2749_v44  ;;  %v11328_v0 = vpop.eup %11327 }
 0xc52   :  { %v2753_v55 = vsub.f32 1.0, %v11328_v0  ;;  %v2755_v48 = vmul.f32 %v11328_v0, %v12863_v41 }
 0xc53   :  { %v2751_v46 = vadd.f32 %v2750_v29, %v12820_v35 }
 0xc55   :  { %11329 = vtanh.f32 %v2751_v46 }
 0xc5f   :  { %v11330_v18 = vpop.eup %11329 }
 0xc60   :  { %v2754_v26 = vmul.f32 %v11330_v18, %v2753_v55 }
 0xc62   :  { %v12911_v12 = vadd.f32 %v2755_v48, %v2754_v26 }
 0xc64   :  { %v12915_v47 = vpack.c.bf16 %v12911_v12, %v12911_v12 }
 0xc66   :  { %2791 = vmatmul.mubr.bf16.vlgmr.msra.gmra.mrb[60].mxu1 %v12915_v47  ;;  %10605 = vmatmul.mubr.bf16.vlgmr.msra.gmra.mrb[72].mxu0 %v12915_v47 }
 0xc67   :  { %2863 = vmatpush1.bf16.msra.mxu1 %v12673_v3  ;;  %10609 = vmatpush3.bf16.msra.mxu0 %v12681_v22 }
 0xc68   :  { %2864 = vmatprep.subr.bf16.mxu1 %v12676_v28  ;;  %10610 = vmatprep.subr.bf16.mxu0 %v13386_v40 }
 0xc69   :  { %2894 = vmatprep.mubr.bf16.mxu1 %v13387_v52  ;;  %10624 = vmatprep.mubr.msk.bf16.mxu0 %vm11795_vm3, %v13386_v40 }
 0xc6b   :  { %2865 = vmatpush1.bf16.msra.mxu1 %v12686_v60  ;;  %10611 = vmatpush3.bf16.msra.mxu0 %v12693_v36 }
 0xc6c   :  { %2866 = vmatprep.subr.bf16.mxu1 %v12689_v1  ;;  %10612 = vmatprep.subr.bf16.mxu0 %v13386_v40 }
 0xc6f   :  { %2867 = vmatpush1.bf16.msra.mxu1 %v12697_v45  ;;  %10613 = vmatpush3.bf16.msra.mxu0 %v12705_v33 }
 0xc70   :  { %2868 = vmatprep.subr.bf16.mxu1 %v12700_v54  ;;  %10614 = vmatprep.subr.bf16.mxu0 %v13386_v40 }
 0xc73   :  { %2869 = vmatpush1.bf16.msra.mxu1 %v12709_v59  ;;  %10615 = vmatpush3.bf16.msra.mxu0 %v12716_v21 }
 0xc74   :  { %2870 = vmatprep.subr.bf16.mxu1 %v12713_v63  ;;  %10616 = vmatprep.subr.bf16.mxu0 %v13386_v40 }
 0xc77   :  { %2871 = vmatpush1.bf16.msra.mxu1 %v12722_v61  ;;  %10617 = vmatpush3.bf16.msra.mxu0 %v12728_v62 }
 0xc78   :  { %2872 = vmatprep.subr.bf16.mxu1 %v12725_v31  ;;  %10618 = vmatprep.subr.bf16.mxu0 %v13386_v40 }
 0xc7b   :  { %2873 = vmatpush1.bf16.msra.mxu1 %v12732_v5  ;;  %10619 = vmatpush3.bf16.msra.mxu0 %v12739_v11 }
 0xc7c   :  { %2874 = vmatprep.subr.bf16.mxu1 %v12736_v6  ;;  %10620 = vmatprep.subr.bf16.mxu0 %v13386_v40 }
 0xc7f   :  { %2875 = vmatpush1.bf16.msra.mxu1 %v12743_v32  ;;  %10621 = vmatpush3.bf16.msra.mxu0 %v12749_v14 }
 0xc80   :  { %2876 = vmatprep.subr.bf16.mxu1 %v12746_v13  ;;  %10622 = vmatprep.subr.bf16.mxu0 %v13386_v40 }
 0xc83   :  { %2877 = vmatpush1.bf16.msra.mxu1 %v12753_v7  ;;  %10623 = vmatpush3.bf16.msra.mxu0 %v12758_v16 }
 0xc84   :  { %2966 = vmatprep.subr.bf16.mxu1 %v12671_v27  ;;  %10628 = vmatprep.subr.bf16.mxu0 %v13386_v40 }
 0xd39   :  { %v2792_v35 = vpop.f32.mrb[60].mxu1  ;;  %v2833_v41 = vpop.f32.mrb[72].mxu0 }
 0xd3a   :  { %v2839_v53 = vadd.f32 %v2792_v35, %v12822_v34  ;;  %v2794_v37 = vpop.f32.mrb[61].mxu1  ;;  %v10606_v25 = vpop.f32.mrb[73].mxu0  ;;  %v2853_v46 = vadd.f32 %v12858_v9, %v2833_v41 }
 0xd3b   :  { %v2846_v49 = vadd.f32 %v2794_v37, %v12827_v24  ;;  %v2796_v20 = vpop.f32.mrb[62].mxu1  ;;  %v2836_v58 = vpop.f32.mrb[74].mxu0 }
 0xd3c   :  { %v9326_v17 = vmul.f32 -1.442695, %v2839_v53  ;;  %v2797_v19 = vpop.f32.mrb[63].mxu1  ;;  %v10607_v39 = vpop.f32.mrb[75].mxu0 }
 0xd3d   :  { %v9327_v42 = vmul.f32 -1.442695, %v2846_v49 }
 0xd3e   :  { %11331 = vpow2.f32 %v9326_v17 }
 0xd3f   :  { %11333 = vpow2.f32 %v9327_v42 }
 0xd48   :  { %v11332_v50 = vpop.eup %11331 }
 0xd49   :  { %v2843_v44 = vadd.f32 1.0, %v11332_v50  ;;  %v11334_v56 = vpop.eup %11333 }
 0xd4a   :  { %v2850_v29 = vadd.f32 1.0, %v11334_v56 }
 0xd4b   :  { %11335 = vrcp.f32 %v2843_v44 }
 0xd4c   :  { %11337 = vrcp.f32 %v2850_v29 }
 0xd55   :  { %v11336_v34 = vpop.eup %11335 }
 0xd56   :  { %v2854_v0 = vmul.f32 %v11336_v34, %v2853_v46  ;;  %v11338_v55 = vpop.eup %11337 }
 0xd57   :  { %v2857_v18 = vsub.f32 1.0, %v11338_v55  ;;  %v2859_v35 = vmul.f32 %v11338_v55, %v12911_v12 }
 0xd58   :  { %v2855_v24 = vadd.f32 %v2854_v0, %v12807_v10 }
 0xd5a   :  { %11339 = vtanh.f32 %v2855_v24 }
 0xd64   :  { %v11340_v26 = vpop.eup %11339 }
 0xd65   :  { %v2858_v48 = vmul.f32 %v11340_v26, %v2857_v18 }
 0xd67   :  { %v12959_v53 = vadd.f32 %v2859_v35, %v2858_v48 }
 0xd69   :  { %v12963_v37 = vpack.c.bf16 %v12959_v53, %v12959_v53 }
 0xd6b   :  { %2895 = vmatmul.mubr.bf16.vlgmr.msra.gmra.mrb[64].mxu1 %v12963_v37  ;;  %10625 = vmatmul.mubr.bf16.vlgmr.msra.gmra.mrb[76].mxu0 %v12963_v37 }
 0xd6c   :  { %2967 = vmatpush1.bf16.msra.mxu1 %v12673_v3  ;;  %10629 = vmatpush3.bf16.msra.mxu0 %v12681_v22 }
 0xd6d   :  { %2968 = vmatprep.subr.bf16.mxu1 %v12676_v28  ;;  %10630 = vmatprep.subr.bf16.mxu0 %v13386_v40 }
 0xd6e   :  { %2998 = vmatprep.mubr.bf16.mxu1 %v13387_v52  ;;  %10644 = vmatprep.mubr.msk.bf16.mxu0 %vm11795_vm3, %v13386_v40 }
 0xd70   :  { %2969 = vmatpush1.bf16.msra.mxu1 %v12686_v60  ;;  %10631 = vmatpush3.bf16.msra.mxu0 %v12693_v36 }
 0xd71   :  { %2970 = vmatprep.subr.bf16.mxu1 %v12689_v1  ;;  %10632 = vmatprep.subr.bf16.mxu0 %v13386_v40 }
 0xd74   :  { %2971 = vmatpush1.bf16.msra.mxu1 %v12697_v45  ;;  %10633 = vmatpush3.bf16.msra.mxu0 %v12705_v33 }
 0xd75   :  { %2972 = vmatprep.subr.bf16.mxu1 %v12700_v54  ;;  %10634 = vmatprep.subr.bf16.mxu0 %v13386_v40 }
 0xd78   :  { %2973 = vmatpush1.bf16.msra.mxu1 %v12709_v59  ;;  %10635 = vmatpush3.bf16.msra.mxu0 %v12716_v21 }
 0xd79   :  { %2974 = vmatprep.subr.bf16.mxu1 %v12713_v63  ;;  %10636 = vmatprep.subr.bf16.mxu0 %v13386_v40 }
 0xd7c   :  { %2975 = vmatpush1.bf16.msra.mxu1 %v12722_v61  ;;  %10637 = vmatpush3.bf16.msra.mxu0 %v12728_v62 }
 0xd7d   :  { %2976 = vmatprep.subr.bf16.mxu1 %v12725_v31  ;;  %10638 = vmatprep.subr.bf16.mxu0 %v13386_v40 }
 0xd80   :  { %2977 = vmatpush1.bf16.msra.mxu1 %v12732_v5  ;;  %10639 = vmatpush3.bf16.msra.mxu0 %v12739_v11 }
 0xd81   :  { %2978 = vmatprep.subr.bf16.mxu1 %v12736_v6  ;;  %10640 = vmatprep.subr.bf16.mxu0 %v13386_v40 }
 0xd84   :  { %2979 = vmatpush1.bf16.msra.mxu1 %v12743_v32  ;;  %10641 = vmatpush3.bf16.msra.mxu0 %v12749_v14 }
 0xd85   :  { %2980 = vmatprep.subr.bf16.mxu1 %v12746_v13  ;;  %10642 = vmatprep.subr.bf16.mxu0 %v13386_v40 }
 0xd88   :  { %2981 = vmatpush1.bf16.msra.mxu1 %v12753_v7  ;;  %10643 = vmatpush3.bf16.msra.mxu0 %v12758_v16 }
 0xd89   :  { %3070 = vmatprep.subr.bf16.mxu1 %v12671_v27  ;;  %10648 = vmatprep.subr.bf16.mxu0 %v13386_v40 }
 0xe3e   :  { %v2896_v10 = vpop.f32.mrb[64].mxu1  ;;  %v2937_v12 = vpop.f32.mrb[76].mxu0 }
 0xe3f   :  { %v2943_v41 = vadd.f32 %v2896_v10, %v12832_v2  ;;  %v2898_v25 = vpop.f32.mrb[65].mxu1  ;;  %v10626_v49 = vpop.f32.mrb[77].mxu0  ;;  %v2957_v34 = vadd.f32 %v12858_v9, %v2937_v12 }
 0xe40   :  { %v2950_v20 = vadd.f32 %v2898_v25, %v12837_v38  ;;  %v2900_v58 = vpop.f32.mrb[66].mxu1  ;;  %v2940_v17 = vpop.f32.mrb[78].mxu0 }
 0xe41   :  { %v9328_v19 = vmul.f32 -1.442695, %v2943_v41  ;;  %v2901_v39 = vpop.f32.mrb[67].mxu1  ;;  %v10627_v42 = vpop.f32.mrb[79].mxu0 }
 0xe42   :  { %v9329_v50 = vmul.f32 -1.442695, %v2950_v20 }
 0xe43   :  { %11341 = vpow2.f32 %v9328_v19 }
 0xe44   :  { %11343 = vpow2.f32 %v9329_v50 }
 0xe4d   :  { %v11342_v44 = vpop.eup %11341 }
 0xe4e   :  { %v2947_v56 = vadd.f32 1.0, %v11342_v44  ;;  %v11344_v29 = vpop.eup %11343 }
 0xe4f   :  { %v2954_v46 = vadd.f32 1.0, %v11344_v29 }
 0xe50   :  { %11345 = vrcp.f32 %v2947_v56 }
 0xe51   :  { %11347 = vrcp.f32 %v2954_v46 }
 0xe5a   :  { %v11346_v2 = vpop.eup %11345 }
 0xe5b   :  { %v2958_v0 = vmul.f32 %v11346_v2, %v2957_v34  ;;  %v11348_v24 = vpop.eup %11347 }
 0xe5c   :  { %v2961_v55 = vsub.f32 1.0, %v11348_v24  ;;  %v2963_v48 = vmul.f32 %v11348_v24, %v12959_v53 }
 0xe5d   :  { %v2959_v38 = vadd.f32 %v2958_v0, %v12815_v8 }
 0xe5f   :  { %11349 = vtanh.f32 %v2959_v38 }
 0xe69   :  { %v11350_v18 = vpop.eup %11349 }
 0xe6a   :  { %v2962_v26 = vmul.f32 %v11350_v18, %v2961_v55 }
 0xe6c   :  { %v13007_v35 = vadd.f32 %v2963_v48, %v2962_v26 }
 0xe6e   :  { %v13011_v10 = vpack.c.bf16 %v13007_v35, %v13007_v35 }
 0xe70   :  { %2999 = vmatmul.mubr.bf16.vlgmr.msra.gmra.mrb[68].mxu1 %v13011_v10  ;;  %10645 = vmatmul.mubr.bf16.vlgmr.msra.gmra.mrb[80].mxu0 %v13011_v10 }
 0xe71   :  { %3071 = vmatpush1.bf16.msra.mxu1 %v12673_v3  ;;  %10649 = vmatpush3.bf16.msra.mxu0 %v12681_v22 }
 0xe72   :  { %3072 = vmatprep.subr.bf16.mxu1 %v12676_v28  ;;  %10650 = vmatprep.subr.bf16.mxu0 %v13386_v40 }
 0xe73   :  { %3102 = vmatprep.mubr.bf16.mxu1 %v13387_v52  ;;  %10664 = vmatprep.mubr.msk.bf16.mxu0 %vm11795_vm3, %v13386_v40 }
 0xe75   :  { %3073 = vmatpush1.bf16.msra.mxu1 %v12686_v60  ;;  %10651 = vmatpush3.bf16.msra.mxu0 %v12693_v36 }
 0xe76   :  { %3074 = vmatprep.subr.bf16.mxu1 %v12689_v1  ;;  %10652 = vmatprep.subr.bf16.mxu0 %v13386_v40 }
 0xe79   :  { %3075 = vmatpush1.bf16.msra.mxu1 %v12697_v45  ;;  %10653 = vmatpush3.bf16.msra.mxu0 %v12705_v33 }
 0xe7a   :  { %3076 = vmatprep.subr.bf16.mxu1 %v12700_v54  ;;  %10654 = vmatprep.subr.bf16.mxu0 %v13386_v40 }
 0xe7d   :  { %3077 = vmatpush1.bf16.msra.mxu1 %v12709_v59  ;;  %10655 = vmatpush3.bf16.msra.mxu0 %v12716_v21 }
 0xe7e   :  { %3078 = vmatprep.subr.bf16.mxu1 %v12713_v63  ;;  %10656 = vmatprep.subr.bf16.mxu0 %v13386_v40 }
 0xe81   :  { %3079 = vmatpush1.bf16.msra.mxu1 %v12722_v61  ;;  %10657 = vmatpush3.bf16.msra.mxu0 %v12728_v62 }
 0xe82   :  { %3080 = vmatprep.subr.bf16.mxu1 %v12725_v31  ;;  %10658 = vmatprep.subr.bf16.mxu0 %v13386_v40 }
 0xe85   :  { %3081 = vmatpush1.bf16.msra.mxu1 %v12732_v5  ;;  %10659 = vmatpush3.bf16.msra.mxu0 %v12739_v11 }
 0xe86   :  { %3082 = vmatprep.subr.bf16.mxu1 %v12736_v6  ;;  %10660 = vmatprep.subr.bf16.mxu0 %v13386_v40 }
 0xe89   :  { %3083 = vmatpush1.bf16.msra.mxu1 %v12743_v32  ;;  %10661 = vmatpush3.bf16.msra.mxu0 %v12749_v14 }
 0xe8a   :  { %3084 = vmatprep.subr.bf16.mxu1 %v12746_v13  ;;  %10662 = vmatprep.subr.bf16.mxu0 %v13386_v40 }
 0xe8d   :  { %3085 = vmatpush1.bf16.msra.mxu1 %v12753_v7  ;;  %10663 = vmatpush3.bf16.msra.mxu0 %v12758_v16 }
 0xe8e   :  { %3174 = vmatprep.subr.bf16.mxu1 %v12671_v27  ;;  %10668 = vmatprep.subr.bf16.mxu0 %v13386_v40 }
 0xf43   :  { %v3000_v8 = vpop.f32.mrb[68].mxu1  ;;  %v3041_v53 = vpop.f32.mrb[80].mxu0 }
 0xf44   :  { %v3047_v12 = vadd.f32 %v3000_v8, %v12842_v15  ;;  %v3002_v41 = vpop.f32.mrb[69].mxu1  ;;  %v10646_v25 = vpop.f32.mrb[81].mxu0  ;;  %v3061_v46 = vadd.f32 %v12858_v9, %v3041_v53 }
 0xf45   :  { %v3054_v49 = vadd.f32 %v3002_v41, %v12844_v4  ;;  %v3004_v20 = vpop.f32.mrb[70].mxu1  ;;  %v3044_v58 = vpop.f32.mrb[82].mxu0 }
 0xf46   :  { %v9330_v17 = vmul.f32 -1.442695, %v3047_v12  ;;  %v3005_v19 = vpop.f32.mrb[71].mxu1  ;;  %v10647_v39 = vpop.f32.mrb[83].mxu0  ;;  %v11407_v58 = vld [vmem:[#allocation16] ss:$12 sps:$4 sm:$0xff]  }
 0xf47   :  { %v9331_v42 = vmul.f32 -1.442695, %v3054_v49  ;;  %v11409_v19 = vld [vmem:[#allocation16 + $0x1c] ss:$12 sps:$4 sm:$0xff]   ;;  %v11410_v39 = vld [vmem:[#allocation16 + $0x18] ss:$12 sps:$4 sm:$0xff]  }
 0xf48   :  { %11351 = vpow2.f32 %v9330_v17  ;;  %v11408_v17 = vld [vmem:[#allocation16 + $0x8] ss:$12 sps:$4 sm:$0xff]  }
 0xf49   :  { %11353 = vpow2.f32 %v9331_v42  ;;  %v11411_v42 = vld [vmem:[#allocation16 + $0x20] ss:$12 sps:$4 sm:$0xff]  }
 0xf52   :  { %v11352_v50 = vpop.eup %11351 }
 0xf53   :  { %v3051_v44 = vadd.f32 1.0, %v11352_v50  ;;  %v11354_v56 = vpop.eup %11353  ;;  %v11412_v50 = vld [vmem:[#allocation16 + $0x34] ss:$12 sps:$4 sm:$0xff]  }
 0xf54   :  { %v3058_v29 = vadd.f32 1.0, %v11354_v56  ;;  %v11414_v56 = vld [vmem:[#allocation16 + $0x38] ss:$12 sps:$4 sm:$0xff]  }
 0xf55   :  { %11355 = vrcp.f32 %v3051_v44  ;;  %v11413_v44 = vld [vmem:[#allocation16 + $0x30] ss:$12 sps:$4 sm:$0xff]  }
 0xf56   :  { %11357 = vrcp.f32 %v3058_v29  ;;  %v11415_v29 = vld [vmem:[#allocation16 + $0x4c] ss:$12 sps:$4 sm:$0xff]  }
 0xf5f   :  { %v11356_v15 = vpop.eup %11355 }
 0xf60   :  { %v3062_v34 = vmul.f32 %v11356_v15, %v3061_v46  ;;  %v11358_v2 = vpop.eup %11357  ;;  %v11417_v46 = vld [vmem:[#allocation16 + $0x50] ss:$12 sps:$4 sm:$0xff]  }
 0xf61   :  { %v3065_v0 = vsub.f32 1.0, %v11358_v2  ;;  %v3067_v55 = vmul.f32 %v11358_v2, %v13007_v35  ;;  %v13401_v35 = vld [vmem:[#allocation40_spill] sm:$0xff] }
 0xf62   :  { %v3063_v4 = vadd.f32 %v3062_v34, %v12830_v30  ;;  %v11418_v15 = vld [vmem:[#allocation16 + $0x64] ss:$12 sps:$4 sm:$0xff]   ;;  %v11419_v34 = vld [vmem:[#allocation16 + $0x60] ss:$12 sps:$4 sm:$0xff]   ;;  %v11421_v2 = vld [vmem:[#allocation16 + $0x7c] ss:$12 sps:$4 sm:$0xff]  }
 0xf64   :  { %11359 = vtanh.f32 %v3063_v4  ;;  %v11420_v4 = vld [vmem:[#allocation16 + $0x68] ss:$12 sps:$4 sm:$0xff]  }
 0xf6e   :  { %v11360_v38 = vpop.eup %11359 }
 0xf6f   :  { %v3066_v24 = vmul.f32 %v11360_v38, %v3065_v0  ;;  %v3381_v0 = vld [vmem:[#allocation18] sm:$0xff] }
 0xf70   :  { %v3509_v38 = vld [vmem:[#allocation18 + $0x400] sm:$0xff] }
 0xf71   :  { %v13055_v18 = vadd.f32 %v3067_v55, %v3066_v24 }
 0xf73   :  { %v13059_v26 = vpack.c.bf16 %v13055_v18, %v13055_v18 }
 0xf75   :  { %3103 = vmatmul.mubr.bf16.vlgmr.msra.gmra.mrb[72].mxu1 %v13059_v26  ;;  %10665 = vmatmul.mubr.bf16.vlgmr.msra.gmra.mrb[84].mxu0 %v13059_v26 }
 0xf76   :  { %3175 = vmatpush1.bf16.msra.mxu1 %v12673_v3  ;;  %10669 = vmatpush3.bf16.msra.mxu0 %v12681_v22 }
 0xf77   :  { %3176 = vmatprep.subr.bf16.mxu1 %v12676_v28  ;;  %10670 = vmatprep.subr.bf16.mxu0 %v13386_v40 }
 0xf78   :  { %3206 = vmatprep.mubr.bf16.mxu1 %v13387_v52  ;;  %10684 = vmatprep.mubr.msk.bf16.mxu0 %vm11795_vm3, %v13386_v40 }
 0xf7a   :  { %3177 = vmatpush1.bf16.msra.mxu1 %v12686_v60  ;;  %10671 = vmatpush3.bf16.msra.mxu0 %v12693_v36 }
 0xf7b   :  { %3178 = vmatprep.subr.bf16.mxu1 %v12689_v1  ;;  %10672 = vmatprep.subr.bf16.mxu0 %v13386_v40 }
 0xf7e   :  { %3179 = vmatpush1.bf16.msra.mxu1 %v12697_v45  ;;  %10673 = vmatpush3.bf16.msra.mxu0 %v12705_v33 }
 0xf7f   :  { %3180 = vmatprep.subr.bf16.mxu1 %v12700_v54  ;;  %10674 = vmatprep.subr.bf16.mxu0 %v13386_v40 }
 0xf82   :  { %3181 = vmatpush1.bf16.msra.mxu1 %v12709_v59  ;;  %10675 = vmatpush3.bf16.msra.mxu0 %v12716_v21 }
 0xf83   :  { %3182 = vmatprep.subr.bf16.mxu1 %v12713_v63  ;;  %10676 = vmatprep.subr.bf16.mxu0 %v13386_v40 }
 0xf86   :  { %3183 = vmatpush1.bf16.msra.mxu1 %v12722_v61  ;;  %10677 = vmatpush3.bf16.msra.mxu0 %v12728_v62 }
 0xf87   :  { %3184 = vmatprep.subr.bf16.mxu1 %v12725_v31  ;;  %10678 = vmatprep.subr.bf16.mxu0 %v13386_v40 }
 0xf8a   :  { %3185 = vmatpush1.bf16.msra.mxu1 %v12732_v5  ;;  %10679 = vmatpush3.bf16.msra.mxu0 %v12739_v11 }
 0xf8b   :  { %3186 = vmatprep.subr.bf16.mxu1 %v12736_v6  ;;  %10680 = vmatprep.subr.bf16.mxu0 %v13386_v40 }
 0xf8e   :  { %3187 = vmatpush1.bf16.msra.mxu1 %v12743_v32  ;;  %10681 = vmatpush3.bf16.msra.mxu0 %v12749_v14 }
 0xf8f   :  { %3188 = vmatprep.subr.bf16.mxu1 %v12746_v13  ;;  %10682 = vmatprep.subr.bf16.mxu0 %v13386_v40 }
 0xf92   :  { %3189 = vmatpush1.bf16.msra.mxu1 %v12753_v7  ;;  %10683 = vmatpush3.bf16.msra.mxu0 %v12758_v16 }
 0xf93   :  { %3278 = vmatprep.subr.bf16.mxu1 %v12671_v27  ;;  %10688 = vmatprep.subr.bf16.mxu0 %v13386_v40 }
0x1048   :  { %v3104_v3 = vpop.f32.mrb[72].mxu1  ;;  %v3145_v28 = vpop.f32.mrb[84].mxu0 }
0x1049   :  { %v3151_v22 = vadd.f32 %v3104_v3, %v12846_v51  ;;  %v3106_v60 = vpop.f32.mrb[73].mxu1  ;;  %v10666_v1 = vpop.f32.mrb[85].mxu0  ;;  %v3165_v30 = vadd.f32 %v12858_v9, %v3145_v28  ;;  %v13402_v3 = vld [vmem:[#allocation41_spill] sm:$0xff] }
0x104a   :  { %v3158_v36 = vadd.f32 %v3106_v60, %v12848_v43  ;;  %v3108_v45 = vpop.f32.mrb[74].mxu1  ;;  %v3148_v54 = vpop.f32.mrb[86].mxu0 }
0x104b   :  { %v9332_v33 = vmul.f32 -1.442695, %v3151_v22  ;;  %v3109_v59 = vpop.f32.mrb[75].mxu1  ;;  %v10667_v63 = vpop.f32.mrb[87].mxu0  ;;  %v13403_v22 = vld [vmem:[#allocation42_spill] sm:$0xff] }
0x104c   :  { %v9333_v21 = vmul.f32 -1.442695, %v3158_v36 }
0x104d   :  { %11361 = vpow2.f32 %v9332_v33 }
0x104e   :  { %11363 = vpow2.f32 %v9333_v21 }
0x1057   :  { %v11362_v61 = vpop.eup %11361 }
0x1058   :  { %v3155_v27 = vadd.f32 1.0, %v11362_v61  ;;  %v11364_v31 = vpop.eup %11363 }
0x1059   :  { %v3162_v62 = vadd.f32 1.0, %v11364_v31 }
0x105a   :  { %11365 = vrcp.f32 %v3155_v27 }
0x105b   :  { %11367 = vrcp.f32 %v3162_v62  ;;  %v13404_v62 = vld [vmem:[#allocation39_spill] sm:$0xff] }
0x1064   :  { %v11366_v51 = vpop.eup %11365 }
0x1065   :  { %v3166_v48 = vmul.f32 %v11366_v51, %v3165_v30  ;;  %v11368_v8 = vpop.eup %11367 }
0x1066   :  { %v3169_v53 = vsub.f32 1.0, %v11368_v8  ;;  %v3171_v25 = vmul.f32 %v11368_v8, %v13055_v18 }
0x1067   :  { %v3167_v43 = vadd.f32 %v3166_v48, %v13401_v35 }
0x1069   :  { %11369 = vtanh.f32 %v3167_v43 }
0x1073   :  { %v11370_v12 = vpop.eup %11369 }
0x1074   :  { %v3170_v41 = vmul.f32 %v11370_v12, %v3169_v53  ;;  %v3389_v53 = vld [vmem:[#allocation18 + $0x40] sm:$0xff] }
0x1076   :  { %v13103_v49 = vadd.f32 %v3171_v25, %v3170_v41  ;;  %v3393_v41 = vld [vmem:[#allocation18 + $0x60] sm:$0xff] }
0x1077   :  { %v3517_v25 = vld [vmem:[#allocation18 + $0x440] sm:$0xff] }
0x1078   :  { %v13107_v20 = vpack.c.bf16 %v13103_v49, %v13103_v49 }
0x107a   :  { %3207 = vmatmul.mubr.bf16.vlgmr.msra.gmra.mrb[76].mxu1 %v13107_v20  ;;  %10685 = vmatmul.mubr.bf16.vlgmr.msra.gmra.mrb[88].mxu0 %v13107_v20 }
0x107b   :  { %3279 = vmatpush1.bf16.msra.mxu1 %v11407_v58  ;;  %10689 = vmatpush3.bf16.msra.mxu0 %v11408_v17  ;;  %v3521_v58 = vld [vmem:[#allocation18 + $0x460] sm:$0xff] }
0x107c   :  { %3280 = vmatprep.subr.bf16.mxu1 %v11409_v19  ;;  %10690 = vmatprep.subr.bf16.mxu0 %v13386_v40  ;;  %v3397_v17 = vld [vmem:[#allocation18 + $0x80] sm:$0xff]  ;;  %v9347_v19 = vcombine.high %v3389_v53, %v3393_v41 }
0x107d   :  { %3310 = vmatprep.mubr.bf16.mxu1 %v13387_v52  ;;  %10704 = vmatprep.mubr.msk.bf16.mxu0 %vm11795_vm3, %v13386_v40  ;;  %v11416_v52 = vld [vmem:[#allocation16 + $0x48] ss:$12 sps:$4 sm:$0xff]  }
0x107f   :  { %3281 = vmatpush1.bf16.msra.mxu1 %v11410_v39  ;;  %10691 = vmatpush3.bf16.msra.mxu0 %v11411_v42  ;;  %v9475_v39 = vcombine.high %v3517_v25, %v3521_v58  ;;  %v3401_v42 = vld [vmem:[#allocation18 + $0xa0] sm:$0xff] }
0x1080   :  { %3282 = vmatprep.subr.bf16.mxu1 %v11412_v50  ;;  %10692 = vmatprep.subr.bf16.mxu0 %v13386_v40  ;;  %v3525_v50 = vld [vmem:[#allocation18 + $0x480] sm:$0xff] }
0x1083   :  { %3283 = vmatpush1.bf16.msra.mxu1 %v11413_v44  ;;  %10693 = vmatpush3.bf16.msra.mxu0 %v11414_v56  ;;  %v3529_v44 = vld [vmem:[#allocation18 + $0x4a0] sm:$0xff]  ;;  %v9474_v56 = vcombine.low %v3517_v25, %v3521_v58 }
0x1084   :  { %3284 = vmatprep.subr.bf16.mxu1 %v11415_v29  ;;  %10694 = vmatprep.subr.bf16.mxu0 %v13386_v40  ;;  %v9355_v29 = vcombine.high %v3397_v17, %v3401_v42  ;;  %v3577_v25 = vld [vmem:[#allocation18 + $0x620] sm:$0xff] }
0x1087   :  { %3285 = vmatpush1.bf16.msra.mxu1 %v11416_v52  ;;  %10695 = vmatpush3.bf16.msra.mxu0 %v11417_v46  ;;  %v9483_v52 = vcombine.high %v3525_v50, %v3529_v44  ;;  %v3405_v46 = vld [vmem:[#allocation18 + $0xc0] sm:$0xff] }
0x1088   :  { %3286 = vmatprep.subr.bf16.mxu1 %v11418_v15  ;;  %10696 = vmatprep.subr.bf16.mxu0 %v13386_v40  ;;  %v3409_v15 = vld [vmem:[#allocation18 + $0xe0] sm:$0xff] }
0x108b   :  { %3287 = vmatpush1.bf16.msra.mxu1 %v11419_v34  ;;  %10697 = vmatpush3.bf16.msra.mxu0 %v11420_v4  ;;  %v3533_v34 = vld [vmem:[#allocation18 + $0x4c0] sm:$0xff] }
0x108c   :  { %3288 = vmatprep.subr.bf16.mxu1 %v11421_v2  ;;  %10698 = vmatprep.subr.bf16.mxu0 %v13386_v40  ;;  %v3537_v4 = vld [vmem:[#allocation18 + $0x4e0] sm:$0xff]  ;;  %v9354_v2 = vcombine.low %v3397_v17, %v3401_v42 }
0x108d   :  { %v3453_v42 = vld [vmem:[#allocation18 + $0x240] sm:$0xff] }
0x108f   :  { %3289 = vmatpush1.bf16.msra.mxu1 %v12732_v5  ;;  %10699 = vmatpush3.bf16.msra.mxu0 %v12739_v11  ;;  %v3385_v5 = vld [vmem:[#allocation18 + $0x20] sm:$0xff] }
0x1090   :  { %3290 = vmatprep.subr.bf16.mxu1 %v12736_v6  ;;  %10700 = vmatprep.subr.bf16.mxu0 %v13386_v40  ;;  %v9338_v11 = vcombine.low %v3381_v0, %v3385_v5  ;;  %v9339_v24 = vcombine.high %v3381_v0, %v3385_v5  ;;  %v3513_v6 = vld [vmem:[#allocation18 + $0x420] sm:$0xff]  ;;  %v9482_v0 = vcombine.low %v3525_v50, %v3529_v44 }
0x1091   :  { %v9466_v55 = vcombine.low %v3509_v38, %v3513_v6  ;;  %v9467_v18 = vcombine.high %v3509_v38, %v3513_v6  ;;  %v9363_v5 = vcombine.high %v3405_v46, %v3409_v15  ;;  %v9491_v38 = vcombine.high %v3533_v34, %v3537_v4  ;;  %v3541_v6 = vld [vmem:[#allocation18 + $0x500] sm:$0xff] }
0x1092   :  { %v3457_v50 = vld [vmem:[#allocation18 + $0x260] sm:$0xff] }
0x1093   :  { %3291 = vmatpush1.bf16.msra.mxu1 %v12743_v32  ;;  %10701 = vmatpush3.bf16.msra.mxu0 %v12749_v14  ;;  %v3581_v44 = vld [vmem:[#allocation18 + $0x640] sm:$0xff] }
0x1094   :  { %3292 = vmatprep.subr.bf16.mxu1 %v12746_v13  ;;  %10702 = vmatprep.subr.bf16.mxu0 %v13386_v40 }
0x1097   :  { %3293 = vmatpush1.bf16.msra.mxu1 %v12753_v7  ;;  %10703 = vmatpush3.bf16.msra.mxu0 %v12758_v16 }
0x1098   :  { %7265 = vmatprep.subr.bf16.mxu0 %v9339_v24  ;;  %7306 = vmatprep.subr.bf16.mxu1 %v9467_v18  ;;  %v3417_v24 = vld [vmem:[#allocation18 + $0x120] sm:$0xff]  ;;  %v9362_v18 = vcombine.low %v3405_v46, %v3409_v15 }
0x1099   :  { %v3461_v15 = vld [vmem:[#allocation18 + $0x280] sm:$0xff] }
0x114d   :  { %v3208_v32 = vpop.f32.mrb[76].mxu1  ;;  %v3249_v14 = vpop.f32.mrb[88].mxu0 }
0x114e   :  { %v3255_v13 = vadd.f32 %v3208_v32, %v13402_v3  ;;  %v3210_v28 = vpop.f32.mrb[77].mxu1  ;;  %v10686_v40 = vpop.f32.mrb[89].mxu0  ;;  %v3269_v61 = vadd.f32 %v12858_v9, %v3249_v14  ;;  %v9490_v32 = vcombine.low %v3533_v34, %v3537_v4  ;;  %v3465_v34 = vld [vmem:[#allocation18 + $0x2a0] sm:$0xff] }
0x114f   :  { %v3262_v7 = vadd.f32 %v3210_v28, %v13403_v22  ;;  %v3212_v60 = vpop.f32.mrb[78].mxu1  ;;  %v3252_v16 = vpop.f32.mrb[90].mxu0  ;;  %v3425_v28 = vld [vmem:[#allocation18 + $0x160] sm:$0xff] }
0x1150   :  { %v9334_v1 = vmul.f32 -1.442695, %v3255_v13  ;;  %v3213_v36 = vpop.f32.mrb[79].mxu1  ;;  %v10687_v45 = vpop.f32.mrb[91].mxu0  ;;  %v3421_v13 = vld [vmem:[#allocation18 + $0x140] sm:$0xff] }
0x1151   :  { %v9335_v54 = vmul.f32 -1.442695, %v3262_v7  ;;  %v3549_v40 = vld [vmem:[#allocation18 + $0x540] sm:$0xff]  ;;  %v9379_v16 = vcombine.high %v3421_v13, %v3425_v28 }
0x1152   :  { %11371 = vpow2.f32 %v9334_v1  ;;  %v3553_v22 = vld [vmem:[#allocation18 + $0x560] sm:$0xff] }
0x1153   :  { %11373 = vpow2.f32 %v9335_v54  ;;  %v9507_v1 = vcombine.high %v3549_v40, %v3553_v22  ;;  %v3429_v36 = vld [vmem:[#allocation18 + $0x180] sm:$0xff] }
0x1154   :  { %v3433_v45 = vld [vmem:[#allocation18 + $0x1a0] sm:$0xff] }
0x1155   :  { %v3557_v54 = vld [vmem:[#allocation18 + $0x580] sm:$0xff] }
0x1156   :  { %v3589_v4 = vld [vmem:[#allocation18 + $0x680] sm:$0xff] }
0x115c   :  { %v11372_v33 = vpop.eup %11371 }
0x115d   :  { %v3259_v59 = vadd.f32 1.0, %v11372_v33  ;;  %v11374_v63 = vpop.eup %11373  ;;  %v3561_v33 = vld [vmem:[#allocation18 + $0x5a0] sm:$0xff] }
0x115e   :  { %v3266_v21 = vadd.f32 1.0, %v11374_v63  ;;  %v9506_v63 = vcombine.low %v3549_v40, %v3553_v22  ;;  %v3481_v40 = vld [vmem:[#allocation18 + $0x320] sm:$0xff] }
0x115f   :  { %11375 = vrcp.f32 %v3259_v59  ;;  %v9378_v59 = vcombine.low %v3421_v13, %v3425_v28  ;;  %v3477_v28 = vld [vmem:[#allocation18 + $0x300] sm:$0xff] }
0x1160   :  { %11377 = vrcp.f32 %v3266_v21  ;;  %v9387_v21 = vcombine.high %v3429_v36, %v3433_v45  ;;  %v3605_v22 = vld [vmem:[#allocation18 + $0x700] sm:$0xff] }
0x1169   :  { %v11376_v27 = vpop.eup %11375 }
0x116a   :  { %v3270_v31 = vmul.f32 %v11376_v27, %v3269_v61  ;;  %v11378_v51 = vpop.eup %11377  ;;  %v9515_v61 = vcombine.high %v3557_v54, %v3561_v33  ;;  %v3437_v27 = vld [vmem:[#allocation18 + $0x1c0] sm:$0xff] }
0x116b   :  { %v3273_v48 = vsub.f32 1.0, %v11378_v51  ;;  %v3275_v8 = vmul.f32 %v11378_v51, %v13103_v49  ;;  %v9346_v49 = vcombine.low %v3389_v53, %v3393_v41  ;;  %v9386_v51 = vcombine.low %v3429_v36, %v3433_v45  ;;  %v3449_v53 = vld [vmem:[#allocation18 + $0x220] sm:$0xff] }
0x116c   :  { %v3271_v30 = vadd.f32 %v3270_v31, %v13404_v62  ;;  %v3441_v31 = vld [vmem:[#allocation18 + $0x1e0] sm:$0xff] }
0x116d   :  { %v3565_v62 = vld [vmem:[#allocation18 + $0x5c0] sm:$0xff]  ;;  %v9394_v58 = vcombine.low %v3437_v27, %v3441_v31 }
0x116e   :  { %11379 = vtanh.f32 %v3271_v30  ;;  %v3569_v30 = vld [vmem:[#allocation18 + $0x5e0] sm:$0xff] }
0x116f   :  { %v3573_v41 = vld [vmem:[#allocation18 + $0x600] sm:$0xff]  ;;  %v9522_v17 = vcombine.low %v3565_v62, %v3569_v30 }
0x1170   :  { %v3485_v45 = vld [vmem:[#allocation18 + $0x340] sm:$0xff] }
0x1178   :  { %v11380_v35 = vpop.eup %11379 }
0x1179   :  { %v3274_v43 = vmul.f32 %v11380_v35, %v3273_v48  ;;  %v9514_v48 = vcombine.low %v3557_v54, %v3561_v33  ;;  %v9395_v35 = vcombine.high %v3437_v27, %v3441_v31  ;;  %v3489_v54 = vld [vmem:[#allocation18 + $0x360] sm:$0xff] }
0x117a   :  { %v3613_v33 = vld [vmem:[#allocation18 + $0x740] sm:$0xff] }
0x117b   :  { %v13134_v12 = vadd.f32 %v3275_v8, %v3274_v43  ;;  %v9523_v43 = vcombine.high %v3565_v62, %v3569_v30  ;;  %v3445_v8 = vld [vmem:[#allocation18 + $0x200] sm:$0xff] }
0x117c   :  { %v3493_v31 = vld [vmem:[#allocation18 + $0x380] sm:$0xff] }
0x117d   :  { %v13138_v9 = vpack.c.bf16 %v13134_v12, %v13134_v12  ;;  %v3497_v62 = vld [vmem:[#allocation18 + $0x3a0] sm:$0xff] }
0x117e   :  { %v3621_v30 = vld [vmem:[#allocation18 + $0x780] sm:$0xff] }
0x117f   :  { %3311 = vmatmul.mubr.bf16.vlgmr.msra.gmra.mrb[80].mxu1 %v13138_v9  ;;  %10705 = vmatmul.mubr.bf16.vlgmr.msra.gmra.mrb[92].mxu0 %v13138_v9 }
0x1180   :  { %7266 = vmatpush1.bf16.msra.mxu0 %v9338_v11  ;;  %7307 = vmatpush1.bf16.msra.mxu1 %v9466_v55  ;;  %v3413_v11 = vld [vmem:[#allocation18 + $0x100] sm:$0xff] }
0x1181   :  { %7297 = vmatprep.mubr.bf16.mxu0 %v12915_v47  ;;  %7338 = vmatprep.mubr.bf16.mxu1 %v13011_v10  ;;  %v3545_v55 = vld [vmem:[#allocation18 + $0x520] sm:$0xff]  ;;  %v9371_v14 = vcombine.high %v3413_v11, %v3417_v24  ;;  %v9370_v7 = vcombine.low %v3413_v11, %v3417_v24 }
0x1182   :  { %7267 = vmatprep.subr.bf16.mxu0 %v9347_v19  ;;  %7308 = vmatprep.subr.bf16.mxu1 %v9475_v39  ;;  %v9499_v3 = vcombine.high %v3541_v6, %v3545_v55  ;;  %v9498_v60 = vcombine.low %v3541_v6, %v3545_v55  ;;  %v9403_v19 = vcombine.high %v3445_v8, %v3449_v53  ;;  %v3469_v24 = vld [vmem:[#allocation18 + $0x2c0] sm:$0xff] }
0x1183   :  { %v9531_v39 = vcombine.high %v3573_v41, %v3577_v25  ;;  %v3473_v6 = vld [vmem:[#allocation18 + $0x2e0] sm:$0xff] }
0x1184   :  { %7268 = vmatpush1.bf16.msra.mxu0 %v9346_v49  ;;  %7309 = vmatpush1.bf16.msra.mxu1 %v9474_v56  ;;  %v3585_v49 = vld [vmem:[#allocation18 + $0x660] sm:$0xff]  ;;  %v9402_v56 = vcombine.low %v3445_v8, %v3449_v53 }
0x1185   :  { %7269 = vmatprep.subr.bf16.mxu0 %v9355_v29  ;;  %7310 = vmatprep.subr.bf16.mxu1 %v9483_v52  ;;  %v9530_v29 = vcombine.low %v3573_v41, %v3577_v25  ;;  %v9411_v52 = vcombine.high %v3453_v42, %v3457_v50  ;;  %v9539_v46 = vcombine.high %v3581_v44, %v3585_v49  ;;  %v3597_v55 = vld [vmem:[#allocation18 + $0x6c0] sm:$0xff] }
0x1186   :  { %v3501_v53 = vld [vmem:[#allocation18 + $0x3c0] sm:$0xff] }
0x1187   :  { %v3505_v41 = vld [vmem:[#allocation18 + $0x3e0] sm:$0xff] }
0x1188   :  { %7270 = vmatpush1.bf16.msra.mxu0 %v9354_v2  ;;  %7311 = vmatpush1.bf16.msra.mxu1 %v9482_v0  ;;  %v3593_v2 = vld [vmem:[#allocation18 + $0x6a0] sm:$0xff]  ;;  %v9410_v0 = vcombine.low %v3453_v42, %v3457_v50 }
0x1189   :  { %7271 = vmatprep.subr.bf16.mxu0 %v9363_v5  ;;  %7312 = vmatprep.subr.bf16.mxu1 %v9491_v38  ;;  %v9538_v5 = vcombine.low %v3581_v44, %v3585_v49  ;;  %v9419_v38 = vcombine.high %v3461_v15, %v3465_v34  ;;  %v9547_v11 = vcombine.high %v3589_v4, %v3593_v2  ;;  %v3629_v25 = vld [vmem:[#allocation18 + $0x7c0] sm:$0xff]  ;;  %v3382_v49 = vld [vmem:[#allocation18 + $0x8] sm:$0xff] }
0x118a   :  { %v3637_v50 = vld [vmem:[#allocation18 + $0x800] sm:$0xff] }
0x118b   :  { %v3641_v44 = vld [vmem:[#allocation18 + $0x820] sm:$0xff] }
0x118c   :  { %7272 = vmatpush1.bf16.msra.mxu0 %v9362_v18  ;;  %7313 = vmatpush1.bf16.msra.mxu1 %v9490_v32  ;;  %v3601_v18 = vld [vmem:[#allocation18 + $0x6e0] sm:$0xff]  ;;  %v9418_v32 = vcombine.low %v3461_v15, %v3465_v34 }
0x118d   :  { %7273 = vmatprep.subr.bf16.mxu0 %v9371_v14  ;;  %7314 = vmatprep.subr.bf16.mxu1 %v9499_v3  ;;  %v9546_v14 = vcombine.low %v3589_v4, %v3593_v2  ;;  %v9427_v3 = vcombine.high %v3469_v24, %v3473_v6  ;;  %v9555_v13 = vcombine.high %v3597_v55, %v3601_v18  ;;  %v3645_v34 = vld [vmem:[#allocation18 + $0x840] sm:$0xff]  ;;  %v3390_v2 = vld [vmem:[#allocation18 + $0x48] sm:$0xff] }
0x118e   :  { %v3649_v4 = vld [vmem:[#allocation18 + $0x860] sm:$0xff] }
0x1190   :  { %7274 = vmatpush1.bf16.msra.mxu0 %v9370_v7  ;;  %7315 = vmatpush1.bf16.msra.mxu1 %v9498_v60  ;;  %v3609_v7 = vld [vmem:[#allocation18 + $0x720] sm:$0xff]  ;;  %v9426_v60 = vcombine.low %v3469_v24, %v3473_v6 }
0x1191   :  { %7275 = vmatprep.subr.bf16.mxu0 %v9379_v16  ;;  %7316 = vmatprep.subr.bf16.mxu1 %v9507_v1  ;;  %v9554_v16 = vcombine.low %v3597_v55, %v3601_v18  ;;  %v9435_v1 = vcombine.high %v3477_v28, %v3481_v40  ;;  %v9563_v36 = vcombine.high %v3605_v22, %v3609_v7  ;;  %v3653_v6 = vld [vmem:[#allocation18 + $0x880] sm:$0xff]  ;;  %v3398_v18 = vld [vmem:[#allocation18 + $0x88] sm:$0xff] }
0x1192   :  { %v3657_v55 = vld [vmem:[#allocation18 + $0x8a0] sm:$0xff] }
0x1194   :  { %7276 = vmatpush1.bf16.msra.mxu0 %v9378_v59  ;;  %7317 = vmatpush1.bf16.msra.mxu1 %v9506_v63  ;;  %v3617_v59 = vld [vmem:[#allocation18 + $0x760] sm:$0xff]  ;;  %v9434_v63 = vcombine.low %v3477_v28, %v3481_v40 }
0x1195   :  { %7277 = vmatprep.subr.bf16.mxu0 %v9387_v21  ;;  %7318 = vmatprep.subr.bf16.mxu1 %v9515_v61  ;;  %v9562_v21 = vcombine.low %v3605_v22, %v3609_v7  ;;  %v9443_v61 = vcombine.high %v3485_v45, %v3489_v54  ;;  %v9571_v27 = vcombine.high %v3613_v33, %v3617_v59  ;;  %v3661_v40 = vld [vmem:[#allocation18 + $0x8c0] sm:$0xff]  ;;  %v3406_v7 = vld [vmem:[#allocation18 + $0xc8] sm:$0xff] }
0x1196   :  { %v3665_v22 = vld [vmem:[#allocation18 + $0x8e0] sm:$0xff] }
0x1198   :  { %7278 = vmatpush1.bf16.msra.mxu0 %v9386_v51  ;;  %7319 = vmatpush1.bf16.msra.mxu1 %v9514_v48  ;;  %v3625_v51 = vld [vmem:[#allocation18 + $0x7a0] sm:$0xff]  ;;  %v9442_v48 = vcombine.low %v3485_v45, %v3489_v54 }
0x1199   :  { %7279 = vmatprep.subr.bf16.mxu0 %v9395_v35  ;;  %7320 = vmatprep.subr.bf16.mxu1 %v9523_v43  ;;  %v9570_v35 = vcombine.low %v3613_v33, %v3617_v59  ;;  %v9451_v43 = vcombine.high %v3493_v31, %v3497_v62  ;;  %v9579_v8 = vcombine.high %v3621_v30, %v3625_v51  ;;  %v3669_v54 = vld [vmem:[#allocation18 + $0x900] sm:$0xff]  ;;  %v3414_v59 = vld [vmem:[#allocation18 + $0x108] sm:$0xff] }
0x119a   :  { %v3673_v33 = vld [vmem:[#allocation18 + $0x920] sm:$0xff] }
0x119c   :  { %7280 = vmatpush1.bf16.msra.mxu0 %v9394_v58  ;;  %7321 = vmatpush1.bf16.msra.mxu1 %v9522_v17  ;;  %v3633_v58 = vld [vmem:[#allocation18 + $0x7e0] sm:$0xff]  ;;  %v9450_v17 = vcombine.low %v3493_v31, %v3497_v62 }
0x119d   :  { %7281 = vmatprep.subr.bf16.mxu0 %v9403_v19  ;;  %7322 = vmatprep.subr.bf16.mxu1 %v9531_v39  ;;  %v9578_v19 = vcombine.low %v3621_v30, %v3625_v51  ;;  %v9459_v39 = vcombine.high %v3501_v53, %v3505_v41  ;;  %v9587_v42 = vcombine.high %v3629_v25, %v3633_v58  ;;  %v3677_v62 = vld [vmem:[#allocation18 + $0x940] sm:$0xff]  ;;  %v3422_v51 = vld [vmem:[#allocation18 + $0x148] sm:$0xff] }
0x119e   :  { %v3681_v30 = vld [vmem:[#allocation18 + $0x960] sm:$0xff] }
0x11a0   :  { %7282 = vmatpush1.bf16.msra.mxu0 %v9402_v56  ;;  %7323 = vmatpush1.bf16.msra.mxu1 %v9530_v29  ;;  %v3386_v56 = vld [vmem:[#allocation18 + $0x28] sm:$0xff]  ;;  %v9458_v29 = vcombine.low %v3501_v53, %v3505_v41  ;;  %v3685_v41 = vld [vmem:[#allocation18 + $0x980] sm:$0xff] }
0x11a1   :  { %7283 = vmatprep.subr.bf16.mxu0 %v9411_v52  ;;  %7324 = vmatprep.subr.bf16.mxu1 %v9539_v46  ;;  %v9586_v52 = vcombine.low %v3629_v25, %v3633_v58  ;;  %v9595_v46 = vcombine.high %v3637_v50, %v3641_v44  ;;  %v9341_v15 = vcombine.high %v3382_v49, %v3386_v56  ;;  %v3689_v25 = vld [vmem:[#allocation18 + $0x9a0] sm:$0xff]  ;;  %v3430_v58 = vld [vmem:[#allocation18 + $0x188] sm:$0xff] }
0x11a4   :  { %7284 = vmatpush1.bf16.msra.mxu0 %v9410_v0  ;;  %7325 = vmatpush1.bf16.msra.mxu1 %v9538_v5  ;;  %v3394_v0 = vld [vmem:[#allocation18 + $0x68] sm:$0xff]  ;;  %v9594_v5 = vcombine.low %v3637_v50, %v3641_v44  ;;  %v3693_v44 = vld [vmem:[#allocation18 + $0x9c0] sm:$0xff] }
0x11a5   :  { %7285 = vmatprep.subr.bf16.mxu0 %v9419_v38  ;;  %7326 = vmatprep.subr.bf16.mxu1 %v9547_v11  ;;  %v9340_v38 = vcombine.low %v3382_v49, %v3386_v56  ;;  %v9603_v11 = vcombine.high %v3645_v34, %v3649_v4  ;;  %v9349_v24 = vcombine.high %v3390_v2, %v3394_v0  ;;  %v3697_v49 = vld [vmem:[#allocation18 + $0x9e0] sm:$0xff]  ;;  %v3438_v56 = vld [vmem:[#allocation18 + $0x1c8] sm:$0xff] }
0x11a8   :  { %7286 = vmatpush1.bf16.msra.mxu0 %v9418_v32  ;;  %7327 = vmatpush1.bf16.msra.mxu1 %v9546_v14  ;;  %v3402_v32 = vld [vmem:[#allocation18 + $0xa8] sm:$0xff]  ;;  %v9602_v14 = vcombine.low %v3645_v34, %v3649_v4  ;;  %v3701_v4 = vld [vmem:[#allocation18 + $0xa00] sm:$0xff] }
0x11a9   :  { %7287 = vmatprep.subr.bf16.mxu0 %v9427_v3  ;;  %7328 = vmatprep.subr.bf16.mxu1 %v9555_v13  ;;  %v9348_v3 = vcombine.low %v3390_v2, %v3394_v0  ;;  %v9611_v13 = vcombine.high %v3653_v6, %v3657_v55  ;;  %v9357_v28 = vcombine.high %v3398_v18, %v3402_v32  ;;  %v3705_v2 = vld [vmem:[#allocation18 + $0xa20] sm:$0xff]  ;;  %v3446_v0 = vld [vmem:[#allocation18 + $0x208] sm:$0xff] }
0x11ac   :  { %7288 = vmatpush1.bf16.msra.mxu0 %v9426_v60  ;;  %7329 = vmatpush1.bf16.msra.mxu1 %v9554_v16  ;;  %v3410_v60 = vld [vmem:[#allocation18 + $0xe8] sm:$0xff]  ;;  %v9610_v16 = vcombine.low %v3653_v6, %v3657_v55  ;;  %v3709_v55 = vld [vmem:[#allocation18 + $0xa40] sm:$0xff] }
0x11ad   :  { %7289 = vmatprep.subr.bf16.mxu0 %v9435_v1  ;;  %7330 = vmatprep.subr.bf16.mxu1 %v9563_v36  ;;  %v9356_v1 = vcombine.low %v3398_v18, %v3402_v32  ;;  %v9619_v36 = vcombine.high %v3661_v40, %v3665_v22  ;;  %v9365_v45 = vcombine.high %v3406_v7, %v3410_v60  ;;  %v3713_v18 = vld [vmem:[#allocation18 + $0xa60] sm:$0xff]  ;;  %v3454_v32 = vld [vmem:[#allocation18 + $0x248] sm:$0xff] }
0x11b0   :  { %7290 = vmatpush1.bf16.msra.mxu0 %v9434_v63  ;;  %7331 = vmatpush1.bf16.msra.mxu1 %v9562_v21  ;;  %v3418_v63 = vld [vmem:[#allocation18 + $0x128] sm:$0xff]  ;;  %v9618_v21 = vcombine.low %v3661_v40, %v3665_v22  ;;  %v3717_v22 = vld [vmem:[#allocation18 + $0xa80] sm:$0xff] }
0x11b1   :  { %7291 = vmatprep.subr.bf16.mxu0 %v9443_v61  ;;  %7332 = vmatprep.subr.bf16.mxu1 %v9571_v27  ;;  %v9364_v61 = vcombine.low %v3406_v7, %v3410_v60  ;;  %v9627_v27 = vcombine.high %v3669_v54, %v3673_v33  ;;  %v9373_v31 = vcombine.high %v3414_v59, %v3418_v63  ;;  %v3721_v7 = vld [vmem:[#allocation18 + $0xaa0] sm:$0xff]  ;;  %v3462_v60 = vld [vmem:[#allocation18 + $0x288] sm:$0xff] }
0x11b4   :  { %7292 = vmatpush1.bf16.msra.mxu0 %v9442_v48  ;;  %7333 = vmatpush1.bf16.msra.mxu1 %v9570_v35  ;;  %v3426_v48 = vld [vmem:[#allocation18 + $0x168] sm:$0xff]  ;;  %v9626_v35 = vcombine.low %v3669_v54, %v3673_v33  ;;  %v3725_v33 = vld [vmem:[#allocation18 + $0xac0] sm:$0xff] }
0x11b5   :  { %7293 = vmatprep.subr.bf16.mxu0 %v9451_v43  ;;  %7334 = vmatprep.subr.bf16.mxu1 %v9579_v8  ;;  %v9372_v43 = vcombine.low %v3414_v59, %v3418_v63  ;;  %v9635_v8 = vcombine.high %v3677_v62, %v3681_v30  ;;  %v9381_v53 = vcombine.high %v3422_v51, %v3426_v48  ;;  %v3729_v59 = vld [vmem:[#allocation18 + $0xae0] sm:$0xff]  ;;  %v3470_v63 = vld [vmem:[#allocation18 + $0x2c8] sm:$0xff] }
0x11b8   :  { %7294 = vmatpush1.bf16.msra.mxu0 %v9450_v17  ;;  %7335 = vmatpush1.bf16.msra.mxu1 %v9578_v19  ;;  %v3434_v17 = vld [vmem:[#allocation18 + $0x1a8] sm:$0xff]  ;;  %v9634_v19 = vcombine.low %v3677_v62, %v3681_v30  ;;  %v3733_v30 = vld [vmem:[#allocation18 + $0xb00] sm:$0xff] }
0x11b9   :  { %7295 = vmatprep.subr.bf16.mxu0 %v9459_v39  ;;  %7336 = vmatprep.subr.bf16.mxu1 %v9587_v42  ;;  %v9380_v39 = vcombine.low %v3422_v51, %v3426_v48  ;;  %v9643_v42 = vcombine.high %v3685_v41, %v3689_v25  ;;  %v9389_v50 = vcombine.high %v3430_v58, %v3434_v17  ;;  %v3737_v51 = vld [vmem:[#allocation18 + $0xb20] sm:$0xff]  ;;  %v3478_v48 = vld [vmem:[#allocation18 + $0x308] sm:$0xff] }
0x11bc   :  { %7296 = vmatpush1.bf16.msra.mxu0 %v9458_v29  ;;  %7337 = vmatpush1.bf16.msra.mxu1 %v9586_v52  ;;  %v3442_v29 = vld [vmem:[#allocation18 + $0x1e8] sm:$0xff]  ;;  %v9642_v52 = vcombine.low %v3685_v41, %v3689_v25  ;;  %v3741_v25 = vld [vmem:[#allocation18 + $0xb40] sm:$0xff] }
0x11bd   :  { %7347 = vmatprep.subr.bf16.mxu1 %v9595_v46  ;;  %7470 = vmatprep.subr.bf16.mxu0 %v9341_v15  ;;  %v9388_v46 = vcombine.low %v3430_v58, %v3434_v17  ;;  %v9651_v15 = vcombine.high %v3693_v44, %v3697_v49  ;;  %v9397_v34 = vcombine.high %v3438_v56, %v3442_v29  ;;  %v3745_v58 = vld [vmem:[#allocation18 + $0xb60] sm:$0xff]  ;;  %v3486_v17 = vld [vmem:[#allocation18 + $0x348] sm:$0xff] }
0x11bf   :  { %7298 = vmatmul.mubr.bf16.vlgmr.msra.gmra.mrb[96].mxu0 %v12867_v23  ;;  %7339 = vmatmul.mubr.bf16.vlgmr.msra.gmra.mrb[84].mxu1 %v12963_v37 }
0x11c0   :  { %7348 = vmatpush1.bf16.msra.mxu1 %v9594_v5  ;;  %7379 = vmatprep.mubr.bf16.mxu1 %v13107_v20  ;;  %v3450_v5 = vld [vmem:[#allocation18 + $0x228] sm:$0xff] }
0x11c1   :  { %7471 = vmatpush1.bf16.msra.mxu0 %v9340_v38  ;;  %7502 = vmatprep.mubr.bf16.mxu0 %v12915_v47  ;;  %v9650_v38 = vcombine.low %v3693_v44, %v3697_v49  ;;  %v9405_v6 = vcombine.high %v3446_v0, %v3450_v5  ;;  %v3749_v49 = vld [vmem:[#allocation18 + $0xb80] sm:$0xff] }
0x11c2   :  { %7349 = vmatprep.subr.bf16.mxu1 %v9603_v11  ;;  %7472 = vmatprep.subr.bf16.mxu0 %v9349_v24  ;;  %v9396_v11 = vcombine.low %v3438_v56, %v3442_v29  ;;  %v9659_v24 = vcombine.high %v3701_v4, %v3705_v2  ;;  %v3753_v56 = vld [vmem:[#allocation18 + $0xba0] sm:$0xff]  ;;  %v3494_v29 = vld [vmem:[#allocation18 + $0x388] sm:$0xff] }
0x11c4   :  { %7350 = vmatpush1.bf16.msra.mxu1 %v9602_v14  ;;  %v3458_v14 = vld [vmem:[#allocation18 + $0x268] sm:$0xff] }
0x11c5   :  { %7473 = vmatpush1.bf16.msra.mxu0 %v9348_v3  ;;  %7351 = vmatprep.subr.bf16.mxu1 %v9611_v13  ;;  %v9658_v3 = vcombine.low %v3701_v4, %v3705_v2  ;;  %v9404_v13 = vcombine.low %v3446_v0, %v3450_v5  ;;  %v9413_v40 = vcombine.high %v3454_v32, %v3458_v14  ;;  %v3757_v2 = vld [vmem:[#allocation18 + $0xbc0] sm:$0xff]  ;;  %v3502_v5 = vld [vmem:[#allocation18 + $0x3c8] sm:$0xff] }
0x11c6   :  { %7474 = vmatprep.subr.bf16.mxu0 %v9357_v28  ;;  %v9667_v28 = vcombine.high %v3709_v55, %v3713_v18  ;;  %v3761_v0 = vld [vmem:[#allocation18 + $0xbe0] sm:$0xff] }
0x11c8   :  { %7352 = vmatpush1.bf16.msra.mxu1 %v9610_v16  ;;  %v3466_v16 = vld [vmem:[#allocation18 + $0x2a8] sm:$0xff] }
0x11c9   :  { %7475 = vmatpush1.bf16.msra.mxu0 %v9356_v1  ;;  %7353 = vmatprep.subr.bf16.mxu1 %v9619_v36  ;;  %v9666_v1 = vcombine.low %v3709_v55, %v3713_v18  ;;  %v9412_v36 = vcombine.low %v3454_v32, %v3458_v14  ;;  %v9421_v54 = vcombine.high %v3462_v60, %v3466_v16  ;;  %v3765_v18 = vld [vmem:[#allocation18 + $0xc00] sm:$0xff]  ;;  %v3510_v14 = vld [vmem:[#allocation18 + $0x408] sm:$0xff] }
0x11ca   :  { %7476 = vmatprep.subr.bf16.mxu0 %v9365_v45  ;;  %v9675_v45 = vcombine.high %v3717_v22, %v3721_v7  ;;  %v3769_v32 = vld [vmem:[#allocation18 + $0xc20] sm:$0xff] }
0x11cc   :  { %7354 = vmatpush1.bf16.msra.mxu1 %v9618_v21  ;;  %v3474_v21 = vld [vmem:[#allocation18 + $0x2e8] sm:$0xff] }
0x11cd   :  { %7477 = vmatpush1.bf16.msra.mxu0 %v9364_v61  ;;  %7355 = vmatprep.subr.bf16.mxu1 %v9627_v27  ;;  %v9674_v61 = vcombine.low %v3717_v22, %v3721_v7  ;;  %v9420_v27 = vcombine.low %v3462_v60, %v3466_v16  ;;  %v9429_v62 = vcombine.high %v3470_v63, %v3474_v21  ;;  %v3518_v7 = vld [vmem:[#allocation18 + $0x448] sm:$0xff]  ;;  %v3773_v16 = vld [vmem:[#allocation18 + $0xc40] sm:$0xff] }
0x11ce   :  { %7478 = vmatprep.subr.bf16.mxu0 %v9373_v31  ;;  %v9683_v31 = vcombine.high %v3725_v33, %v3729_v59  ;;  %v3522_v60 = vld [vmem:[#allocation18 + $0x468] sm:$0xff] }
0x11d0   :  { %7356 = vmatpush1.bf16.msra.mxu1 %v9626_v35  ;;  %v3482_v35 = vld [vmem:[#allocation18 + $0x328] sm:$0xff] }
0x11d1   :  { %7479 = vmatpush1.bf16.msra.mxu0 %v9372_v43  ;;  %7357 = vmatprep.subr.bf16.mxu1 %v9635_v8  ;;  %v9682_v43 = vcombine.low %v3725_v33, %v3729_v59  ;;  %v9428_v8 = vcombine.low %v3470_v63, %v3474_v21  ;;  %v9437_v41 = vcombine.high %v3478_v48, %v3482_v35  ;;  %v3781_v59 = vld [vmem:[#allocation18 + $0xc80] sm:$0xff]  ;;  %v3526_v21 = vld [vmem:[#allocation18 + $0x488] sm:$0xff] }
0x11d2   :  { %7480 = vmatprep.subr.bf16.mxu0 %v9381_v53  ;;  %v9691_v53 = vcombine.high %v3733_v30, %v3737_v51  ;;  %v3785_v63 = vld [vmem:[#allocation18 + $0xca0] sm:$0xff] }
0x11d4   :  { %7358 = vmatpush1.bf16.msra.mxu1 %v9634_v19  ;;  %v3490_v19 = vld [vmem:[#allocation18 + $0x368] sm:$0xff] }
0x11d5   :  { %7481 = vmatpush1.bf16.msra.mxu0 %v9380_v39  ;;  %7359 = vmatprep.subr.bf16.mxu1 %v9643_v42  ;;  %v9690_v39 = vcombine.low %v3733_v30, %v3737_v51  ;;  %v9436_v42 = vcombine.low %v3478_v48, %v3482_v35  ;;  %v9445_v44 = vcombine.high %v3486_v17, %v3490_v19  ;;  %v3534_v51 = vld [vmem:[#allocation18 + $0x4c8] sm:$0xff]  ;;  %v3789_v48 = vld [vmem:[#allocation18 + $0xcc0] sm:$0xff] }
0x11d6   :  { %7482 = vmatprep.subr.bf16.mxu0 %v9389_v50  ;;  %v9699_v50 = vcombine.high %v3741_v25, %v3745_v58  ;;  %v3793_v35 = vld [vmem:[#allocation18 + $0xce0] sm:$0xff] }
0x11d8   :  { %7360 = vmatpush1.bf16.msra.mxu1 %v9642_v52  ;;  %v3498_v52 = vld [vmem:[#allocation18 + $0x3a8] sm:$0xff] }
0x11d9   :  { %7483 = vmatpush1.bf16.msra.mxu0 %v9388_v46  ;;  %7361 = vmatprep.subr.bf16.mxu1 %v9651_v15  ;;  %v9698_v46 = vcombine.low %v3741_v25, %v3745_v58  ;;  %v9444_v15 = vcombine.low %v3486_v17, %v3490_v19  ;;  %v9453_v4 = vcombine.high %v3494_v29, %v3498_v52 }
0x11da   :  { %7484 = vmatprep.subr.bf16.mxu0 %v9397_v34  ;;  %v9707_v34 = vcombine.high %v3749_v49, %v3753_v56  ;;  %v9747_v58 = vcombine.high %v3789_v48, %v3793_v35 }
0x11dc   :  { %7362 = vmatpush1.bf16.msra.mxu1 %v9650_v38  ;;  %v3506_v38 = vld [vmem:[#allocation18 + $0x3e8] sm:$0xff] }
0x11dd   :  { %7485 = vmatpush1.bf16.msra.mxu0 %v9396_v11  ;;  %7363 = vmatprep.subr.bf16.mxu1 %v9659_v24  ;;  %v9706_v11 = vcombine.low %v3749_v49, %v3753_v56  ;;  %v9452_v24 = vcombine.low %v3494_v29, %v3498_v52  ;;  %v9461_v55 = vcombine.high %v3502_v5, %v3506_v38 }
0x11de   :  { %7486 = vmatprep.subr.bf16.mxu0 %v9405_v6  ;;  %v9715_v6 = vcombine.high %v3757_v2, %v3761_v0  ;;  %v9746_v49 = vcombine.low %v3789_v48, %v3793_v35 }
0x11e0   :  { %7364 = vmatpush1.bf16.msra.mxu1 %v9658_v3  ;;  %v3514_v3 = vld [vmem:[#allocation18 + $0x428] sm:$0xff] }
0x11e1   :  { %7487 = vmatpush1.bf16.msra.mxu0 %v9404_v13  ;;  %7365 = vmatprep.subr.bf16.mxu1 %v9667_v28  ;;  %v9714_v13 = vcombine.low %v3757_v2, %v3761_v0  ;;  %v9460_v28 = vcombine.low %v3502_v5, %v3506_v38  ;;  %v9469_v22 = vcombine.high %v3510_v14, %v3514_v3 }
0x11e2   :  { %7488 = vmatprep.subr.bf16.mxu0 %v9413_v40  ;;  %v9723_v40 = vcombine.high %v3765_v18, %v3769_v32 }
0x11e4   :  { %7366 = vmatpush1.bf16.msra.mxu1 %v9666_v1  ;;  %v3777_v1 = vld [vmem:[#allocation18 + $0xc60] sm:$0xff] }
0x11e5   :  { %7489 = vmatpush1.bf16.msra.mxu0 %v9412_v36  ;;  %7367 = vmatprep.subr.bf16.mxu1 %v9675_v45  ;;  %v9722_v36 = vcombine.low %v3765_v18, %v3769_v32  ;;  %v9468_v45 = vcombine.low %v3510_v14, %v3514_v3  ;;  %v9731_v33 = vcombine.high %v3773_v16, %v3777_v1 }
0x11e6   :  { %7490 = vmatprep.subr.bf16.mxu0 %v9421_v54  ;;  %v9477_v54 = vcombine.high %v3518_v7, %v3522_v60 }
0x11e8   :  { %7368 = vmatpush1.bf16.msra.mxu1 %v9674_v61  ;;  %v3530_v61 = vld [vmem:[#allocation18 + $0x4a8] sm:$0xff] }
0x11e9   :  { %7491 = vmatpush1.bf16.msra.mxu0 %v9420_v27  ;;  %7369 = vmatprep.subr.bf16.mxu1 %v9683_v31  ;;  %v9730_v27 = vcombine.low %v3773_v16, %v3777_v1  ;;  %v9476_v31 = vcombine.low %v3518_v7, %v3522_v60  ;;  %v9485_v30 = vcombine.high %v3526_v21, %v3530_v61 }
0x11ea   :  { %7492 = vmatprep.subr.bf16.mxu0 %v9429_v62  ;;  %v9739_v62 = vcombine.high %v3781_v59, %v3785_v63  ;;  %v9484_v25 = vcombine.low %v3526_v21, %v3530_v61 }
0x11ec   :  { %7370 = vmatpush1.bf16.msra.mxu1 %v9682_v43  ;;  %v3538_v43 = vld [vmem:[#allocation18 + $0x4e8] sm:$0xff] }
0x11ed   :  { %7493 = vmatpush1.bf16.msra.mxu0 %v9428_v8  ;;  %7371 = vmatprep.subr.bf16.mxu1 %v9691_v53  ;;  %v13151_v8 = vld [vmem:[#allocation18 + $0x1000] sm:$0xff]  ;;  %v9493_v19 = vcombine.high %v3534_v51, %v3538_v43  ;;  %v9492_v56 = vcombine.low %v3534_v51, %v3538_v43 }
0x11ee   :  { %7494 = vmatprep.subr.bf16.mxu0 %v9437_v41  ;;  %v13153_v53 = vld [vmem:[#allocation18 + $0x1020] sm:$0xff]  ;;  %v9738_v41 = vcombine.low %v3781_v59, %v3785_v63 }
0x11ef   :  { %v9850_v17 = vcombine.low %v13151_v8, %v13153_v53 }
0x11f0   :  { %7372 = vmatpush1.bf16.msra.mxu1 %v9690_v39  ;;  %v3797_v39 = vld [vmem:[#allocation18 + $0xd00] sm:$0xff] }
0x11f1   :  { %7495 = vmatpush1.bf16.msra.mxu0 %v9436_v42  ;;  %7373 = vmatprep.subr.bf16.mxu1 %v9699_v50  ;;  %v3801_v42 = vld [vmem:[#allocation18 + $0xd20] sm:$0xff]  ;;  %v3542_v50 = vld [vmem:[#allocation18 + $0x508] sm:$0xff] }
0x11f2   :  { %7496 = vmatprep.subr.bf16.mxu0 %v9445_v44  ;;  %v3546_v44 = vld [vmem:[#allocation18 + $0x528] sm:$0xff]  ;;  %v9755_v29 = vcombine.high %v3797_v39, %v3801_v42  ;;  %v9754_v2 = vcombine.low %v3797_v39, %v3801_v42 }
0x11f3   :  { %v9501_v52 = vcombine.high %v3542_v50, %v3546_v44  ;;  %v9500_v0 = vcombine.low %v3542_v50, %v3546_v44 }
0x11f4   :  { %7374 = vmatpush1.bf16.msra.mxu1 %v9698_v46  ;;  %v3805_v46 = vld [vmem:[#allocation18 + $0xd40] sm:$0xff] }
0x11f5   :  { %7497 = vmatpush1.bf16.msra.mxu0 %v9444_v15  ;;  %7375 = vmatprep.subr.bf16.mxu1 %v9707_v34  ;;  %v3809_v15 = vld [vmem:[#allocation18 + $0xd60] sm:$0xff]  ;;  %v3550_v34 = vld [vmem:[#allocation18 + $0x548] sm:$0xff] }
0x11f6   :  { %7498 = vmatprep.subr.bf16.mxu0 %v9453_v4  ;;  %v3554_v4 = vld [vmem:[#allocation18 + $0x568] sm:$0xff]  ;;  %v9763_v5 = vcombine.high %v3805_v46, %v3809_v15  ;;  %v9762_v18 = vcombine.low %v3805_v46, %v3809_v15 }
0x11f7   :  { %v9509_v38 = vcombine.high %v3550_v34, %v3554_v4  ;;  %v9508_v32 = vcombine.low %v3550_v34, %v3554_v4 }
0x11f8   :  { %7376 = vmatpush1.bf16.msra.mxu1 %v9706_v11  ;;  %v3813_v11 = vld [vmem:[#allocation18 + $0xd80] sm:$0xff] }
0x11f9   :  { %7499 = vmatpush1.bf16.msra.mxu0 %v9452_v24  ;;  %7377 = vmatprep.subr.bf16.mxu1 %v9715_v6  ;;  %v3817_v24 = vld [vmem:[#allocation18 + $0xda0] sm:$0xff]  ;;  %v3558_v6 = vld [vmem:[#allocation18 + $0x588] sm:$0xff] }
0x11fa   :  { %7500 = vmatprep.subr.bf16.mxu0 %v9461_v55  ;;  %v3562_v55 = vld [vmem:[#allocation18 + $0x5a8] sm:$0xff]  ;;  %v9771_v14 = vcombine.high %v3813_v11, %v3817_v24  ;;  %v9770_v7 = vcombine.low %v3813_v11, %v3817_v24 }
0x11fb   :  { %v9517_v3 = vcombine.high %v3558_v6, %v3562_v55  ;;  %v9516_v60 = vcombine.low %v3558_v6, %v3562_v55 }
0x11fc   :  { %7378 = vmatpush1.bf16.msra.mxu1 %v9714_v13  ;;  %v3821_v13 = vld [vmem:[#allocation18 + $0xdc0] sm:$0xff] }
0x11fd   :  { %7501 = vmatpush1.bf16.msra.mxu0 %v9460_v28  ;;  %7388 = vmatprep.subr.bf16.mxu1 %v9723_v40  ;;  %v3825_v28 = vld [vmem:[#allocation18 + $0xde0] sm:$0xff]  ;;  %v3566_v40 = vld [vmem:[#allocation18 + $0x5c8] sm:$0xff] }
0x11fe   :  { %7511 = vmatprep.subr.bf16.mxu0 %v9469_v22  ;;  %v3570_v22 = vld [vmem:[#allocation18 + $0x5e8] sm:$0xff]  ;;  %v9779_v16 = vcombine.high %v3821_v13, %v3825_v28  ;;  %v9778_v59 = vcombine.low %v3821_v13, %v3825_v28 }
0x11ff   :  { %7380 = vmatmul.mubr.bf16.vlgmr.msra.gmra.mrb[84].mxu1 %v13059_v26  ;;  %v9525_v1 = vcombine.high %v3566_v40, %v3570_v22  ;;  %v9524_v63 = vcombine.low %v3566_v40, %v3570_v22 }
0x1200   :  { %7503 = vmatmul.mubr.bf16.vlgmr.msra.gmra.mrb[100].mxu0 %v12867_v23  ;;  %7389 = vmatpush1.bf16.msra.mxu1 %v9722_v36  ;;  %v3829_v36 = vld [vmem:[#allocation18 + $0xe00] sm:$0xff] }
0x1201   :  { %7512 = vmatpush1.bf16.msra.mxu0 %v9468_v45  ;;  %7543 = vmatprep.mubr.bf16.mxu0 %v13011_v10  ;;  %v3833_v45 = vld [vmem:[#allocation18 + $0xe20] sm:$0xff] }
0x1202   :  { %7513 = vmatprep.subr.bf16.mxu0 %v9477_v54  ;;  %7390 = vmatprep.subr.bf16.mxu1 %v9731_v33  ;;  %v3574_v54 = vld [vmem:[#allocation18 + $0x608] sm:$0xff]  ;;  %v9787_v21 = vcombine.high %v3829_v36, %v3833_v45  ;;  %v9786_v51 = vcombine.low %v3829_v36, %v3833_v45 }
0x1203   :  { %v3578_v33 = vld [vmem:[#allocation18 + $0x628] sm:$0xff] }
0x1204   :  { %7391 = vmatpush1.bf16.msra.mxu1 %v9730_v27  ;;  %v9533_v61 = vcombine.high %v3574_v54, %v3578_v33  ;;  %v3837_v27 = vld [vmem:[#allocation18 + $0xe40] sm:$0xff]  ;;  %v9532_v48 = vcombine.low %v3574_v54, %v3578_v33 }
0x1205   :  { %7514 = vmatpush1.bf16.msra.mxu0 %v9476_v31  ;;  %7392 = vmatprep.subr.bf16.mxu1 %v9739_v62  ;;  %v3841_v31 = vld [vmem:[#allocation18 + $0xe60] sm:$0xff]  ;;  %v3582_v62 = vld [vmem:[#allocation18 + $0x648] sm:$0xff] }
0x1206   :  { %7515 = vmatprep.subr.bf16.mxu0 %v9485_v30  ;;  %v3586_v30 = vld [vmem:[#allocation18 + $0x668] sm:$0xff]  ;;  %v9795_v35 = vcombine.high %v3837_v27, %v3841_v31  ;;  %v9794_v39 = vcombine.low %v3837_v27, %v3841_v31 }
0x1207   :  { %v9541_v43 = vcombine.high %v3582_v62, %v3586_v30  ;;  %v9540_v42 = vcombine.low %v3582_v62, %v3586_v30 }
0x1208   :  { %7393 = vmatpush1.bf16.msra.mxu1 %v9738_v41  ;;  %v3845_v41 = vld [vmem:[#allocation18 + $0xe80] sm:$0xff] }
0x1209   :  { %7516 = vmatpush1.bf16.msra.mxu0 %v9484_v25  ;;  %7394 = vmatprep.subr.bf16.mxu1 %v9747_v58  ;;  %v3849_v25 = vld [vmem:[#allocation18 + $0xea0] sm:$0xff]  ;;  %v3590_v58 = vld [vmem:[#allocation18 + $0x688] sm:$0xff] }
0x120a   :  { %7517 = vmatprep.subr.bf16.mxu0 %v9493_v19  ;;  %v3594_v19 = vld [vmem:[#allocation18 + $0x6a8] sm:$0xff]  ;;  %v9803_v50 = vcombine.high %v3845_v41, %v3849_v25  ;;  %v9802_v46 = vcombine.low %v3845_v41, %v3849_v25  ;;  %v9851_v41 = vcombine.high %v13151_v8, %v13153_v53 }
0x120b   :  { %v9549_v44 = vcombine.high %v3590_v58, %v3594_v19  ;;  %v9548_v15 = vcombine.low %v3590_v58, %v3594_v19  ;;  %v3646_v58 = vld [vmem:[#allocation18 + $0x848] sm:$0xff] }
0x120c   :  { %7395 = vmatpush1.bf16.msra.mxu1 %v9746_v49  ;;  %v3853_v49 = vld [vmem:[#allocation18 + $0xec0] sm:$0xff]  ;;  %v3650_v19 = vld [vmem:[#allocation18 + $0x868] sm:$0xff] }
0x120d   :  { %7518 = vmatpush1.bf16.msra.mxu0 %v9492_v56  ;;  %7396 = vmatprep.subr.bf16.mxu1 %v9755_v29  ;;  %v3857_v56 = vld [vmem:[#allocation18 + $0xee0] sm:$0xff]  ;;  %v3598_v29 = vld [vmem:[#allocation18 + $0x6c8] sm:$0xff] }
0x120e   :  { %7519 = vmatprep.subr.bf16.mxu0 %v9501_v52  ;;  %v3602_v52 = vld [vmem:[#allocation18 + $0x6e8] sm:$0xff]  ;;  %v9811_v34 = vcombine.high %v3853_v49, %v3857_v56  ;;  %v9810_v11 = vcombine.low %v3853_v49, %v3857_v56  ;;  %v9604_v49 = vcombine.low %v3646_v58, %v3650_v19 }
0x120f   :  { %v9557_v4 = vcombine.high %v3598_v29, %v3602_v52  ;;  %v9556_v24 = vcombine.low %v3598_v29, %v3602_v52  ;;  %v3662_v29 = vld [vmem:[#allocation18 + $0x8c8] sm:$0xff] }
0x1210   :  { %7397 = vmatpush1.bf16.msra.mxu1 %v9754_v2  ;;  %v3861_v2 = vld [vmem:[#allocation18 + $0xf00] sm:$0xff]  ;;  %v3666_v52 = vld [vmem:[#allocation18 + $0x8e8] sm:$0xff] }
0x1211   :  { %7520 = vmatpush1.bf16.msra.mxu0 %v9500_v0  ;;  %7398 = vmatprep.subr.bf16.mxu1 %v9763_v5  ;;  %v3865_v0 = vld [vmem:[#allocation18 + $0xf20] sm:$0xff]  ;;  %v3606_v5 = vld [vmem:[#allocation18 + $0x708] sm:$0xff] }
0x1212   :  { %7521 = vmatprep.subr.bf16.mxu0 %v9509_v38  ;;  %v3610_v38 = vld [vmem:[#allocation18 + $0x728] sm:$0xff]  ;;  %v9819_v6 = vcombine.high %v3861_v2, %v3865_v0  ;;  %v9818_v13 = vcombine.low %v3861_v2, %v3865_v0  ;;  %v9620_v2 = vcombine.low %v3662_v29, %v3666_v52 }
0x1213   :  { %v9565_v55 = vcombine.high %v3606_v5, %v3610_v38  ;;  %v9564_v28 = vcombine.low %v3606_v5, %v3610_v38  ;;  %v3678_v5 = vld [vmem:[#allocation18 + $0x948] sm:$0xff] }
0x1214   :  { %7399 = vmatpush1.bf16.msra.mxu1 %v9762_v18  ;;  %v3869_v18 = vld [vmem:[#allocation18 + $0xf40] sm:$0xff]  ;;  %v3682_v38 = vld [vmem:[#allocation18 + $0x968] sm:$0xff] }
0x1215   :  { %7522 = vmatpush1.bf16.msra.mxu0 %v9508_v32  ;;  %7400 = vmatprep.subr.bf16.mxu1 %v9771_v14  ;;  %v3873_v32 = vld [vmem:[#allocation18 + $0xf60] sm:$0xff]  ;;  %v3614_v14 = vld [vmem:[#allocation18 + $0x748] sm:$0xff] }
0x1216   :  { %7523 = vmatprep.subr.bf16.mxu0 %v9517_v3  ;;  %v3618_v3 = vld [vmem:[#allocation18 + $0x768] sm:$0xff]  ;;  %v9827_v40 = vcombine.high %v3869_v18, %v3873_v32  ;;  %v9826_v36 = vcombine.low %v3869_v18, %v3873_v32  ;;  %v9636_v18 = vcombine.low %v3678_v5, %v3682_v38 }
0x1217   :  { %v9573_v22 = vcombine.high %v3614_v14, %v3618_v3  ;;  %v9572_v45 = vcombine.low %v3614_v14, %v3618_v3  ;;  %v3806_v53 = vld [vmem:[#allocation18 + $0xd48] sm:$0xff] }
0x1218   :  { %7401 = vmatpush1.bf16.msra.mxu1 %v9770_v7  ;;  %v3877_v7 = vld [vmem:[#allocation18 + $0xf80] sm:$0xff] }
0x1219   :  { %7524 = vmatpush1.bf16.msra.mxu0 %v9516_v60  ;;  %7402 = vmatprep.subr.bf16.mxu1 %v9779_v16  ;;  %v3881_v60 = vld [vmem:[#allocation18 + $0xfa0] sm:$0xff]  ;;  %v3622_v16 = vld [vmem:[#allocation18 + $0x788] sm:$0xff] }
0x121a   :  { %7525 = vmatprep.subr.bf16.mxu0 %v9525_v1  ;;  %v3626_v1 = vld [vmem:[#allocation18 + $0x7a8] sm:$0xff]  ;;  %v9835_v54 = vcombine.high %v3877_v7, %v3881_v60  ;;  %v9834_v27 = vcombine.low %v3877_v7, %v3881_v60 }
0x121b   :  { %v9581_v33 = vcombine.high %v3622_v16, %v3626_v1  ;;  %v9580_v31 = vcombine.low %v3622_v16, %v3626_v1  ;;  %v3694_v7 = vld [vmem:[#allocation18 + $0x9c8] sm:$0xff] }
0x121c   :  { %7403 = vmatpush1.bf16.msra.mxu1 %v9778_v59  ;;  %v3885_v59 = vld [vmem:[#allocation18 + $0xfc0] sm:$0xff]  ;;  %v3698_v60 = vld [vmem:[#allocation18 + $0x9e8] sm:$0xff] }
0x121d   :  { %7526 = vmatpush1.bf16.msra.mxu0 %v9524_v63  ;;  %7404 = vmatprep.subr.bf16.mxu1 %v9787_v21  ;;  %v3889_v63 = vld [vmem:[#allocation18 + $0xfe0] sm:$0xff]  ;;  %v3630_v21 = vld [vmem:[#allocation18 + $0x7c8] sm:$0xff] }
0x121e   :  { %7527 = vmatprep.subr.bf16.mxu0 %v9533_v61  ;;  %v3634_v61 = vld [vmem:[#allocation18 + $0x7e8] sm:$0xff]  ;;  %v9843_v62 = vcombine.high %v3885_v59, %v3889_v63 }
0x121f   :  { %v9589_v30 = vcombine.high %v3630_v21, %v3634_v61 }
0x1220   :  { %7405 = vmatpush1.bf16.msra.mxu1 %v9786_v51  ;;  %v3638_v51 = vld [vmem:[#allocation18 + $0x808] sm:$0xff] }
0x1221   :  { %7528 = vmatpush1.bf16.msra.mxu0 %v9532_v48  ;;  %7406 = vmatprep.subr.bf16.mxu1 %v9795_v35  ;;  %v3642_v48 = vld [vmem:[#allocation18 + $0x828] sm:$0xff]  ;;  %v9842_v35 = vcombine.low %v3885_v59, %v3889_v63  ;;  %v9653_v63 = vcombine.high %v3694_v7, %v3698_v60 }
0x1222   :  { %7529 = vmatprep.subr.bf16.mxu0 %v9541_v43  ;;  %v9588_v43 = vcombine.low %v3630_v21, %v3634_v61  ;;  %v9597_v25 = vcombine.high %v3638_v51, %v3642_v48  ;;  %v3702_v21 = vld [vmem:[#allocation18 + $0xa08] sm:$0xff] }
0x1223   :  { %v3706_v61 = vld [vmem:[#allocation18 + $0xa28] sm:$0xff] }
0x1224   :  { %7407 = vmatpush1.bf16.msra.mxu1 %v9794_v39  ;;  %v9596_v39 = vcombine.low %v3638_v51, %v3642_v48  ;;  %v3714_v51 = vld [vmem:[#allocation18 + $0xa68] sm:$0xff] }
0x1225   :  { %7530 = vmatpush1.bf16.msra.mxu0 %v9540_v42  ;;  %7408 = vmatprep.subr.bf16.mxu1 %v9803_v50  ;;  %v9605_v42 = vcombine.high %v3646_v58, %v3650_v19  ;;  %v3654_v50 = vld [vmem:[#allocation18 + $0x888] sm:$0xff] }
0x1226   :  { %7531 = vmatprep.subr.bf16.mxu0 %v9549_v44  ;;  %v3658_v44 = vld [vmem:[#allocation18 + $0x8a8] sm:$0xff] }
0x1227   :  { %v9613_v56 = vcombine.high %v3654_v50, %v3658_v44 }
0x1228   :  { %7409 = vmatpush1.bf16.msra.mxu1 %v9802_v46  ;;  %v9612_v46 = vcombine.low %v3654_v50, %v3658_v44 }
0x1229   :  { %7532 = vmatpush1.bf16.msra.mxu0 %v9548_v15  ;;  %7410 = vmatprep.subr.bf16.mxu1 %v9811_v34  ;;  %v9621_v15 = vcombine.high %v3662_v29, %v3666_v52  ;;  %v3670_v34 = vld [vmem:[#allocation18 + $0x908] sm:$0xff] }
0x122a   :  { %7533 = vmatprep.subr.bf16.mxu0 %v9557_v4  ;;  %v3674_v4 = vld [vmem:[#allocation18 + $0x928] sm:$0xff] }
0x122b   :  { %v9629_v0 = vcombine.high %v3670_v34, %v3674_v4 }
0x122c   :  { %7411 = vmatpush1.bf16.msra.mxu1 %v9810_v11  ;;  %v9628_v11 = vcombine.low %v3670_v34, %v3674_v4  ;;  %v3742_v34 = vld [vmem:[#allocation18 + $0xb48] sm:$0xff] }
0x122d   :  { %7534 = vmatpush1.bf16.msra.mxu0 %v9556_v24  ;;  %7412 = vmatprep.subr.bf16.mxu1 %v9819_v6  ;;  %v9637_v24 = vcombine.high %v3678_v5, %v3682_v38  ;;  %v3686_v6 = vld [vmem:[#allocation18 + $0x988] sm:$0xff] }
0x122e   :  { %7535 = vmatprep.subr.bf16.mxu0 %v9565_v55  ;;  %v3690_v55 = vld [vmem:[#allocation18 + $0x9a8] sm:$0xff] }
0x122f   :  { %v9645_v3 = vcombine.high %v3686_v6, %v3690_v55  ;;  %v9644_v59 = vcombine.low %v3686_v6, %v3690_v55  ;;  %v3746_v4 = vld [vmem:[#allocation18 + $0xb68] sm:$0xff] }
0x1230   :  { %7413 = vmatpush1.bf16.msra.mxu1 %v9818_v13  ;;  %v13405_v13 = vld [vmem:[#allocation43_spill] sm:$0xff]  ;;  %v3750_v6 = vld [vmem:[#allocation18 + $0xb88] sm:$0xff] }
0x1231   :  { %7536 = vmatpush1.bf16.msra.mxu0 %v9564_v28  ;;  %7414 = vmatprep.subr.bf16.mxu1 %v9827_v40  ;;  %v3754_v55 = vld [vmem:[#allocation18 + $0xba8] sm:$0xff] }
0x1232   :  { %7537 = vmatprep.subr.bf16.mxu0 %v9573_v22 }
0x1234   :  { %7415 = vmatpush1.bf16.msra.mxu1 %v9826_v36 }
0x1235   :  { %7538 = vmatpush1.bf16.msra.mxu0 %v9572_v45  ;;  %7416 = vmatprep.subr.bf16.mxu1 %v9835_v54 }
0x1236   :  { %7539 = vmatprep.subr.bf16.mxu0 %v9581_v33 }
0x1238   :  { %7417 = vmatpush1.bf16.msra.mxu1 %v9834_v27  ;;  %v9652_v27 = vcombine.low %v3694_v7, %v3698_v60  ;;  %v3766_v7 = vld [vmem:[#allocation18 + $0xc08] sm:$0xff] }
0x1239   :  { %7540 = vmatpush1.bf16.msra.mxu0 %v9580_v31  ;;  %7418 = vmatprep.subr.bf16.mxu1 %v9843_v62  ;;  %v9661_v62 = vcombine.high %v3702_v21, %v3706_v61  ;;  %v3770_v60 = vld [vmem:[#allocation18 + $0xc28] sm:$0xff] }
0x123a   :  { %7541 = vmatprep.subr.bf16.mxu0 %v9589_v30  ;;  %v3710_v30 = vld [vmem:[#allocation18 + $0xa48] sm:$0xff] }
0x123b   :  { %v9669_v48 = vcombine.high %v3710_v30, %v3714_v51 }
0x123c   :  { %7419 = vmatpush1.bf16.msra.mxu1 %v9842_v35  ;;  %v3718_v35 = vld [vmem:[#allocation18 + $0xa88] sm:$0xff] }
0x123d   :  { %7542 = vmatpush1.bf16.msra.mxu0 %v9588_v43  ;;  %7429 = vmatprep.subr.bf16.mxu1 %v9851_v41  ;;  %v3722_v43 = vld [vmem:[#allocation18 + $0xaa8] sm:$0xff] }
0x123e   :  { %7552 = vmatprep.subr.bf16.mxu0 %v9597_v25  ;;  %v9668_v25 = vcombine.low %v3710_v30, %v3714_v51  ;;  %v9677_v19 = vcombine.high %v3718_v35, %v3722_v43  ;;  %v9676_v50 = vcombine.low %v3718_v35, %v3722_v43  ;;  %v3786_v30 = vld [vmem:[#allocation18 + $0xca8] sm:$0xff]  ;;  %v3901_v51 = vld [vmem:[#allocation18 + $0x1040] sm:$0xff] }
0x1240   :  { %7544 = vmatmul.mubr.bf16.vlgmr.msra.gmra.mrb[100].mxu0 %v12963_v37 }
0x1241   :  { %7553 = vmatpush1.bf16.msra.mxu0 %v9596_v39  ;;  %7584 = vmatprep.mubr.bf16.mxu0 %v13107_v20  ;;  %v3726_v39 = vld [vmem:[#allocation18 + $0xac8] sm:$0xff] }
0x1242   :  { %7554 = vmatprep.subr.bf16.mxu0 %v9605_v42  ;;  %v3730_v42 = vld [vmem:[#allocation18 + $0xae8] sm:$0xff] }
0x1243   :  { %v9685_v44 = vcombine.high %v3726_v39, %v3730_v42  ;;  %v9684_v52 = vcombine.low %v3726_v39, %v3730_v42 }
0x1245   :  { %7555 = vmatpush1.bf16.msra.mxu0 %v9604_v49  ;;  %v3734_v49 = vld [vmem:[#allocation18 + $0xb08] sm:$0xff] }
0x1246   :  { %7556 = vmatprep.subr.bf16.mxu0 %v9613_v56  ;;  %v3738_v56 = vld [vmem:[#allocation18 + $0xb28] sm:$0xff] }
0x1247   :  { %v9692_v5 = vcombine.low %v3734_v49, %v3738_v56 }
0x1249   :  { %7557 = vmatpush1.bf16.msra.mxu0 %v9612_v46  ;;  %v9693_v46 = vcombine.high %v3734_v49, %v3738_v56  ;;  %v3798_v49 = vld [vmem:[#allocation18 + $0xd08] sm:$0xff] }
0x124a   :  { %7558 = vmatprep.subr.bf16.mxu0 %v9621_v15  ;;  %v3802_v56 = vld [vmem:[#allocation18 + $0xd28] sm:$0xff] }
0x124d   :  { %7559 = vmatpush1.bf16.msra.mxu0 %v9620_v2  ;;  %v11422_v2 = vld [vmem:[#allocation15] ss:$0 sm:$0xff] }
0x124e   :  { %7560 = vmatprep.subr.bf16.mxu0 %v9629_v0 }
0x1251   :  { %7561 = vmatpush1.bf16.msra.mxu0 %v9628_v11  ;;  %v9701_v11 = vcombine.high %v3742_v34, %v3746_v4 }
0x1252   :  { %v3312_v32 = vpop.f32.mrb[80].mxu1  ;;  %v3353_v14 = vpop.f32.mrb[92].mxu0  ;;  %7562 = vmatprep.subr.bf16.mxu0 %v9637_v24 }
0x1253   :  { %v3359_v28 = vadd.f32 %v3312_v32, %v13405_v13  ;;  %v3314_v40 = vpop.f32.mrb[81].mxu1  ;;  %v10706_v22 = vpop.f32.mrb[93].mxu0  ;;  %v3373_v0 = vadd.f32 %v11422_v2, %v3353_v14  ;;  %v9709_v13 = vcombine.high %v3750_v6, %v3754_v55  ;;  %v9708_v14 = vcombine.low %v3750_v6, %v3754_v55  ;;  %v3929_v2 = vld [vmem:[#allocation18 + $0x1120] sm:$0xff]  ;;  %v3818_v6 = vld [vmem:[#allocation18 + $0xda8] sm:$0xff] }
0x1254   :  { %v3366_v16 = vadd.f32 %v3314_v40, %v12856_v57  ;;  %v3316_v1 = vpop.f32.mrb[82].mxu1  ;;  %v3356_v36 = vpop.f32.mrb[94].mxu0  ;;  %v9660_v57 = vcombine.low %v3702_v21, %v3706_v61  ;;  %v3762_v40 = vld [vmem:[#allocation18 + $0xbe8] sm:$0xff]  ;;  %v3933_v55 = vld [vmem:[#allocation18 + $0x1140] sm:$0xff] }
0x1255   :  { %v9336_v45 = vmul.f32 -1.442695, %v3359_v28  ;;  %7563 = vmatpush1.bf16.msra.mxu0 %v9636_v18  ;;  %v3317_v54 = vpop.f32.mrb[83].mxu1  ;;  %v10707_v33 = vpop.f32.mrb[95].mxu0  ;;  %v13406_v18 = vld [vmem:[#allocation35_spill] sm:$0xff]  ;;  %v3758_v28 = vld [vmem:[#allocation18 + $0xbc8] sm:$0xff]  ;;  %v9725_v36 = vcombine.high %v3766_v7, %v3770_v60 }
0x1256   :  { %7564 = vmatprep.subr.bf16.mxu0 %v9645_v3  ;;  %v9337_v31 = vmul.f32 -1.442695, %v3366_v16  ;;  %v9700_v3 = vcombine.low %v3742_v34, %v3746_v4  ;;  %v9717_v22 = vcombine.high %v3758_v28, %v3762_v40  ;;  %v9716_v1 = vcombine.low %v3758_v28, %v3762_v40  ;;  %v3778_v54 = vld [vmem:[#allocation18 + $0xc68] sm:$0xff]  ;;  %v3925_v4 = vld [vmem:[#allocation18 + $0x1100] sm:$0xff] }
0x1257   :  { %11381 = vpow2.f32 %v9336_v45  ;;  %v3774_v45 = vld [vmem:[#allocation18 + $0xc48] sm:$0xff]  ;;  %v9757_v34 = vcombine.high %v3798_v49, %v3802_v56 }
0x1258   :  { %11383 = vpow2.f32 %v9337_v31  ;;  %v3782_v31 = vld [vmem:[#allocation18 + $0xc88] sm:$0xff] }
0x1259   :  { %7565 = vmatpush1.bf16.msra.mxu0 %v9644_v59  ;;  %v9741_v43 = vcombine.high %v3782_v31, %v3786_v30  ;;  %v9740_v39 = vcombine.low %v3782_v31, %v3786_v30 }
0x125a   :  { %7566 = vmatprep.subr.bf16.mxu0 %v9653_v63  ;;  %v9724_v63 = vcombine.low %v3766_v7, %v3770_v60  ;;  %v3826_v7 = vld [vmem:[#allocation18 + $0xde8] sm:$0xff] }
0x125d   :  { %7567 = vmatpush1.bf16.msra.mxu0 %v9652_v27  ;;  %v9733_v27 = vcombine.high %v3774_v45, %v3778_v54 }
0x125e   :  { %7568 = vmatprep.subr.bf16.mxu0 %v9661_v62 }
0x1261   :  { %v11382_v41 = vpop.eup %11381  ;;  %7569 = vmatpush1.bf16.msra.mxu0 %v9660_v57  ;;  %v3905_v57 = vld [vmem:[#allocation18 + $0x1060] sm:$0xff] }
0x1262   :  { %v3363_v58 = vadd.f32 1.0, %v11382_v41  ;;  %7570 = vmatprep.subr.bf16.mxu0 %v9669_v48  ;;  %v11384_v29 = vpop.eup %11383  ;;  %v9732_v48 = vcombine.low %v3774_v45, %v3778_v54  ;;  %v9859_v41 = vcombine.high %v3901_v51, %v3905_v57  ;;  %v9858_v42 = vcombine.low %v3901_v51, %v3905_v57  ;;  %v3838_v57 = vld [vmem:[#allocation18 + $0xe48] sm:$0xff] }
0x1263   :  { %v3370_v15 = vadd.f32 1.0, %v11384_v29  ;;  %v3917_v29 = vld [vmem:[#allocation18 + $0x10c0] sm:$0xff] }
0x1264   :  { %11385 = vrcp.f32 %v3363_v58  ;;  %v3794_v58 = vld [vmem:[#allocation18 + $0xce8] sm:$0xff] }
0x1265   :  { %7571 = vmatpush1.bf16.msra.mxu0 %v9668_v25  ;;  %11387 = vrcp.f32 %v3370_v15  ;;  %v3790_v25 = vld [vmem:[#allocation18 + $0xcc8] sm:$0xff] }
0x1266   :  { %7572 = vmatprep.subr.bf16.mxu0 %v9677_v19  ;;  %v3913_v19 = vld [vmem:[#allocation18 + $0x10a0] sm:$0xff] }
0x1269   :  { %7573 = vmatpush1.bf16.msra.mxu0 %v9676_v50  ;;  %v9749_v50 = vcombine.high %v3790_v25, %v3794_v58 }
0x126a   :  { %7574 = vmatprep.subr.bf16.mxu0 %v9685_v44 }
0x126d   :  { %7575 = vmatpush1.bf16.msra.mxu0 %v9684_v52  ;;  %v3921_v52 = vld [vmem:[#allocation18 + $0x10e0] sm:$0xff] }
0x126e   :  { %v11386_v38 = vpop.eup %11385  ;;  %7576 = vmatprep.subr.bf16.mxu0 %v9693_v46  ;;  %v9748_v46 = vcombine.low %v3790_v25, %v3794_v58  ;;  %v9875_v8 = vcombine.high %v3917_v29, %v3921_v52 }
0x126f   :  { %v3374_v24 = vmul.f32 %v11386_v38, %v3373_v0  ;;  %v11388_v16 = vpop.eup %11387  ;;  %v9756_v0 = vcombine.low %v3798_v49, %v3802_v56 }
0x1270   :  { %v3377_v33 = vsub.f32 1.0, %v11388_v16  ;;  %v3379_v61 = vmul.f32 %v11388_v16, %v13134_v12  ;;  %v3909_v12 = vld [vmem:[#allocation18 + $0x1080] sm:$0xff] }
0x1271   :  { %v3375_v32 = vadd.f32 %v3374_v24, %v13406_v18  ;;  %7577 = vmatpush1.bf16.msra.mxu0 %v9692_v5  ;;  %v9867_v44 = vcombine.high %v3909_v12, %v3913_v19  ;;  %v9866_v15 = vcombine.low %v3909_v12, %v3913_v19  ;;  %v9874_v5 = vcombine.low %v3917_v29, %v3921_v52  ;;  %v3814_v24 = vld [vmem:[#allocation18 + $0xd88] sm:$0xff]  ;;  %v3937_v18 = vld [vmem:[#allocation18 + $0x1160] sm:$0xff] }
0x1272   :  { %7578 = vmatprep.subr.bf16.mxu0 %v9701_v11  ;;  %v9883_v11 = vcombine.high %v3925_v4, %v3929_v2  ;;  %v9773_v28 = vcombine.high %v3814_v24, %v3818_v6  ;;  %v3941_v16 = vld [vmem:[#allocation18 + $0x1180] sm:$0xff]  ;;  %v9772_v45 = vcombine.low %v3814_v24, %v3818_v6  ;;  %v9890_v54 = vcombine.low %v3933_v55, %v3937_v18 }
0x1273   :  { %11389 = vtanh.f32 %v3375_v32 }
0x1275   :  { %7579 = vmatpush1.bf16.msra.mxu0 %v9700_v3 }
0x1276   :  { %7580 = vmatprep.subr.bf16.mxu0 %v9709_v13  ;;  %v9882_v13 = vcombine.low %v3925_v4, %v3929_v2 }
0x1279   :  { %7581 = vmatpush1.bf16.msra.mxu0 %v9708_v14  ;;  %v9891_v14 = vcombine.high %v3933_v55, %v3937_v18 }
0x127a   :  { %7582 = vmatprep.subr.bf16.mxu0 %v9717_v22  ;;  %v3822_v22 = vld [vmem:[#allocation18 + $0xdc8] sm:$0xff] }
0x127b   :  { %v9780_v31 = vcombine.low %v3822_v22, %v3826_v7 }
0x127d   :  { %v11390_v59 = vpop.eup %11389  ;;  %7583 = vmatpush1.bf16.msra.mxu0 %v9716_v1  ;;  %v3945_v1 = vld [vmem:[#allocation18 + $0x11a0] sm:$0xff] }
0x127e   :  { %v3378_v21 = vmul.f32 %v11390_v59, %v3377_v33  ;;  %7593 = vmatprep.subr.bf16.mxu0 %v9725_v36  ;;  %v9781_v33 = vcombine.high %v3822_v22, %v3826_v7  ;;  %v9899_v59 = vcombine.high %v3941_v16, %v3945_v1 }
0x1280   :  { %v3380_v62 = vadd.f32 %v3379_v61, %v3378_v21  ;;  %7585 = vmatmul.mubr.bf16.vlgmr.msra.gmra.mrb[100].mxu0 %v13059_v26  ;;  %v3834_v21 = vld [vmem:[#allocation18 + $0xe28] sm:$0xff]  ;;  %v3949_v61 = vld [vmem:[#allocation18 + $0x11c0] sm:$0xff] }
0x1281   :  { %7594 = vmatpush1.bf16.msra.mxu0 %v9724_v63  ;;  %v3830_v63 = vld [vmem:[#allocation18 + $0xe08] sm:$0xff] }
0x1282   :  { %v13166_v35 = vpack.c.bf16 %v3380_v62, %v3380_v62  ;;  %7595 = vmatprep.subr.bf16.mxu0 %v9733_v27  ;;  %v3953_v27 = vld [vmem:[#allocation18 + $0x11e0] sm:$0xff]  ;;  %v9898_v62 = vcombine.low %v3941_v16, %v3945_v1  ;;  %v9789_v30 = vcombine.high %v3830_v63, %v3834_v21  ;;  %v9788_v25 = vcombine.low %v3830_v63, %v3834_v21  ;;  %v3878_v1 = vld [vmem:[#allocation18 + $0xf88] sm:$0xff] }
0x1283   :  { %v9907_v51 = vcombine.high %v3949_v61, %v3953_v27  ;;  %v9906_v58 = vcombine.low %v3949_v61, %v3953_v27  ;;  %v3886_v61 = vld [vmem:[#allocation18 + $0xfc8] sm:$0xff] }
0x1284   :  { %7420 = vmatprep.mubr.bf16.mxu1 %v13166_v35  ;;  %7625 = vmatprep.mubr.bf16.mxu0 %v13166_v35  ;;  %v3890_v27 = vld [vmem:[#allocation18 + $0xfe8] sm:$0xff] }
0x1285   :  { %7596 = vmatpush1.bf16.msra.mxu0 %v9732_v48  ;;  %7421 = vmatmul.mubr.bf16.vlgmr.msra.gmra.mrb[84].mxu1 %v13138_v9  ;;  %v3842_v48 = vld [vmem:[#allocation18 + $0xe68] sm:$0xff] }
0x1286   :  { %7430 = vmatpush1.bf16.msra.mxu1 %v9850_v17  ;;  %7461 = vmatprep.mubr.bf16.mxu1 %v13166_v35  ;;  %v3810_v17 = vld [vmem:[#allocation18 + $0xd68] sm:$0xff]  ;;  %v9797_v12 = vcombine.high %v3838_v57, %v3842_v48  ;;  %v9796_v49 = vcombine.low %v3838_v57, %v3842_v48  ;;  %v9845_v57 = vcombine.high %v3886_v61, %v3890_v27 }
0x1287   :  { %7597 = vmatprep.subr.bf16.mxu0 %v9741_v43  ;;  %7431 = vmatprep.subr.bf16.mxu1 %v9859_v41  ;;  %v9765_v38 = vcombine.high %v3806_v53, %v3810_v17  ;;  %v9764_v32 = vcombine.low %v3806_v53, %v3810_v17  ;;  %v3957_v43 = vld [vmem:[#allocation18 + $0x1200] sm:$0xff] }
0x1288   :  { %v3961_v41 = vld [vmem:[#allocation18 + $0x1220] sm:$0xff] }
0x1289   :  { %7598 = vmatpush1.bf16.msra.mxu0 %v9740_v39  ;;  %v9915_v19 = vcombine.high %v3957_v43, %v3961_v41  ;;  %v3846_v39 = vld [vmem:[#allocation18 + $0xe88] sm:$0xff]  ;;  %v9914_v56 = vcombine.low %v3957_v43, %v3961_v41 }
0x128a   :  { %7432 = vmatpush1.bf16.msra.mxu1 %v9858_v42  ;;  %7599 = vmatprep.subr.bf16.mxu0 %v9749_v50  ;;  %v3850_v42 = vld [vmem:[#allocation18 + $0xea8] sm:$0xff]  ;;  %v3965_v50 = vld [vmem:[#allocation18 + $0x1240] sm:$0xff] }
0x128b   :  { %7433 = vmatprep.subr.bf16.mxu1 %v9867_v44  ;;  %v3969_v44 = vld [vmem:[#allocation18 + $0x1260] sm:$0xff]  ;;  %v9805_v29 = vcombine.high %v3846_v39, %v3850_v42  ;;  %v9804_v53 = vcombine.low %v3846_v39, %v3850_v42  ;;  %v3894_v43 = vld [vmem:[#allocation18 + $0x1008] sm:$0xff] }
0x128c   :  { %v9923_v52 = vcombine.high %v3965_v50, %v3969_v44  ;;  %v9922_v17 = vcombine.low %v3965_v50, %v3969_v44  ;;  %v3898_v41 = vld [vmem:[#allocation18 + $0x1028] sm:$0xff] }
0x128d   :  { %7600 = vmatpush1.bf16.msra.mxu0 %v9748_v46  ;;  %v3854_v46 = vld [vmem:[#allocation18 + $0xec8] sm:$0xff]  ;;  %v9853_v39 = vcombine.high %v3894_v43, %v3898_v41 }
0x128e   :  { %7434 = vmatpush1.bf16.msra.mxu1 %v9866_v15  ;;  %7601 = vmatprep.subr.bf16.mxu0 %v9757_v34  ;;  %v3858_v15 = vld [vmem:[#allocation18 + $0xee8] sm:$0xff]  ;;  %v3973_v34 = vld [vmem:[#allocation18 + $0x1280] sm:$0xff] }
0x128f   :  { %7435 = vmatprep.subr.bf16.mxu1 %v9875_v8  ;;  %v3977_v8 = vld [vmem:[#allocation18 + $0x12a0] sm:$0xff]  ;;  %v9813_v4 = vcombine.high %v3854_v46, %v3858_v15  ;;  %v9812_v24 = vcombine.low %v3854_v46, %v3858_v15  ;;  %v3902_v50 = vld [vmem:[#allocation18 + $0x1048] sm:$0xff] }
0x1290   :  { %v9931_v2 = vcombine.high %v3973_v34, %v3977_v8  ;;  %v9930_v6 = vcombine.low %v3973_v34, %v3977_v8  ;;  %v3906_v44 = vld [vmem:[#allocation18 + $0x1068] sm:$0xff] }
0x1291   :  { %7602 = vmatpush1.bf16.msra.mxu0 %v9756_v0  ;;  %v3862_v0 = vld [vmem:[#allocation18 + $0xf08] sm:$0xff]  ;;  %v9861_v46 = vcombine.high %v3902_v50, %v3906_v44 }
0x1292   :  { %v13175_v3 = vpop.f32.mrb[96].mxu0  ;;  %7436 = vmatpush1.bf16.msra.mxu1 %v9874_v5  ;;  %7603 = vmatprep.subr.bf16.mxu0 %v9765_v38  ;;  %v3866_v5 = vld [vmem:[#allocation18 + $0xf28] sm:$0xff]  ;;  %v3981_v38 = vld [vmem:[#allocation18 + $0x12c0] sm:$0xff] }
0x1293   :  { %v13177_v40 = vpop.f32.mrb[97].mxu0  ;;  %7437 = vmatprep.subr.bf16.mxu1 %v9883_v11  ;;  %v3985_v11 = vld [vmem:[#allocation18 + $0x12e0] sm:$0xff]  ;;  %v9821_v55 = vcombine.high %v3862_v0, %v3866_v5  ;;  %v9820_v22 = vcombine.low %v3862_v0, %v3866_v5  ;;  %v3910_v34 = vld [vmem:[#allocation18 + $0x1088] sm:$0xff]  ;;  %v13407_v0 = vld [vmem:[#allocation38_spill] sm:$0xff] }
0x1294   :  { %v7303_v60 = vpop.f32.mrb[98].mxu0  ;;  %v9939_v18 = vcombine.high %v3981_v38, %v3985_v11  ;;  %v9938_v7 = vcombine.low %v3981_v38, %v3985_v11  ;;  %v3914_v8 = vld [vmem:[#allocation18 + $0x10a8] sm:$0xff]  ;;  %v13183_v5 = vpack.c.bf16 %v13407_v0, %v13407_v0  ;;  %v3447_v0 = vld [vmem:[#allocation18 + $0x210] sm:$0xff] }
0x1295   :  { %7604 = vmatpush1.bf16.msra.mxu0 %v9764_v32  ;;  %v7304_v36 = vpop.f32.mrb[99].mxu0  ;;  %v3870_v32 = vld [vmem:[#allocation18 + $0xf48] sm:$0xff]  ;;  %v9869_v38 = vcombine.high %v3910_v34, %v3914_v8 }
0x1296   :  { %7438 = vmatpush1.bf16.msra.mxu1 %v9882_v13  ;;  %7605 = vmatprep.subr.bf16.mxu0 %v9773_v28  ;;  %v3874_v13 = vld [vmem:[#allocation18 + $0xf68] sm:$0xff]  ;;  %v3989_v28 = vld [vmem:[#allocation18 + $0x1300] sm:$0xff] }
0x1297   :  { %7439 = vmatprep.subr.bf16.mxu1 %v9891_v14  ;;  %v3993_v14 = vld [vmem:[#allocation18 + $0x1320] sm:$0xff]  ;;  %v9829_v60 = vcombine.high %v3870_v32, %v3874_v13  ;;  %v3882_v36 = vld [vmem:[#allocation18 + $0xfa8] sm:$0xff] }
0x1298   :  { %v9947_v16 = vcombine.high %v3989_v28, %v3993_v14  ;;  %v9837_v63 = vcombine.high %v3878_v1, %v3882_v36 }
0x1299   :  { %7606 = vmatpush1.bf16.msra.mxu0 %v9772_v45  ;;  %v3997_v45 = vld [vmem:[#allocation18 + $0x1340] sm:$0xff] }
0x129a   :  { %7440 = vmatpush1.bf16.msra.mxu1 %v9890_v54  ;;  %7607 = vmatprep.subr.bf16.mxu0 %v9781_v33  ;;  %v4001_v54 = vld [vmem:[#allocation18 + $0x1360] sm:$0xff]  ;;  %v9828_v33 = vcombine.low %v3870_v32, %v3874_v13  ;;  %v9868_v32 = vcombine.low %v3910_v34, %v3914_v8 }
0x129b   :  { %7441 = vmatprep.subr.bf16.mxu1 %v9899_v59  ;;  %v9946_v59 = vcombine.low %v3989_v28, %v3993_v14  ;;  %v9955_v21 = vcombine.high %v3997_v45, %v4001_v54 }
0x129d   :  { %7608 = vmatpush1.bf16.msra.mxu0 %v9780_v31  ;;  %v4005_v31 = vld [vmem:[#allocation18 + $0x1380] sm:$0xff] }
0x129e   :  { %7442 = vmatpush1.bf16.msra.mxu1 %v9898_v62  ;;  %7609 = vmatprep.subr.bf16.mxu0 %v9789_v30  ;;  %v4009_v62 = vld [vmem:[#allocation18 + $0x13a0] sm:$0xff]  ;;  %v9836_v30 = vcombine.low %v3878_v1, %v3882_v36 }
0x129f   :  { %7443 = vmatprep.subr.bf16.mxu1 %v9907_v51  ;;  %v9954_v51 = vcombine.low %v3997_v45, %v4001_v54  ;;  %v9963_v48 = vcombine.high %v4005_v31, %v4009_v62 }
0x12a1   :  { %7610 = vmatpush1.bf16.msra.mxu0 %v9788_v25  ;;  %v4013_v25 = vld [vmem:[#allocation18 + $0x13c0] sm:$0xff] }
0x12a2   :  { %7444 = vmatpush1.bf16.msra.mxu1 %v9906_v58  ;;  %7611 = vmatprep.subr.bf16.mxu0 %v9797_v12  ;;  %v4017_v58 = vld [vmem:[#allocation18 + $0x13e0] sm:$0xff]  ;;  %v9844_v12 = vcombine.low %v3886_v61, %v3890_v27 }
0x12a3   :  { %7445 = vmatprep.subr.bf16.mxu1 %v9915_v19  ;;  %v9962_v19 = vcombine.low %v4005_v31, %v4009_v62  ;;  %v9971_v42 = vcombine.high %v4013_v25, %v4017_v58 }
0x12a5   :  { %7612 = vmatpush1.bf16.msra.mxu0 %v9796_v49  ;;  %v3383_v49 = vld [vmem:[#allocation18 + $0x10] sm:$0xff] }
0x12a6   :  { %7446 = vmatpush1.bf16.msra.mxu1 %v9914_v56  ;;  %7613 = vmatprep.subr.bf16.mxu0 %v9805_v29  ;;  %v3387_v56 = vld [vmem:[#allocation18 + $0x30] sm:$0xff]  ;;  %v9852_v29 = vcombine.low %v3894_v43, %v3898_v41 }
0x12a7   :  { %7447 = vmatprep.subr.bf16.mxu1 %v9923_v52  ;;  %v9970_v52 = vcombine.low %v4013_v25, %v4017_v58  ;;  %v9343_v15 = vcombine.high %v3383_v49, %v3387_v56 }
0x12a9   :  { %7614 = vmatpush1.bf16.msra.mxu0 %v9804_v53  ;;  %v3391_v53 = vld [vmem:[#allocation18 + $0x50] sm:$0xff] }
0x12aa   :  { %7448 = vmatpush1.bf16.msra.mxu1 %v9922_v17  ;;  %7615 = vmatprep.subr.bf16.mxu0 %v9813_v4  ;;  %v3395_v17 = vld [vmem:[#allocation18 + $0x70] sm:$0xff]  ;;  %v9860_v4 = vcombine.low %v3902_v50, %v3906_v44 }
0x12ab   :  { %7449 = vmatprep.subr.bf16.mxu1 %v9931_v2  ;;  %v9342_v2 = vcombine.low %v3383_v49, %v3387_v56  ;;  %v9351_v11 = vcombine.high %v3391_v53, %v3395_v17  ;;  %v9350_v13 = vcombine.low %v3391_v53, %v3395_v17 }
0x12ad   :  { %7616 = vmatpush1.bf16.msra.mxu0 %v9812_v24  ;;  %v3918_v24 = vld [vmem:[#allocation18 + $0x10c8] sm:$0xff] }
0x12ae   :  { %7450 = vmatpush1.bf16.msra.mxu1 %v9930_v6  ;;  %7617 = vmatprep.subr.bf16.mxu0 %v9821_v55  ;;  %v3922_v6 = vld [vmem:[#allocation18 + $0x10e8] sm:$0xff]  ;;  %v3399_v55 = vld [vmem:[#allocation18 + $0x90] sm:$0xff] }
0x12af   :  { %7451 = vmatprep.subr.bf16.mxu1 %v9939_v18  ;;  %v3403_v18 = vld [vmem:[#allocation18 + $0xb0] sm:$0xff]  ;;  %v9877_v28 = vcombine.high %v3918_v24, %v3922_v6  ;;  %v9876_v1 = vcombine.low %v3918_v24, %v3922_v6 }
0x12b0   :  { %v9359_v14 = vcombine.high %v3399_v55, %v3403_v18  ;;  %v9358_v36 = vcombine.low %v3399_v55, %v3403_v18  ;;  %v3974_v18 = vld [vmem:[#allocation18 + $0x1288] sm:$0xff] }
0x12b1   :  { %7618 = vmatpush1.bf16.msra.mxu0 %v9820_v22  ;;  %v3926_v22 = vld [vmem:[#allocation18 + $0x1108] sm:$0xff] }
0x12b2   :  { %7452 = vmatpush1.bf16.msra.mxu1 %v9938_v7  ;;  %7619 = vmatprep.subr.bf16.mxu0 %v9829_v60  ;;  %v3930_v7 = vld [vmem:[#allocation18 + $0x1128] sm:$0xff]  ;;  %v3407_v60 = vld [vmem:[#allocation18 + $0xd0] sm:$0xff] }
0x12b3   :  { %7453 = vmatprep.subr.bf16.mxu1 %v9947_v16  ;;  %v3411_v16 = vld [vmem:[#allocation18 + $0xf0] sm:$0xff]  ;;  %v9885_v45 = vcombine.high %v3926_v22, %v3930_v7  ;;  %v9884_v61 = vcombine.low %v3926_v22, %v3930_v7 }
0x12b4   :  { %v9367_v54 = vcombine.high %v3407_v60, %v3411_v16  ;;  %v9366_v27 = vcombine.low %v3407_v60, %v3411_v16  ;;  %v3982_v16 = vld [vmem:[#allocation18 + $0x12c8] sm:$0xff] }
0x12b5   :  { %7620 = vmatpush1.bf16.msra.mxu0 %v9828_v33  ;;  %v3934_v33 = vld [vmem:[#allocation18 + $0x1148] sm:$0xff] }
0x12b6   :  { %7454 = vmatpush1.bf16.msra.mxu1 %v9946_v59  ;;  %7621 = vmatprep.subr.bf16.mxu0 %v9837_v63  ;;  %v3938_v59 = vld [vmem:[#allocation18 + $0x1168] sm:$0xff]  ;;  %v3415_v63 = vld [vmem:[#allocation18 + $0x110] sm:$0xff] }
0x12b7   :  { %7455 = vmatprep.subr.bf16.mxu1 %v9955_v21  ;;  %v3419_v21 = vld [vmem:[#allocation18 + $0x130] sm:$0xff]  ;;  %v9893_v31 = vcombine.high %v3934_v33, %v3938_v59  ;;  %v9892_v43 = vcombine.low %v3934_v33, %v3938_v59 }
0x12b8   :  { %v9375_v62 = vcombine.high %v3415_v63, %v3419_v21  ;;  %v9374_v41 = vcombine.low %v3415_v63, %v3419_v21  ;;  %v3990_v21 = vld [vmem:[#allocation18 + $0x1308] sm:$0xff] }
0x12b9   :  { %7622 = vmatpush1.bf16.msra.mxu0 %v9836_v30  ;;  %v3942_v30 = vld [vmem:[#allocation18 + $0x1188] sm:$0xff] }
0x12ba   :  { %7456 = vmatpush1.bf16.msra.mxu1 %v9954_v51  ;;  %7623 = vmatprep.subr.bf16.mxu0 %v9845_v57  ;;  %v3946_v51 = vld [vmem:[#allocation18 + $0x11a8] sm:$0xff]  ;;  %v3423_v57 = vld [vmem:[#allocation18 + $0x150] sm:$0xff] }
0x12bb   :  { %7457 = vmatprep.subr.bf16.mxu1 %v9963_v48  ;;  %v3427_v48 = vld [vmem:[#allocation18 + $0x170] sm:$0xff]  ;;  %v9901_v25 = vcombine.high %v3942_v30, %v3946_v51  ;;  %v9900_v50 = vcombine.low %v3942_v30, %v3946_v51 }
0x12bc   :  { %v9383_v58 = vcombine.high %v3423_v57, %v3427_v48  ;;  %v9382_v44 = vcombine.low %v3423_v57, %v3427_v48  ;;  %v3998_v48 = vld [vmem:[#allocation18 + $0x1348] sm:$0xff] }
0x12bd   :  { %7624 = vmatpush1.bf16.msra.mxu0 %v9844_v12  ;;  %v3950_v12 = vld [vmem:[#allocation18 + $0x11c8] sm:$0xff] }
0x12be   :  { %7458 = vmatpush1.bf16.msra.mxu1 %v9962_v19  ;;  %7634 = vmatprep.subr.bf16.mxu0 %v9853_v39  ;;  %v3954_v19 = vld [vmem:[#allocation18 + $0x11e8] sm:$0xff]  ;;  %v3431_v39 = vld [vmem:[#allocation18 + $0x190] sm:$0xff] }
0x12bf   :  { %7459 = vmatprep.subr.bf16.mxu1 %v9971_v42  ;;  %v3435_v42 = vld [vmem:[#allocation18 + $0x1b0] sm:$0xff]  ;;  %v9909_v49 = vcombine.high %v3950_v12, %v3954_v19  ;;  %v9908_v34 = vcombine.low %v3950_v12, %v3954_v19 }
0x12c0   :  { %7626 = vmatmul.mubr.bf16.vlgmr.msra.gmra.mrb[100].mxu0 %v13138_v9  ;;  %v9391_v56 = vcombine.high %v3431_v39, %v3435_v42  ;;  %v9390_v8 = vcombine.low %v3431_v39, %v3435_v42  ;;  %v4006_v42 = vld [vmem:[#allocation18 + $0x1388] sm:$0xff] }
0x12c1   :  { %7635 = vmatpush1.bf16.msra.mxu0 %v9852_v29  ;;  %7666 = vmatprep.mubr.bf16.mxu0 %v13166_v35  ;;  %v3958_v29 = vld [vmem:[#allocation18 + $0x1208] sm:$0xff] }
0x12c2   :  { %7460 = vmatpush1.bf16.msra.mxu1 %v9970_v52  ;;  %7636 = vmatprep.subr.bf16.mxu0 %v9861_v46  ;;  %v3962_v52 = vld [vmem:[#allocation18 + $0x1228] sm:$0xff]  ;;  %v3439_v46 = vld [vmem:[#allocation18 + $0x1d0] sm:$0xff] }
0x12c3   :  { %7675 = vmatprep.subr.bf16.mxu1 %v9343_v15  ;;  %v3443_v15 = vld [vmem:[#allocation18 + $0x1f0] sm:$0xff]  ;;  %v9917_v53 = vcombine.high %v3958_v29, %v3962_v52 }
0x12c4   :  { %v9399_v17 = vcombine.high %v3439_v46, %v3443_v15  ;;  %v9398_v24 = vcombine.low %v3439_v46, %v3443_v15  ;;  %v4014_v15 = vld [vmem:[#allocation18 + $0x13c8] sm:$0xff] }
0x12c5   :  { %7637 = vmatpush1.bf16.msra.mxu0 %v9860_v4  ;;  %7462 = vmatmul.mubr.bf16.vlgmr.msra.gmra.mrb[84].mxu1 %v13183_v5  ;;  %v3966_v4 = vld [vmem:[#allocation18 + $0x1248] sm:$0xff] }
0x12c6   :  { %7676 = vmatpush1.bf16.msra.mxu1 %v9342_v2  ;;  %7707 = vmatprep.mubr.bf16.mxu1 %v12915_v47  ;;  %v3970_v2 = vld [vmem:[#allocation18 + $0x1268] sm:$0xff] }
0x12c7   :  { %7638 = vmatprep.subr.bf16.mxu0 %v9869_v38  ;;  %7677 = vmatprep.subr.bf16.mxu1 %v9351_v11  ;;  %v3451_v38 = vld [vmem:[#allocation18 + $0x230] sm:$0xff]  ;;  %v9916_v11 = vcombine.low %v3958_v29, %v3962_v52  ;;  %v9925_v6 = vcombine.high %v3966_v4, %v3970_v2 }
0x12c8   :  { %v9407_v55 = vcombine.high %v3447_v0, %v3451_v38  ;;  %v9406_v22 = vcombine.low %v3447_v0, %v3451_v38  ;;  %v3384_v38 = vld [vmem:[#allocation18 + $0x18] sm:$0xff] }
0x12c9   :  { %7639 = vmatpush1.bf16.msra.mxu0 %v9868_v32  ;;  %v3978_v32 = vld [vmem:[#allocation18 + $0x12a8] sm:$0xff] }
0x12ca   :  { %7678 = vmatpush1.bf16.msra.mxu1 %v9350_v13  ;;  %7640 = vmatprep.subr.bf16.mxu0 %v9877_v28  ;;  %v3455_v13 = vld [vmem:[#allocation18 + $0x250] sm:$0xff]  ;;  %v9933_v7 = vcombine.high %v3974_v18, %v3978_v32 }
0x12cb   :  { %7679 = vmatprep.subr.bf16.mxu1 %v9359_v14  ;;  %v3459_v28 = vld [vmem:[#allocation18 + $0x270] sm:$0xff]  ;;  %v9924_v14 = vcombine.low %v3966_v4, %v3970_v2 }
0x12cc   :  { %v9415_v60 = vcombine.high %v3455_v13, %v3459_v28  ;;  %v9414_v33 = vcombine.low %v3455_v13, %v3459_v28  ;;  %v3392_v28 = vld [vmem:[#allocation18 + $0x58] sm:$0xff] }
0x12cd   :  { %7641 = vmatpush1.bf16.msra.mxu0 %v9876_v1  ;;  %v3986_v1 = vld [vmem:[#allocation18 + $0x12e8] sm:$0xff] }
0x12ce   :  { %7680 = vmatpush1.bf16.msra.mxu1 %v9358_v36  ;;  %7642 = vmatprep.subr.bf16.mxu0 %v9885_v45  ;;  %v3463_v36 = vld [vmem:[#allocation18 + $0x290] sm:$0xff]  ;;  %v9941_v59 = vcombine.high %v3982_v16, %v3986_v1 }
0x12cf   :  { %7681 = vmatprep.subr.bf16.mxu1 %v9367_v54  ;;  %v3467_v45 = vld [vmem:[#allocation18 + $0x2b0] sm:$0xff]  ;;  %v9932_v54 = vcombine.low %v3974_v18, %v3978_v32 }
0x12d0   :  { %v9423_v63 = vcombine.high %v3463_v36, %v3467_v45  ;;  %v9422_v30 = vcombine.low %v3463_v36, %v3467_v45  ;;  %v3400_v45 = vld [vmem:[#allocation18 + $0x98] sm:$0xff] }
0x12d1   :  { %7643 = vmatpush1.bf16.msra.mxu0 %v9884_v61  ;;  %v3994_v61 = vld [vmem:[#allocation18 + $0x1328] sm:$0xff] }
0x12d2   :  { %7682 = vmatpush1.bf16.msra.mxu1 %v9366_v27  ;;  %7644 = vmatprep.subr.bf16.mxu0 %v9893_v31  ;;  %v3471_v27 = vld [vmem:[#allocation18 + $0x2d0] sm:$0xff]  ;;  %v9949_v51 = vcombine.high %v3990_v21, %v3994_v61 }
0x12d3   :  { %7683 = vmatprep.subr.bf16.mxu1 %v9375_v62  ;;  %v3475_v31 = vld [vmem:[#allocation18 + $0x2f0] sm:$0xff]  ;;  %v9940_v62 = vcombine.low %v3982_v16, %v3986_v1 }
0x12d4   :  { %v9431_v57 = vcombine.high %v3471_v27, %v3475_v31  ;;  %v9430_v12 = vcombine.low %v3471_v27, %v3475_v31  ;;  %v3408_v31 = vld [vmem:[#allocation18 + $0xd8] sm:$0xff] }
0x12d5   :  { %7645 = vmatpush1.bf16.msra.mxu0 %v9892_v43  ;;  %v4002_v43 = vld [vmem:[#allocation18 + $0x1368] sm:$0xff] }
0x12d6   :  { %7684 = vmatpush1.bf16.msra.mxu1 %v9374_v41  ;;  %7646 = vmatprep.subr.bf16.mxu0 %v9901_v25  ;;  %v3479_v41 = vld [vmem:[#allocation18 + $0x310] sm:$0xff]  ;;  %v9957_v19 = vcombine.high %v3998_v48, %v4002_v43 }
0x12d7   :  { %7685 = vmatprep.subr.bf16.mxu1 %v9383_v58  ;;  %v3483_v25 = vld [vmem:[#allocation18 + $0x330] sm:$0xff]  ;;  %v9948_v58 = vcombine.low %v3990_v21, %v3994_v61 }
0x12d8   :  { %v9439_v39 = vcombine.high %v3479_v41, %v3483_v25  ;;  %v9438_v29 = vcombine.low %v3479_v41, %v3483_v25  ;;  %v3416_v41 = vld [vmem:[#allocation18 + $0x118] sm:$0xff] }
0x12d9   :  { %7647 = vmatpush1.bf16.msra.mxu0 %v9900_v50  ;;  %v4010_v50 = vld [vmem:[#allocation18 + $0x13a8] sm:$0xff]  ;;  %v3420_v25 = vld [vmem:[#allocation18 + $0x138] sm:$0xff] }
0x12da   :  { %7686 = vmatpush1.bf16.msra.mxu1 %v9382_v44  ;;  %7648 = vmatprep.subr.bf16.mxu0 %v9909_v49  ;;  %v3487_v44 = vld [vmem:[#allocation18 + $0x350] sm:$0xff]  ;;  %v9965_v52 = vcombine.high %v4006_v42, %v4010_v50 }
0x12db   :  { %7687 = vmatprep.subr.bf16.mxu1 %v9391_v56  ;;  %v3491_v49 = vld [vmem:[#allocation18 + $0x370] sm:$0xff]  ;;  %v9956_v56 = vcombine.low %v3998_v48, %v4002_v43 }
0x12dc   :  { %v9447_v46 = vcombine.high %v3487_v44, %v3491_v49  ;;  %v9446_v4 = vcombine.low %v3487_v44, %v3491_v49  ;;  %v3424_v44 = vld [vmem:[#allocation18 + $0x158] sm:$0xff] }
0x12dd   :  { %7649 = vmatpush1.bf16.msra.mxu0 %v9908_v34  ;;  %v4018_v34 = vld [vmem:[#allocation18 + $0x13e8] sm:$0xff]  ;;  %v3428_v49 = vld [vmem:[#allocation18 + $0x178] sm:$0xff] }
0x12de   :  { %7688 = vmatpush1.bf16.msra.mxu1 %v9390_v8  ;;  %7650 = vmatprep.subr.bf16.mxu0 %v9917_v53  ;;  %v3495_v8 = vld [vmem:[#allocation18 + $0x390] sm:$0xff]  ;;  %v9973_v2 = vcombine.high %v4014_v15, %v4018_v34 }
0x12df   :  { %7689 = vmatprep.subr.bf16.mxu1 %v9399_v17  ;;  %v3499_v53 = vld [vmem:[#allocation18 + $0x3b0] sm:$0xff]  ;;  %v9964_v17 = vcombine.low %v4006_v42, %v4010_v50  ;;  %v9377_v42 = vcombine.high %v3416_v41, %v3420_v25 }
0x12e0   :  { %v9455_v0 = vcombine.high %v3495_v8, %v3499_v53  ;;  %v9454_v18 = vcombine.low %v3495_v8, %v3499_v53  ;;  %v3432_v8 = vld [vmem:[#allocation18 + $0x198] sm:$0xff] }
0x12e1   :  { %7651 = vmatpush1.bf16.msra.mxu0 %v9916_v11  ;;  %v3388_v11 = vld [vmem:[#allocation18 + $0x38] sm:$0xff] }
0x12e2   :  { %7690 = vmatpush1.bf16.msra.mxu1 %v9398_v24  ;;  %7652 = vmatprep.subr.bf16.mxu0 %v9925_v6  ;;  %v3503_v24 = vld [vmem:[#allocation18 + $0x3d0] sm:$0xff]  ;;  %v9345_v32 = vcombine.high %v3384_v38, %v3388_v11  ;;  %v3436_v53 = vld [vmem:[#allocation18 + $0x1b8] sm:$0xff] }
0x12e3   :  { %7691 = vmatprep.subr.bf16.mxu1 %v9407_v55  ;;  %v3507_v6 = vld [vmem:[#allocation18 + $0x3f0] sm:$0xff]  ;;  %v9972_v55 = vcombine.low %v4014_v15, %v4018_v34  ;;  %v9385_v15 = vcombine.high %v3424_v44, %v3428_v49 }
0x12e4   :  { %v9463_v13 = vcombine.high %v3503_v24, %v3507_v6  ;;  %v9462_v16 = vcombine.low %v3503_v24, %v3507_v6  ;;  %v3440_v24 = vld [vmem:[#allocation18 + $0x1d8] sm:$0xff] }
0x12e5   :  { %7653 = vmatpush1.bf16.msra.mxu0 %v9924_v14  ;;  %v3396_v14 = vld [vmem:[#allocation18 + $0x78] sm:$0xff] }
0x12e6   :  { %7692 = vmatpush1.bf16.msra.mxu1 %v9406_v22  ;;  %7654 = vmatprep.subr.bf16.mxu0 %v9933_v7  ;;  %v3511_v22 = vld [vmem:[#allocation18 + $0x410] sm:$0xff]  ;;  %v9353_v1 = vcombine.high %v3392_v28, %v3396_v14  ;;  %v3444_v6 = vld [vmem:[#allocation18 + $0x1f8] sm:$0xff] }
0x12e7   :  { %7693 = vmatprep.subr.bf16.mxu1 %v9415_v60  ;;  %v3515_v7 = vld [vmem:[#allocation18 + $0x430] sm:$0xff]  ;;  %v9344_v60 = vcombine.low %v3384_v38, %v3388_v11  ;;  %v9393_v38 = vcombine.high %v3432_v8, %v3436_v53 }
0x12e8   :  { %v9471_v36 = vcombine.high %v3511_v22, %v3515_v7  ;;  %v9470_v21 = vcombine.low %v3511_v22, %v3515_v7  ;;  %v3448_v22 = vld [vmem:[#allocation18 + $0x218] sm:$0xff] }
0x12e9   :  { %7655 = vmatpush1.bf16.msra.mxu0 %v9932_v54  ;;  %v3404_v54 = vld [vmem:[#allocation18 + $0xb8] sm:$0xff] }
0x12ea   :  { %7694 = vmatpush1.bf16.msra.mxu1 %v9414_v33  ;;  %7656 = vmatprep.subr.bf16.mxu0 %v9941_v59  ;;  %v3519_v33 = vld [vmem:[#allocation18 + $0x450] sm:$0xff]  ;;  %v9361_v61 = vcombine.high %v3400_v45, %v3404_v54  ;;  %v3452_v7 = vld [vmem:[#allocation18 + $0x238] sm:$0xff] }
0x12eb   :  { %7695 = vmatprep.subr.bf16.mxu1 %v9423_v63  ;;  %v3523_v59 = vld [vmem:[#allocation18 + $0x470] sm:$0xff]  ;;  %v9352_v63 = vcombine.low %v3392_v28, %v3396_v14  ;;  %v9401_v28 = vcombine.high %v3440_v24, %v3444_v6 }
0x12ec   :  { %v9479_v27 = vcombine.high %v3519_v33, %v3523_v59  ;;  %v9478_v48 = vcombine.low %v3519_v33, %v3523_v59  ;;  %v3456_v33 = vld [vmem:[#allocation18 + $0x258] sm:$0xff] }
0x12ed   :  { %7657 = vmatpush1.bf16.msra.mxu0 %v9940_v62  ;;  %v3412_v62 = vld [vmem:[#allocation18 + $0xf8] sm:$0xff] }
0x12ee   :  { %7696 = vmatpush1.bf16.msra.mxu1 %v9422_v30  ;;  %7658 = vmatprep.subr.bf16.mxu0 %v9949_v51  ;;  %v3527_v30 = vld [vmem:[#allocation18 + $0x490] sm:$0xff]  ;;  %v3460_v59 = vld [vmem:[#allocation18 + $0x278] sm:$0xff] }
0x12ef   :  { %7697 = vmatprep.subr.bf16.mxu1 %v9431_v57  ;;  %v3531_v51 = vld [vmem:[#allocation18 + $0x4b0] sm:$0xff]  ;;  %v9360_v57 = vcombine.low %v3400_v45, %v3404_v54  ;;  %v9409_v45 = vcombine.high %v3448_v22, %v3452_v7 }
0x12f0   :  { %v9487_v43 = vcombine.high %v3527_v30, %v3531_v51 }
0x12f1   :  { %7659 = vmatpush1.bf16.msra.mxu0 %v9948_v58  ;;  %v3535_v58 = vld [vmem:[#allocation18 + $0x4d0] sm:$0xff] }
0x12f2   :  { %7698 = vmatpush1.bf16.msra.mxu1 %v9430_v12  ;;  %7660 = vmatprep.subr.bf16.mxu0 %v9957_v19  ;;  %v3539_v12 = vld [vmem:[#allocation18 + $0x4f0] sm:$0xff]  ;;  %v9368_v19 = vcombine.low %v3408_v31, %v3412_v62 }
0x12f3   :  { %7699 = vmatprep.subr.bf16.mxu1 %v9439_v39  ;;  %v9486_v39 = vcombine.low %v3527_v30, %v3531_v51  ;;  %v9495_v50 = vcombine.high %v3535_v58, %v3539_v12  ;;  %v3464_v30 = vld [vmem:[#allocation18 + $0x298] sm:$0xff] }
0x12f4   :  { %v3468_v51 = vld [vmem:[#allocation18 + $0x2b8] sm:$0xff] }
0x12f5   :  { %7661 = vmatpush1.bf16.msra.mxu0 %v9956_v56  ;;  %v3543_v56 = vld [vmem:[#allocation18 + $0x510] sm:$0xff] }
0x12f6   :  { %7700 = vmatpush1.bf16.msra.mxu1 %v9438_v29  ;;  %7662 = vmatprep.subr.bf16.mxu0 %v9965_v52  ;;  %v3547_v29 = vld [vmem:[#allocation18 + $0x530] sm:$0xff]  ;;  %v9376_v52 = vcombine.low %v3416_v41, %v3420_v25  ;;  %v9425_v41 = vcombine.high %v3464_v30, %v3468_v51 }
0x12f7   :  { %7701 = vmatprep.subr.bf16.mxu1 %v9447_v46  ;;  %v9494_v46 = vcombine.low %v3535_v58, %v3539_v12  ;;  %v9503_v34 = vcombine.high %v3543_v56, %v3547_v29  ;;  %v3472_v58 = vld [vmem:[#allocation18 + $0x2d8] sm:$0xff] }
0x12f8   :  { %v3476_v12 = vld [vmem:[#allocation18 + $0x2f8] sm:$0xff] }
0x12f9   :  { %7663 = vmatpush1.bf16.msra.mxu0 %v9964_v17  ;;  %v3551_v17 = vld [vmem:[#allocation18 + $0x550] sm:$0xff] }
0x12fa   :  { %7702 = vmatpush1.bf16.msra.mxu1 %v9446_v4  ;;  %7664 = vmatprep.subr.bf16.mxu0 %v9973_v2  ;;  %v3555_v4 = vld [vmem:[#allocation18 + $0x570] sm:$0xff]  ;;  %v9384_v2 = vcombine.low %v3424_v44, %v3428_v49  ;;  %v9433_v44 = vcombine.high %v3472_v58, %v3476_v12 }
0x12fb   :  { %7703 = vmatprep.subr.bf16.mxu1 %v9455_v0  ;;  %v9502_v0 = vcombine.low %v3543_v56, %v3547_v29  ;;  %v9511_v11 = vcombine.high %v3551_v17, %v3555_v4  ;;  %v3480_v56 = vld [vmem:[#allocation18 + $0x318] sm:$0xff] }
0x12fc   :  { %v3484_v29 = vld [vmem:[#allocation18 + $0x338] sm:$0xff] }
0x12fd   :  { %7665 = vmatpush1.bf16.msra.mxu0 %v9972_v55  ;;  %v3559_v55 = vld [vmem:[#allocation18 + $0x590] sm:$0xff] }
0x12fe   :  { %7704 = vmatpush1.bf16.msra.mxu1 %v9454_v18  ;;  %7880 = vmatprep.subr.bf16.mxu0 %v9345_v32  ;;  %v3563_v18 = vld [vmem:[#allocation18 + $0x5b0] sm:$0xff]  ;;  %v9392_v32 = vcombine.low %v3432_v8, %v3436_v53  ;;  %v9441_v8 = vcombine.high %v3480_v56, %v3484_v29 }
0x12ff   :  { %7705 = vmatprep.subr.bf16.mxu1 %v9463_v13  ;;  %v9510_v13 = vcombine.low %v3551_v17, %v3555_v4  ;;  %v9519_v14 = vcombine.high %v3559_v55, %v3563_v18  ;;  %v3488_v17 = vld [vmem:[#allocation18 + $0x358] sm:$0xff] }
0x1300   :  { %7667 = vmatmul.mubr.bf16.vlgmr.msra.gmra.mrb[100].mxu0 %v13183_v5  ;;  %v3492_v4 = vld [vmem:[#allocation18 + $0x378] sm:$0xff] }
0x1301   :  { %7881 = vmatpush1.bf16.msra.mxu0 %v9344_v60  ;;  %7912 = vmatprep.mubr.bf16.mxu0 %v12915_v47  ;;  %v9369_v47 = vcombine.high %v3408_v31, %v3412_v62  ;;  %v3567_v60 = vld [vmem:[#allocation18 + $0x5d0] sm:$0xff]  ;;  %v9417_v31 = vcombine.high %v3456_v33, %v3460_v59 }
0x1302   :  { %7706 = vmatpush1.bf16.msra.mxu1 %v9462_v16  ;;  %7882 = vmatprep.subr.bf16.mxu0 %v9353_v1  ;;  %v3571_v16 = vld [vmem:[#allocation18 + $0x5f0] sm:$0xff]  ;;  %v9400_v1 = vcombine.low %v3440_v24, %v3444_v6  ;;  %v9449_v24 = vcombine.high %v3488_v17, %v3492_v4 }
0x1303   :  { %7716 = vmatprep.subr.bf16.mxu1 %v9471_v36  ;;  %v9518_v36 = vcombine.low %v3559_v55, %v3563_v18  ;;  %v9527_v54 = vcombine.high %v3567_v60, %v3571_v16  ;;  %v3496_v55 = vld [vmem:[#allocation18 + $0x398] sm:$0xff] }
0x1304   :  { %v3500_v18 = vld [vmem:[#allocation18 + $0x3b8] sm:$0xff] }
0x1305   :  { %7883 = vmatpush1.bf16.msra.mxu0 %v9352_v63  ;;  %7708 = vmatmul.mubr.bf16.vlgmr.msra.gmra.mrb[88].mxu1 %v12867_v23  ;;  %v3575_v63 = vld [vmem:[#allocation18 + $0x610] sm:$0xff] }
0x1306   :  { %7717 = vmatpush1.bf16.msra.mxu1 %v9470_v21  ;;  %7748 = vmatprep.mubr.bf16.mxu1 %v13011_v10  ;;  %v3579_v21 = vld [vmem:[#allocation18 + $0x630] sm:$0xff] }
0x1307   :  { %7884 = vmatprep.subr.bf16.mxu0 %v9361_v61  ;;  %7718 = vmatprep.subr.bf16.mxu1 %v9479_v27  ;;  %v9408_v61 = vcombine.low %v3448_v22, %v3452_v7  ;;  %v9526_v27 = vcombine.low %v3567_v60, %v3571_v16  ;;  %v9535_v62 = vcombine.high %v3575_v63, %v3579_v21  ;;  %v3504_v60 = vld [vmem:[#allocation18 + $0x3d8] sm:$0xff] }
0x1308   :  { %v9457_v22 = vcombine.high %v3496_v55, %v3500_v18  ;;  %v3508_v16 = vld [vmem:[#allocation18 + $0x3f8] sm:$0xff] }
0x1309   :  { %7885 = vmatpush1.bf16.msra.mxu0 %v9360_v57  ;;  %v3583_v57 = vld [vmem:[#allocation18 + $0x650] sm:$0xff] }
0x130a   :  { %7719 = vmatpush1.bf16.msra.mxu1 %v9478_v48  ;;  %7886 = vmatprep.subr.bf16.mxu0 %v9369_v47  ;;  %v3587_v48 = vld [vmem:[#allocation18 + $0x670] sm:$0xff]  ;;  %v9416_v47 = vcombine.low %v3456_v33, %v3460_v59  ;;  %v9465_v33 = vcombine.high %v3504_v60, %v3508_v16 }
0x130b   :  { %7720 = vmatprep.subr.bf16.mxu1 %v9487_v43  ;;  %v9534_v43 = vcombine.low %v3575_v63, %v3579_v21  ;;  %v9543_v25 = vcombine.high %v3583_v57, %v3587_v48  ;;  %v3512_v63 = vld [vmem:[#allocation18 + $0x418] sm:$0xff] }
0x130c   :  { %v3516_v21 = vld [vmem:[#allocation18 + $0x438] sm:$0xff] }
0x130d   :  { %7887 = vmatpush1.bf16.msra.mxu0 %v9368_v19  ;;  %v3591_v19 = vld [vmem:[#allocation18 + $0x690] sm:$0xff] }
0x130e   :  { %7721 = vmatpush1.bf16.msra.mxu1 %v9486_v39  ;;  %7888 = vmatprep.subr.bf16.mxu0 %v9377_v42  ;;  %v3595_v39 = vld [vmem:[#allocation18 + $0x6b0] sm:$0xff]  ;;  %v9424_v42 = vcombine.low %v3464_v30, %v3468_v51  ;;  %v9473_v30 = vcombine.high %v3512_v63, %v3516_v21 }
0x130f   :  { %7722 = vmatprep.subr.bf16.mxu1 %v9495_v50  ;;  %v9542_v50 = vcombine.low %v3583_v57, %v3587_v48  ;;  %v9551_v49 = vcombine.high %v3591_v19, %v3595_v39  ;;  %v3520_v57 = vld [vmem:[#allocation18 + $0x458] sm:$0xff] }
0x1310   :  { %v3524_v48 = vld [vmem:[#allocation18 + $0x478] sm:$0xff] }
0x1311   :  { %7889 = vmatpush1.bf16.msra.mxu0 %v9376_v52  ;;  %v3599_v52 = vld [vmem:[#allocation18 + $0x6d0] sm:$0xff] }
0x1312   :  { %7723 = vmatpush1.bf16.msra.mxu1 %v9494_v46  ;;  %7890 = vmatprep.subr.bf16.mxu0 %v9385_v15  ;;  %v3603_v46 = vld [vmem:[#allocation18 + $0x6f0] sm:$0xff]  ;;  %v9432_v15 = vcombine.low %v3472_v58, %v3476_v12  ;;  %v9481_v58 = vcombine.high %v3520_v57, %v3524_v48 }
0x1313   :  { %7724 = vmatprep.subr.bf16.mxu1 %v9503_v34  ;;  %v9550_v34 = vcombine.low %v3591_v19, %v3595_v39  ;;  %v9559_v53 = vcombine.high %v3599_v52, %v3603_v46  ;;  %v3528_v19 = vld [vmem:[#allocation18 + $0x498] sm:$0xff] }
0x1314   :  { %v3532_v39 = vld [vmem:[#allocation18 + $0x4b8] sm:$0xff] }
0x1315   :  { %7891 = vmatpush1.bf16.msra.mxu0 %v9384_v2  ;;  %v3607_v2 = vld [vmem:[#allocation18 + $0x710] sm:$0xff] }
0x1316   :  { %7725 = vmatpush1.bf16.msra.mxu1 %v9502_v0  ;;  %7892 = vmatprep.subr.bf16.mxu0 %v9393_v38  ;;  %v3611_v0 = vld [vmem:[#allocation18 + $0x730] sm:$0xff]  ;;  %v9440_v38 = vcombine.low %v3480_v56, %v3484_v29  ;;  %v9489_v56 = vcombine.high %v3528_v19, %v3532_v39 }
0x1317   :  { %7726 = vmatprep.subr.bf16.mxu1 %v9511_v11  ;;  %v9558_v11 = vcombine.low %v3599_v52, %v3603_v46  ;;  %v9567_v6 = vcombine.high %v3607_v2, %v3611_v0  ;;  %v3536_v52 = vld [vmem:[#allocation18 + $0x4d8] sm:$0xff] }
0x1318   :  { %v3540_v46 = vld [vmem:[#allocation18 + $0x4f8] sm:$0xff] }
0x1319   :  { %7893 = vmatpush1.bf16.msra.mxu0 %v9392_v32  ;;  %v3615_v32 = vld [vmem:[#allocation18 + $0x750] sm:$0xff] }
0x131a   :  { %7727 = vmatpush1.bf16.msra.mxu1 %v9510_v13  ;;  %7894 = vmatprep.subr.bf16.mxu0 %v9401_v28  ;;  %v3619_v13 = vld [vmem:[#allocation18 + $0x770] sm:$0xff]  ;;  %v9448_v28 = vcombine.low %v3488_v17, %v3492_v4  ;;  %v3544_v17 = vld [vmem:[#allocation18 + $0x518] sm:$0xff] }
0x131b   :  { %7728 = vmatprep.subr.bf16.mxu1 %v9519_v14  ;;  %v9566_v14 = vcombine.low %v3607_v2, %v3611_v0  ;;  %v9575_v7 = vcombine.high %v3615_v32, %v3619_v13  ;;  %v3548_v4 = vld [vmem:[#allocation18 + $0x538] sm:$0xff]  ;;  %v3663_v2 = vld [vmem:[#allocation18 + $0x8d0] sm:$0xff] }
0x131c   :  { %v3667_v0 = vld [vmem:[#allocation18 + $0x8f0] sm:$0xff] }
0x131d   :  { %7895 = vmatpush1.bf16.msra.mxu0 %v9400_v1  ;;  %v3623_v1 = vld [vmem:[#allocation18 + $0x790] sm:$0xff] }
0x131e   :  { %7729 = vmatpush1.bf16.msra.mxu1 %v9518_v36  ;;  %7896 = vmatprep.subr.bf16.mxu0 %v9409_v45  ;;  %v3627_v36 = vld [vmem:[#allocation18 + $0x7b0] sm:$0xff]  ;;  %v9456_v45 = vcombine.low %v3496_v55, %v3500_v18  ;;  %v3552_v55 = vld [vmem:[#allocation18 + $0x558] sm:$0xff] }
0x131f   :  { %7730 = vmatprep.subr.bf16.mxu1 %v9527_v54  ;;  %v9574_v54 = vcombine.low %v3615_v32, %v3619_v13  ;;  %v9583_v59 = vcombine.high %v3623_v1, %v3627_v36  ;;  %v3556_v18 = vld [vmem:[#allocation18 + $0x578] sm:$0xff]  ;;  %v3671_v32 = vld [vmem:[#allocation18 + $0x910] sm:$0xff] }
0x1320   :  { %v3675_v13 = vld [vmem:[#allocation18 + $0x930] sm:$0xff] }
0x1321   :  { %7897 = vmatpush1.bf16.msra.mxu0 %v9408_v61  ;;  %v3631_v61 = vld [vmem:[#allocation18 + $0x7d0] sm:$0xff] }
0x1322   :  { %7731 = vmatpush1.bf16.msra.mxu1 %v9526_v27  ;;  %7898 = vmatprep.subr.bf16.mxu0 %v9417_v31  ;;  %v3635_v27 = vld [vmem:[#allocation18 + $0x7f0] sm:$0xff]  ;;  %v9464_v31 = vcombine.low %v3504_v60, %v3508_v16  ;;  %v3560_v60 = vld [vmem:[#allocation18 + $0x598] sm:$0xff] }
0x1323   :  { %7732 = vmatprep.subr.bf16.mxu1 %v9535_v62  ;;  %v9582_v62 = vcombine.low %v3623_v1, %v3627_v36  ;;  %v9591_v51 = vcombine.high %v3631_v61, %v3635_v27  ;;  %v3564_v16 = vld [vmem:[#allocation18 + $0x5b8] sm:$0xff]  ;;  %v3679_v1 = vld [vmem:[#allocation18 + $0x950] sm:$0xff] }
0x1324   :  { %v3683_v36 = vld [vmem:[#allocation18 + $0x970] sm:$0xff] }
0x1325   :  { %7899 = vmatpush1.bf16.msra.mxu0 %v9416_v47  ;;  %v3639_v47 = vld [vmem:[#allocation18 + $0x810] sm:$0xff] }
0x1326   :  { %7733 = vmatpush1.bf16.msra.mxu1 %v9534_v43  ;;  %7900 = vmatprep.subr.bf16.mxu0 %v9425_v41  ;;  %v3643_v43 = vld [vmem:[#allocation18 + $0x830] sm:$0xff]  ;;  %v9472_v41 = vcombine.low %v3512_v63, %v3516_v21  ;;  %v3568_v63 = vld [vmem:[#allocation18 + $0x5d8] sm:$0xff] }
0x1327   :  { %7734 = vmatprep.subr.bf16.mxu1 %v9543_v25  ;;  %v9590_v25 = vcombine.low %v3631_v61, %v3635_v27  ;;  %v9599_v12 = vcombine.high %v3639_v47, %v3643_v43  ;;  %v3572_v21 = vld [vmem:[#allocation18 + $0x5f8] sm:$0xff]  ;;  %v3687_v61 = vld [vmem:[#allocation18 + $0x990] sm:$0xff] }
0x1328   :  { %v3691_v27 = vld [vmem:[#allocation18 + $0x9b0] sm:$0xff] }
0x1329   :  { %7901 = vmatpush1.bf16.msra.mxu0 %v9424_v42  ;;  %v3647_v42 = vld [vmem:[#allocation18 + $0x850] sm:$0xff] }
0x132a   :  { %7735 = vmatpush1.bf16.msra.mxu1 %v9542_v50  ;;  %7902 = vmatprep.subr.bf16.mxu0 %v9433_v44  ;;  %v3651_v50 = vld [vmem:[#allocation18 + $0x870] sm:$0xff]  ;;  %v9480_v44 = vcombine.low %v3520_v57, %v3524_v48  ;;  %v3576_v57 = vld [vmem:[#allocation18 + $0x618] sm:$0xff] }
0x132b   :  { %7736 = vmatprep.subr.bf16.mxu1 %v9551_v49  ;;  %v9598_v49 = vcombine.low %v3639_v47, %v3643_v43  ;;  %v9607_v29 = vcombine.high %v3647_v42, %v3651_v50  ;;  %v3580_v48 = vld [vmem:[#allocation18 + $0x638] sm:$0xff]  ;;  %v3695_v47 = vld [vmem:[#allocation18 + $0x9d0] sm:$0xff] }
0x132c   :  { %v3699_v43 = vld [vmem:[#allocation18 + $0x9f0] sm:$0xff] }
0x132d   :  { %7903 = vmatpush1.bf16.msra.mxu0 %v9432_v15  ;;  %v3655_v15 = vld [vmem:[#allocation18 + $0x890] sm:$0xff] }
0x132e   :  { %7737 = vmatpush1.bf16.msra.mxu1 %v9550_v34  ;;  %7904 = vmatprep.subr.bf16.mxu0 %v9441_v8  ;;  %v3659_v34 = vld [vmem:[#allocation18 + $0x8b0] sm:$0xff]  ;;  %v9606_v8 = vcombine.low %v3647_v42, %v3651_v50 }
0x132f   :  { %7738 = vmatprep.subr.bf16.mxu1 %v9559_v53  ;;  %v9615_v53 = vcombine.high %v3655_v15, %v3659_v34  ;;  %v3703_v42 = vld [vmem:[#allocation18 + $0xa10] sm:$0xff] }
0x1330   :  { %v3707_v50 = vld [vmem:[#allocation18 + $0xa30] sm:$0xff] }
0x1331   :  { %7905 = vmatpush1.bf16.msra.mxu0 %v9440_v38  ;;  %v9496_v38 = vcombine.low %v3536_v52, %v3540_v46 }
0x1332   :  { %7739 = vmatpush1.bf16.msra.mxu1 %v9558_v11  ;;  %7906 = vmatprep.subr.bf16.mxu0 %v9449_v24  ;;  %v9614_v11 = vcombine.low %v3655_v15, %v3659_v34  ;;  %v9505_v24 = vcombine.high %v3544_v17, %v3548_v4  ;;  %v3711_v15 = vld [vmem:[#allocation18 + $0xa50] sm:$0xff] }
0x1333   :  { %7740 = vmatprep.subr.bf16.mxu1 %v9567_v6  ;;  %v9623_v6 = vcombine.high %v3663_v2, %v3667_v0  ;;  %v3715_v34 = vld [vmem:[#allocation18 + $0xa70] sm:$0xff] }
0x1335   :  { %7907 = vmatpush1.bf16.msra.mxu0 %v9448_v28  ;;  %v9504_v28 = vcombine.low %v3544_v17, %v3548_v4  ;;  %v3600_v17 = vld [vmem:[#allocation18 + $0x6d8] sm:$0xff] }
0x1336   :  { %7741 = vmatpush1.bf16.msra.mxu1 %v9566_v14  ;;  %7908 = vmatprep.subr.bf16.mxu0 %v9457_v22  ;;  %v9622_v14 = vcombine.low %v3663_v2, %v3667_v0  ;;  %v9513_v22 = vcombine.high %v3552_v55, %v3556_v18  ;;  %v3604_v4 = vld [vmem:[#allocation18 + $0x6f8] sm:$0xff]  ;;  %v3719_v2 = vld [vmem:[#allocation18 + $0xa90] sm:$0xff] }
0x1337   :  { %7742 = vmatprep.subr.bf16.mxu1 %v9575_v7  ;;  %v9631_v7 = vcombine.high %v3671_v32, %v3675_v13  ;;  %v3723_v0 = vld [vmem:[#allocation18 + $0xab0] sm:$0xff] }
0x1339   :  { %7909 = vmatpush1.bf16.msra.mxu0 %v9456_v45  ;;  %v9512_v45 = vcombine.low %v3552_v55, %v3556_v18  ;;  %v3608_v55 = vld [vmem:[#allocation18 + $0x718] sm:$0xff] }
0x133a   :  { %7743 = vmatpush1.bf16.msra.mxu1 %v9574_v54  ;;  %7910 = vmatprep.subr.bf16.mxu0 %v9465_v33  ;;  %v9630_v54 = vcombine.low %v3671_v32, %v3675_v13  ;;  %v9521_v33 = vcombine.high %v3560_v60, %v3564_v16  ;;  %v3612_v18 = vld [vmem:[#allocation18 + $0x738] sm:$0xff]  ;;  %v3727_v32 = vld [vmem:[#allocation18 + $0xad0] sm:$0xff] }
0x133b   :  { %7744 = vmatprep.subr.bf16.mxu1 %v9583_v59  ;;  %v9639_v59 = vcombine.high %v3679_v1, %v3683_v36  ;;  %v3731_v13 = vld [vmem:[#allocation18 + $0xaf0] sm:$0xff] }
0x133d   :  { %7911 = vmatpush1.bf16.msra.mxu0 %v9464_v31  ;;  %v9520_v31 = vcombine.low %v3560_v60, %v3564_v16  ;;  %v3616_v60 = vld [vmem:[#allocation18 + $0x758] sm:$0xff] }
0x133e   :  { %7745 = vmatpush1.bf16.msra.mxu1 %v9582_v62  ;;  %7921 = vmatprep.subr.bf16.mxu0 %v9473_v30  ;;  %v9638_v62 = vcombine.low %v3679_v1, %v3683_v36  ;;  %v9529_v30 = vcombine.high %v3568_v63, %v3572_v21  ;;  %v3620_v16 = vld [vmem:[#allocation18 + $0x778] sm:$0xff]  ;;  %v3735_v1 = vld [vmem:[#allocation18 + $0xb10] sm:$0xff] }
0x133f   :  { %7746 = vmatprep.subr.bf16.mxu1 %v9591_v51  ;;  %v9647_v51 = vcombine.high %v3687_v61, %v3691_v27  ;;  %v3739_v36 = vld [vmem:[#allocation18 + $0xb30] sm:$0xff] }
0x1340   :  { %7913 = vmatmul.mubr.bf16.vlgmr.msra.gmra.mrb[104].mxu0 %v12867_v23  ;;  %v9488_v23 = vcombine.low %v3528_v19, %v3532_v39  ;;  %v3584_v19 = vld [vmem:[#allocation18 + $0x658] sm:$0xff] }
0x1341   :  { %7922 = vmatpush1.bf16.msra.mxu0 %v9472_v41  ;;  %7953 = vmatprep.mubr.bf16.mxu0 %v13011_v10  ;;  %v9497_v10 = vcombine.high %v3536_v52, %v3540_v46  ;;  %v9528_v41 = vcombine.low %v3568_v63, %v3572_v21  ;;  %v3588_v39 = vld [vmem:[#allocation18 + $0x678] sm:$0xff] }
0x1342   :  { %7747 = vmatpush1.bf16.msra.mxu1 %v9590_v25  ;;  %7923 = vmatprep.subr.bf16.mxu0 %v9481_v58  ;;  %v9646_v25 = vcombine.low %v3687_v61, %v3691_v27  ;;  %v9537_v58 = vcombine.high %v3576_v57, %v3580_v48  ;;  %v3592_v52 = vld [vmem:[#allocation18 + $0x698] sm:$0xff]  ;;  %v3743_v61 = vld [vmem:[#allocation18 + $0xb50] sm:$0xff] }
0x1343   :  { %7757 = vmatprep.subr.bf16.mxu1 %v9599_v12  ;;  %v9655_v12 = vcombine.high %v3695_v47, %v3699_v43  ;;  %v3596_v46 = vld [vmem:[#allocation18 + $0x6b8] sm:$0xff]  ;;  %v3747_v27 = vld [vmem:[#allocation18 + $0xb70] sm:$0xff] }
0x1344   :  { %v3624_v63 = vld [vmem:[#allocation18 + $0x798] sm:$0xff] }
0x1345   :  { %7924 = vmatpush1.bf16.msra.mxu0 %v9480_v44  ;;  %7749 = vmatmul.mubr.bf16.vlgmr.msra.gmra.mrb[88].mxu1 %v12963_v37  ;;  %v9536_v44 = vcombine.low %v3576_v57, %v3580_v48  ;;  %v3628_v21 = vld [vmem:[#allocation18 + $0x7b8] sm:$0xff] }
0x1346   :  { %7758 = vmatpush1.bf16.msra.mxu1 %v9598_v49  ;;  %7789 = vmatprep.mubr.bf16.mxu1 %v13107_v20  ;;  %v9654_v49 = vcombine.low %v3695_v47, %v3699_v43  ;;  %v3632_v57 = vld [vmem:[#allocation18 + $0x7d8] sm:$0xff]  ;;  %v3751_v47 = vld [vmem:[#allocation18 + $0xb90] sm:$0xff] }
0x1347   :  { %7925 = vmatprep.subr.bf16.mxu0 %v9489_v56  ;;  %7759 = vmatprep.subr.bf16.mxu1 %v9607_v29  ;;  %v9545_v56 = vcombine.high %v3584_v19, %v3588_v39  ;;  %v9663_v29 = vcombine.high %v3703_v42, %v3707_v50  ;;  %v3636_v48 = vld [vmem:[#allocation18 + $0x7f8] sm:$0xff]  ;;  %v3755_v43 = vld [vmem:[#allocation18 + $0xbb0] sm:$0xff] }
0x1349   :  { %7926 = vmatpush1.bf16.msra.mxu0 %v9488_v23  ;;  %v9544_v23 = vcombine.low %v3584_v19, %v3588_v39  ;;  %v3640_v19 = vld [vmem:[#allocation18 + $0x818] sm:$0xff] }
0x134a   :  { %7760 = vmatpush1.bf16.msra.mxu1 %v9606_v8  ;;  %7927 = vmatprep.subr.bf16.mxu0 %v9497_v10  ;;  %v9662_v8 = vcombine.low %v3703_v42, %v3707_v50  ;;  %v9553_v10 = vcombine.high %v3592_v52, %v3596_v46  ;;  %v3644_v39 = vld [vmem:[#allocation18 + $0x838] sm:$0xff]  ;;  %v3759_v42 = vld [vmem:[#allocation18 + $0xbd0] sm:$0xff] }
0x134b   :  { %7761 = vmatprep.subr.bf16.mxu1 %v9615_v53  ;;  %v9671_v53 = vcombine.high %v3711_v15, %v3715_v34  ;;  %v3763_v50 = vld [vmem:[#allocation18 + $0xbf0] sm:$0xff] }
0x134d   :  { %7928 = vmatpush1.bf16.msra.mxu0 %v9496_v38  ;;  %v9552_v38 = vcombine.low %v3592_v52, %v3596_v46  ;;  %v3648_v52 = vld [vmem:[#allocation18 + $0x858] sm:$0xff] }
0x134e   :  { %7762 = vmatpush1.bf16.msra.mxu1 %v9614_v11  ;;  %7929 = vmatprep.subr.bf16.mxu0 %v9505_v24  ;;  %v9670_v11 = vcombine.low %v3711_v15, %v3715_v34  ;;  %v9561_v24 = vcombine.high %v3600_v17, %v3604_v4  ;;  %v3652_v46 = vld [vmem:[#allocation18 + $0x878] sm:$0xff]  ;;  %v3767_v15 = vld [vmem:[#allocation18 + $0xc10] sm:$0xff] }
0x134f   :  { %7763 = vmatprep.subr.bf16.mxu1 %v9623_v6  ;;  %v9679_v6 = vcombine.high %v3719_v2, %v3723_v0  ;;  %v3771_v34 = vld [vmem:[#allocation18 + $0xc30] sm:$0xff] }
0x1351   :  { %7930 = vmatpush1.bf16.msra.mxu0 %v9504_v28  ;;  %v9560_v28 = vcombine.low %v3600_v17, %v3604_v4  ;;  %v3656_v17 = vld [vmem:[#allocation18 + $0x898] sm:$0xff] }
0x1352   :  { %7764 = vmatpush1.bf16.msra.mxu1 %v9622_v14  ;;  %7931 = vmatprep.subr.bf16.mxu0 %v9513_v22  ;;  %v9678_v14 = vcombine.low %v3719_v2, %v3723_v0  ;;  %v9569_v22 = vcombine.high %v3608_v55, %v3612_v18  ;;  %v3660_v4 = vld [vmem:[#allocation18 + $0x8b8] sm:$0xff]  ;;  %v3775_v2 = vld [vmem:[#allocation18 + $0xc50] sm:$0xff] }
0x1353   :  { %7765 = vmatprep.subr.bf16.mxu1 %v9631_v7  ;;  %v9687_v7 = vcombine.high %v3727_v32, %v3731_v13  ;;  %v3779_v0 = vld [vmem:[#allocation18 + $0xc70] sm:$0xff] }
0x1355   :  { %7932 = vmatpush1.bf16.msra.mxu0 %v9512_v45  ;;  %v9568_v45 = vcombine.low %v3608_v55, %v3612_v18  ;;  %v3664_v55 = vld [vmem:[#allocation18 + $0x8d8] sm:$0xff] }
0x1356   :  { %7766 = vmatpush1.bf16.msra.mxu1 %v9630_v54  ;;  %7933 = vmatprep.subr.bf16.mxu0 %v9521_v33  ;;  %v9686_v54 = vcombine.low %v3727_v32, %v3731_v13  ;;  %v9577_v33 = vcombine.high %v3616_v60, %v3620_v16  ;;  %v3668_v18 = vld [vmem:[#allocation18 + $0x8f8] sm:$0xff]  ;;  %v3783_v32 = vld [vmem:[#allocation18 + $0xc90] sm:$0xff] }
0x1357   :  { %7767 = vmatprep.subr.bf16.mxu1 %v9639_v59  ;;  %v9695_v59 = vcombine.high %v3735_v1, %v3739_v36  ;;  %v3787_v13 = vld [vmem:[#allocation18 + $0xcb0] sm:$0xff] }
0x1359   :  { %7934 = vmatpush1.bf16.msra.mxu0 %v9520_v31  ;;  %v9576_v31 = vcombine.low %v3616_v60, %v3620_v16  ;;  %v3791_v60 = vld [vmem:[#allocation18 + $0xcd0] sm:$0xff] }
0x135a   :  { %7768 = vmatpush1.bf16.msra.mxu1 %v9638_v62  ;;  %7935 = vmatprep.subr.bf16.mxu0 %v9529_v30  ;;  %v9694_v62 = vcombine.low %v3735_v1, %v3739_v36  ;;  %v9585_v30 = vcombine.high %v3624_v63, %v3628_v21  ;;  %v3795_v16 = vld [vmem:[#allocation18 + $0xcf0] sm:$0xff]  ;;  %v9624_v1 = vcombine.low %v3664_v55, %v3668_v18 }
0x135b   :  { %7769 = vmatprep.subr.bf16.mxu1 %v9647_v51  ;;  %v9703_v51 = vcombine.high %v3743_v61, %v3747_v27  ;;  %v9742_v36 = vcombine.low %v3783_v32, %v3787_v13 }
0x135d   :  { %7936 = vmatpush1.bf16.msra.mxu0 %v9528_v41  ;;  %v9584_v41 = vcombine.low %v3624_v63, %v3628_v21  ;;  %v3799_v63 = vld [vmem:[#allocation18 + $0xd10] sm:$0xff] }
0x135e   :  { %7770 = vmatpush1.bf16.msra.mxu1 %v9646_v25  ;;  %7937 = vmatprep.subr.bf16.mxu0 %v9537_v58  ;;  %v9702_v25 = vcombine.low %v3743_v61, %v3747_v27  ;;  %v9593_v58 = vcombine.high %v3632_v57, %v3636_v48  ;;  %v3803_v21 = vld [vmem:[#allocation18 + $0xd30] sm:$0xff]  ;;  %v9750_v27 = vcombine.low %v3791_v60, %v3795_v16 }
0x135f   :  { %7771 = vmatprep.subr.bf16.mxu1 %v9655_v12  ;;  %v9711_v12 = vcombine.high %v3751_v47, %v3755_v43 }
0x1361   :  { %7938 = vmatpush1.bf16.msra.mxu0 %v9536_v44  ;;  %v9592_v44 = vcombine.low %v3632_v57, %v3636_v48  ;;  %v13199_v57 = vld [vmem:[#allocation19] sm:$0xff]  ;;  %v3807_v48 = vld [vmem:[#allocation18 + $0xd50] sm:$0xff] }
0x1362   :  { %7772 = vmatpush1.bf16.msra.mxu1 %v9654_v49  ;;  %7939 = vmatprep.subr.bf16.mxu0 %v9545_v56  ;;  %v9710_v49 = vcombine.low %v3751_v47, %v3755_v43  ;;  %v9601_v56 = vcombine.high %v3640_v19, %v3644_v39  ;;  %v3811_v47 = vld [vmem:[#allocation18 + $0xd70] sm:$0xff] }
0x1363   :  { %7773 = vmatprep.subr.bf16.mxu1 %v9663_v29  ;;  %v9719_v29 = vcombine.high %v3759_v42, %v3763_v50 }
0x1365   :  { %7940 = vmatpush1.bf16.msra.mxu0 %v9544_v23  ;;  %v9600_v23 = vcombine.low %v3640_v19, %v3644_v39  ;;  %v9767_v19 = vcombine.high %v3807_v48, %v3811_v47  ;;  %v3696_v39 = vld [vmem:[#allocation18 + $0x9d8] sm:$0xff] }
0x1366   :  { %7774 = vmatpush1.bf16.msra.mxu1 %v9662_v8  ;;  %7941 = vmatprep.subr.bf16.mxu0 %v9553_v10  ;;  %v9718_v8 = vcombine.low %v3759_v42, %v3763_v50  ;;  %v9609_v10 = vcombine.high %v3648_v52, %v3652_v46  ;;  %v3700_v42 = vld [vmem:[#allocation18 + $0x9f8] sm:$0xff]  ;;  %v13409_v50 = vld [vmem:[#allocation37_spill] sm:$0xff] }
0x1367   :  { %7775 = vmatprep.subr.bf16.mxu1 %v9671_v53  ;;  %v9727_v53 = vcombine.high %v3767_v15, %v3771_v34 }
0x1369   :  { %7942 = vmatpush1.bf16.msra.mxu0 %v9552_v38  ;;  %v9608_v38 = vcombine.low %v3648_v52, %v3652_v46  ;;  %v9766_v52 = vcombine.low %v3807_v48, %v3811_v47  ;;  %v9657_v46 = vcombine.high %v3696_v39, %v3700_v42  ;;  %v3740_v48 = vld [vmem:[#allocation18 + $0xb38] sm:$0xff]  ;;  %v3855_v47 = vld [vmem:[#allocation18 + $0xed0] sm:$0xff] }
0x136a   :  { %7776 = vmatpush1.bf16.msra.mxu1 %v9670_v11  ;;  %7943 = vmatprep.subr.bf16.mxu0 %v9561_v24  ;;  %v9726_v11 = vcombine.low %v3767_v15, %v3771_v34  ;;  %v9617_v24 = vcombine.high %v3656_v17, %v3660_v4 }
0x136b   :  { %7777 = vmatprep.subr.bf16.mxu1 %v9679_v6  ;;  %v9735_v6 = vcombine.high %v3775_v2, %v3779_v0 }
0x136d   :  { %7944 = vmatpush1.bf16.msra.mxu0 %v9560_v28  ;;  %v9734_v28 = vcombine.low %v3775_v2, %v3779_v0 }
0x136e   :  { %7778 = vmatpush1.bf16.msra.mxu1 %v9678_v14  ;;  %7945 = vmatprep.subr.bf16.mxu0 %v9569_v22  ;;  %v9743_v14 = vcombine.high %v3783_v32, %v3787_v13  ;;  %v3672_v22 = vld [vmem:[#allocation18 + $0x918] sm:$0xff]  ;;  %v3831_v13 = vld [vmem:[#allocation18 + $0xe10] sm:$0xff] }
0x136f   :  { %7779 = vmatprep.subr.bf16.mxu1 %v9687_v7  ;;  %v3676_v7 = vld [vmem:[#allocation18 + $0x938] sm:$0xff] }
0x1370   :  { %v9632_v61 = vcombine.low %v3672_v22, %v3676_v7  ;;  %v3712_v32 = vld [vmem:[#allocation18 + $0xa58] sm:$0xff] }
0x1371   :  { %7946 = vmatpush1.bf16.msra.mxu0 %v9568_v45  ;;  %v9633_v45 = vcombine.high %v3672_v22, %v3676_v7  ;;  %v3720_v7 = vld [vmem:[#allocation18 + $0xa98] sm:$0xff] }
0x1372   :  { %7780 = vmatpush1.bf16.msra.mxu1 %v9686_v54  ;;  %7947 = vmatprep.subr.bf16.mxu0 %v9577_v33  ;;  %v9751_v54 = vcombine.high %v3791_v60, %v3795_v16  ;;  %v3680_v33 = vld [vmem:[#allocation18 + $0x958] sm:$0xff]  ;;  %v3839_v16 = vld [vmem:[#allocation18 + $0xe50] sm:$0xff] }
0x1373   :  { %7781 = vmatprep.subr.bf16.mxu1 %v9695_v59  ;;  %v3684_v59 = vld [vmem:[#allocation18 + $0x978] sm:$0xff] }
0x1374   :  { %v9640_v43 = vcombine.low %v3680_v33, %v3684_v59  ;;  %v3724_v60 = vld [vmem:[#allocation18 + $0xab8] sm:$0xff] }
0x1375   :  { %7948 = vmatpush1.bf16.msra.mxu0 %v9576_v31  ;;  %v9641_v31 = vcombine.high %v3680_v33, %v3684_v59  ;;  %v3728_v59 = vld [vmem:[#allocation18 + $0xad8] sm:$0xff] }
0x1376   :  { %7782 = vmatpush1.bf16.msra.mxu1 %v9694_v62  ;;  %7949 = vmatprep.subr.bf16.mxu0 %v9585_v30  ;;  %v9759_v62 = vcombine.high %v3799_v63, %v3803_v21  ;;  %v3688_v30 = vld [vmem:[#allocation18 + $0x998] sm:$0xff] }
0x1377   :  { %7783 = vmatprep.subr.bf16.mxu1 %v9703_v51  ;;  %v3692_v51 = vld [vmem:[#allocation18 + $0x9b8] sm:$0xff] }
0x1379   :  { %7950 = vmatpush1.bf16.msra.mxu0 %v9584_v41  ;;  %v9758_v41 = vcombine.low %v3799_v63, %v3803_v21  ;;  %v3732_v63 = vld [vmem:[#allocation18 + $0xaf8] sm:$0xff]  ;;  %v3847_v21 = vld [vmem:[#allocation18 + $0xe90] sm:$0xff] }
0x137a   :  { %7784 = vmatpush1.bf16.msra.mxu1 %v9702_v25  ;;  %7951 = vmatprep.subr.bf16.mxu0 %v9593_v58  ;;  %v9649_v25 = vcombine.high %v3688_v30, %v3692_v51  ;;  %v13408_v58 = vld [vmem:[#allocation36_spill] sm:$0xff] }
0x137b   :  { %7785 = vmatprep.subr.bf16.mxu1 %v9711_v12  ;;  %v4028_v12 = vrot.slane %v13199_v57, %v13408_v58 }
0x137d   :  { %7952 = vmatpush1.bf16.msra.mxu0 %v9592_v44  ;;  %v4032_v44 = vrot.slane %v13199_v57, %v13409_v50  ;;  %v7300_v15 = vadd.f32 %v13175_v3, %v4028_v12 }
0x137e   :  { %7786 = vmatpush1.bf16.msra.mxu1 %v9710_v49  ;;  %7962 = vmatprep.subr.bf16.mxu0 %v9601_v56  ;;  %v3815_v49 = vld [vmem:[#allocation18 + $0xd90] sm:$0xff] }
0x137f   :  { %7787 = vmatprep.subr.bf16.mxu1 %v9719_v29  ;;  %v3819_v56 = vld [vmem:[#allocation18 + $0xdb0] sm:$0xff]  ;;  %v9648_v29 = vcombine.low %v3688_v30, %v3692_v51  ;;  %v3736_v51 = vld [vmem:[#allocation18 + $0xb18] sm:$0xff] }
0x1380   :  { %7954 = vmatmul.mubr.bf16.vlgmr.msra.gmra.mrb[104].mxu0 %v12963_v37  ;;  %v9616_v37 = vcombine.low %v3656_v17, %v3660_v4  ;;  %v9775_v34 = vcombine.high %v3815_v49, %v3819_v56  ;;  %v3823_v17 = vld [vmem:[#allocation18 + $0xdd0] sm:$0xff]  ;;  %v9774_v3 = vcombine.low %v3815_v49, %v3819_v56  ;;  %v9697_v12 = vcombine.high %v3736_v51, %v3740_v48 }
0x1381   :  { %7963 = vmatpush1.bf16.msra.mxu0 %v9600_v23  ;;  %7994 = vmatprep.mubr.bf16.mxu0 %v13107_v20  ;;  %v9625_v20 = vcombine.high %v3664_v55, %v3668_v18  ;;  %v3704_v23 = vld [vmem:[#allocation18 + $0xa18] sm:$0xff]  ;;  %v3827_v4 = vld [vmem:[#allocation18 + $0xdf0] sm:$0xff]  ;;  %v9696_v56 = vcombine.low %v3736_v51, %v3740_v48 }
0x1382   :  { %7788 = vmatpush1.bf16.msra.mxu1 %v9718_v8  ;;  %7964 = vmatprep.subr.bf16.mxu0 %v9609_v10  ;;  %v3708_v8 = vld [vmem:[#allocation18 + $0xa38] sm:$0xff]  ;;  %v7302_v10 = vadd.f32 %v13177_v40, %v4032_v44  ;;  %v9783_v18 = vcombine.high %v3823_v17, %v3827_v4  ;;  %v3863_v44 = vld [vmem:[#allocation18 + $0xf10] sm:$0xff] }
0x1383   :  { %7798 = vmatprep.subr.bf16.mxu1 %v9727_v53  ;;  %v3716_v40 = vld [vmem:[#allocation18 + $0xa78] sm:$0xff]  ;;  %v3867_v49 = vld [vmem:[#allocation18 + $0xf30] sm:$0xff] }
0x1384   :  { %v3792_v48 = vld [vmem:[#allocation18 + $0xcd8] sm:$0xff] }
0x1385   :  { %7965 = vmatpush1.bf16.msra.mxu0 %v9608_v38  ;;  %7790 = vmatmul.mubr.bf16.vlgmr.msra.gmra.mrb[88].mxu1 %v13059_v26  ;;  %v9656_v38 = vcombine.low %v3696_v39, %v3700_v42  ;;  %v3744_v39 = vld [vmem:[#allocation18 + $0xb58] sm:$0xff] }
0x1386   :  { %7799 = vmatpush1.bf16.msra.mxu1 %v9726_v11  ;;  %7830 = vmatprep.mubr.bf16.mxu1 %v13166_v35  ;;  %v3748_v42 = vld [vmem:[#allocation18 + $0xb78] sm:$0xff] }
0x1387   :  { %7966 = vmatprep.subr.bf16.mxu0 %v9617_v24  ;;  %7800 = vmatprep.subr.bf16.mxu1 %v9735_v6  ;;  %v9665_v6 = vcombine.high %v3704_v23, %v3708_v8 }
0x1389   :  { %7967 = vmatpush1.bf16.msra.mxu0 %v9616_v37  ;;  %v3835_v37 = vld [vmem:[#allocation18 + $0xe30] sm:$0xff] }
0x138a   :  { %7801 = vmatpush1.bf16.msra.mxu1 %v9734_v28  ;;  %7968 = vmatprep.subr.bf16.mxu0 %v9625_v20  ;;  %v9664_v28 = vcombine.low %v3704_v23, %v3708_v8  ;;  %v9782_v20 = vcombine.low %v3823_v17, %v3827_v4  ;;  %v9791_v22 = vcombine.high %v3831_v13, %v3835_v37  ;;  %v3871_v23 = vld [vmem:[#allocation18 + $0xf50] sm:$0xff] }
0x138b   :  { %7802 = vmatprep.subr.bf16.mxu1 %v9743_v14  ;;  %v9673_v14 = vcombine.high %v3712_v32, %v3716_v40  ;;  %v3875_v8 = vld [vmem:[#allocation18 + $0xf70] sm:$0xff] }
0x138c   :  { %v9831_v4 = vcombine.high %v3871_v23, %v3875_v8 }
0x138d   :  { %7969 = vmatpush1.bf16.msra.mxu0 %v9624_v1  ;;  %v3843_v1 = vld [vmem:[#allocation18 + $0xe70] sm:$0xff] }
0x138e   :  { %7803 = vmatpush1.bf16.msra.mxu1 %v9742_v36  ;;  %7970 = vmatprep.subr.bf16.mxu0 %v9633_v45  ;;  %v9672_v36 = vcombine.low %v3712_v32, %v3716_v40  ;;  %v9790_v45 = vcombine.low %v3831_v13, %v3835_v37  ;;  %v9799_v33 = vcombine.high %v3839_v16, %v3843_v1  ;;  %v3768_v40 = vld [vmem:[#allocation18 + $0xc18] sm:$0xff]  ;;  %v3887_v37 = vld [vmem:[#allocation18 + $0xfd0] sm:$0xff] }
0x138f   :  { %7804 = vmatprep.subr.bf16.mxu1 %v9751_v54  ;;  %v9681_v54 = vcombine.high %v3720_v7, %v3724_v60  ;;  %v3772_v13 = vld [vmem:[#allocation18 + $0xc38] sm:$0xff] }
0x1391   :  { %7971 = vmatpush1.bf16.msra.mxu0 %v9632_v61  ;;  %v3851_v61 = vld [vmem:[#allocation18 + $0xeb0] sm:$0xff] }
0x1392   :  { %7805 = vmatpush1.bf16.msra.mxu1 %v9750_v27  ;;  %7972 = vmatprep.subr.bf16.mxu0 %v9641_v31  ;;  %v9680_v27 = vcombine.low %v3720_v7, %v3724_v60  ;;  %v9798_v31 = vcombine.low %v3839_v16, %v3843_v1  ;;  %v9807_v30 = vcombine.high %v3847_v21, %v3851_v61  ;;  %v3776_v60 = vld [vmem:[#allocation18 + $0xc58] sm:$0xff]  ;;  %v3895_v1 = vld [vmem:[#allocation18 + $0x1010] sm:$0xff] }
0x1393   :  { %7806 = vmatprep.subr.bf16.mxu1 %v9759_v62  ;;  %v9689_v62 = vcombine.high %v3728_v59, %v3732_v63  ;;  %v3780_v16 = vld [vmem:[#allocation18 + $0xc78] sm:$0xff] }
0x1395   :  { %7973 = vmatpush1.bf16.msra.mxu0 %v9640_v43  ;;  %v3859_v43 = vld [vmem:[#allocation18 + $0xef0] sm:$0xff] }
0x1396   :  { %7807 = vmatpush1.bf16.msra.mxu1 %v9758_v41  ;;  %7974 = vmatprep.subr.bf16.mxu0 %v9649_v25  ;;  %v9688_v41 = vcombine.low %v3728_v59, %v3732_v63  ;;  %v9806_v25 = vcombine.low %v3847_v21, %v3851_v61  ;;  %v3784_v63 = vld [vmem:[#allocation18 + $0xc98] sm:$0xff]  ;;  %v3903_v61 = vld [vmem:[#allocation18 + $0x1050] sm:$0xff] }
0x1397   :  { %7808 = vmatprep.subr.bf16.mxu1 %v9767_v19  ;;  %v9815_v19 = vcombine.high %v3855_v47, %v3859_v43  ;;  %v3788_v21 = vld [vmem:[#allocation18 + $0xcb8] sm:$0xff] }
0x1398   :  { %v7463_v53 = vpop.f32.mrb[84].mxu1 }
0x1399   :  { %v13207_v2 = vadd.f32 %v7463_v53, %v7300_v15  ;;  %7975 = vmatpush1.bf16.msra.mxu0 %v9648_v29  ;;  %v7465_v0 = vpop.f32.mrb[85].mxu1  ;;  %v9814_v29 = vcombine.low %v3855_v47, %v3859_v43  ;;  %v3752_v15 = vld [vmem:[#allocation18 + $0xb98] sm:$0xff]  ;;  %v9822_v53 = vcombine.low %v3863_v44, %v3867_v49  ;;  %v3911_v43 = vld [vmem:[#allocation18 + $0x1090] sm:$0xff] }
0x139a   :  { %v13209_v11 = vadd.f32 %v7465_v0, %v7302_v10  ;;  %v7467_v24 = vpop.f32.mrb[86].mxu1  ;;  %7809 = vmatpush1.bf16.msra.mxu1 %v9766_v52  ;;  %7976 = vmatprep.subr.bf16.mxu0 %v9657_v46  ;;  %v9705_v52 = vcombine.high %v3744_v39, %v3748_v42  ;;  %v9823_v46 = vcombine.high %v3863_v44, %v3867_v49  ;;  %v3760_v0 = vld [vmem:[#allocation18 + $0xbd8] sm:$0xff]  ;;  %v3919_v44 = vld [vmem:[#allocation18 + $0x10d0] sm:$0xff] }
0x139b   :  { %v7468_v55 = vpop.f32.mrb[87].mxu1  ;;  %7810 = vmatprep.subr.bf16.mxu1 %v9775_v34  ;;  %v3756_v34 = vld [vmem:[#allocation18 + $0xbb8] sm:$0xff]  ;;  %v9704_v10 = vcombine.low %v3744_v39, %v3748_v42  ;;  %v3879_v24 = vld [vmem:[#allocation18 + $0xf90] sm:$0xff] }
0x139c   :  { %v9713_v17 = vcombine.high %v3752_v15, %v3756_v34  ;;  %v9830_v55 = vcombine.low %v3871_v23, %v3875_v8  ;;  %v3796_v47 = vld [vmem:[#allocation18 + $0xcf8] sm:$0xff]  ;;  %v3923_v49 = vld [vmem:[#allocation18 + $0x10f0] sm:$0xff] }
0x139d   :  { %7977 = vmatpush1.bf16.msra.mxu0 %v9656_v38  ;;  %v3764_v38 = vld [vmem:[#allocation18 + $0xbf8] sm:$0xff]  ;;  %v3927_v23 = vld [vmem:[#allocation18 + $0x1110] sm:$0xff] }
0x139e   :  { %7811 = vmatpush1.bf16.msra.mxu1 %v9774_v3  ;;  %7978 = vmatprep.subr.bf16.mxu0 %v9665_v6  ;;  %v3883_v3 = vld [vmem:[#allocation18 + $0xfb0] sm:$0xff]  ;;  %v9712_v6 = vcombine.low %v3752_v15, %v3756_v34  ;;  %v3800_v39 = vld [vmem:[#allocation18 + $0xd18] sm:$0xff] }
0x139f   :  { %7812 = vmatprep.subr.bf16.mxu1 %v9783_v18  ;;  %v9721_v18 = vcombine.high %v3760_v0, %v3764_v38  ;;  %v9839_v32 = vcombine.high %v3879_v24, %v3883_v3  ;;  %v3804_v42 = vld [vmem:[#allocation18 + $0xd38] sm:$0xff]  ;;  %v3931_v8 = vld [vmem:[#allocation18 + $0x1130] sm:$0xff] }
0x13a0   :  { %v3808_v15 = vld [vmem:[#allocation18 + $0xd58] sm:$0xff] }
0x13a1   :  { %7979 = vmatpush1.bf16.msra.mxu0 %v9664_v28  ;;  %v3891_v28 = vld [vmem:[#allocation18 + $0xff0] sm:$0xff]  ;;  %v3812_v34 = vld [vmem:[#allocation18 + $0xd78] sm:$0xff] }
0x13a2   :  { %7813 = vmatpush1.bf16.msra.mxu1 %v9782_v20  ;;  %7980 = vmatprep.subr.bf16.mxu0 %v9673_v14  ;;  %v9720_v20 = vcombine.low %v3760_v0, %v3764_v38  ;;  %v9838_v14 = vcombine.low %v3879_v24, %v3883_v3  ;;  %v9847_v7 = vcombine.high %v3887_v37, %v3891_v28  ;;  %v3816_v0 = vld [vmem:[#allocation18 + $0xd98] sm:$0xff]  ;;  %v3935_v24 = vld [vmem:[#allocation18 + $0x1150] sm:$0xff] }
0x13a3   :  { %7814 = vmatprep.subr.bf16.mxu1 %v9791_v22  ;;  %v9729_v22 = vcombine.high %v3768_v40, %v3772_v13  ;;  %v3820_v38 = vld [vmem:[#allocation18 + $0xdb8] sm:$0xff]  ;;  %v3939_v3 = vld [vmem:[#allocation18 + $0x1170] sm:$0xff] }
0x13a5   :  { %7981 = vmatpush1.bf16.msra.mxu0 %v9672_v36  ;;  %v3899_v36 = vld [vmem:[#allocation18 + $0x1030] sm:$0xff] }
0x13a6   :  { %7815 = vmatpush1.bf16.msra.mxu1 %v9790_v45  ;;  %7982 = vmatprep.subr.bf16.mxu0 %v9681_v54  ;;  %v9728_v45 = vcombine.low %v3768_v40, %v3772_v13  ;;  %v9846_v54 = vcombine.low %v3887_v37, %v3891_v28  ;;  %v9855_v59 = vcombine.high %v3895_v1, %v3899_v36  ;;  %v3824_v13 = vld [vmem:[#allocation18 + $0xdd8] sm:$0xff] }
0x13a7   :  { %7816 = vmatprep.subr.bf16.mxu1 %v9799_v33  ;;  %v9737_v33 = vcombine.high %v3776_v60, %v3780_v16  ;;  %v9895_v40 = vcombine.high %v3935_v24, %v3939_v3  ;;  %v3828_v37 = vld [vmem:[#allocation18 + $0xdf8] sm:$0xff] }
0x13a9   :  { %7983 = vmatpush1.bf16.msra.mxu0 %v9680_v27  ;;  %v3907_v27 = vld [vmem:[#allocation18 + $0x1070] sm:$0xff] }
0x13aa   :  { %7817 = vmatpush1.bf16.msra.mxu1 %v9798_v31  ;;  %7984 = vmatprep.subr.bf16.mxu0 %v9689_v62  ;;  %v9736_v31 = vcombine.low %v3776_v60, %v3780_v16  ;;  %v9854_v62 = vcombine.low %v3895_v1, %v3899_v36  ;;  %v9863_v51 = vcombine.high %v3903_v61, %v3907_v27 }
0x13ab   :  { %7818 = vmatprep.subr.bf16.mxu1 %v9807_v30  ;;  %v9745_v30 = vcombine.high %v3784_v63, %v3788_v21  ;;  %v9894_v16 = vcombine.low %v3935_v24, %v3939_v3  ;;  %v9785_v1 = vcombine.high %v3824_v13, %v3828_v37 }
0x13ad   :  { %7985 = vmatpush1.bf16.msra.mxu0 %v9688_v41  ;;  %v3915_v41 = vld [vmem:[#allocation18 + $0x10b0] sm:$0xff] }
0x13ae   :  { %7819 = vmatpush1.bf16.msra.mxu1 %v9806_v25  ;;  %7986 = vmatprep.subr.bf16.mxu0 %v9697_v12  ;;  %v9862_v25 = vcombine.low %v3903_v61, %v3907_v27  ;;  %v9753_v12 = vcombine.high %v3792_v48, %v3796_v47 }
0x13af   :  { %7820 = vmatprep.subr.bf16.mxu1 %v9815_v19  ;;  %v9871_v19 = vcombine.high %v3911_v43, %v3915_v41 }
0x13b1   :  { %7987 = vmatpush1.bf16.msra.mxu0 %v9696_v56  ;;  %v9752_v56 = vcombine.low %v3792_v48, %v3796_v47 }
0x13b2   :  { %7821 = vmatpush1.bf16.msra.mxu1 %v9814_v29  ;;  %7988 = vmatprep.subr.bf16.mxu0 %v9705_v52  ;;  %v9870_v29 = vcombine.low %v3911_v43, %v3915_v41  ;;  %v9761_v52 = vcombine.high %v3800_v39, %v3804_v42 }
0x13b3   :  { %7822 = vmatprep.subr.bf16.mxu1 %v9823_v46  ;;  %v9879_v46 = vcombine.high %v3919_v44, %v3923_v49 }
0x13b5   :  { %7989 = vmatpush1.bf16.msra.mxu0 %v9704_v10  ;;  %v9760_v10 = vcombine.low %v3800_v39, %v3804_v42 }
0x13b6   :  { %7823 = vmatpush1.bf16.msra.mxu1 %v9822_v53  ;;  %7990 = vmatprep.subr.bf16.mxu0 %v9713_v17  ;;  %v9878_v53 = vcombine.low %v3919_v44, %v3923_v49  ;;  %v9769_v17 = vcombine.high %v3808_v15, %v3812_v34 }
0x13b7   :  { %7824 = vmatprep.subr.bf16.mxu1 %v9831_v4  ;;  %v9887_v4 = vcombine.high %v3927_v23, %v3931_v8 }
0x13b9   :  { %7991 = vmatpush1.bf16.msra.mxu0 %v9712_v6  ;;  %v9768_v6 = vcombine.low %v3808_v15, %v3812_v34 }
0x13ba   :  { %7825 = vmatpush1.bf16.msra.mxu1 %v9830_v55  ;;  %7992 = vmatprep.subr.bf16.mxu0 %v9721_v18  ;;  %v9886_v55 = vcombine.low %v3927_v23, %v3931_v8  ;;  %v9777_v18 = vcombine.high %v3816_v0, %v3820_v38 }
0x13bb   :  { %7826 = vmatprep.subr.bf16.mxu1 %v9839_v32 }
0x13bd   :  { %7993 = vmatpush1.bf16.msra.mxu0 %v9720_v20  ;;  %v3943_v20 = vld [vmem:[#allocation18 + $0x1190] sm:$0xff] }
0x13be   :  { %7827 = vmatpush1.bf16.msra.mxu1 %v9838_v14  ;;  %8003 = vmatprep.subr.bf16.mxu0 %v9729_v22  ;;  %v3947_v14 = vld [vmem:[#allocation18 + $0x11b0] sm:$0xff] }
0x13bf   :  { %7828 = vmatprep.subr.bf16.mxu1 %v9847_v7  ;;  %v9776_v7 = vcombine.low %v3816_v0, %v3820_v38  ;;  %v9903_v36 = vcombine.high %v3943_v20, %v3947_v14 }
0x13c0   :  { %7995 = vmatmul.mubr.bf16.vlgmr.msra.gmra.mrb[104].mxu0 %v13059_v26  ;;  %v9744_v26 = vcombine.low %v3784_v63, %v3788_v21  ;;  %v9784_v63 = vcombine.low %v3824_v13, %v3828_v37  ;;  %v9902_v21 = vcombine.low %v3943_v20, %v3947_v14 }
0x13c1   :  { %8004 = vmatpush1.bf16.msra.mxu0 %v9728_v45  ;;  %8035 = vmatprep.mubr.bf16.mxu0 %v13166_v35  ;;  %v3832_v45 = vld [vmem:[#allocation18 + $0xe18] sm:$0xff] }
0x13c2   :  { %7829 = vmatpush1.bf16.msra.mxu1 %v9846_v54  ;;  %8005 = vmatprep.subr.bf16.mxu0 %v9737_v33  ;;  %v3836_v54 = vld [vmem:[#allocation18 + $0xe38] sm:$0xff]  ;;  %v3951_v33 = vld [vmem:[#allocation18 + $0x11d0] sm:$0xff] }
0x13c3   :  { %7839 = vmatprep.subr.bf16.mxu1 %v9855_v59  ;;  %v3955_v59 = vld [vmem:[#allocation18 + $0x11f0] sm:$0xff]  ;;  %v9793_v61 = vcombine.high %v3832_v45, %v3836_v54  ;;  %v9792_v48 = vcombine.low %v3832_v45, %v3836_v54 }
0x13c4   :  { %v9911_v27 = vcombine.high %v3951_v33, %v3955_v59  ;;  %v9910_v47 = vcombine.low %v3951_v33, %v3955_v59  ;;  %v3888_v33 = vld [vmem:[#allocation18 + $0xfd8] sm:$0xff] }
0x13c5   :  { %8006 = vmatpush1.bf16.msra.mxu0 %v9736_v31  ;;  %7831 = vmatmul.mubr.bf16.vlgmr.msra.gmra.mrb[88].mxu1 %v13138_v9  ;;  %v3840_v31 = vld [vmem:[#allocation18 + $0xe58] sm:$0xff] }
0x13c6   :  { %7840 = vmatpush1.bf16.msra.mxu1 %v9854_v62  ;;  %7871 = vmatprep.mubr.bf16.mxu1 %v13166_v35  ;;  %v3844_v62 = vld [vmem:[#allocation18 + $0xe78] sm:$0xff] }
0x13c7   :  { %8007 = vmatprep.subr.bf16.mxu0 %v9745_v30  ;;  %7841 = vmatprep.subr.bf16.mxu1 %v9863_v51  ;;  %v3959_v30 = vld [vmem:[#allocation18 + $0x1210] sm:$0xff]  ;;  %v9801_v43 = vcombine.high %v3840_v31, %v3844_v62  ;;  %v9800_v39 = vcombine.low %v3840_v31, %v3844_v62  ;;  %v3892_v59 = vld [vmem:[#allocation18 + $0xff8] sm:$0xff] }
0x13c8   :  { %v3963_v51 = vld [vmem:[#allocation18 + $0x1230] sm:$0xff]  ;;  %v9849_v31 = vcombine.high %v3888_v33, %v3892_v59 }
0x13c9   :  { %8008 = vmatpush1.bf16.msra.mxu0 %v9744_v26  ;;  %v9919_v41 = vcombine.high %v3959_v30, %v3963_v51  ;;  %v3848_v26 = vld [vmem:[#allocation18 + $0xe98] sm:$0xff]  ;;  %v9918_v42 = vcombine.low %v3959_v30, %v3963_v51 }
0x13ca   :  { %7842 = vmatpush1.bf16.msra.mxu1 %v9862_v25  ;;  %8009 = vmatprep.subr.bf16.mxu0 %v9753_v12  ;;  %v3852_v25 = vld [vmem:[#allocation18 + $0xeb8] sm:$0xff]  ;;  %v3967_v12 = vld [vmem:[#allocation18 + $0x1250] sm:$0xff] }
0x13cb   :  { %7843 = vmatprep.subr.bf16.mxu1 %v9871_v19  ;;  %v3971_v19 = vld [vmem:[#allocation18 + $0x1270] sm:$0xff]  ;;  %v9809_v44 = vcombine.high %v3848_v26, %v3852_v25  ;;  %v9808_v15 = vcombine.low %v3848_v26, %v3852_v25  ;;  %v3896_v30 = vld [vmem:[#allocation18 + $0x1018] sm:$0xff] }
0x13cc   :  { %v9927_v49 = vcombine.high %v3967_v12, %v3971_v19  ;;  %v9926_v34 = vcombine.low %v3967_v12, %v3971_v19  ;;  %v3900_v51 = vld [vmem:[#allocation18 + $0x1038] sm:$0xff] }
0x13cd   :  { %8010 = vmatpush1.bf16.msra.mxu0 %v9752_v56  ;;  %v3856_v56 = vld [vmem:[#allocation18 + $0xed8] sm:$0xff]  ;;  %v9857_v26 = vcombine.high %v3896_v30, %v3900_v51 }
0x13ce   :  { %7844 = vmatpush1.bf16.msra.mxu1 %v9870_v29  ;;  %8011 = vmatprep.subr.bf16.mxu0 %v9761_v52  ;;  %v3860_v29 = vld [vmem:[#allocation18 + $0xef8] sm:$0xff]  ;;  %v3975_v52 = vld [vmem:[#allocation18 + $0x1290] sm:$0xff] }
0x13cf   :  { %7845 = vmatprep.subr.bf16.mxu1 %v9879_v46  ;;  %v3979_v46 = vld [vmem:[#allocation18 + $0x12b0] sm:$0xff]  ;;  %v9817_v23 = vcombine.high %v3856_v56, %v3860_v29  ;;  %v9816_v0 = vcombine.low %v3856_v56, %v3860_v29  ;;  %v3904_v12 = vld [vmem:[#allocation18 + $0x1058] sm:$0xff]  ;;  %v8086_v56 = vmax.f32 %v13209_v11, 0.0 }
0x13d0   :  { %v9935_v8 = vcombine.high %v3975_v52, %v3979_v46  ;;  %v9934_v38 = vcombine.low %v3975_v52, %v3979_v46  ;;  %v3908_v19 = vld [vmem:[#allocation18 + $0x1078] sm:$0xff] }
0x13d1   :  { %8012 = vmatpush1.bf16.msra.mxu0 %v9760_v10  ;;  %v3864_v10 = vld [vmem:[#allocation18 + $0xf18] sm:$0xff]  ;;  %v9864_v46 = vcombine.low %v3904_v12, %v3908_v19 }
0x13d2   :  { %7846 = vmatpush1.bf16.msra.mxu1 %v9878_v53  ;;  %8013 = vmatprep.subr.bf16.mxu0 %v9769_v17  ;;  %v3868_v53 = vld [vmem:[#allocation18 + $0xf38] sm:$0xff]  ;;  %v3983_v17 = vld [vmem:[#allocation18 + $0x12d0] sm:$0xff] }
0x13d3   :  { %v13215_v32 = vpop.f32.mrb[100].mxu0  ;;  %7847 = vmatprep.subr.bf16.mxu1 %v9887_v4  ;;  %v3987_v4 = vld [vmem:[#allocation18 + $0x12f0] sm:$0xff]  ;;  %v9825_v24 = vcombine.high %v3864_v10, %v3868_v53  ;;  %v9824_v13 = vcombine.low %v3864_v10, %v3868_v53  ;;  %v3912_v29 = vld [vmem:[#allocation18 + $0x1098] sm:$0xff]  ;;  %v8222_v53 = vpack.c.bf16 %v8086_v56, %v8086_v56 }
0x13d4   :  { %v13217_v28 = vpop.f32.mrb[101].mxu0  ;;  %v9943_v3 = vcombine.high %v3983_v17, %v3987_v4  ;;  %v9942_v37 = vcombine.low %v3983_v17, %v3987_v4  ;;  %v3916_v52 = vld [vmem:[#allocation18 + $0x10b8] sm:$0xff] }
0x13d5   :  { %v7672_v22 = vpop.f32.mrb[102].mxu0  ;;  %8014 = vmatpush1.bf16.msra.mxu0 %v9768_v6  ;;  %v3872_v6 = vld [vmem:[#allocation18 + $0xf58] sm:$0xff]  ;;  %v9872_v11 = vcombine.low %v3912_v29, %v3916_v52 }
0x13d6   :  { %v7673_v60 = vpop.f32.mrb[103].mxu0  ;;  %7848 = vmatpush1.bf16.msra.mxu1 %v9886_v55  ;;  %8015 = vmatprep.subr.bf16.mxu0 %v9777_v18  ;;  %v3876_v55 = vld [vmem:[#allocation18 + $0xf78] sm:$0xff]  ;;  %v3991_v18 = vld [vmem:[#allocation18 + $0x1310] sm:$0xff] }
0x13d7   :  { %7849 = vmatprep.subr.bf16.mxu1 %v9895_v40  ;;  %v3995_v40 = vld [vmem:[#allocation18 + $0x1330] sm:$0xff]  ;;  %v9833_v20 = vcombine.high %v3872_v6, %v3876_v55  ;;  %v3880_v22 = vld [vmem:[#allocation18 + $0xf98] sm:$0xff] }
0x13d8   :  { %v9951_v14 = vcombine.high %v3991_v18, %v3995_v40  ;;  %v3999_v60 = vld [vmem:[#allocation18 + $0x1350] sm:$0xff]  ;;  %v3924_v10 = vld [vmem:[#allocation18 + $0x10f8] sm:$0xff] }
0x13d9   :  { %8016 = vmatpush1.bf16.msra.mxu0 %v9776_v7  ;;  %v3884_v7 = vld [vmem:[#allocation18 + $0xfb8] sm:$0xff] }
0x13da   :  { %7850 = vmatpush1.bf16.msra.mxu1 %v9894_v16  ;;  %8017 = vmatprep.subr.bf16.mxu0 %v9785_v1  ;;  %v4003_v16 = vld [vmem:[#allocation18 + $0x1370] sm:$0xff]  ;;  %v9832_v1 = vcombine.low %v3872_v6, %v3876_v55  ;;  %v9841_v45 = vcombine.high %v3880_v22, %v3884_v7  ;;  %v3928_v4 = vld [vmem:[#allocation18 + $0x1118] sm:$0xff] }
0x13db   :  { %7851 = vmatprep.subr.bf16.mxu1 %v9903_v36  ;;  %v9950_v36 = vcombine.low %v3991_v18, %v3995_v40  ;;  %v9959_v54 = vcombine.high %v3999_v60, %v4003_v16  ;;  %v11050_v6 = vld [vmem:[#allocation21 + $0x34] ss:$8 sps:$4 sm:$0xff]  }
0x13dc   :  { %v3936_v55 = vld [vmem:[#allocation18 + $0x1158] sm:$0xff] }
0x13dd   :  { %8018 = vmatpush1.bf16.msra.mxu0 %v9784_v63  ;;  %v4007_v63 = vld [vmem:[#allocation18 + $0x1390] sm:$0xff]  ;;  %v3940_v18 = vld [vmem:[#allocation18 + $0x1178] sm:$0xff] }
0x13de   :  { %7852 = vmatpush1.bf16.msra.mxu1 %v9902_v21  ;;  %8019 = vmatprep.subr.bf16.mxu0 %v9793_v61  ;;  %v4011_v21 = vld [vmem:[#allocation18 + $0x13b0] sm:$0xff]  ;;  %v9840_v61 = vcombine.low %v3880_v22, %v3884_v7  ;;  %v3948_v22 = vld [vmem:[#allocation18 + $0x11b8] sm:$0xff]  ;;  %v9896_v7 = vcombine.low %v3936_v55, %v3940_v18 }
0x13df   :  { %7853 = vmatprep.subr.bf16.mxu1 %v9911_v27  ;;  %v9958_v27 = vcombine.low %v3999_v60, %v4003_v16  ;;  %v9967_v62 = vcombine.high %v4007_v63, %v4011_v21  ;;  %v11051_v60 = vld [vmem:[#allocation21 + $0x40] ss:$8 sps:$4 sm:$0xff]   ;;  %v3988_v56 = vld [vmem:[#allocation18 + $0x12f8] sm:$0xff] }
0x13e1   :  { %8020 = vmatpush1.bf16.msra.mxu0 %v9792_v48  ;;  %v4015_v48 = vld [vmem:[#allocation18 + $0x13d0] sm:$0xff] }
0x13e2   :  { %7854 = vmatpush1.bf16.msra.mxu1 %v9910_v47  ;;  %8021 = vmatprep.subr.bf16.mxu0 %v9801_v43  ;;  %v4019_v47 = vld [vmem:[#allocation18 + $0x13f0] sm:$0xff]  ;;  %v9848_v43 = vcombine.low %v3888_v33, %v3892_v59  ;;  %v11054_v33 = vld [vmem:[#allocation21 + $0x50] ss:$8 sps:$4 sm:$0xff]  }
0x13e3   :  { %7855 = vmatprep.subr.bf16.mxu1 %v9919_v41  ;;  %v9966_v41 = vcombine.low %v4007_v63, %v4011_v21  ;;  %v9975_v25 = vcombine.high %v4015_v48, %v4019_v47  ;;  %v11059_v63 = vld [vmem:[#allocation21 + $0x64] ss:$8 sps:$4 sm:$0xff]   ;;  %v3960_v21 = vld [vmem:[#allocation18 + $0x1218] sm:$0xff] }
0x13e5   :  { %8022 = vmatpush1.bf16.msra.mxu0 %v9800_v39  ;;  %v9856_v39 = vcombine.low %v3896_v30, %v3900_v51  ;;  %v11062_v30 = vld [vmem:[#allocation21 + $0x74] ss:$8 sps:$4 sm:$0xff]  }
0x13e6   :  { %7856 = vmatpush1.bf16.msra.mxu1 %v9918_v42  ;;  %8023 = vmatprep.subr.bf16.mxu0 %v9809_v44  ;;  %v9974_v42 = vcombine.low %v4015_v48, %v4019_v47  ;;  %v9865_v44 = vcombine.high %v3904_v12, %v3908_v19  ;;  %v3968_v51 = vld [vmem:[#allocation18 + $0x1258] sm:$0xff] }
0x13e7   :  { %7857 = vmatprep.subr.bf16.mxu1 %v9927_v49  ;;  %v11041_v49 = vld [vmem:[#allocation21 + $0x4] ss:$8 sps:$4 sm:$0xff]   ;;  %v3972_v48 = vld [vmem:[#allocation18 + $0x1278] sm:$0xff] }
0x13e8   :  { %v3980_v12 = vld [vmem:[#allocation18 + $0x12b8] sm:$0xff]  ;;  %v9928_v19 = vcombine.low %v3968_v51, %v3972_v48 }
0x13e9   :  { %8024 = vmatpush1.bf16.msra.mxu0 %v9808_v15  ;;  %v11039_v15 = vld [vmem:[#allocation21] ss:$8 sps:$4 sm:$0xff]  }
0x13ea   :  { %7858 = vmatpush1.bf16.msra.mxu1 %v9926_v34  ;;  %8025 = vmatprep.subr.bf16.mxu0 %v9817_v23  ;;  %v9873_v34 = vcombine.high %v3912_v29, %v3916_v52  ;;  %v11044_v23 = vld [vmem:[#allocation21 + $0x14] ss:$8 sps:$4 sm:$0xff]   ;;  %v11066_v52 = vld [vmem:[#allocation21 + $0x90] ss:$8 sps:$4 sm:$0xff]  }
0x13eb   :  { %7859 = vmatprep.subr.bf16.mxu1 %v9935_v8  ;;  %v3920_v8 = vld [vmem:[#allocation18 + $0x10d8] sm:$0xff] }
0x13ec   :  { %v9881_v17 = vcombine.high %v3920_v8, %v3924_v10 }
0x13ed   :  { %8026 = vmatpush1.bf16.msra.mxu0 %v9816_v0  ;;  %v3932_v0 = vld [vmem:[#allocation18 + $0x1138] sm:$0xff] }
0x13ee   :  { %7860 = vmatpush1.bf16.msra.mxu1 %v9934_v38  ;;  %8027 = vmatprep.subr.bf16.mxu0 %v9825_v24  ;;  %v9880_v38 = vcombine.low %v3920_v8, %v3924_v10  ;;  %v11045_v24 = vld [vmem:[#allocation21 + $0x20] ss:$8 sps:$4 sm:$0xff]   ;;  %v9888_v40 = vcombine.low %v3928_v4, %v3932_v0 }
0x13ef   :  { %7861 = vmatprep.subr.bf16.mxu1 %v9943_v3  ;;  %v9889_v3 = vcombine.high %v3928_v4, %v3932_v0  ;;  %v11069_v10 = vld [vmem:[#allocation21 + $0xa0] ss:$8 sps:$4 sm:$0xff]   ;;  %v11072_v4 = vld [vmem:[#allocation21 + $0xb0] ss:$8 sps:$4 sm:$0xff]  }
0x13f1   :  { %8028 = vmatpush1.bf16.msra.mxu0 %v9824_v13  ;;  %v11048_v13 = vld [vmem:[#allocation21 + $0x30] ss:$8 sps:$4 sm:$0xff]  }
0x13f2   :  { %7862 = vmatpush1.bf16.msra.mxu1 %v9942_v37  ;;  %8029 = vmatprep.subr.bf16.mxu0 %v9833_v20  ;;  %v9897_v37 = vcombine.high %v3936_v55, %v3940_v18  ;;  %v11053_v20 = vld [vmem:[#allocation21 + $0x44] ss:$8 sps:$4 sm:$0xff]   ;;  %v11075_v55 = vld [vmem:[#allocation21 + $0xc0] ss:$8 sps:$4 sm:$0xff]  }
0x13f3   :  { %7863 = vmatprep.subr.bf16.mxu1 %v9951_v14  ;;  %v3944_v14 = vld [vmem:[#allocation18 + $0x1198] sm:$0xff] }
0x13f4   :  { %v9905_v16 = vcombine.high %v3944_v14, %v3948_v22 }
0x13f5   :  { %8030 = vmatpush1.bf16.msra.mxu0 %v9832_v1  ;;  %v11056_v1 = vld [vmem:[#allocation21 + $0x54] ss:$8 sps:$4 sm:$0xff]  }
0x13f6   :  { %7864 = vmatpush1.bf16.msra.mxu1 %v9950_v36  ;;  %8031 = vmatprep.subr.bf16.mxu0 %v9841_v45  ;;  %v3952_v36 = vld [vmem:[#allocation18 + $0x11d8] sm:$0xff] }
0x13f7   :  { %7865 = vmatprep.subr.bf16.mxu1 %v9959_v54  ;;  %v3956_v45 = vld [vmem:[#allocation18 + $0x11f8] sm:$0xff]  ;;  %v9904_v54 = vcombine.low %v3944_v14, %v3948_v22 }
0x13f8   :  { %v9913_v59 = vcombine.high %v3952_v36, %v3956_v45 }
0x13f9   :  { %8032 = vmatpush1.bf16.msra.mxu0 %v9840_v61  ;;  %v3964_v61 = vld [vmem:[#allocation18 + $0x1238] sm:$0xff] }
0x13fa   :  { %7866 = vmatpush1.bf16.msra.mxu1 %v9958_v27  ;;  %8033 = vmatprep.subr.bf16.mxu0 %v9849_v31  ;;  %v9912_v27 = vcombine.low %v3952_v36, %v3956_v45  ;;  %v11057_v31 = vld [vmem:[#allocation21 + $0x60] ss:$8 sps:$4 sm:$0xff]   ;;  %v9920_v47 = vcombine.low %v3960_v21, %v3964_v61 }
0x13fb   :  { %7867 = vmatprep.subr.bf16.mxu1 %v9967_v62  ;;  %v9921_v62 = vcombine.high %v3960_v21, %v3964_v61  ;;  %v11081_v45 = vld [vmem:[#allocation21 + $0xe0] ss:$8 sps:$4 sm:$0xff]   ;;  %v11089_v21 = vld [vmem:[#allocation21 + $0x104] ss:$8 sps:$4 sm:$0xff]  }
0x13fd   :  { %8034 = vmatpush1.bf16.msra.mxu0 %v9848_v43  ;;  %v11060_v43 = vld [vmem:[#allocation21 + $0x70] ss:$8 sps:$4 sm:$0xff]  }
0x13fe   :  { %7868 = vmatpush1.bf16.msra.mxu1 %v9966_v41  ;;  %8044 = vmatprep.subr.bf16.mxu0 %v9857_v26  ;;  %v9929_v41 = vcombine.high %v3968_v51, %v3972_v48  ;;  %v11065_v26 = vld [vmem:[#allocation21 + $0x84] ss:$8 sps:$4 sm:$0xff]   ;;  %v11093_v51 = vld [vmem:[#allocation21 + $0x120] ss:$8 sps:$4 sm:$0xff]   ;;  %v11096_v48 = vld [vmem:[#allocation21 + $0x130] ss:$8 sps:$4 sm:$0xff]  }
0x13ff   :  { %7869 = vmatprep.subr.bf16.mxu1 %v9975_v25  ;;  %v3976_v25 = vld [vmem:[#allocation18 + $0x1298] sm:$0xff] }
0x1400   :  { %8036 = vmatmul.mubr.bf16.vlgmr.msra.gmra.mrb[104].mxu0 %v13138_v9  ;;  %v11042_v9 = vld [vmem:[#allocation21 + $0x10] ss:$8 sps:$4 sm:$0xff]   ;;  %v9936_v29 = vcombine.low %v3976_v25, %v3980_v12 }
0x1401   :  { %8045 = vmatpush1.bf16.msra.mxu0 %v9856_v39  ;;  %8076 = vmatprep.mubr.bf16.mxu0 %v13166_v35  ;;  %v11047_v35 = vld [vmem:[#allocation21 + $0x24] ss:$8 sps:$4 sm:$0xff]   ;;  %v11063_v39 = vld [vmem:[#allocation21 + $0x80] ss:$8 sps:$4 sm:$0xff]  }
0x1402   :  { %7870 = vmatpush1.bf16.msra.mxu1 %v9974_v42  ;;  %8046 = vmatprep.subr.bf16.mxu0 %v9865_v44  ;;  %v9937_v42 = vcombine.high %v3976_v25, %v3980_v12  ;;  %v11068_v44 = vld [vmem:[#allocation21 + $0x94] ss:$8 sps:$4 sm:$0xff]   ;;  %v11105_v25 = vld [vmem:[#allocation21 + $0x160] ss:$8 sps:$4 sm:$0xff]  }
0x1403   :  { %8881 = vmatprep.subr.bf16.mxu1 %v11041_v49  ;;  %v3984_v49 = vld [vmem:[#allocation18 + $0x12d8] sm:$0xff] }
0x1404   :  { %v9944_v8 = vcombine.low %v3984_v49, %v3988_v56  ;;  %v11110_v12 = vld [vmem:[#allocation21 + $0x174] ss:$8 sps:$4 sm:$0xff]  }
0x1405   :  { %8047 = vmatpush1.bf16.msra.mxu0 %v9864_v46  ;;  %7872 = vmatmul.mubr.bf16.vlgmr.msra.gmra.mrb[88].mxu1 %v13183_v5  ;;  %v9945_v46 = vcombine.high %v3984_v49, %v3988_v56  ;;  %v11114_v49 = vld [vmem:[#allocation21 + $0x190] ss:$8 sps:$4 sm:$0xff]   ;;  %v11119_v56 = vld [vmem:[#allocation21 + $0x1a4] ss:$8 sps:$4 sm:$0xff]  }
0x1406   :  { %8882 = vmatpush1.bf16.msra.mxu1 %v11039_v15  ;;  %8913 = vmatprep.mubr.bf16.mxu1 %v8222_v53  ;;  %v11071_v15 = vld [vmem:[#allocation21 + $0xa4] ss:$8 sps:$4 sm:$0xff]  }
0x1407   :  { %8048 = vmatprep.subr.bf16.mxu0 %v9873_v34  ;;  %8883 = vmatprep.subr.bf16.mxu1 %v11044_v23  ;;  %v3992_v34 = vld [vmem:[#allocation18 + $0x1318] sm:$0xff] }
0x1408   :  { %v3996_v23 = vld [vmem:[#allocation18 + $0x1338] sm:$0xff] }
0x1409   :  { %8049 = vmatpush1.bf16.msra.mxu0 %v9872_v11  ;;  %v9953_v53 = vcombine.high %v3992_v34, %v3996_v23  ;;  %v11074_v11 = vld [vmem:[#allocation21 + $0xb4] ss:$8 sps:$4 sm:$0xff]  }
0x140a   :  { %8884 = vmatpush1.bf16.msra.mxu1 %v11042_v9  ;;  %8050 = vmatprep.subr.bf16.mxu0 %v9881_v17  ;;  %v4000_v9 = vld [vmem:[#allocation18 + $0x1358] sm:$0xff] }
0x140b   :  { %8885 = vmatprep.subr.bf16.mxu1 %v11047_v35  ;;  %v4004_v17 = vld [vmem:[#allocation18 + $0x1378] sm:$0xff]  ;;  %v9952_v35 = vcombine.low %v3992_v34, %v3996_v23  ;;  %v11123_v34 = vld [vmem:[#allocation21 + $0x1c0] ss:$8 sps:$4 sm:$0xff]  }
0x140c   :  { %v9961_v0 = vcombine.high %v4000_v9, %v4004_v17  ;;  %v11128_v23 = vld [vmem:[#allocation21 + $0x1d4] ss:$8 sps:$4 sm:$0xff]  }
0x140d   :  { %8051 = vmatpush1.bf16.msra.mxu0 %v9880_v38  ;;  %v11077_v38 = vld [vmem:[#allocation21 + $0xc4] ss:$8 sps:$4 sm:$0xff]  }
0x140e   :  { %8886 = vmatpush1.bf16.msra.mxu1 %v11045_v24  ;;  %8052 = vmatprep.subr.bf16.mxu0 %v9889_v3  ;;  %v4008_v24 = vld [vmem:[#allocation18 + $0x1398] sm:$0xff] }
0x140f   :  { %8887 = vmatprep.subr.bf16.mxu1 %v11050_v6  ;;  %v4012_v3 = vld [vmem:[#allocation18 + $0x13b8] sm:$0xff]  ;;  %v9960_v6 = vcombine.low %v4000_v9, %v4004_v17  ;;  %v11131_v9 = vld [vmem:[#allocation21 + $0x1e4] ss:$8 sps:$4 sm:$0xff]   ;;  %v11129_v17 = vld [vmem:[#allocation21 + $0x1e0] ss:$8 sps:$4 sm:$0xff]  }
0x1410   :  { %v9969_v18 = vcombine.high %v4008_v24, %v4012_v3  ;;  %v9968_v22 = vcombine.low %v4008_v24, %v4012_v3  ;;  %v11137_v24 = vld [vmem:[#allocation21 + $0x204] ss:$8 sps:$4 sm:$0xff]   ;;  %v11135_v3 = vld [vmem:[#allocation21 + $0x200] ss:$8 sps:$4 sm:$0xff]  }
0x1411   :  { %8053 = vmatpush1.bf16.msra.mxu0 %v9888_v40  ;;  %v11080_v40 = vld [vmem:[#allocation21 + $0xd4] ss:$8 sps:$4 sm:$0xff]  }
0x1412   :  { %8888 = vmatpush1.bf16.msra.mxu1 %v11048_v13  ;;  %8054 = vmatprep.subr.bf16.mxu0 %v9897_v37  ;;  %v4016_v13 = vld [vmem:[#allocation18 + $0x13d8] sm:$0xff] }
0x1413   :  { %8889 = vmatprep.subr.bf16.mxu1 %v11053_v20  ;;  %v4020_v37 = vld [vmem:[#allocation18 + $0x13f8] sm:$0xff]  ;;  %v13410_v20 = vld [vmem:[#allocation33_spill] sm:$0xff] }
0x1414   :  { %v4039_v14 = vsub.s32 3, %v13410_v20  ;;  %v9976_v36 = vcombine.low %v4016_v13, %v4020_v37 }
0x1415   :  { %8055 = vmatpush1.bf16.msra.mxu0 %v9896_v7  ;;  %v11078_v7 = vld [vmem:[#allocation21 + $0xd0] ss:$8 sps:$4 sm:$0xff]  }
0x1416   :  { %8890 = vmatpush1.bf16.msra.mxu1 %v11051_v60  ;;  %8056 = vmatprep.subr.bf16.mxu0 %v9905_v16  ;;  %v9977_v60 = vcombine.high %v4016_v13, %v4020_v37  ;;  %v11083_v16 = vld [vmem:[#allocation21 + $0xe4] ss:$8 sps:$4 sm:$0xff]   ;;  %v11141_v13 = vld [vmem:[#allocation21 + $0x220] ss:$8 sps:$4 sm:$0xff]   ;;  %v11144_v37 = vld [vmem:[#allocation21 + $0x230] ss:$8 sps:$4 sm:$0xff]  }
0x1417   :  { %8891 = vmatprep.subr.bf16.mxu1 %v11056_v1  ;;  %v4040_v1 = vrot.slane %v13199_v57, %v4039_v14  ;;  %v11087_v57 = vld [vmem:[#allocation21 + $0x100] ss:$8 sps:$4 sm:$0xff]   ;;  %v11149_v14 = vld [vmem:[#allocation21 + $0x244] ss:$8 sps:$4 sm:$0xff]  }
0x1419   :  { %8057 = vmatpush1.bf16.msra.mxu0 %v9904_v54  ;;  %v11086_v54 = vld [vmem:[#allocation21 + $0xf4] ss:$8 sps:$4 sm:$0xff]  }
0x141a   :  { %8892 = vmatpush1.bf16.msra.mxu1 %v11054_v33  ;;  %8058 = vmatprep.subr.bf16.mxu0 %v9913_v59  ;;  %v10751_v33 = vadd.f32 %v13217_v28, %v4040_v1  ;;  %v11084_v59 = vld [vmem:[#allocation21 + $0xf0] ss:$8 sps:$4 sm:$0xff]   ;;  %v11153_v1 = vld [vmem:[#allocation21 + $0x260] ss:$8 sps:$4 sm:$0xff]  }
0x141b   :  { %8893 = vmatprep.subr.bf16.mxu1 %v11059_v63  ;;  %v8085_v63 = vmax.f32 %v13207_v2, 0.0  ;;  %v11090_v28 = vld [vmem:[#allocation21 + $0x110] ss:$8 sps:$4 sm:$0xff]   ;;  %v11098_v2 = vld [vmem:[#allocation21 + $0x134] ss:$8 sps:$4 sm:$0xff]  }
0x141c   :  { %v8088_v61 = vmax.f32 %v10751_v33, 0.0  ;;  %v11159_v33 = vld [vmem:[#allocation21 + $0x280] ss:$8 sps:$4 sm:$0xff]  }
0x141d   :  { %8059 = vmatpush1.bf16.msra.mxu0 %v9912_v27  ;;  %v8221_v27 = vpack.c.bf16 %v8085_v63, %v8085_v63  ;;  %v9063_v63 = vld [vmem:[%s13357_s15 + $0x80] sm:$0xff] }
0x141e   :  { %8894 = vmatpush1.bf16.msra.mxu1 %v11057_v31  ;;  %8060 = vmatprep.subr.bf16.mxu0 %v9921_v62  ;;  %v11092_v31 = vld [vmem:[#allocation21 + $0x114] ss:$8 sps:$4 sm:$0xff]   ;;  %v8224_v62 = vpack.c.bf16 %v8088_v61, %v8088_v61 }
0x141f   :  { %8895 = vmatprep.subr.bf16.mxu1 %v11062_v30  ;;  %v11095_v30 = vld [vmem:[#allocation21 + $0x124] ss:$8 sps:$4 sm:$0xff]   ;;  %v9047_v61 = vld [vmem:[%s13357_s15] sm:$0xff] }
0x1421   :  { %8061 = vmatpush1.bf16.msra.mxu0 %v9920_v47  ;;  %v11099_v47 = vld [vmem:[#allocation21 + $0x140] ss:$8 sps:$4 sm:$0xff]  }
0x1422   :  { %8896 = vmatpush1.bf16.msra.mxu1 %v11060_v43  ;;  %8062 = vmatprep.subr.bf16.mxu0 %v9929_v41  ;;  %v11104_v43 = vld [vmem:[#allocation21 + $0x154] ss:$8 sps:$4 sm:$0xff]   ;;  %v11102_v41 = vld [vmem:[#allocation21 + $0x150] ss:$8 sps:$4 sm:$0xff]  }
0x1423   :  { %8897 = vmatprep.subr.bf16.mxu1 %v11065_v26  ;;  %v11107_v26 = vld [vmem:[#allocation21 + $0x164] ss:$8 sps:$4 sm:$0xff]  }
0x1425   :  { %8063 = vmatpush1.bf16.msra.mxu0 %v9928_v19  ;;  %v11108_v19 = vld [vmem:[#allocation21 + $0x170] ss:$8 sps:$4 sm:$0xff]  }
0x1426   :  { %8898 = vmatpush1.bf16.msra.mxu1 %v11063_v39  ;;  %8064 = vmatprep.subr.bf16.mxu0 %v9937_v42  ;;  %v11113_v39 = vld [vmem:[#allocation21 + $0x184] ss:$8 sps:$4 sm:$0xff]   ;;  %v11111_v42 = vld [vmem:[#allocation21 + $0x180] ss:$8 sps:$4 sm:$0xff]  }
0x1427   :  { %8899 = vmatprep.subr.bf16.mxu1 %v11068_v44  ;;  %v11116_v44 = vld [vmem:[#allocation21 + $0x194] ss:$8 sps:$4 sm:$0xff]  }
0x1429   :  { %8065 = vmatpush1.bf16.msra.mxu0 %v9936_v29  ;;  %v11117_v29 = vld [vmem:[#allocation21 + $0x1a0] ss:$8 sps:$4 sm:$0xff]  }
0x142a   :  { %8900 = vmatpush1.bf16.msra.mxu1 %v11066_v52  ;;  %8066 = vmatprep.subr.bf16.mxu0 %v9945_v46  ;;  %v11122_v52 = vld [vmem:[#allocation21 + $0x1b4] ss:$8 sps:$4 sm:$0xff]   ;;  %v11120_v46 = vld [vmem:[#allocation21 + $0x1b0] ss:$8 sps:$4 sm:$0xff]  }
0x142b   :  { %8901 = vmatprep.subr.bf16.mxu1 %v11071_v15  ;;  %v11125_v15 = vld [vmem:[#allocation21 + $0x1c4] ss:$8 sps:$4 sm:$0xff]  }
0x142d   :  { %8067 = vmatpush1.bf16.msra.mxu0 %v9944_v8  ;;  %v11126_v8 = vld [vmem:[#allocation21 + $0x1d0] ss:$8 sps:$4 sm:$0xff]  }
0x142e   :  { %8902 = vmatpush1.bf16.msra.mxu1 %v11069_v10  ;;  %8068 = vmatprep.subr.bf16.mxu0 %v9953_v53  ;;  %v13228_v10 = vld [vmem:[#allocation19] sm:$0xff]  ;;  %v13411_v53 = vld [vmem:[#allocation34_spill] sm:$0xff] }
0x142f   :  { %8903 = vmatprep.subr.bf16.mxu1 %v11074_v11  ;;  %v4036_v11 = vrot.slane %v13228_v10, %v13411_v53  ;;  %v9055_v53 = vld [vmem:[%s13357_s15 + $0x40] sm:$0xff] }
0x1431   :  { %8069 = vmatpush1.bf16.msra.mxu0 %v9952_v35  ;;  %v10750_v35 = vadd.f32 %v13215_v32, %v4036_v11  ;;  %v11146_v32 = vld [vmem:[#allocation21 + $0x234] ss:$8 sps:$4 sm:$0xff]  }
0x1432   :  { %8904 = vmatpush1.bf16.msra.mxu1 %v11072_v4  ;;  %8070 = vmatprep.subr.bf16.mxu0 %v9961_v0  ;;  %v11134_v4 = vld [vmem:[#allocation21 + $0x1f4] ss:$8 sps:$4 sm:$0xff]   ;;  %v11132_v0 = vld [vmem:[#allocation21 + $0x1f0] ss:$8 sps:$4 sm:$0xff]  }
0x1433   :  { %8905 = vmatprep.subr.bf16.mxu1 %v11077_v38  ;;  %v8087_v38 = vmax.f32 %v10750_v35, 0.0  ;;  %v9056_v11 = vld [vmem:[%s13357_s15 + $0x48] sm:$0xff]  ;;  %v9074_v35 = vld [vmem:[%s13357_s15 + $0xd8] sm:$0xff] }
0x1435   :  { %8071 = vmatpush1.bf16.msra.mxu0 %v9960_v6  ;;  %v8223_v6 = vpack.c.bf16 %v8087_v38, %v8087_v38 }
0x1436   :  { %8906 = vmatpush1.bf16.msra.mxu1 %v11075_v55  ;;  %8072 = vmatprep.subr.bf16.mxu0 %v9969_v18  ;;  %v11140_v55 = vld [vmem:[#allocation21 + $0x214] ss:$8 sps:$4 sm:$0xff]   ;;  %v11138_v18 = vld [vmem:[#allocation21 + $0x210] ss:$8 sps:$4 sm:$0xff]  }
0x1437   :  { %8907 = vmatprep.subr.bf16.mxu1 %v11080_v40  ;;  %v11143_v40 = vld [vmem:[#allocation21 + $0x224] ss:$8 sps:$4 sm:$0xff]  }
0x1439   :  { %8073 = vmatpush1.bf16.msra.mxu0 %v9968_v22  ;;  %v11147_v22 = vld [vmem:[#allocation21 + $0x240] ss:$8 sps:$4 sm:$0xff]  }
0x143a   :  { %8908 = vmatpush1.bf16.msra.mxu1 %v11078_v7  ;;  %8074 = vmatprep.subr.bf16.mxu0 %v9977_v60  ;;  %v11152_v7 = vld [vmem:[#allocation21 + $0x254] ss:$8 sps:$4 sm:$0xff]   ;;  %v11150_v60 = vld [vmem:[#allocation21 + $0x250] ss:$8 sps:$4 sm:$0xff]  }
0x143b   :  { %8909 = vmatprep.subr.bf16.mxu1 %v11083_v16  ;;  %v11155_v16 = vld [vmem:[#allocation21 + $0x264] ss:$8 sps:$4 sm:$0xff]  }
0x143d   :  { %8075 = vmatpush1.bf16.msra.mxu0 %v9976_v36  ;;  %v11158_v36 = vld [vmem:[#allocation21 + $0x274] ss:$8 sps:$4 sm:$0xff]  }
0x143e   :  { %8910 = vmatpush1.bf16.msra.mxu1 %v11081_v45  ;;  %v11156_v45 = vld [vmem:[#allocation21 + $0x270] ss:$8 sps:$4 sm:$0xff]  }
0x143f   :  { %8911 = vmatprep.subr.bf16.mxu1 %v11086_v54  ;;  %v11161_v54 = vld [vmem:[#allocation21 + $0x284] ss:$8 sps:$4 sm:$0xff]  }
0x1440   :  { %8077 = vmatmul.mubr.bf16.vlgmr.msra.gmra.mrb[104].mxu0 %v13183_v5  ;;  %v11101_v5 = vld [vmem:[#allocation21 + $0x144] ss:$8 sps:$4 sm:$0xff]  }
0x1442   :  { %8912 = vmatpush1.bf16.msra.mxu1 %v11084_v59  ;;  %v11164_v59 = vld [vmem:[#allocation21 + $0x294] ss:$8 sps:$4 sm:$0xff]  }
0x1443   :  { %8922 = vmatprep.subr.bf16.mxu1 %v11089_v21  ;;  %v9064_v21 = vld [vmem:[%s13357_s15 + $0x88] sm:$0xff] }
0x1445   :  { %8914 = vmatmul.mubr.bf16.vlgmr.msra.gmra.mrb[92].mxu1 %v8221_v27  ;;  %v9048_v27 = vld [vmem:[%s13357_s15 + $0x8] sm:$0xff] }
0x1446   :  { %8923 = vmatpush1.bf16.msra.mxu1 %v11087_v57  ;;  %8954 = vmatprep.mubr.bf16.mxu1 %v8224_v62  ;;  %v10708_v57 = vpack.c.bf16 %v9064_v21, %v9063_v63  ;;  %v9066_v62 = vld [vmem:[%s13357_s15 + $0x98] sm:$0xff] }
0x1447   :  { %8924 = vmatprep.subr.bf16.mxu1 %v11092_v31  ;;  %v9065_v31 = vld [vmem:[%s13357_s15 + $0x90] sm:$0xff] }
0x1448   :  { %10709 = vmatprep.subr.bf16.mxu0 %v10708_v57 }
0x144a   :  { %8925 = vmatpush1.bf16.msra.mxu1 %v11090_v28  ;;  %v10710_v28 = vpack.c.bf16 %v9048_v27, %v9047_v61 }
0x144b   :  { %8926 = vmatprep.subr.bf16.mxu1 %v11095_v30  ;;  %v10712_v30 = vpack.c.bf16 %v9066_v62, %v9065_v31  ;;  %v11183_v62 = vld [vmem:[#allocation21 + $0x300] ss:$8 sps:$4 sm:$0xff]  }
0x144c   :  { %10711 = vmatpush3.bf16.msra.mxu0 %v10710_v28 }
0x144d   :  { %10713 = vmatprep.subr.bf16.mxu0 %v10712_v30  ;;  %v11188_v30 = vld [vmem:[#allocation21 + $0x314] ss:$8 sps:$4 sm:$0xff]  }
0x144e   :  { %8927 = vmatpush1.bf16.msra.mxu1 %v11093_v51  ;;  %v9049_v51 = vld [vmem:[%s13357_s15 + $0x10] sm:$0xff] }
0x144f   :  { %8928 = vmatprep.subr.bf16.mxu1 %v11098_v2  ;;  %v9050_v2 = vld [vmem:[%s13357_s15 + $0x18] sm:$0xff] }
0x1452   :  { %8929 = vmatpush1.bf16.msra.mxu1 %v11096_v48  ;;  %v9067_v48 = vld [vmem:[%s13357_s15 + $0xa0] sm:$0xff] }
0x1453   :  { %8930 = vmatprep.subr.bf16.mxu1 %v11101_v5  ;;  %v9068_v5 = vld [vmem:[%s13357_s15 + $0xa8] sm:$0xff] }
0x1456   :  { %8931 = vmatpush1.bf16.msra.mxu1 %v11099_v47  ;;  %v10714_v47 = vpack.c.bf16 %v9050_v2, %v9049_v51  ;;  %v11186_v51 = vld [vmem:[#allocation21 + $0x310] ss:$8 sps:$4 sm:$0xff]   ;;  %v11191_v2 = vld [vmem:[#allocation21 + $0x324] ss:$8 sps:$4 sm:$0xff]  }
0x1457   :  { %8932 = vmatprep.subr.bf16.mxu1 %v11104_v43  ;;  %v11162_v43 = vld [vmem:[#allocation21 + $0x290] ss:$8 sps:$4 sm:$0xff]  }
0x1458   :  { %10715 = vmatpush3.bf16.msra.mxu0 %v10714_v47  ;;  %v11192_v47 = vld [vmem:[#allocation21 + $0x330] ss:$8 sps:$4 sm:$0xff]  }
0x145a   :  { %8933 = vmatpush1.bf16.msra.mxu1 %v11102_v41  ;;  %v10716_v41 = vpack.c.bf16 %v9068_v5, %v9067_v48  ;;  %v11189_v48 = vld [vmem:[#allocation21 + $0x320] ss:$8 sps:$4 sm:$0xff]   ;;  %v11194_v5 = vld [vmem:[#allocation21 + $0x334] ss:$8 sps:$4 sm:$0xff]  }
0x145b   :  { %8934 = vmatprep.subr.bf16.mxu1 %v11107_v26  ;;  %v9051_v26 = vld [vmem:[%s13357_s15 + $0x20] sm:$0xff] }
0x145c   :  { %10717 = vmatprep.subr.bf16.mxu0 %v10716_v41  ;;  %v11195_v41 = vld [vmem:[#allocation21 + $0x340] ss:$8 sps:$4 sm:$0xff]  }
0x145e   :  { %8935 = vmatpush1.bf16.msra.mxu1 %v11105_v25  ;;  %v9052_v25 = vld [vmem:[%s13357_s15 + $0x28] sm:$0xff] }
0x145f   :  { %8936 = vmatprep.subr.bf16.mxu1 %v11110_v12  ;;  %v11167_v12 = vld [vmem:[#allocation21 + $0x2a4] ss:$8 sps:$4 sm:$0xff]  }
0x1462   :  { %8937 = vmatpush1.bf16.msra.mxu1 %v11108_v19  ;;  %v9069_v19 = vld [vmem:[%s13357_s15 + $0xb0] sm:$0xff] }
0x1463   :  { %8938 = vmatprep.subr.bf16.mxu1 %v11113_v39  ;;  %v9070_v39 = vld [vmem:[%s13357_s15 + $0xb8] sm:$0xff] }
0x1466   :  { %8939 = vmatpush1.bf16.msra.mxu1 %v11111_v42  ;;  %v10718_v42 = vpack.c.bf16 %v9052_v25, %v9051_v26  ;;  %v11200_v26 = vld [vmem:[#allocation21 + $0x354] ss:$8 sps:$4 sm:$0xff]   ;;  %v11198_v25 = vld [vmem:[#allocation21 + $0x350] ss:$8 sps:$4 sm:$0xff]  }
0x1467   :  { %8940 = vmatprep.subr.bf16.mxu1 %v11116_v44  ;;  %v11165_v44 = vld [vmem:[#allocation21 + $0x2a0] ss:$8 sps:$4 sm:$0xff]  }
0x1468   :  { %10719 = vmatpush3.bf16.msra.mxu0 %v10718_v42  ;;  %v11204_v42 = vld [vmem:[#allocation21 + $0x370] ss:$8 sps:$4 sm:$0xff]  }
0x146a   :  { %8941 = vmatpush1.bf16.msra.mxu1 %v11114_v49  ;;  %v10720_v49 = vpack.c.bf16 %v9070_v39, %v9069_v19  ;;  %v11201_v19 = vld [vmem:[#allocation21 + $0x360] ss:$8 sps:$4 sm:$0xff]   ;;  %v11206_v39 = vld [vmem:[#allocation21 + $0x374] ss:$8 sps:$4 sm:$0xff]  }
0x146b   :  { %8942 = vmatprep.subr.bf16.mxu1 %v11119_v56  ;;  %v9053_v56 = vld [vmem:[%s13357_s15 + $0x30] sm:$0xff] }
0x146c   :  { %10721 = vmatprep.subr.bf16.mxu0 %v10720_v49  ;;  %v11207_v49 = vld [vmem:[#allocation21 + $0x380] ss:$8 sps:$4 sm:$0xff]  }
0x146e   :  { %8943 = vmatpush1.bf16.msra.mxu1 %v11117_v29  ;;  %v9054_v29 = vld [vmem:[%s13357_s15 + $0x38] sm:$0xff] }
0x146f   :  { %8944 = vmatprep.subr.bf16.mxu1 %v11122_v52  ;;  %v11170_v52 = vld [vmem:[#allocation21 + $0x2b4] ss:$8 sps:$4 sm:$0xff]  }
0x1472   :  { %8945 = vmatpush1.bf16.msra.mxu1 %v11120_v46  ;;  %v9071_v46 = vld [vmem:[%s13357_s15 + $0xc0] sm:$0xff] }
0x1473   :  { %8946 = vmatprep.subr.bf16.mxu1 %v11125_v15  ;;  %v9072_v15 = vld [vmem:[%s13357_s15 + $0xc8] sm:$0xff] }
0x1476   :  { %8947 = vmatpush1.bf16.msra.mxu1 %v11123_v34  ;;  %v10722_v34 = vpack.c.bf16 %v9054_v29, %v9053_v56  ;;  %v11212_v56 = vld [vmem:[#allocation21 + $0x394] ss:$8 sps:$4 sm:$0xff]   ;;  %v11210_v29 = vld [vmem:[#allocation21 + $0x390] ss:$8 sps:$4 sm:$0xff]  }
0x1477   :  { %8948 = vmatprep.subr.bf16.mxu1 %v11128_v23  ;;  %v11168_v23 = vld [vmem:[#allocation21 + $0x2b0] ss:$8 sps:$4 sm:$0xff]  }
0x1478   :  { %10723 = vmatpush3.bf16.msra.mxu0 %v10722_v34  ;;  %v11216_v34 = vld [vmem:[#allocation21 + $0x3b0] ss:$8 sps:$4 sm:$0xff]  }
0x147a   :  { %8949 = vmatpush1.bf16.msra.mxu1 %v11126_v8  ;;  %v10724_v8 = vpack.c.bf16 %v9072_v15, %v9071_v46  ;;  %v11213_v46 = vld [vmem:[#allocation21 + $0x3a0] ss:$8 sps:$4 sm:$0xff]   ;;  %v11218_v15 = vld [vmem:[#allocation21 + $0x3b4] ss:$8 sps:$4 sm:$0xff]  }
0x147b   :  { %8950 = vmatprep.subr.bf16.mxu1 %v11131_v9  ;;  %v11173_v9 = vld [vmem:[#allocation21 + $0x2c4] ss:$8 sps:$4 sm:$0xff]  }
0x147c   :  { %10725 = vmatprep.subr.bf16.mxu0 %v10724_v8  ;;  %v4055_v8 = vsub.s32 7, %v13410_v20 }
0x147e   :  { %8951 = vmatpush1.bf16.msra.mxu1 %v11129_v17  ;;  %v9073_v17 = vld [vmem:[%s13357_s15 + $0xd0] sm:$0xff] }
0x147f   :  { %8952 = vmatprep.subr.bf16.mxu1 %v11134_v4  ;;  %v10726_v4 = vpack.c.bf16 %v9056_v11, %v9055_v53  ;;  %v10728_v38 = vpack.c.bf16 %v9074_v35, %v9073_v17  ;;  %v11219_v53 = vld [vmem:[#allocation21 + $0x3c0] ss:$8 sps:$4 sm:$0xff]   ;;  %v4051_v11 = vsub.s32 6, %v13410_v20  ;;  %v4056_v17 = vrot.slane %v13228_v10, %v4055_v8  ;;  %v11222_v35 = vld [vmem:[#allocation21 + $0x3d0] ss:$8 sps:$4 sm:$0xff]  }
0x1481   :  { %10727 = vmatpush3.bf16.msra.mxu0 %v10726_v4  ;;  %v4052_v4 = vrot.slane %v13228_v10, %v4051_v11 }
0x1482   :  { %8953 = vmatpush1.bf16.msra.mxu1 %v11132_v0  ;;  %v11171_v0 = vld [vmem:[#allocation21 + $0x2c0] ss:$8 sps:$4 sm:$0xff]   ;;  %10729 = vmatprep.subr.bf16.mxu0 %v10728_v38  ;;  %v11227_v38 = vld [vmem:[#allocation21 + $0x3e4] ss:$8 sps:$4 sm:$0xff]  }
0x1483   :  { %8963 = vmatprep.subr.bf16.mxu1 %v11137_v24  ;;  %v9057_v24 = vld [vmem:[%s13357_s15 + $0x50] sm:$0xff] }
0x1485   :  { %8955 = vmatmul.mubr.bf16.vlgmr.msra.gmra.mrb[92].mxu1 %v8223_v6  ;;  %v11176_v6 = vld [vmem:[#allocation21 + $0x2d4] ss:$8 sps:$4 sm:$0xff]  }
0x1486   :  { %8964 = vmatpush1.bf16.msra.mxu1 %v11135_v3  ;;  %v9058_v3 = vld [vmem:[%s13357_s15 + $0x58] sm:$0xff] }
0x1487   :  { %8965 = vmatprep.subr.bf16.mxu1 %v11140_v55  ;;  %v9075_v55 = vld [vmem:[%s13357_s15 + $0xe0] sm:$0xff] }
0x148a   :  { %8966 = vmatpush1.bf16.msra.mxu1 %v11138_v18  ;;  %v9076_v18 = vld [vmem:[%s13357_s15 + $0xe8] sm:$0xff] }
0x148b   :  { %8967 = vmatprep.subr.bf16.mxu1 %v11143_v40  ;;  %v10730_v40 = vpack.c.bf16 %v9058_v3, %v9057_v24 }
0x148d   :  { %10731 = vmatpush3.bf16.msra.mxu0 %v10730_v40 }
0x148e   :  { %8968 = vmatpush1.bf16.msra.mxu1 %v11141_v13  ;;  %v11174_v13 = vld [vmem:[#allocation21 + $0x2d0] ss:$8 sps:$4 sm:$0xff]  }
0x148f   :  { %8969 = vmatprep.subr.bf16.mxu1 %v11146_v32  ;;  %v10732_v32 = vpack.c.bf16 %v9076_v18, %v9075_v55  ;;  %v11225_v18 = vld [vmem:[#allocation21 + $0x3e0] ss:$8 sps:$4 sm:$0xff]  }
0x1491   :  { %10733 = vmatprep.subr.bf16.mxu0 %v10732_v32 }
0x1492   :  { %8970 = vmatpush1.bf16.msra.mxu1 %v11144_v37  ;;  %v11179_v37 = vld [vmem:[#allocation21 + $0x2e4] ss:$8 sps:$4 sm:$0xff]  }
0x1493   :  { %8971 = vmatprep.subr.bf16.mxu1 %v11149_v14  ;;  %v11177_v14 = vld [vmem:[#allocation21 + $0x2e0] ss:$8 sps:$4 sm:$0xff]  }
0x1496   :  { %8972 = vmatpush1.bf16.msra.mxu1 %v11147_v22  ;;  %v11182_v22 = vld [vmem:[#allocation21 + $0x2f4] ss:$8 sps:$4 sm:$0xff]  }
0x1497   :  { %8973 = vmatprep.subr.bf16.mxu1 %v11152_v7  ;;  %v11180_v7 = vld [vmem:[#allocation21 + $0x2f0] ss:$8 sps:$4 sm:$0xff]  }
0x149a   :  { %8974 = vmatpush1.bf16.msra.mxu1 %v11150_v60  ;;  %v11185_v60 = vld [vmem:[#allocation21 + $0x304] ss:$8 sps:$4 sm:$0xff]  }
0x149b   :  { %8975 = vmatprep.subr.bf16.mxu1 %v11155_v16  ;;  %v4043_v16 = vsub.s32 4, %v13410_v20 }
0x149e   :  { %8976 = vmatpush1.bf16.msra.mxu1 %v11153_v1  ;;  %v4047_v1 = vsub.s32 5, %v13410_v20  ;;  %v11230_v20 = vld [vmem:[#allocation21 + $0x3f4] ss:$8 sps:$4 sm:$0xff]  }
0x149f   :  { %8977 = vmatprep.subr.bf16.mxu1 %v11158_v36  ;;  %v4044_v36 = vrot.slane %v13228_v10, %v4043_v16  ;;  %v9077_v16 = vld [vmem:[%s13357_s15 + $0xf0] sm:$0xff] }
0x14a2   :  { %8978 = vmatpush1.bf16.msra.mxu1 %v11156_v45  ;;  %v4048_v45 = vrot.slane %v13228_v10, %v4047_v1  ;;  %v9078_v1 = vld [vmem:[%s13357_s15 + $0xf8] sm:$0xff] }
0x14a3   :  { %8979 = vmatprep.subr.bf16.mxu1 %v11161_v54 }
0x14a6   :  { %8980 = vmatpush1.bf16.msra.mxu1 %v11159_v33 }
0x14a7   :  { %8981 = vmatprep.subr.bf16.mxu1 %v11164_v59 }
0x14aa   :  { %8982 = vmatpush1.bf16.msra.mxu1 %v11162_v43  ;;  %v11197_v43 = vld [vmem:[#allocation21 + $0x344] ss:$8 sps:$4 sm:$0xff]  }
0x14ab   :  { %8983 = vmatprep.subr.bf16.mxu1 %v11167_v12  ;;  %v11203_v12 = vld [vmem:[#allocation21 + $0x364] ss:$8 sps:$4 sm:$0xff]  }
0x14ae   :  { %8984 = vmatpush1.bf16.msra.mxu1 %v11165_v44  ;;  %v11209_v44 = vld [vmem:[#allocation21 + $0x384] ss:$8 sps:$4 sm:$0xff]  }
0x14af   :  { %8985 = vmatprep.subr.bf16.mxu1 %v11170_v52  ;;  %v11215_v52 = vld [vmem:[#allocation21 + $0x3a4] ss:$8 sps:$4 sm:$0xff]  }
0x14b2   :  { %8986 = vmatpush1.bf16.msra.mxu1 %v11168_v23  ;;  %v11221_v23 = vld [vmem:[#allocation21 + $0x3c4] ss:$8 sps:$4 sm:$0xff]  }
0x14b3   :  { %8987 = vmatprep.subr.bf16.mxu1 %v11173_v9  ;;  %v11224_v9 = vld [vmem:[#allocation21 + $0x3d4] ss:$8 sps:$4 sm:$0xff]  }
0x14b6   :  { %8988 = vmatpush1.bf16.msra.mxu1 %v11171_v0 }
0x14b7   :  { %8989 = vmatprep.subr.bf16.mxu1 %v11176_v6 }
0x14ba   :  { %8990 = vmatpush1.bf16.msra.mxu1 %v11174_v13 }
0x14bb   :  { %8991 = vmatprep.subr.bf16.mxu1 %v11179_v37  ;;  %v11228_v37 = vld [vmem:[#allocation21 + $0x3f0] ss:$8 sps:$4 sm:$0xff]  }
0x14be   :  { %8992 = vmatpush1.bf16.msra.mxu1 %v11177_v14 }
0x14bf   :  { %8993 = vmatprep.subr.bf16.mxu1 %v11182_v22  ;;  %v9059_v22 = vld [vmem:[%s13357_s15 + $0x60] sm:$0xff] }
0x14c2   :  { %8994 = vmatpush1.bf16.msra.mxu1 %v11180_v7  ;;  %v9060_v7 = vld [vmem:[%s13357_s15 + $0x68] sm:$0xff] }
0x14c3   :  { %9004 = vmatprep.subr.bf16.mxu1 %v11185_v60  ;;  %v10734_v60 = vpack.c.bf16 %v9060_v7, %v9059_v22 }
0x14c5   :  { %10735 = vmatpush3.bf16.msra.mxu0 %v10734_v60 }
0x14d8   :  { %v7873_v54 = vpop.f32.mrb[88].mxu1 }
0x14d9   :  { %v10752_v33 = vadd.f32 %v7873_v54, %v4044_v36  ;;  %v7875_v59 = vpop.f32.mrb[89].mxu1  ;;  %v10736_v36 = vpack.c.bf16 %v9078_v1, %v9077_v16  ;;  %v9062_v54 = vld [vmem:[%s13357_s15 + $0x78] sm:$0xff] }
0x14da   :  { %v10753_v63 = vadd.f32 %v7875_v59, %v4048_v45  ;;  %v7877_v21 = vpop.f32.mrb[90].mxu1  ;;  %v9061_v45 = vld [vmem:[%s13357_s15 + $0x70] sm:$0xff]  ;;  %v8229_v59 = vld [vmem:[#allocation22] sm:$0x3] }
0x14db   :  { %v8089_v61 = vmax.f32 %v10752_v33, 0.0  ;;  %v7878_v57 = vpop.f32.mrb[91].mxu1  ;;  %v10738_v33 = vpack.c.bf16 %v9062_v54, %v9061_v45  ;;  %10737 = vmatprep.subr.bf16.mxu0 %v10736_v36  ;;  %v8238_v21 = vrot.slane %v8229_v59, %v13409_v50 }
0x14dc   :  { %v8090_v27 = vmax.f32 %v10753_v63, 0.0  ;;  %v8234_v63 = vrot.slane %v8229_v59, %v13408_v58 }
0x14dd   :  { %v8225_v28 = vpack.c.bf16 %v8089_v61, %v8089_v61  ;;  %10739 = vmatpush3.bf16.msra.mxu0 %v10738_v33 }
0x14de   :  { %v8226_v31 = vpack.c.bf16 %v8090_v27, %v8090_v27 }
0x14e0   :  { %8995 = vmatprep.mubr.bf16.mxu1 %v8226_v31 }
0x14e1   :  { %8996 = vmatmul.mubr.bf16.vlgmr.msra.gmra.mrb[92].mxu1 %v8225_v28 }
0x14e2   :  { %9005 = vmatpush1.bf16.msra.mxu1 %v11183_v62 }
0x14e3   :  { %9006 = vmatprep.subr.bf16.mxu1 %v11188_v30 }
0x14e6   :  { %9007 = vmatpush1.bf16.msra.mxu1 %v11186_v51 }
0x14e7   :  { %9008 = vmatprep.subr.bf16.mxu1 %v11191_v2 }
0x14ea   :  { %9009 = vmatpush1.bf16.msra.mxu1 %v11189_v48  ;;  %v10106_v48 = vld [vmem:[#allocation24] ss:$0 sm:$0xff] }
0x14eb   :  { %9010 = vmatprep.subr.bf16.mxu1 %v11194_v5 }
0x14ee   :  { %9011 = vmatpush1.bf16.msra.mxu1 %v11192_v47 }
0x14ef   :  { %9012 = vmatprep.subr.bf16.mxu1 %v11197_v43 }
0x14f2   :  { %9013 = vmatpush1.bf16.msra.mxu1 %v11195_v41 }
0x14f3   :  { %9014 = vmatprep.subr.bf16.mxu1 %v11200_v26 }
0x14f6   :  { %9015 = vmatpush1.bf16.msra.mxu1 %v11198_v25 }
0x14f7   :  { %9016 = vmatprep.subr.bf16.mxu1 %v11203_v12 }
0x14fa   :  { %9017 = vmatpush1.bf16.msra.mxu1 %v11201_v19 }
0x14fb   :  { %9018 = vmatprep.subr.bf16.mxu1 %v11206_v39 }
0x14fe   :  { %9019 = vmatpush1.bf16.msra.mxu1 %v11204_v42 }
0x14ff   :  { %9020 = vmatprep.subr.bf16.mxu1 %v11209_v44 }
0x1502   :  { %9021 = vmatpush1.bf16.msra.mxu1 %v11207_v49 }
0x1503   :  { %9022 = vmatprep.subr.bf16.mxu1 %v11212_v56 }
0x1506   :  { %9023 = vmatpush1.bf16.msra.mxu1 %v11210_v29 }
0x1507   :  { %9024 = vmatprep.subr.bf16.mxu1 %v11215_v52 }
0x150a   :  { %9025 = vmatpush1.bf16.msra.mxu1 %v11213_v46 }
0x150b   :  { %9026 = vmatprep.subr.bf16.mxu1 %v11218_v15 }
0x150e   :  { %9027 = vmatpush1.bf16.msra.mxu1 %v11216_v34 }
0x150f   :  { %9028 = vmatprep.subr.bf16.mxu1 %v11221_v23 }
0x1512   :  { %9029 = vmatpush1.bf16.msra.mxu1 %v11219_v53 }
0x1513   :  { %v8078_v0 = vpop.f32.mrb[104].mxu0  ;;  %9030 = vmatprep.subr.bf16.mxu1 %v11224_v9 }
0x1514   :  { %v8080_v24 = vpop.f32.mrb[105].mxu0  ;;  %v10754_v40 = vadd.f32 %v8078_v0, %v4052_v4 }
0x1515   :  { %v10755_v3 = vadd.f32 %v8080_v24, %v4056_v17  ;;  %v8082_v6 = vpop.f32.mrb[106].mxu0 }
0x1516   :  { %v8083_v55 = vpop.f32.mrb[107].mxu0  ;;  %9031 = vmatpush1.bf16.msra.mxu1 %v11222_v35  ;;  %v8091_v14 = vmax.f32 %v10754_v40, 0.0 }
0x1517   :  { %v8092_v13 = vmax.f32 %v10755_v3, 0.0  ;;  %9032 = vmatprep.subr.bf16.mxu1 %v11227_v38 }
0x1518   :  { %v8227_v10 = vpack.c.bf16 %v8091_v14, %v8091_v14 }
0x1519   :  { %v8228_v32 = vpack.c.bf16 %v8092_v13, %v8092_v13 }
0x151a   :  { %9033 = vmatpush1.bf16.msra.mxu1 %v11225_v18 }
0x151b   :  { %9036 = vmatprep.mubr.bf16.mxu1 %v8228_v32  ;;  %9034 = vmatprep.subr.bf16.mxu1 %v11230_v20 }
0x151e   :  { %9035 = vmatpush1.bf16.msra.mxu1 %v11228_v37 }
0x1521   :  { %9037 = vmatmul.mubr.bf16.vlgmr.msra.gmra.mrb[92].mxu1 %v8227_v10 }
0x15f4   :  { %v9038_v61 = vpop.f32.mrb[92].mxu1 }
0x15f5   :  { %v10756_v57 = vadd.f32 %v9038_v61, %v8234_v63  ;;  %v9040_v27 = vpop.f32.mrb[93].mxu1 }
0x15f6   :  { %v10757_v31 = vadd.f32 %v9040_v27, %v8238_v21  ;;  %v9042_v62 = vpop.f32.mrb[94].mxu1 }
0x15f7   :  { %v9043_v28 = vpop.f32.mrb[95].mxu1  ;;  %v9045_v51 = vmax.f32 %v10756_v57, 0.0 }
0x15f8   :  { %v9046_v30 = vmax.f32 %v10757_v31, 0.0 }
0x15fa   :  { %9150 = vmatprep.mubr.f32.mxu0 %v9046_v30 }
0x15fb   :  { %9151 = vmatmul.mubr.f32.vlgmr.msra.gmra.mrb[108].mxu0 %v9045_v51 }
0x16ce   :  { %v10317_v2 = vpop.f32.mrb[108].mxu0 }
0x16cf   :  { %v10318_v5 = vpop.f32.mrb[109].mxu0 }
0x16d0   :  { %v10319_v47 = vadd.f32 %v10318_v5, %v10317_v2 }
0x16d2   :  { %v9153_v43 = vadd.f32 %v10319_v47, %v10106_v48 }
0x16d4   :  { %9157 = vst.msk [vmem:[%s13359_s17] sm:$0xff] %vm9156_vm4, %v9153_v43 }
0x16d5   :  { %9162 = vsyncpa [#allocation3], 1 }
0x16d6   :  { %9163 = vsyncpa [#allocation5], 1 }
0x16d7   :  { %9164 = vsyncpa [#allocation8], 1 }
0x16d8   :  { %9165 = vsyncpa [#allocation11], 1 }
0x16d9   :  { %9166 = vsyncpa [#allocation14], 1 }
0x16da   :  { %9167 = vsyncpa [#allocation17], 1 }
0x16db   :  { %9168 = vsyncpa [#allocation20], 1 }
0x16dc   :  { %9169 = vsyncpa [#allocation23], 1 }

</bundles_post_ra>
